<compile_context>
chip_gen: v5e
topology: v5e:2x2
jax: 0.10.0
libtpu: 0.0.40
codegen_flags: <defaults>
</compile_context>

<pallas_src>
import math
import functools

import numpy as np
import jax
import jax.numpy as jnp
from jax.experimental import pallas as pl
from jax.experimental.pallas import tpu as pltpu

# ----------------------------- config ---------------------------------------
BODY_SIZE = 6
OBJ_SIZE = 9
VOC_SIZE = 12
SEQ_LEN = 8          # S
HIDDEN = 32          # h  (also ff_size and transformer dim_feedforward)
NUM_HEADS = 4
NUM_LAYERS = 1
B, T, NOBJ = 2, 5, 3
MAX_LEN = 64         # PE table length (>= T and S)
LN_EPS = 1e-5
NEG_BIG = 1e30

# ----------------------------- helpers ---------------------------------------


def _round_up(x, m):
    return (x + m - 1) // m * m


def _full_spec(shape):
    """BlockSpec covering the whole array (grid=(1,))."""
    zeros = (0,) * len(shape)
    return pl.BlockSpec(shape, lambda i, _z=zeros: _z)


def _build_plan(bsz, t_len, nobj, s_len, h):
    """Static row-index plan shared by the wrapper and the kernel."""
    L1 = t_len + s_len + 1                 # temporal sequence length
    L2 = nobj + 2                          # spatial sequence length
    N1 = (nobj + 1) * bsz                  # temporal "batch" rows
    M1 = N1 * L1
    M2 = bsz * L2
    n_st, n_bt, n_wd = nobj * bsz * t_len, bsz * t_len, bsz * s_len

    st_off = 0
    bt_off = _round_up(n_st, 8)
    wd_off = bt_off + _round_up(n_bt, 8)
    ex_off = wd_off + _round_up(n_wd, 8)
    ex_rows = _round_up(1 + L1, 8)         # [query; per-l additive rows; zeros]
    K1 = ex_off + ex_rows

    meta = np.zeros((max(M1, M2, 8), 8), np.int32)
    # temporal assembly: content row / additive row / group id per dest row
    for o in range(nobj + 1):
        for b in range(bsz):
            g = o * bsz + b
            for l in range(L1):
                i = g * L1 + l
                if l < t_len:
                    if o < nobj:
                        content = st_off + (o * bsz + b) * t_len + l
                    else:
                        content = bt_off + b * t_len + l
                elif l < t_len + s_len:
                    content = wd_off + b * s_len + (l - t_len)
                else:
                    content = ex_off                      # raw query token
                meta[i, 0] = content
                meta[i, 1] = ex_off + 1 + l               # PE/row-bias (zeros for query)
                meta[i, 2] = g
    # spatial assembly: source row (into [temporal query rows; query]) / group id
    for b in range(bsz):
        for l2 in range(L2):
            j = b * L2 + l2
            meta[j, 3] = l2 * bsz + b if l2 < nobj + 1 else N1
            meta[j, 4] = b
    # rows to keep after the last temporal / spatial encoder layer
    for g in range(N1):
        meta[g, 5] = g * L1 + (L1 - 1)
    for b in range(bsz):
        meta[b, 6] = b * L2 + (L2 - 1)

    dims = dict(B=bsz, T=t_len, Nobj=nobj, S=s_len, h=h, L1=L1, L2=L2,
                N1=N1, M1=M1, M2=M2, K1=K1,
                n_st=n_st, n_bt=n_bt, n_wd=n_wd,
                st_off=st_off, bt_off=bt_off, wd_off=wd_off,
                ex_off=ex_off, ex_rows=ex_rows)
    return meta, dims


# ----------------------------- fused kernel ----------------------------------


def _fused_forward_kernel(meta_ref, state_ref, body_ref, desc_ref,
                          objw1_ref, bodyw1_ref, wordsw1_ref,
                          castw2_ref, castvec_ref, extras_ref,
                          t_qkvw_ref, t_outw_ref, t_l1w_ref, t_l2w_ref, t_vec_ref,
                          s_qkvw_ref, s_outw_ref, s_l1w_ref, s_l2w_ref, s_vec_ref,
                          fo_w1_ref, fo_w2_ref, fo_vec_ref,
                          out_ref,
                          src1_ref, src2_ref,
                          *, num_heads, num_layers, dims):
    f32 = jnp.float32
    h = dims["h"]
    dh = h // num_heads
    bsz = dims["B"]
    N1, M1, M2, K1 = dims["N1"], dims["M1"], dims["M2"], dims["K1"]
    n_st, n_bt, n_wd = dims["n_st"], dims["n_bt"], dims["n_wd"]
    st_off, bt_off, wd_off = dims["st_off"], dims["bt_off"], dims["wd_off"]
    ex_off, ex_rows = dims["ex_off"], dims["ex_rows"]

    meta = meta_ref[...]
    cv = castvec_ref[...]

    def mlp(x, w1, b1, w2, b2):
        y = jnp.maximum(jnp.dot(x, w1, preferred_element_type=f32) + b1, 0.0)
        return jnp.dot(y, w2, preferred_element_type=f32) + b2

    def layernorm(x, g, b):
        mean = jnp.mean(x, axis=-1, keepdims=True)
        var = jnp.mean(jnp.square(x - mean), axis=-1, keepdims=True)
        return (x - mean) * jax.lax.rsqrt(var + LN_EPS) * g + b

    def group_bias(gid_col, n_groups, n_rows):
        """0 within a group, -1e30 across groups, built from iota (no DMA)."""
        colsg = jax.lax.broadcasted_iota(jnp.int32, (n_rows, n_groups), 1)
        g_oh = jnp.where(colsg == gid_col, 1.0, 0.0)
        same = jax.lax.dot_general(g_oh, g_oh, (((1,), (1,)), ((), ())),
                                   preferred_element_type=f32)
        return (same - 1.0) * NEG_BIG

    def tfm_module(x, qkvw_ref, outw_ref, l1w_ref, l2w_ref, vec_ref,
                   bias, keep_sel):
        """Post-norm TransformerEncoder + final LayerNorm. In the last layer the
        FF/LN2/final-LN run only on the kept (query) rows."""
        vec = vec_ref[...]
        for li in range(num_layers):
            vb = li * 10
            qkvw = qkvw_ref[li]
            outw = outw_ref[li]
            qkv = jnp.dot(x, qkvw, preferred_element_type=f32)        # (M, 3h)
            acc = jnp.zeros((x.shape[0], h), f32)
            for hd in range(num_heads):
                c = hd * dh
                q = qkv[:, c:c + dh] + vec[vb + 0:vb + 1, c:c + dh]   # scale folded
                k = qkv[:, h + c:h + c + dh] + vec[vb + 1:vb + 2, c:c + dh]
                v = qkv[:, 2 * h + c:2 * h + c + dh] + vec[vb + 2:vb + 3, c:c + dh]
                # q @ k^T without materializing the transpose
                s = jax.lax.dot_general(q, k, (((1,), (1,)), ((), ())),
                                        preferred_element_type=f32)
                s = s + bias
                s = s - jnp.max(s, axis=-1, keepdims=True)
                p = jnp.exp(s)
                p = p / jnp.sum(p, axis=-1, keepdims=True)
                hv = jnp.dot(p, v, preferred_element_type=f32)        # (M, dh)
                # fold the head concat into the out-projection (accumulate)
                acc = acc + jnp.dot(hv, outw[c:c + dh, :],
                                    preferred_element_type=f32)
            attn = acc + vec[vb + 3:vb + 4]
            x = layernorm(x + attn, vec[vb + 6:vb + 7], vec[vb + 7:vb + 8])
            if li == num_layers - 1:
                # only the query rows are consumed downstream; all remaining
                # ops are row-wise, so restrict them to those rows.
                x = jnp.dot(keep_sel, x, preferred_element_type=f32)
            ff = jnp.maximum(jnp.dot(x, l1w_ref[li], preferred_element_type=f32)
                             + vec[vb + 4:vb + 5], 0.0)
            ff = jnp.dot(ff, l2w_ref[li], preferred_element_type=f32) + vec[vb + 5:vb + 6]
            x = layernorm(x + ff, vec[vb + 8:vb + 9], vec[vb + 9:vb + 10])
        nb = num_layers * 10
        return layernorm(x, vec[nb:nb + 1], vec[nb + 1:nb + 2])

    # ---- cast MLPs (dim_adjust projection folded into the second layer),
    #      staged into one VMEM slab together with query + PE/row-bias table --
    src1_ref[...] = jnp.zeros_like(src1_ref)
    src1_ref[st_off:st_off + n_st, :] = mlp(state_ref[...], objw1_ref[...],
                                            cv[0:1], castw2_ref[0], cv[1:2])
    src1_ref[bt_off:bt_off + n_bt, :] = mlp(body_ref[...], bodyw1_ref[...],
                                            cv[2:3], castw2_ref[1], cv[3:4])
    src1_ref[wd_off:wd_off + n_wd, :] = mlp(desc_ref[...], wordsw1_ref[...],
                                            cv[4:5], castw2_ref[2], cv[5:6])
    src1_ref[ex_off:ex_off + ex_rows, :] = extras_ref[...]
    src1 = src1_ref[...]

    # ---- temporal input: one-hot gather/broadcast (content + additive rows) --
    cols1 = jax.lax.broadcasted_iota(jnp.int32, (M1, K1), 1)
    sel1 = (jnp.where(cols1 == meta[0:M1, 0:1], 1.0, 0.0)
            + jnp.where(cols1 == meta[0:M1, 1:2], 1.0, 0.0))
    x_t = jnp.dot(sel1, src1, preferred_element_type=f32)             # (M1, h)

    bias_t = group_bias(meta[0:M1, 2:3], N1, M1)
    colsk1 = jax.lax.broadcasted_iota(jnp.int32, (N1, M1), 1)
    keep_t = jnp.where(colsk1 == meta[0:N1, 5:6], 1.0, 0.0)
    t_out = tfm_module(x_t, t_qkvw_ref, t_outw_ref, t_l1w_ref, t_l2w_ref,
                       t_vec_ref, bias_t, keep_t)                     # (N1, h)

    # ---- spatial input: temporal query-row outputs + query token -------------
    src2_ref[0:N1, :] = t_out
    src2_ref[N1:N1 + 1, :] = cv[6:7]                                  # query
    src2 = src2_ref[...]
    cols2 = jax.lax.broadcasted_iota(jnp.int32, (M2, N1 + 1), 1)
    sel2 = jnp.where(cols2 == meta[0:M2, 3:4], 1.0, 0.0)
    x_s = jnp.dot(sel2, src2, preferred_element_type=f32)             # (M2, h)

    bias_s = group_bias(meta[0:M2, 4:5], bsz, M2)
    colsk2 = jax.lax.broadcasted_iota(jnp.int32, (bsz, M2), 1)
    keep_s = jnp.where(colsk2 == meta[0:bsz, 6:7], 1.0, 0.0)
    s_out = tfm_module(x_s, s_qkvw_ref, s_outw_ref, s_l1w_ref, s_l2w_ref,
                       s_vec_ref, bias_s, keep_s)                     # (B, h)

    # ---- output head: Linear -> ReLU -> Linear -> sigmoid --------------------
    fv = fo_vec_ref[...]
    y = jnp.maximum(jnp.dot(s_out, fo_w1_ref[...],
                            preferred_element_type=f32) + fv[0:1], 0.0)
    y = jnp.dot(y, fo_w2_ref[...], preferred_element_type=f32) + fv[1:2, 0:1]
    out_ref[...] = jax.nn.sigmoid(y)


# ----------------------------- parameter packing ------------------------------


def _pack_module_params(tp, num_heads):
    """Fold the 1/sqrt(dh) scale into Q and pack all (1,h) vectors."""
    h = HIDDEN
    num_layers = tp["qkv_w"].shape[0]
    dh = h // num_heads
    scale = 1.0 / math.sqrt(dh)
    qscale = jnp.concatenate([jnp.full((h,), scale, jnp.float32),
                              jnp.ones((2 * h,), jnp.float32)], axis=0)
    qkv_w = tp["qkv_w"] * qscale                    # (L, h, 3h)
    qkv_b = tp["qkv_b"] * qscale                    # (L, 1, 3h)
    rows = []
    for li in range(num_layers):
        rows.append(qkv_b[li].reshape(3, h))        # bq, bk, bv
        rows += [tp["out_b"][li], tp["lin1_b"][li], tp["lin2_b"][li],
                 tp["ln1_g"][li], tp["ln1_b"][li], tp["ln2_g"][li], tp["ln2_b"][li]]
    rows += [tp["norm_g"], tp["norm_b"]]
    vec = jnp.concatenate(rows, axis=0)             # (L*10 + 2, h)
    return (qkv_w, tp["out_w"], tp["lin1_w"], tp["lin2_w"], vec)


# ----------------------------- model forward ----------------------------------


def temporal_first_transformer_forward(params, state_trace, body_trace,
                                        description, *, num_heads=NUM_HEADS):
    h = HIDDEN
    bsz, t_len, nobj, obj_size = state_trace.shape
    s_len = description.shape[1]
    meta_np, d = _build_plan(bsz, t_len, nobj, s_len, h)
    meta = jnp.asarray(meta_np)

    # raw-input row layouts (single layout-only op on tiny inputs)
    state2d = jnp.transpose(state_trace, (2, 0, 1, 3)).reshape(d["n_st"], obj_size)
    body2d = body_trace.reshape(d["n_bt"], body_trace.shape[-1])
    desc2d = description.reshape(d["n_wd"], description.shape[-1])

    # ---- parameter preprocessing (folds; tiny, outside the hot kernel) -------
    w_adj, b_adj = params["dim_adjust_w"], params["dim_adjust_b"]
    w_main = w_adj[:h]                                  # (h, h)
    rb_sens = (w_adj[h] + b_adj)[None, :]               # sensory one-hot [1,0]
    rb_ling = (w_adj[h + 1] + b_adj)[None, :]           # linguistic one-hot [0,1]

    ow1, ob1, ow2, ob2 = params["fc_cast_obj"]
    bw1, bb1, bw2, bb2 = params["fc_cast_body"]
    ww1, wb1, ww2, wb2 = params["fc_cast_words"]
    cast_w2 = jnp.stack([ow2 @ w_main, bw2 @ w_main, ww2 @ w_main], axis=0)
    cast_vec = jnp.concatenate([ob1, ob2 @ w_main, bb1, bb2 @ w_main,
                                wb1, wb2 @ w_main,
                                params["query"][None, :]], axis=0)     # (7, h)

    pe = params["pe"]
    extras = jnp.zeros((d["ex_rows"], h), jnp.float32)
    extras = extras.at[0].set(params["query"])
    extras = extras.at[1:1 + t_len].set(pe[:t_len] @ w_main + rb_sens)
    extras = extras.at[1 + t_len:1 + t_len + s_len].set(pe[:s_len] @ w_main + rb_ling)

    t_pack = _pack_module_params(params["temporal_tfm"], num_heads)
    s_pack = _pack_module_params(params["spatial_tfm"], num_heads)

    fo_w1, fo_b1, fo_w2, fo_b2 = params["fc_out"]
    fo_vec = jnp.zeros((2, h), jnp.float32).at[0:1].set(fo_b1).at[1, 0].set(fo_b2[0, 0])

    num_layers = params["temporal_tfm"]["qkv_w"].shape[0]

    args = [meta, state2d, body2d, desc2d,
            ow1, bw1, ww1, cast_w2, cast_vec, extras,
            *t_pack, *s_pack,
            fo_w1, fo_w2, fo_vec]

    kernel = functools.partial(_fused_forward_kernel, num_heads=num_heads,
                               num_layers=num_layers, dims=d)
    return pl.pallas_call(
        kernel,
        grid=(1,),
        out_shape=jax.ShapeDtypeStruct((bsz, 1), jnp.float32),
        in_specs=[_full_spec(a.shape) for a in args],
        out_specs=_full_spec((bsz, 1)),
        scratch_shapes=[pltpu.VMEM((d["K1"], h), jnp.float32),
                        pltpu.VMEM((d["N1"] + 1, h), jnp.float32)],
    )(*args)


# ----------------------------- init ------------------------------------------


def make_pe(max_len, d_model):
    position = jnp.arange(max_len, dtype=jnp.float32)[:, None]
    div_term = jnp.exp(jnp.arange(0, d_model, 2, dtype=jnp.float32)
                       * (-math.log(10000.0) / d_model))
    pe = jnp.zeros((max_len, d_model), jnp.float32)
    pe = pe.at[:, 0::2].set(jnp.sin(position * div_term))
    pe = pe.at[:, 1::2].set(jnp.cos(position * div_term))
    return pe


def _w(key, shape, scale=0.02):
    return scale * jax.random.normal(key, shape, dtype=jnp.float32)


def init_mlp2(key, d_in, d_hid, d_out):
    k1, k2 = jax.random.split(key)
    return (_w(k1, (d_in, d_hid)), jnp.zeros((1, d_hid), jnp.float32),
            _w(k2, (d_hid, d_out)), jnp.zeros((1, d_out), jnp.float32))


def init_encoder_layer(key, h):
    k = jax.random.split(key, 4)
    return dict(
        qkv_w=_w(k[0], (h, 3 * h)), qkv_b=jnp.zeros((1, 3 * h), jnp.float32),
        out_w=_w(k[1], (h, h)), out_b=jnp.zeros((1, h), jnp.float32),
        lin1_w=_w(k[2], (h, h)), lin1_b=jnp.zeros((1, h), jnp.float32),
        lin2_w=_w(k[3], (h, h)), lin2_b=jnp.zeros((1, h), jnp.float32),
        ln1_g=jnp.ones((1, h), jnp.float32), ln1_b=jnp.zeros((1, h), jnp.float32),
        ln2_g=jnp.ones((1, h), jnp.float32), ln2_b=jnp.zeros((1, h), jnp.float32),
    )


def init_transformer_module(key, h, num_layers):
    keys = jax.random.split(key, num_layers)
    layers = [init_encoder_layer(k, h) for k in keys]
    tp = {name: jnp.stack([lyr[name] for lyr in layers], axis=0)
          for name in layers[0]}                      # (num_layers, ...)
    tp["norm_g"] = jnp.ones((1, h), jnp.float32)
    tp["norm_b"] = jnp.zeros((1, h), jnp.float32)
    return tp


def init_params(key):
    h = HIDDEN
    ks = jax.random.split(key, 8)
    return dict(
        fc_cast_body=init_mlp2(ks[0], BODY_SIZE, h, h),
        fc_cast_obj=init_mlp2(ks[1], OBJ_SIZE, h, h),
        fc_cast_words=init_mlp2(ks[2], VOC_SIZE, h, h),
        query=jnp.zeros((h,), jnp.float32),           # nn.Parameter(torch.zeros)
        dim_adjust_w=_w(ks[3], (h + 2, h)),
        dim_adjust_b=jnp.zeros((h,), jnp.float32),
        fc_out=init_mlp2(ks[4], h, h, 1),
        temporal_tfm=init_transformer_module(ks[5], h, NUM_LAYERS),
        spatial_tfm=init_transformer_module(ks[6], h, NUM_LAYERS),
        pe=make_pe(MAX_LEN, h),
    )


# ----------------------------- main -------------------------------------------

if __name__ == "__main__":
    key = jax.random.PRNGKey(0)
    k_param, k_s, k_b, k_d = jax.random.split(key, 4)

    params = init_params(k_param)

    state_trace = jax.random.normal(k_s, (B, T, NOBJ, OBJ_SIZE), jnp.float32)
    body_trace = jax.random.normal(k_b, (B, T, 1, BODY_SIZE), jnp.float32)
    description = jax.random.normal(k_d, (B, SEQ_LEN, VOC_SIZE), jnp.float32)

    fwd = jax.jit(functools.partial(temporal_first_transformer_forward,
                                    num_heads=NUM_HEADS))
    out = jax.block_until_ready(fwd(params, state_trace, body_trace, description))

    assert out.shape == (B, 1), out.shape
    assert bool(jnp.all(jnp.isfinite(out)))
    assert bool(jnp.all((out >= 0.0) & (out <= 1.0)))
    print("KERNEL_OK")
</pallas_src>

<mosaic_0001>
module attributes {stable_mosaic.version = 11 : i64} {
  func.func @_fused_forward_kernel(%arg0: i32, %arg1: memref<112x8xi32, #tpu.memory_space<vmem>>, %arg2: memref<30x9xf32, #tpu.memory_space<vmem>>, %arg3: memref<10x6xf32, #tpu.memory_space<vmem>>, %arg4: memref<16x12xf32, #tpu.memory_space<vmem>>, %arg5: memref<9x32xf32, #tpu.memory_space<vmem>>, %arg6: memref<6x32xf32, #tpu.memory_space<vmem>>, %arg7: memref<12x32xf32, #tpu.memory_space<vmem>>, %arg8: memref<3x32x32xf32, #tpu.memory_space<vmem>>, %arg9: memref<7x32xf32, #tpu.memory_space<vmem>>, %arg10: memref<16x32xf32, #tpu.memory_space<vmem>>, %arg11: memref<1x32x96xf32, #tpu.memory_space<vmem>>, %arg12: memref<1x32x32xf32, #tpu.memory_space<vmem>>, %arg13: memref<1x32x32xf32, #tpu.memory_space<vmem>>, %arg14: memref<1x32x32xf32, #tpu.memory_space<vmem>>, %arg15: memref<12x32xf32, #tpu.memory_space<vmem>>, %arg16: memref<1x32x96xf32, #tpu.memory_space<vmem>>, %arg17: memref<1x32x32xf32, #tpu.memory_space<vmem>>, %arg18: memref<1x32x32xf32, #tpu.memory_space<vmem>>, %arg19: memref<1x32x32xf32, #tpu.memory_space<vmem>>, %arg20: memref<12x32xf32, #tpu.memory_space<vmem>>, %arg21: memref<32x32xf32, #tpu.memory_space<vmem>>, %arg22: memref<32x1xf32, #tpu.memory_space<vmem>>, %arg23: memref<2x32xf32, #tpu.memory_space<vmem>>, %arg24: memref<2x1xf32, #tpu.memory_space<vmem>>, %arg25: memref<80x32xf32, #tpu.memory_space<vmem>>, %arg26: memref<9x32xf32, #tpu.memory_space<vmem>>) attributes {dimension_semantics = [#tpu.dimension_semantics<arbitrary>], iteration_bounds = array<i64: 1>, scalar_prefetch = 0 : i64, scratch_operands = 2 : i64, tpu.core_type = #tpu.core_type<tc>, window_params = [{pipeline_mode = #tpu.pipeline_mode<synchronous>, transform_indices = @transform_0, window_bounds = array<i64: 112, 8>}, {pipeline_mode = #tpu.pipeline_mode<synchronous>, transform_indices = @transform_1, window_bounds = array<i64: 30, 9>}, {pipeline_mode = #tpu.pipeline_mode<synchronous>, transform_indices = @transform_2, window_bounds = array<i64: 10, 6>}, {pipeline_mode = #tpu.pipeline_mode<synchronous>, transform_indices = @transform_3, window_bounds = array<i64: 16, 12>}, {pipeline_mode = #tpu.pipeline_mode<synchronous>, transform_indices = @transform_4, window_bounds = array<i64: 9, 32>}, {pipeline_mode = #tpu.pipeline_mode<synchronous>, transform_indices = @transform_5, window_bounds = array<i64: 6, 32>}, {pipeline_mode = #tpu.pipeline_mode<synchronous>, transform_indices = @transform_6, window_bounds = array<i64: 12, 32>}, {pipeline_mode = #tpu.pipeline_mode<synchronous>, transform_indices = @transform_7, window_bounds = array<i64: 3, 32, 32>}, {pipeline_mode = #tpu.pipeline_mode<synchronous>, transform_indices = @transform_8, window_bounds = array<i64: 7, 32>}, {pipeline_mode = #tpu.pipeline_mode<synchronous>, transform_indices = @transform_9, window_bounds = array<i64: 16, 32>}, {pipeline_mode = #tpu.pipeline_mode<synchronous>, transform_indices = @transform_10, window_bounds = array<i64: 1, 32, 96>}, {pipeline_mode = #tpu.pipeline_mode<synchronous>, transform_indices = @transform_11, window_bounds = array<i64: 1, 32, 32>}, {pipeline_mode = #tpu.pipeline_mode<synchronous>, transform_indices = @transform_12, window_bounds = array<i64: 1, 32, 32>}, {pipeline_mode = #tpu.pipeline_mode<synchronous>, transform_indices = @transform_13, window_bounds = array<i64: 1, 32, 32>}, {pipeline_mode = #tpu.pipeline_mode<synchronous>, transform_indices = @transform_14, window_bounds = array<i64: 12, 32>}, {pipeline_mode = #tpu.pipeline_mode<synchronous>, transform_indices = @transform_15, window_bounds = array<i64: 1, 32, 96>}, {pipeline_mode = #tpu.pipeline_mode<synchronous>, transform_indices = @transform_16, window_bounds = array<i64: 1, 32, 32>}, {pipeline_mode = #tpu.pipeline_mode<synchronous>, transform_indices = @transform_17, window_bounds = array<i64: 1, 32, 32>}, {pipeline_mode = #tpu.pipeline_mode<synchronous>, transform_indices = @transform_18, window_bounds = array<i64: 1, 32, 32>}, {pipeline_mode = #tpu.pipeline_mode<synchronous>, transform_indices = @transform_19, window_bounds = array<i64: 12, 32>}, {pipeline_mode = #tpu.pipeline_mode<synchronous>, transform_indices = @transform_20, window_bounds = array<i64: 32, 32>}, {pipeline_mode = #tpu.pipeline_mode<synchronous>, transform_indices = @transform_21, window_bounds = array<i64: 32, 1>}, {pipeline_mode = #tpu.pipeline_mode<synchronous>, transform_indices = @transform_22, window_bounds = array<i64: 2, 32>}, {pipeline_mode = #tpu.pipeline_mode<synchronous>, transform_indices = @transform_23, window_bounds = array<i64: 2, 1>}]} {
    %c0 = arith.constant 0 : index
    %c0_0 = arith.constant 0 : index
    %0 = vector.load %arg1[%c0, %c0_0] : memref<112x8xi32, #tpu.memory_space<vmem>>, vector<112x8xi32>
    %c0_1 = arith.constant 0 : index
    %c0_2 = arith.constant 0 : index
    %1 = vector.load %arg9[%c0_1, %c0_2] : memref<7x32xf32, #tpu.memory_space<vmem>>, vector<7x32xf32>
    %cst = arith.constant 0.000000e+00 : f32
    %2 = vector.broadcast %cst : f32 to vector<80x32xf32>
    %c0_3 = arith.constant 0 : index
    %c0_4 = arith.constant 0 : index
    %3 = vector.load %arg25[%c0_3, %c0_4] : memref<80x32xf32, #tpu.memory_space<vmem>>, vector<80x32xf32>
    tpu.vector_store %arg25[%c0_3, %c0_4], %2 {strides = array<i32>} : memref<80x32xf32, #tpu.memory_space<vmem>>, vector<80x32xf32>,
    %c0_5 = arith.constant 0 : index
    %c0_6 = arith.constant 0 : index
    %4 = vector.load %arg2[%c0_5, %c0_6] : memref<30x9xf32, #tpu.memory_space<vmem>>, vector<30x9xf32>
    %c0_7 = arith.constant 0 : index
    %c0_8 = arith.constant 0 : index
    %5 = vector.load %arg5[%c0_7, %c0_8] : memref<9x32xf32, #tpu.memory_space<vmem>>, vector<9x32xf32>
    %6 = vector.extract_strided_slice %1 {offsets = [0, 0], sizes = [1, 32], strides = [1, 1]} : vector<7x32xf32> to vector<1x32xf32>
    %c0_9 = arith.constant 0 : index
    %c0_10 = arith.constant 0 : index
    %c0_11 = arith.constant 0 : index
    %7 = vector.load %arg8[%c0_9, %c0_10, %c0_11] : memref<3x32x32xf32, #tpu.memory_space<vmem>>, vector<1x32x32xf32>
    %8 = vector.shape_cast %7 : vector<1x32x32xf32> to vector<32x32xf32>
    %9 = vector.extract_strided_slice %1 {offsets = [1, 0], sizes = [1, 32], strides = [1, 1]} : vector<7x32xf32> to vector<1x32xf32>
    %cst_12 = arith.constant dense<0.000000e+00> : vector<30x32xf32>
    %10 = tpu.matmul %4, %5, %cst_12 {dimension_numbers = #tpu.dot_dimension_numbers<[1], [0], [0], [1], [0, 0, 1, 1], [], []>} : vector<30x9xf32>, vector<9x32xf32>, vector<30x32xf32> -> vector<30x32xf32>
    %11 = vector.broadcast %6 : vector<1x32xf32> to vector<30x32xf32>
    %12 = arith.addf %10, %11 : vector<30x32xf32>
    %cst_13 = arith.constant 0.000000e+00 : f32
    %13 = vector.broadcast %cst_13 : f32 to vector<30x32xf32>
    %14 = arith.maximumf %12, %13 : vector<30x32xf32>
    %cst_14 = arith.constant dense<0.000000e+00> : vector<30x32xf32>
    %15 = tpu.matmul %14, %8, %cst_14 {dimension_numbers = #tpu.dot_dimension_numbers<[1], [0], [0], [1], [0, 0, 1, 1], [], []>} : vector<30x32xf32>, vector<32x32xf32>, vector<30x32xf32> -> vector<30x32xf32>
    %16 = vector.broadcast %9 : vector<1x32xf32> to vector<30x32xf32>
    %17 = arith.addf %15, %16 : vector<30x32xf32>
    %c0_15 = arith.constant 0 : index
    %c0_16 = arith.constant 0 : index
    %18 = vector.load %arg25[%c0_15, %c0_16] : memref<80x32xf32, #tpu.memory_space<vmem>>, vector<30x32xf32>
    tpu.vector_store %arg25[%c0_15, %c0_16], %17 {strides = array<i32>} : memref<80x32xf32, #tpu.memory_space<vmem>>, vector<30x32xf32>,
    %c0_17 = arith.constant 0 : index
    %c0_18 = arith.constant 0 : index
    %19 = vector.load %arg3[%c0_17, %c0_18] : memref<10x6xf32, #tpu.memory_space<vmem>>, vector<10x6xf32>
    %c0_19 = arith.constant 0 : index
    %c0_20 = arith.constant 0 : index
    %20 = vector.load %arg6[%c0_19, %c0_20] : memref<6x32xf32, #tpu.memory_space<vmem>>, vector<6x32xf32>
    %21 = vector.extract_strided_slice %1 {offsets = [2, 0], sizes = [1, 32], strides = [1, 1]} : vector<7x32xf32> to vector<1x32xf32>
    %c1 = arith.constant 1 : index
    %c0_21 = arith.constant 0 : index
    %c0_22 = arith.constant 0 : index
    %22 = vector.load %arg8[%c1, %c0_21, %c0_22] : memref<3x32x32xf32, #tpu.memory_space<vmem>>, vector<1x32x32xf32>
    %23 = vector.shape_cast %22 : vector<1x32x32xf32> to vector<32x32xf32>
    %24 = vector.extract_strided_slice %1 {offsets = [3, 0], sizes = [1, 32], strides = [1, 1]} : vector<7x32xf32> to vector<1x32xf32>
    %cst_23 = arith.constant dense<0.000000e+00> : vector<10x32xf32>
    %25 = tpu.matmul %19, %20, %cst_23 {dimension_numbers = #tpu.dot_dimension_numbers<[1], [0], [0], [1], [0, 0, 1, 1], [], []>} : vector<10x6xf32>, vector<6x32xf32>, vector<10x32xf32> -> vector<10x32xf32>
    %26 = vector.broadcast %21 : vector<1x32xf32> to vector<10x32xf32>
    %27 = arith.addf %25, %26 : vector<10x32xf32>
    %cst_24 = arith.constant 0.000000e+00 : f32
    %28 = vector.broadcast %cst_24 : f32 to vector<10x32xf32>
    %29 = arith.maximumf %27, %28 : vector<10x32xf32>
    %cst_25 = arith.constant dense<0.000000e+00> : vector<10x32xf32>
    %30 = tpu.matmul %29, %23, %cst_25 {dimension_numbers = #tpu.dot_dimension_numbers<[1], [0], [0], [1], [0, 0, 1, 1], [], []>} : vector<10x32xf32>, vector<32x32xf32>, vector<10x32xf32> -> vector<10x32xf32>
    %31 = vector.broadcast %24 : vector<1x32xf32> to vector<10x32xf32>
    %32 = arith.addf %30, %31 : vector<10x32xf32>
    %c32 = arith.constant 32 : index
    %c0_26 = arith.constant 0 : index
    %33 = vector.load %arg25[%c32, %c0_26] : memref<80x32xf32, #tpu.memory_space<vmem>>, vector<10x32xf32>
    tpu.vector_store %arg25[%c32, %c0_26], %32 {strides = array<i32>} : memref<80x32xf32, #tpu.memory_space<vmem>>, vector<10x32xf32>,
    %c0_27 = arith.constant 0 : index
    %c0_28 = arith.constant 0 : index
    %34 = vector.load %arg4[%c0_27, %c0_28] : memref<16x12xf32, #tpu.memory_space<vmem>>, vector<16x12xf32>
    %c0_29 = arith.constant 0 : index
    %c0_30 = arith.constant 0 : index
    %35 = vector.load %arg7[%c0_29, %c0_30] : memref<12x32xf32, #tpu.memory_space<vmem>>, vector<12x32xf32>
    %36 = vector.extract_strided_slice %1 {offsets = [4, 0], sizes = [1, 32], strides = [1, 1]} : vector<7x32xf32> to vector<1x32xf32>
    %c2 = arith.constant 2 : index
    %c0_31 = arith.constant 0 : index
    %c0_32 = arith.constant 0 : index
    %37 = vector.load %arg8[%c2, %c0_31, %c0_32] : memref<3x32x32xf32, #tpu.memory_space<vmem>>, vector<1x32x32xf32>
    %38 = vector.shape_cast %37 : vector<1x32x32xf32> to vector<32x32xf32>
    %39 = vector.extract_strided_slice %1 {offsets = [5, 0], sizes = [1, 32], strides = [1, 1]} : vector<7x32xf32> to vector<1x32xf32>
    %cst_33 = arith.constant dense<0.000000e+00> : vector<16x32xf32>
    %40 = tpu.matmul %34, %35, %cst_33 {dimension_numbers = #tpu.dot_dimension_numbers<[1], [0], [0], [1], [0, 0, 1, 1], [], []>} : vector<16x12xf32>, vector<12x32xf32>, vector<16x32xf32> -> vector<16x32xf32>
    %41 = vector.broadcast %36 : vector<1x32xf32> to vector<16x32xf32>
    %42 = arith.addf %40, %41 : vector<16x32xf32>
    %cst_34 = arith.constant 0.000000e+00 : f32
    %43 = vector.broadcast %cst_34 : f32 to vector<16x32xf32>
    %44 = arith.maximumf %42, %43 : vector<16x32xf32>
    %cst_35 = arith.constant dense<0.000000e+00> : vector<16x32xf32>
    %45 = tpu.matmul %44, %38, %cst_35 {dimension_numbers = #tpu.dot_dimension_numbers<[1], [0], [0], [1], [0, 0, 1, 1], [], []>} : vector<16x32xf32>, vector<32x32xf32>, vector<16x32xf32> -> vector<16x32xf32>
    %46 = vector.broadcast %39 : vector<1x32xf32> to vector<16x32xf32>
    %47 = arith.addf %45, %46 : vector<16x32xf32>
    %c48 = arith.constant 48 : index
    %c0_36 = arith.constant 0 : index
    %48 = vector.load %arg25[%c48, %c0_36] : memref<80x32xf32, #tpu.memory_space<vmem>>, vector<16x32xf32>
    tpu.vector_store %arg25[%c48, %c0_36], %47 {strides = array<i32>} : memref<80x32xf32, #tpu.memory_space<vmem>>, vector<16x32xf32>,
    %c0_37 = arith.constant 0 : index
    %c0_38 = arith.constant 0 : index
    %49 = vector.load %arg10[%c0_37, %c0_38] : memref<16x32xf32, #tpu.memory_space<vmem>>, vector<16x32xf32>
    %c64 = arith.constant 64 : index
    %c0_39 = arith.constant 0 : index
    %50 = vector.load %arg25[%c64, %c0_39] : memref<80x32xf32, #tpu.memory_space<vmem>>, vector<16x32xf32>
    tpu.vector_store %arg25[%c64, %c0_39], %49 {strides = array<i32>} : memref<80x32xf32, #tpu.memory_space<vmem>>, vector<16x32xf32>,
    %c0_40 = arith.constant 0 : index
    %c0_41 = arith.constant 0 : index
    %51 = vector.load %arg25[%c0_40, %c0_41] : memref<80x32xf32, #tpu.memory_space<vmem>>, vector<80x32xf32>
    %52 = tpu.iota {dimensions = array<i32: 1>} : vector<112x80xi32>
    %53 = vector.extract_strided_slice %0 {offsets = [0, 0], sizes = [112, 1], strides = [1, 1]} : vector<112x8xi32> to vector<112x1xi32>
    %54 = vector.broadcast %53 : vector<112x1xi32> to vector<112x80xi32>
    %55 = arith.cmpi eq, %52, %54 : vector<112x80xi32>
    %cst_42 = arith.constant 1.000000e+00 : f32
    %cst_43 = arith.constant 0.000000e+00 : f32
    %56 = vector.broadcast %cst_42 : f32 to vector<112x80xf32>
    %57 = vector.broadcast %cst_43 : f32 to vector<112x80xf32>
    %58 = arith.select %55, %56, %57 : vector<112x80xi1>, vector<112x80xf32>
    %59 = vector.extract_strided_slice %0 {offsets = [0, 1], sizes = [112, 1], strides = [1, 1]} : vector<112x8xi32> to vector<112x1xi32>
    %60 = vector.broadcast %59 : vector<112x1xi32> to vector<112x80xi32>
    %61 = arith.cmpi eq, %52, %60 : vector<112x80xi32>
    %cst_44 = arith.constant 1.000000e+00 : f32
    %cst_45 = arith.constant 0.000000e+00 : f32
    %62 = vector.broadcast %cst_44 : f32 to vector<112x80xf32>
    %63 = vector.broadcast %cst_45 : f32 to vector<112x80xf32>
    %64 = arith.select %61, %62, %63 : vector<112x80xi1>, vector<112x80xf32>
    %65 = arith.addf %58, %64 : vector<112x80xf32>
    %cst_46 = arith.constant dense<0.000000e+00> : vector<112x32xf32>
    %66 = tpu.matmul %65, %51, %cst_46 {dimension_numbers = #tpu.dot_dimension_numbers<[1], [0], [0], [1], [0, 0, 1, 1], [], []>} : vector<112x80xf32>, vector<80x32xf32>, vector<112x32xf32> -> vector<112x32xf32>
    %67 = vector.extract_strided_slice %0 {offsets = [0, 2], sizes = [112, 1], strides = [1, 1]} : vector<112x8xi32> to vector<112x1xi32>
    %68 = tpu.iota {dimensions = array<i32: 1>} : vector<112x8xi32>
    %69 = vector.broadcast %67 : vector<112x1xi32> to vector<112x8xi32>
    %70 = arith.cmpi eq, %68, %69 : vector<112x8xi32>
    %cst_47 = arith.constant 1.000000e+00 : f32
    %cst_48 = arith.constant 0.000000e+00 : f32
    %71 = vector.broadcast %cst_47 : f32 to vector<112x8xf32>
    %72 = vector.broadcast %cst_48 : f32 to vector<112x8xf32>
    %73 = arith.select %70, %71, %72 : vector<112x8xi1>, vector<112x8xf32>
    %cst_49 = arith.constant dense<0.000000e+00> : vector<112x112xf32>
    %74 = tpu.matmul %73, %73, %cst_49 {dimension_numbers = #tpu.dot_dimension_numbers<[1], [1], [0], [0], [0, 0, 1, 0], [], []>} : vector<112x8xf32>, vector<112x8xf32>, vector<112x112xf32> -> vector<112x112xf32>
    %cst_50 = arith.constant 1.000000e+00 : f32
    %75 = vector.broadcast %cst_50 : f32 to vector<112x112xf32>
    %76 = arith.subf %74, %75 : vector<112x112xf32>
    %cst_51 = arith.constant 1.000000e+30 : f32
    %77 = vector.broadcast %cst_51 : f32 to vector<112x112xf32>
    %78 = arith.mulf %76, %77 : vector<112x112xf32>
    %79 = tpu.iota {dimensions = array<i32: 1>} : vector<8x112xi32>
    %80 = vector.extract_strided_slice %0 {offsets = [0, 5], sizes = [8, 1], strides = [1, 1]} : vector<112x8xi32> to vector<8x1xi32>
    %81 = vector.broadcast %80 : vector<8x1xi32> to vector<8x112xi32>
    %82 = arith.cmpi eq, %79, %81 : vector<8x112xi32>
    %cst_52 = arith.constant 1.000000e+00 : f32
    %cst_53 = arith.constant 0.000000e+00 : f32
    %83 = vector.broadcast %cst_52 : f32 to vector<8x112xf32>
    %84 = vector.broadcast %cst_53 : f32 to vector<8x112xf32>
    %85 = arith.select %82, %83, %84 : vector<8x112xi1>, vector<8x112xf32>
    %c0_54 = arith.constant 0 : index
    %c0_55 = arith.constant 0 : index
    %86 = vector.load %arg15[%c0_54, %c0_55] : memref<12x32xf32, #tpu.memory_space<vmem>>, vector<12x32xf32>
    %c0_56 = arith.constant 0 : index
    %c0_57 = arith.constant 0 : index
    %c0_58 = arith.constant 0 : index
    %87 = vector.load %arg11[%c0_56, %c0_57, %c0_58] : memref<1x32x96xf32, #tpu.memory_space<vmem>>, vector<1x32x96xf32>
    %88 = vector.shape_cast %87 : vector<1x32x96xf32> to vector<32x96xf32>
    %c0_59 = arith.constant 0 : index
    %c0_60 = arith.constant 0 : index
    %c0_61 = arith.constant 0 : index
    %89 = vector.load %arg12[%c0_59, %c0_60, %c0_61] : memref<1x32x32xf32, #tpu.memory_space<vmem>>, vector<1x32x32xf32>
    %90 = vector.shape_cast %89 : vector<1x32x32xf32> to vector<32x32xf32>
    %cst_62 = arith.constant dense<0.000000e+00> : vector<112x96xf32>
    %91 = tpu.matmul %66, %88, %cst_62 {dimension_numbers = #tpu.dot_dimension_numbers<[1], [0], [0], [1], [0, 0, 1, 1], [], []>} : vector<112x32xf32>, vector<32x96xf32>, vector<112x96xf32> -> vector<112x96xf32>
    %cst_63 = arith.constant 0.000000e+00 : f32
    %92 = vector.broadcast %cst_63 : f32 to vector<112x32xf32>
    %93 = vector.extract_strided_slice %91 {offsets = [0, 0], sizes = [112, 8], strides = [1, 1]} : vector<112x96xf32> to vector<112x8xf32>
    %94 = vector.extract_strided_slice %86 {offsets = [0, 0], sizes = [1, 8], strides = [1, 1]} : vector<12x32xf32> to vector<1x8xf32>
    %95 = vector.broadcast %94 : vector<1x8xf32> to vector<112x8xf32>
    %96 = arith.addf %93, %95 : vector<112x8xf32>
    %97 = vector.extract_strided_slice %91 {offsets = [0, 32], sizes = [112, 8], strides = [1, 1]} : vector<112x96xf32> to vector<112x8xf32>
    %98 = vector.extract_strided_slice %86 {offsets = [1, 0], sizes = [1, 8], strides = [1, 1]} : vector<12x32xf32> to vector<1x8xf32>
    %99 = vector.broadcast %98 : vector<1x8xf32> to vector<112x8xf32>
    %100 = arith.addf %97, %99 : vector<112x8xf32>
    %101 = vector.extract_strided_slice %91 {offsets = [0, 64], sizes = [112, 8], strides = [1, 1]} : vector<112x96xf32> to vector<112x8xf32>
    %102 = vector.extract_strided_slice %86 {offsets = [2, 0], sizes = [1, 8], strides = [1, 1]} : vector<12x32xf32> to vector<1x8xf32>
    %103 = vector.broadcast %102 : vector<1x8xf32> to vector<112x8xf32>
    %104 = arith.addf %101, %103 : vector<112x8xf32>
    %cst_64 = arith.constant dense<0.000000e+00> : vector<112x112xf32>
    %105 = tpu.matmul %96, %100, %cst_64 {dimension_numbers = #tpu.dot_dimension_numbers<[1], [1], [0], [0], [0, 0, 1, 0], [], []>} : vector<112x8xf32>, vector<112x8xf32>, vector<112x112xf32> -> vector<112x112xf32>
    %106 = arith.addf %105, %78 : vector<112x112xf32>
    %cst_65 = arith.constant dense<0xFF800000> : vector<112xf32>
    %107 = vector.multi_reduction <maximumf>, %106, %cst_65 [1] : vector<112x112xf32> to vector<112xf32>
    %108 = vector.shape_cast %107 : vector<112xf32> to vector<112x1xf32>
    %109 = vector.broadcast %108 : vector<112x1xf32> to vector<112x112xf32>
    %110 = arith.subf %106, %109 : vector<112x112xf32>
    %111 = math.exp %110 : vector<112x112xf32>
    %cst_66 = arith.constant dense<0.000000e+00> : vector<112xf32>
    %112 = vector.multi_reduction <add>, %111, %cst_66 [1] : vector<112x112xf32> to vector<112xf32>
    %113 = vector.shape_cast %112 : vector<112xf32> to vector<112x1xf32>
    %114 = vector.broadcast %113 : vector<112x1xf32> to vector<112x112xf32>
    %115 = arith.divf %111, %114 : vector<112x112xf32>
    %cst_67 = arith.constant dense<0.000000e+00> : vector<112x8xf32>
    %116 = tpu.matmul %115, %104, %cst_67 {dimension_numbers = #tpu.dot_dimension_numbers<[1], [0], [0], [1], [0, 0, 1, 1], [], []>} : vector<112x112xf32>, vector<112x8xf32>, vector<112x8xf32> -> vector<112x8xf32>
    %117 = vector.extract_strided_slice %90 {offsets = [0, 0], sizes = [8, 32], strides = [1, 1]} : vector<32x32xf32> to vector<8x32xf32>
    %cst_68 = arith.constant dense<0.000000e+00> : vector<112x32xf32>
    %118 = tpu.matmul %116, %117, %cst_68 {dimension_numbers = #tpu.dot_dimension_numbers<[1], [0], [0], [1], [0, 0, 1, 1], [], []>} : vector<112x8xf32>, vector<8x32xf32>, vector<112x32xf32> -> vector<112x32xf32>
    %119 = arith.addf %92, %118 : vector<112x32xf32>
    %120 = vector.extract_strided_slice %91 {offsets = [0, 8], sizes = [112, 8], strides = [1, 1]} : vector<112x96xf32> to vector<112x8xf32>
    %121 = vector.extract_strided_slice %86 {offsets = [0, 8], sizes = [1, 8], strides = [1, 1]} : vector<12x32xf32> to vector<1x8xf32>
    %122 = vector.broadcast %121 : vector<1x8xf32> to vector<112x8xf32>
    %123 = arith.addf %120, %122 : vector<112x8xf32>
    %124 = vector.extract_strided_slice %91 {offsets = [0, 40], sizes = [112, 8], strides = [1, 1]} : vector<112x96xf32> to vector<112x8xf32>
    %125 = vector.extract_strided_slice %86 {offsets = [1, 8], sizes = [1, 8], strides = [1, 1]} : vector<12x32xf32> to vector<1x8xf32>
    %126 = vector.broadcast %125 : vector<1x8xf32> to vector<112x8xf32>
    %127 = arith.addf %124, %126 : vector<112x8xf32>
    %128 = vector.extract_strided_slice %91 {offsets = [0, 72], sizes = [112, 8], strides = [1, 1]} : vector<112x96xf32> to vector<112x8xf32>
    %129 = vector.extract_strided_slice %86 {offsets = [2, 8], sizes = [1, 8], strides = [1, 1]} : vector<12x32xf32> to vector<1x8xf32>
    %130 = vector.broadcast %129 : vector<1x8xf32> to vector<112x8xf32>
    %131 = arith.addf %128, %130 : vector<112x8xf32>
    %cst_69 = arith.constant dense<0.000000e+00> : vector<112x112xf32>
    %132 = tpu.matmul %123, %127, %cst_69 {dimension_numbers = #tpu.dot_dimension_numbers<[1], [1], [0], [0], [0, 0, 1, 0], [], []>} : vector<112x8xf32>, vector<112x8xf32>, vector<112x112xf32> -> vector<112x112xf32>
    %133 = arith.addf %132, %78 : vector<112x112xf32>
    %cst_70 = arith.constant dense<0xFF800000> : vector<112xf32>
    %134 = vector.multi_reduction <maximumf>, %133, %cst_70 [1] : vector<112x112xf32> to vector<112xf32>
    %135 = vector.shape_cast %134 : vector<112xf32> to vector<112x1xf32>
    %136 = vector.broadcast %135 : vector<112x1xf32> to vector<112x112xf32>
    %137 = arith.subf %133, %136 : vector<112x112xf32>
    %138 = math.exp %137 : vector<112x112xf32>
    %cst_71 = arith.constant dense<0.000000e+00> : vector<112xf32>
    %139 = vector.multi_reduction <add>, %138, %cst_71 [1] : vector<112x112xf32> to vector<112xf32>
    %140 = vector.shape_cast %139 : vector<112xf32> to vector<112x1xf32>
    %141 = vector.broadcast %140 : vector<112x1xf32> to vector<112x112xf32>
    %142 = arith.divf %138, %141 : vector<112x112xf32>
    %cst_72 = arith.constant dense<0.000000e+00> : vector<112x8xf32>
    %143 = tpu.matmul %142, %131, %cst_72 {dimension_numbers = #tpu.dot_dimension_numbers<[1], [0], [0], [1], [0, 0, 1, 1], [], []>} : vector<112x112xf32>, vector<112x8xf32>, vector<112x8xf32> -> vector<112x8xf32>
    %144 = vector.extract_strided_slice %90 {offsets = [8, 0], sizes = [8, 32], strides = [1, 1]} : vector<32x32xf32> to vector<8x32xf32>
    %cst_73 = arith.constant dense<0.000000e+00> : vector<112x32xf32>
    %145 = tpu.matmul %143, %144, %cst_73 {dimension_numbers = #tpu.dot_dimension_numbers<[1], [0], [0], [1], [0, 0, 1, 1], [], []>} : vector<112x8xf32>, vector<8x32xf32>, vector<112x32xf32> -> vector<112x32xf32>
    %146 = arith.addf %119, %145 : vector<112x32xf32>
    %147 = vector.extract_strided_slice %91 {offsets = [0, 16], sizes = [112, 8], strides = [1, 1]} : vector<112x96xf32> to vector<112x8xf32>
    %148 = vector.extract_strided_slice %86 {offsets = [0, 16], sizes = [1, 8], strides = [1, 1]} : vector<12x32xf32> to vector<1x8xf32>
    %149 = vector.broadcast %148 : vector<1x8xf32> to vector<112x8xf32>
    %150 = arith.addf %147, %149 : vector<112x8xf32>
    %151 = vector.extract_strided_slice %91 {offsets = [0, 48], sizes = [112, 8], strides = [1, 1]} : vector<112x96xf32> to vector<112x8xf32>
    %152 = vector.extract_strided_slice %86 {offsets = [1, 16], sizes = [1, 8], strides = [1, 1]} : vector<12x32xf32> to vector<1x8xf32>
    %153 = vector.broadcast %152 : vector<1x8xf32> to vector<112x8xf32>
    %154 = arith.addf %151, %153 : vector<112x8xf32>
    %155 = vector.extract_strided_slice %91 {offsets = [0, 80], sizes = [112, 8], strides = [1, 1]} : vector<112x96xf32> to vector<112x8xf32>
    %156 = vector.extract_strided_slice %86 {offsets = [2, 16], sizes = [1, 8], strides = [1, 1]} : vector<12x32xf32> to vector<1x8xf32>
    %157 = vector.broadcast %156 : vector<1x8xf32> to vector<112x8xf32>
    %158 = arith.addf %155, %157 : vector<112x8xf32>
    %cst_74 = arith.constant dense<0.000000e+00> : vector<112x112xf32>
    %159 = tpu.matmul %150, %154, %cst_74 {dimension_numbers = #tpu.dot_dimension_numbers<[1], [1], [0], [0], [0, 0, 1, 0], [], []>} : vector<112x8xf32>, vector<112x8xf32>, vector<112x112xf32> -> vector<112x112xf32>
    %160 = arith.addf %159, %78 : vector<112x112xf32>
    %cst_75 = arith.constant dense<0xFF800000> : vector<112xf32>
    %161 = vector.multi_reduction <maximumf>, %160, %cst_75 [1] : vector<112x112xf32> to vector<112xf32>
    %162 = vector.shape_cast %161 : vector<112xf32> to vector<112x1xf32>
    %163 = vector.broadcast %162 : vector<112x1xf32> to vector<112x112xf32>
    %164 = arith.subf %160, %163 : vector<112x112xf32>
    %165 = math.exp %164 : vector<112x112xf32>
    %cst_76 = arith.constant dense<0.000000e+00> : vector<112xf32>
    %166 = vector.multi_reduction <add>, %165, %cst_76 [1] : vector<112x112xf32> to vector<112xf32>
    %167 = vector.shape_cast %166 : vector<112xf32> to vector<112x1xf32>
    %168 = vector.broadcast %167 : vector<112x1xf32> to vector<112x112xf32>
    %169 = arith.divf %165, %168 : vector<112x112xf32>
    %cst_77 = arith.constant dense<0.000000e+00> : vector<112x8xf32>
    %170 = tpu.matmul %169, %158, %cst_77 {dimension_numbers = #tpu.dot_dimension_numbers<[1], [0], [0], [1], [0, 0, 1, 1], [], []>} : vector<112x112xf32>, vector<112x8xf32>, vector<112x8xf32> -> vector<112x8xf32>
    %171 = vector.extract_strided_slice %90 {offsets = [16, 0], sizes = [8, 32], strides = [1, 1]} : vector<32x32xf32> to vector<8x32xf32>
    %cst_78 = arith.constant dense<0.000000e+00> : vector<112x32xf32>
    %172 = tpu.matmul %170, %171, %cst_78 {dimension_numbers = #tpu.dot_dimension_numbers<[1], [0], [0], [1], [0, 0, 1, 1], [], []>} : vector<112x8xf32>, vector<8x32xf32>, vector<112x32xf32> -> vector<112x32xf32>
    %173 = arith.addf %146, %172 : vector<112x32xf32>
    %174 = vector.extract_strided_slice %91 {offsets = [0, 24], sizes = [112, 8], strides = [1, 1]} : vector<112x96xf32> to vector<112x8xf32>
    %175 = vector.extract_strided_slice %86 {offsets = [0, 24], sizes = [1, 8], strides = [1, 1]} : vector<12x32xf32> to vector<1x8xf32>
    %176 = vector.broadcast %175 : vector<1x8xf32> to vector<112x8xf32>
    %177 = arith.addf %174, %176 : vector<112x8xf32>
    %178 = vector.extract_strided_slice %91 {offsets = [0, 56], sizes = [112, 8], strides = [1, 1]} : vector<112x96xf32> to vector<112x8xf32>
    %179 = vector.extract_strided_slice %86 {offsets = [1, 24], sizes = [1, 8], strides = [1, 1]} : vector<12x32xf32> to vector<1x8xf32>
    %180 = vector.broadcast %179 : vector<1x8xf32> to vector<112x8xf32>
    %181 = arith.addf %178, %180 : vector<112x8xf32>
    %182 = vector.extract_strided_slice %91 {offsets = [0, 88], sizes = [112, 8], strides = [1, 1]} : vector<112x96xf32> to vector<112x8xf32>
    %183 = vector.extract_strided_slice %86 {offsets = [2, 24], sizes = [1, 8], strides = [1, 1]} : vector<12x32xf32> to vector<1x8xf32>
    %184 = vector.broadcast %183 : vector<1x8xf32> to vector<112x8xf32>
    %185 = arith.addf %182, %184 : vector<112x8xf32>
    %cst_79 = arith.constant dense<0.000000e+00> : vector<112x112xf32>
    %186 = tpu.matmul %177, %181, %cst_79 {dimension_numbers = #tpu.dot_dimension_numbers<[1], [1], [0], [0], [0, 0, 1, 0], [], []>} : vector<112x8xf32>, vector<112x8xf32>, vector<112x112xf32> -> vector<112x112xf32>
    %187 = arith.addf %186, %78 : vector<112x112xf32>
    %cst_80 = arith.constant dense<0xFF800000> : vector<112xf32>
    %188 = vector.multi_reduction <maximumf>, %187, %cst_80 [1] : vector<112x112xf32> to vector<112xf32>
    %189 = vector.shape_cast %188 : vector<112xf32> to vector<112x1xf32>
    %190 = vector.broadcast %189 : vector<112x1xf32> to vector<112x112xf32>
    %191 = arith.subf %187, %190 : vector<112x112xf32>
    %192 = math.exp %191 : vector<112x112xf32>
    %cst_81 = arith.constant dense<0.000000e+00> : vector<112xf32>
    %193 = vector.multi_reduction <add>, %192, %cst_81 [1] : vector<112x112xf32> to vector<112xf32>
    %194 = vector.shape_cast %193 : vector<112xf32> to vector<112x1xf32>
    %195 = vector.broadcast %194 : vector<112x1xf32> to vector<112x112xf32>
    %196 = arith.divf %192, %195 : vector<112x112xf32>
    %cst_82 = arith.constant dense<0.000000e+00> : vector<112x8xf32>
    %197 = tpu.matmul %196, %185, %cst_82 {dimension_numbers = #tpu.dot_dimension_numbers<[1], [0], [0], [1], [0, 0, 1, 1], [], []>} : vector<112x112xf32>, vector<112x8xf32>, vector<112x8xf32> -> vector<112x8xf32>
    %198 = vector.extract_strided_slice %90 {offsets = [24, 0], sizes = [8, 32], strides = [1, 1]} : vector<32x32xf32> to vector<8x32xf32>
    %cst_83 = arith.constant dense<0.000000e+00> : vector<112x32xf32>
    %199 = tpu.matmul %197, %198, %cst_83 {dimension_numbers = #tpu.dot_dimension_numbers<[1], [0], [0], [1], [0, 0, 1, 1], [], []>} : vector<112x8xf32>, vector<8x32xf32>, vector<112x32xf32> -> vector<112x32xf32>
    %200 = arith.addf %173, %199 : vector<112x32xf32>
    %201 = vector.extract_strided_slice %86 {offsets = [3, 0], sizes = [1, 32], strides = [1, 1]} : vector<12x32xf32> to vector<1x32xf32>
    %202 = vector.broadcast %201 : vector<1x32xf32> to vector<112x32xf32>
    %203 = arith.addf %200, %202 : vector<112x32xf32>
    %204 = arith.addf %66, %203 : vector<112x32xf32>
    %205 = vector.extract_strided_slice %86 {offsets = [6, 0], sizes = [1, 32], strides = [1, 1]} : vector<12x32xf32> to vector<1x32xf32>
    %206 = vector.extract_strided_slice %86 {offsets = [7, 0], sizes = [1, 32], strides = [1, 1]} : vector<12x32xf32> to vector<1x32xf32>
    %cst_84 = arith.constant dense<0.000000e+00> : vector<112xf32>
    %207 = vector.multi_reduction <add>, %204, %cst_84 [1] : vector<112x32xf32> to vector<112xf32>
    %208 = vector.shape_cast %207 : vector<112xf32> to vector<112x1xf32>
    %cst_85 = arith.constant 3.200000e+01 : f32
    %209 = vector.broadcast %cst_85 : f32 to vector<112x1xf32>
    %210 = arith.divf %208, %209 : vector<112x1xf32>
    %211 = vector.broadcast %210 : vector<112x1xf32> to vector<112x32xf32>
    %212 = arith.subf %204, %211 : vector<112x32xf32>
    %213 = arith.mulf %212, %212 : vector<112x32xf32>
    %cst_86 = arith.constant dense<0.000000e+00> : vector<112xf32>
    %214 = vector.multi_reduction <add>, %213, %cst_86 [1] : vector<112x32xf32> to vector<112xf32>
    %215 = vector.shape_cast %214 : vector<112xf32> to vector<112x1xf32>
    %cst_87 = arith.constant 3.200000e+01 : f32
    %216 = vector.broadcast %cst_87 : f32 to vector<112x1xf32>
    %217 = arith.divf %215, %216 : vector<112x1xf32>
    %218 = vector.broadcast %210 : vector<112x1xf32> to vector<112x32xf32>
    %219 = arith.subf %204, %218 : vector<112x32xf32>
    %cst_88 = arith.constant 9.99999974E-6 : f32
    %220 = vector.broadcast %cst_88 : f32 to vector<112x1xf32>
    %221 = arith.addf %217, %220 : vector<112x1xf32>
    %222 = math.rsqrt %221 : vector<112x1xf32>
    %223 = vector.broadcast %222 : vector<112x1xf32> to vector<112x32xf32>
    %224 = arith.mulf %219, %223 : vector<112x32xf32>
    %225 = vector.broadcast %205 : vector<1x32xf32> to vector<112x32xf32>
    %226 = arith.mulf %224, %225 : vector<112x32xf32>
    %227 = vector.broadcast %206 : vector<1x32xf32> to vector<112x32xf32>
    %228 = arith.addf %226, %227 : vector<112x32xf32>
    %cst_89 = arith.constant dense<0.000000e+00> : vector<8x32xf32>
    %229 = tpu.matmul %85, %228, %cst_89 {dimension_numbers = #tpu.dot_dimension_numbers<[1], [0], [0], [1], [0, 0, 1, 1], [], []>} : vector<8x112xf32>, vector<112x32xf32>, vector<8x32xf32> -> vector<8x32xf32>
    %c0_90 = arith.constant 0 : index
    %c0_91 = arith.constant 0 : index
    %c0_92 = arith.constant 0 : index
    %230 = vector.load %arg13[%c0_90, %c0_91, %c0_92] : memref<1x32x32xf32, #tpu.memory_space<vmem>>, vector<1x32x32xf32>
    %231 = vector.shape_cast %230 : vector<1x32x32xf32> to vector<32x32xf32>
    %cst_93 = arith.constant dense<0.000000e+00> : vector<8x32xf32>
    %232 = tpu.matmul %229, %231, %cst_93 {dimension_numbers = #tpu.dot_dimension_numbers<[1], [0], [0], [1], [0, 0, 1, 1], [], []>} : vector<8x32xf32>, vector<32x32xf32>, vector<8x32xf32> -> vector<8x32xf32>
    %233 = vector.extract_strided_slice %86 {offsets = [4, 0], sizes = [1, 32], strides = [1, 1]} : vector<12x32xf32> to vector<1x32xf32>
    %234 = vector.broadcast %233 : vector<1x32xf32> to vector<8x32xf32>
    %235 = arith.addf %232, %234 : vector<8x32xf32>
    %cst_94 = arith.constant 0.000000e+00 : f32
    %236 = vector.broadcast %cst_94 : f32 to vector<8x32xf32>
    %237 = arith.maximumf %235, %236 : vector<8x32xf32>
    %c0_95 = arith.constant 0 : index
    %c0_96 = arith.constant 0 : index
    %c0_97 = arith.constant 0 : index
    %238 = vector.load %arg14[%c0_95, %c0_96, %c0_97] : memref<1x32x32xf32, #tpu.memory_space<vmem>>, vector<1x32x32xf32>
    %239 = vector.shape_cast %238 : vector<1x32x32xf32> to vector<32x32xf32>
    %cst_98 = arith.constant dense<0.000000e+00> : vector<8x32xf32>
    %240 = tpu.matmul %237, %239, %cst_98 {dimension_numbers = #tpu.dot_dimension_numbers<[1], [0], [0], [1], [0, 0, 1, 1], [], []>} : vector<8x32xf32>, vector<32x32xf32>, vector<8x32xf32> -> vector<8x32xf32>
    %241 = vector.extract_strided_slice %86 {offsets = [5, 0], sizes = [1, 32], strides = [1, 1]} : vector<12x32xf32> to vector<1x32xf32>
    %242 = vector.broadcast %241 : vector<1x32xf32> to vector<8x32xf32>
    %243 = arith.addf %240, %242 : vector<8x32xf32>
    %244 = arith.addf %229, %243 : vector<8x32xf32>
    %245 = vector.extract_strided_slice %86 {offsets = [8, 0], sizes = [1, 32], strides = [1, 1]} : vector<12x32xf32> to vector<1x32xf32>
    %246 = vector.extract_strided_slice %86 {offsets = [9, 0], sizes = [1, 32], strides = [1, 1]} : vector<12x32xf32> to vector<1x32xf32>
    %cst_99 = arith.constant dense<0.000000e+00> : vector<8xf32>
    %247 = vector.multi_reduction <add>, %244, %cst_99 [1] : vector<8x32xf32> to vector<8xf32>
    %248 = vector.shape_cast %247 : vector<8xf32> to vector<8x1xf32>
    %cst_100 = arith.constant 3.200000e+01 : f32
    %249 = vector.broadcast %cst_100 : f32 to vector<8x1xf32>
    %250 = arith.divf %248, %249 : vector<8x1xf32>
    %251 = vector.broadcast %250 : vector<8x1xf32> to vector<8x32xf32>
    %252 = arith.subf %244, %251 : vector<8x32xf32>
    %253 = arith.mulf %252, %252 : vector<8x32xf32>
    %cst_101 = arith.constant dense<0.000000e+00> : vector<8xf32>
    %254 = vector.multi_reduction <add>, %253, %cst_101 [1] : vector<8x32xf32> to vector<8xf32>
    %255 = vector.shape_cast %254 : vector<8xf32> to vector<8x1xf32>
    %cst_102 = arith.constant 3.200000e+01 : f32
    %256 = vector.broadcast %cst_102 : f32 to vector<8x1xf32>
    %257 = arith.divf %255, %256 : vector<8x1xf32>
    %258 = vector.broadcast %250 : vector<8x1xf32> to vector<8x32xf32>
    %259 = arith.subf %244, %258 : vector<8x32xf32>
    %cst_103 = arith.constant 9.99999974E-6 : f32
    %260 = vector.broadcast %cst_103 : f32 to vector<8x1xf32>
    %261 = arith.addf %257, %260 : vector<8x1xf32>
    %262 = math.rsqrt %261 : vector<8x1xf32>
    %263 = vector.broadcast %262 : vector<8x1xf32> to vector<8x32xf32>
    %264 = arith.mulf %259, %263 : vector<8x32xf32>
    %265 = vector.broadcast %245 : vector<1x32xf32> to vector<8x32xf32>
    %266 = arith.mulf %264, %265 : vector<8x32xf32>
    %267 = vector.broadcast %246 : vector<1x32xf32> to vector<8x32xf32>
    %268 = arith.addf %266, %267 : vector<8x32xf32>
    %269 = vector.extract_strided_slice %86 {offsets = [10, 0], sizes = [1, 32], strides = [1, 1]} : vector<12x32xf32> to vector<1x32xf32>
    %270 = vector.extract_strided_slice %86 {offsets = [11, 0], sizes = [1, 32], strides = [1, 1]} : vector<12x32xf32> to vector<1x32xf32>
    %cst_104 = arith.constant dense<0.000000e+00> : vector<8xf32>
    %271 = vector.multi_reduction <add>, %268, %cst_104 [1] : vector<8x32xf32> to vector<8xf32>
    %272 = vector.shape_cast %271 : vector<8xf32> to vector<8x1xf32>
    %cst_105 = arith.constant 3.200000e+01 : f32
    %273 = vector.broadcast %cst_105 : f32 to vector<8x1xf32>
    %274 = arith.divf %272, %273 : vector<8x1xf32>
    %275 = vector.broadcast %274 : vector<8x1xf32> to vector<8x32xf32>
    %276 = arith.subf %268, %275 : vector<8x32xf32>
    %277 = arith.mulf %276, %276 : vector<8x32xf32>
    %cst_106 = arith.constant dense<0.000000e+00> : vector<8xf32>
    %278 = vector.multi_reduction <add>, %277, %cst_106 [1] : vector<8x32xf32> to vector<8xf32>
    %279 = vector.shape_cast %278 : vector<8xf32> to vector<8x1xf32>
    %cst_107 = arith.constant 3.200000e+01 : f32
    %280 = vector.broadcast %cst_107 : f32 to vector<8x1xf32>
    %281 = arith.divf %279, %280 : vector<8x1xf32>
    %282 = vector.broadcast %274 : vector<8x1xf32> to vector<8x32xf32>
    %283 = arith.subf %268, %282 : vector<8x32xf32>
    %cst_108 = arith.constant 9.99999974E-6 : f32
    %284 = vector.broadcast %cst_108 : f32 to vector<8x1xf32>
    %285 = arith.addf %281, %284 : vector<8x1xf32>
    %286 = math.rsqrt %285 : vector<8x1xf32>
    %287 = vector.broadcast %286 : vector<8x1xf32> to vector<8x32xf32>
    %288 = arith.mulf %283, %287 : vector<8x32xf32>
    %289 = vector.broadcast %269 : vector<1x32xf32> to vector<8x32xf32>
    %290 = arith.mulf %288, %289 : vector<8x32xf32>
    %291 = vector.broadcast %270 : vector<1x32xf32> to vector<8x32xf32>
    %292 = arith.addf %290, %291 : vector<8x32xf32>
    %c0_109 = arith.constant 0 : index
    %c0_110 = arith.constant 0 : index
    %293 = vector.load %arg26[%c0_109, %c0_110] : memref<9x32xf32, #tpu.memory_space<vmem>>, vector<8x32xf32>
    tpu.vector_store %arg26[%c0_109, %c0_110], %292 {strides = array<i32>} : memref<9x32xf32, #tpu.memory_space<vmem>>, vector<8x32xf32>,
    %294 = vector.extract_strided_slice %1 {offsets = [6, 0], sizes = [1, 32], strides = [1, 1]} : vector<7x32xf32> to vector<1x32xf32>
    %c8 = arith.constant 8 : index
    %c0_111 = arith.constant 0 : index
    %295 = vector.load %arg26[%c8, %c0_111] : memref<9x32xf32, #tpu.memory_space<vmem>>, vector<1x32xf32>
    tpu.vector_store %arg26[%c8, %c0_111], %294 {strides = array<i32>} : memref<9x32xf32, #tpu.memory_space<vmem>>, vector<1x32xf32>,
    %c0_112 = arith.constant 0 : index
    %c0_113 = arith.constant 0 : index
    %296 = vector.load %arg26[%c0_112, %c0_113] : memref<9x32xf32, #tpu.memory_space<vmem>>, vector<9x32xf32>
    %297 = tpu.iota {dimensions = array<i32: 1>} : vector<10x9xi32>
    %298 = vector.extract_strided_slice %0 {offsets = [0, 3], sizes = [10, 1], strides = [1, 1]} : vector<112x8xi32> to vector<10x1xi32>
    %299 = vector.broadcast %298 : vector<10x1xi32> to vector<10x9xi32>
    %300 = arith.cmpi eq, %297, %299 : vector<10x9xi32>
    %cst_114 = arith.constant 1.000000e+00 : f32
    %cst_115 = arith.constant 0.000000e+00 : f32
    %301 = vector.broadcast %cst_114 : f32 to vector<10x9xf32>
    %302 = vector.broadcast %cst_115 : f32 to vector<10x9xf32>
    %303 = arith.select %300, %301, %302 : vector<10x9xi1>, vector<10x9xf32>
    %cst_116 = arith.constant dense<0.000000e+00> : vector<10x32xf32>
    %304 = tpu.matmul %303, %296, %cst_116 {dimension_numbers = #tpu.dot_dimension_numbers<[1], [0], [0], [1], [0, 0, 1, 1], [], []>} : vector<10x9xf32>, vector<9x32xf32>, vector<10x32xf32> -> vector<10x32xf32>
    %305 = vector.extract_strided_slice %0 {offsets = [0, 4], sizes = [10, 1], strides = [1, 1]} : vector<112x8xi32> to vector<10x1xi32>
    %306 = tpu.iota {dimensions = array<i32: 1>} : vector<10x2xi32>
    %307 = vector.broadcast %305 : vector<10x1xi32> to vector<10x2xi32>
    %308 = arith.cmpi eq, %306, %307 : vector<10x2xi32>
    %cst_117 = arith.constant 1.000000e+00 : f32
    %cst_118 = arith.constant 0.000000e+00 : f32
    %309 = vector.broadcast %cst_117 : f32 to vector<10x2xf32>
    %310 = vector.broadcast %cst_118 : f32 to vector<10x2xf32>
    %311 = arith.select %308, %309, %310 : vector<10x2xi1>, vector<10x2xf32>
    %cst_119 = arith.constant dense<0.000000e+00> : vector<10x10xf32>
    %312 = tpu.matmul %311, %311, %cst_119 {dimension_numbers = #tpu.dot_dimension_numbers<[1], [1], [0], [0], [0, 0, 1, 0], [], []>} : vector<10x2xf32>, vector<10x2xf32>, vector<10x10xf32> -> vector<10x10xf32>
    %cst_120 = arith.constant 1.000000e+00 : f32
    %313 = vector.broadcast %cst_120 : f32 to vector<10x10xf32>
    %314 = arith.subf %312, %313 : vector<10x10xf32>
    %cst_121 = arith.constant 1.000000e+30 : f32
    %315 = vector.broadcast %cst_121 : f32 to vector<10x10xf32>
    %316 = arith.mulf %314, %315 : vector<10x10xf32>
    %317 = tpu.iota {dimensions = array<i32: 1>} : vector<2x10xi32>
    %318 = vector.extract_strided_slice %0 {offsets = [0, 6], sizes = [2, 1], strides = [1, 1]} : vector<112x8xi32> to vector<2x1xi32>
    %319 = vector.broadcast %318 : vector<2x1xi32> to vector<2x10xi32>
    %320 = arith.cmpi eq, %317, %319 : vector<2x10xi32>
    %cst_122 = arith.constant 1.000000e+00 : f32
    %cst_123 = arith.constant 0.000000e+00 : f32
    %321 = vector.broadcast %cst_122 : f32 to vector<2x10xf32>
    %322 = vector.broadcast %cst_123 : f32 to vector<2x10xf32>
    %323 = arith.select %320, %321, %322 : vector<2x10xi1>, vector<2x10xf32>
    %c0_124 = arith.constant 0 : index
    %c0_125 = arith.constant 0 : index
    %324 = vector.load %arg20[%c0_124, %c0_125] : memref<12x32xf32, #tpu.memory_space<vmem>>, vector<12x32xf32>
    %c0_126 = arith.constant 0 : index
    %c0_127 = arith.constant 0 : index
    %c0_128 = arith.constant 0 : index
    %325 = vector.load %arg16[%c0_126, %c0_127, %c0_128] : memref<1x32x96xf32, #tpu.memory_space<vmem>>, vector<1x32x96xf32>
    %326 = vector.shape_cast %325 : vector<1x32x96xf32> to vector<32x96xf32>
    %c0_129 = arith.constant 0 : index
    %c0_130 = arith.constant 0 : index
    %c0_131 = arith.constant 0 : index
    %327 = vector.load %arg17[%c0_129, %c0_130, %c0_131] : memref<1x32x32xf32, #tpu.memory_space<vmem>>, vector<1x32x32xf32>
    %328 = vector.shape_cast %327 : vector<1x32x32xf32> to vector<32x32xf32>
    %cst_132 = arith.constant dense<0.000000e+00> : vector<10x96xf32>
    %329 = tpu.matmul %304, %326, %cst_132 {dimension_numbers = #tpu.dot_dimension_numbers<[1], [0], [0], [1], [0, 0, 1, 1], [], []>} : vector<10x32xf32>, vector<32x96xf32>, vector<10x96xf32> -> vector<10x96xf32>
    %cst_133 = arith.constant 0.000000e+00 : f32
    %330 = vector.broadcast %cst_133 : f32 to vector<10x32xf32>
    %331 = vector.extract_strided_slice %329 {offsets = [0, 0], sizes = [10, 8], strides = [1, 1]} : vector<10x96xf32> to vector<10x8xf32>
    %332 = vector.extract_strided_slice %324 {offsets = [0, 0], sizes = [1, 8], strides = [1, 1]} : vector<12x32xf32> to vector<1x8xf32>
    %333 = vector.broadcast %332 : vector<1x8xf32> to vector<10x8xf32>
    %334 = arith.addf %331, %333 : vector<10x8xf32>
    %335 = vector.extract_strided_slice %329 {offsets = [0, 32], sizes = [10, 8], strides = [1, 1]} : vector<10x96xf32> to vector<10x8xf32>
    %336 = vector.extract_strided_slice %324 {offsets = [1, 0], sizes = [1, 8], strides = [1, 1]} : vector<12x32xf32> to vector<1x8xf32>
    %337 = vector.broadcast %336 : vector<1x8xf32> to vector<10x8xf32>
    %338 = arith.addf %335, %337 : vector<10x8xf32>
    %339 = vector.extract_strided_slice %329 {offsets = [0, 64], sizes = [10, 8], strides = [1, 1]} : vector<10x96xf32> to vector<10x8xf32>
    %340 = vector.extract_strided_slice %324 {offsets = [2, 0], sizes = [1, 8], strides = [1, 1]} : vector<12x32xf32> to vector<1x8xf32>
    %341 = vector.broadcast %340 : vector<1x8xf32> to vector<10x8xf32>
    %342 = arith.addf %339, %341 : vector<10x8xf32>
    %cst_134 = arith.constant dense<0.000000e+00> : vector<10x10xf32>
    %343 = tpu.matmul %334, %338, %cst_134 {dimension_numbers = #tpu.dot_dimension_numbers<[1], [1], [0], [0], [0, 0, 1, 0], [], []>} : vector<10x8xf32>, vector<10x8xf32>, vector<10x10xf32> -> vector<10x10xf32>
    %344 = arith.addf %343, %316 : vector<10x10xf32>
    %cst_135 = arith.constant dense<0xFF800000> : vector<10xf32>
    %345 = vector.multi_reduction <maximumf>, %344, %cst_135 [1] : vector<10x10xf32> to vector<10xf32>
    %346 = vector.shape_cast %345 : vector<10xf32> to vector<10x1xf32>
    %347 = vector.broadcast %346 : vector<10x1xf32> to vector<10x10xf32>
    %348 = arith.subf %344, %347 : vector<10x10xf32>
    %349 = math.exp %348 : vector<10x10xf32>
    %cst_136 = arith.constant dense<0.000000e+00> : vector<10xf32>
    %350 = vector.multi_reduction <add>, %349, %cst_136 [1] : vector<10x10xf32> to vector<10xf32>
    %351 = vector.shape_cast %350 : vector<10xf32> to vector<10x1xf32>
    %352 = vector.broadcast %351 : vector<10x1xf32> to vector<10x10xf32>
    %353 = arith.divf %349, %352 : vector<10x10xf32>
    %cst_137 = arith.constant dense<0.000000e+00> : vector<10x8xf32>
    %354 = tpu.matmul %353, %342, %cst_137 {dimension_numbers = #tpu.dot_dimension_numbers<[1], [0], [0], [1], [0, 0, 1, 1], [], []>} : vector<10x10xf32>, vector<10x8xf32>, vector<10x8xf32> -> vector<10x8xf32>
    %355 = vector.extract_strided_slice %328 {offsets = [0, 0], sizes = [8, 32], strides = [1, 1]} : vector<32x32xf32> to vector<8x32xf32>
    %cst_138 = arith.constant dense<0.000000e+00> : vector<10x32xf32>
    %356 = tpu.matmul %354, %355, %cst_138 {dimension_numbers = #tpu.dot_dimension_numbers<[1], [0], [0], [1], [0, 0, 1, 1], [], []>} : vector<10x8xf32>, vector<8x32xf32>, vector<10x32xf32> -> vector<10x32xf32>
    %357 = arith.addf %330, %356 : vector<10x32xf32>
    %358 = vector.extract_strided_slice %329 {offsets = [0, 8], sizes = [10, 8], strides = [1, 1]} : vector<10x96xf32> to vector<10x8xf32>
    %359 = vector.extract_strided_slice %324 {offsets = [0, 8], sizes = [1, 8], strides = [1, 1]} : vector<12x32xf32> to vector<1x8xf32>
    %360 = vector.broadcast %359 : vector<1x8xf32> to vector<10x8xf32>
    %361 = arith.addf %358, %360 : vector<10x8xf32>
    %362 = vector.extract_strided_slice %329 {offsets = [0, 40], sizes = [10, 8], strides = [1, 1]} : vector<10x96xf32> to vector<10x8xf32>
    %363 = vector.extract_strided_slice %324 {offsets = [1, 8], sizes = [1, 8], strides = [1, 1]} : vector<12x32xf32> to vector<1x8xf32>
    %364 = vector.broadcast %363 : vector<1x8xf32> to vector<10x8xf32>
    %365 = arith.addf %362, %364 : vector<10x8xf32>
    %366 = vector.extract_strided_slice %329 {offsets = [0, 72], sizes = [10, 8], strides = [1, 1]} : vector<10x96xf32> to vector<10x8xf32>
    %367 = vector.extract_strided_slice %324 {offsets = [2, 8], sizes = [1, 8], strides = [1, 1]} : vector<12x32xf32> to vector<1x8xf32>
    %368 = vector.broadcast %367 : vector<1x8xf32> to vector<10x8xf32>
    %369 = arith.addf %366, %368 : vector<10x8xf32>
    %cst_139 = arith.constant dense<0.000000e+00> : vector<10x10xf32>
    %370 = tpu.matmul %361, %365, %cst_139 {dimension_numbers = #tpu.dot_dimension_numbers<[1], [1], [0], [0], [0, 0, 1, 0], [], []>} : vector<10x8xf32>, vector<10x8xf32>, vector<10x10xf32> -> vector<10x10xf32>
    %371 = arith.addf %370, %316 : vector<10x10xf32>
    %cst_140 = arith.constant dense<0xFF800000> : vector<10xf32>
    %372 = vector.multi_reduction <maximumf>, %371, %cst_140 [1] : vector<10x10xf32> to vector<10xf32>
    %373 = vector.shape_cast %372 : vector<10xf32> to vector<10x1xf32>
    %374 = vector.broadcast %373 : vector<10x1xf32> to vector<10x10xf32>
    %375 = arith.subf %371, %374 : vector<10x10xf32>
    %376 = math.exp %375 : vector<10x10xf32>
    %cst_141 = arith.constant dense<0.000000e+00> : vector<10xf32>
    %377 = vector.multi_reduction <add>, %376, %cst_141 [1] : vector<10x10xf32> to vector<10xf32>
    %378 = vector.shape_cast %377 : vector<10xf32> to vector<10x1xf32>
    %379 = vector.broadcast %378 : vector<10x1xf32> to vector<10x10xf32>
    %380 = arith.divf %376, %379 : vector<10x10xf32>
    %cst_142 = arith.constant dense<0.000000e+00> : vector<10x8xf32>
    %381 = tpu.matmul %380, %369, %cst_142 {dimension_numbers = #tpu.dot_dimension_numbers<[1], [0], [0], [1], [0, 0, 1, 1], [], []>} : vector<10x10xf32>, vector<10x8xf32>, vector<10x8xf32> -> vector<10x8xf32>
    %382 = vector.extract_strided_slice %328 {offsets = [8, 0], sizes = [8, 32], strides = [1, 1]} : vector<32x32xf32> to vector<8x32xf32>
    %cst_143 = arith.constant dense<0.000000e+00> : vector<10x32xf32>
    %383 = tpu.matmul %381, %382, %cst_143 {dimension_numbers = #tpu.dot_dimension_numbers<[1], [0], [0], [1], [0, 0, 1, 1], [], []>} : vector<10x8xf32>, vector<8x32xf32>, vector<10x32xf32> -> vector<10x32xf32>
    %384 = arith.addf %357, %383 : vector<10x32xf32>
    %385 = vector.extract_strided_slice %329 {offsets = [0, 16], sizes = [10, 8], strides = [1, 1]} : vector<10x96xf32> to vector<10x8xf32>
    %386 = vector.extract_strided_slice %324 {offsets = [0, 16], sizes = [1, 8], strides = [1, 1]} : vector<12x32xf32> to vector<1x8xf32>
    %387 = vector.broadcast %386 : vector<1x8xf32> to vector<10x8xf32>
    %388 = arith.addf %385, %387 : vector<10x8xf32>
    %389 = vector.extract_strided_slice %329 {offsets = [0, 48], sizes = [10, 8], strides = [1, 1]} : vector<10x96xf32> to vector<10x8xf32>
    %390 = vector.extract_strided_slice %324 {offsets = [1, 16], sizes = [1, 8], strides = [1, 1]} : vector<12x32xf32> to vector<1x8xf32>
    %391 = vector.broadcast %390 : vector<1x8xf32> to vector<10x8xf32>
    %392 = arith.addf %389, %391 : vector<10x8xf32>
    %393 = vector.extract_strided_slice %329 {offsets = [0, 80], sizes = [10, 8], strides = [1, 1]} : vector<10x96xf32> to vector<10x8xf32>
    %394 = vector.extract_strided_slice %324 {offsets = [2, 16], sizes = [1, 8], strides = [1, 1]} : vector<12x32xf32> to vector<1x8xf32>
    %395 = vector.broadcast %394 : vector<1x8xf32> to vector<10x8xf32>
    %396 = arith.addf %393, %395 : vector<10x8xf32>
    %cst_144 = arith.constant dense<0.000000e+00> : vector<10x10xf32>
    %397 = tpu.matmul %388, %392, %cst_144 {dimension_numbers = #tpu.dot_dimension_numbers<[1], [1], [0], [0], [0, 0, 1, 0], [], []>} : vector<10x8xf32>, vector<10x8xf32>, vector<10x10xf32> -> vector<10x10xf32>
    %398 = arith.addf %397, %316 : vector<10x10xf32>
    %cst_145 = arith.constant dense<0xFF800000> : vector<10xf32>
    %399 = vector.multi_reduction <maximumf>, %398, %cst_145 [1] : vector<10x10xf32> to vector<10xf32>
    %400 = vector.shape_cast %399 : vector<10xf32> to vector<10x1xf32>
    %401 = vector.broadcast %400 : vector<10x1xf32> to vector<10x10xf32>
    %402 = arith.subf %398, %401 : vector<10x10xf32>
    %403 = math.exp %402 : vector<10x10xf32>
    %cst_146 = arith.constant dense<0.000000e+00> : vector<10xf32>
    %404 = vector.multi_reduction <add>, %403, %cst_146 [1] : vector<10x10xf32> to vector<10xf32>
    %405 = vector.shape_cast %404 : vector<10xf32> to vector<10x1xf32>
    %406 = vector.broadcast %405 : vector<10x1xf32> to vector<10x10xf32>
    %407 = arith.divf %403, %406 : vector<10x10xf32>
    %cst_147 = arith.constant dense<0.000000e+00> : vector<10x8xf32>
    %408 = tpu.matmul %407, %396, %cst_147 {dimension_numbers = #tpu.dot_dimension_numbers<[1], [0], [0], [1], [0, 0, 1, 1], [], []>} : vector<10x10xf32>, vector<10x8xf32>, vector<10x8xf32> -> vector<10x8xf32>
    %409 = vector.extract_strided_slice %328 {offsets = [16, 0], sizes = [8, 32], strides = [1, 1]} : vector<32x32xf32> to vector<8x32xf32>
    %cst_148 = arith.constant dense<0.000000e+00> : vector<10x32xf32>
    %410 = tpu.matmul %408, %409, %cst_148 {dimension_numbers = #tpu.dot_dimension_numbers<[1], [0], [0], [1], [0, 0, 1, 1], [], []>} : vector<10x8xf32>, vector<8x32xf32>, vector<10x32xf32> -> vector<10x32xf32>
    %411 = arith.addf %384, %410 : vector<10x32xf32>
    %412 = vector.extract_strided_slice %329 {offsets = [0, 24], sizes = [10, 8], strides = [1, 1]} : vector<10x96xf32> to vector<10x8xf32>
    %413 = vector.extract_strided_slice %324 {offsets = [0, 24], sizes = [1, 8], strides = [1, 1]} : vector<12x32xf32> to vector<1x8xf32>
    %414 = vector.broadcast %413 : vector<1x8xf32> to vector<10x8xf32>
    %415 = arith.addf %412, %414 : vector<10x8xf32>
    %416 = vector.extract_strided_slice %329 {offsets = [0, 56], sizes = [10, 8], strides = [1, 1]} : vector<10x96xf32> to vector<10x8xf32>
    %417 = vector.extract_strided_slice %324 {offsets = [1, 24], sizes = [1, 8], strides = [1, 1]} : vector<12x32xf32> to vector<1x8xf32>
    %418 = vector.broadcast %417 : vector<1x8xf32> to vector<10x8xf32>
    %419 = arith.addf %416, %418 : vector<10x8xf32>
    %420 = vector.extract_strided_slice %329 {offsets = [0, 88], sizes = [10, 8], strides = [1, 1]} : vector<10x96xf32> to vector<10x8xf32>
    %421 = vector.extract_strided_slice %324 {offsets = [2, 24], sizes = [1, 8], strides = [1, 1]} : vector<12x32xf32> to vector<1x8xf32>
    %422 = vector.broadcast %421 : vector<1x8xf32> to vector<10x8xf32>
    %423 = arith.addf %420, %422 : vector<10x8xf32>
    %cst_149 = arith.constant dense<0.000000e+00> : vector<10x10xf32>
    %424 = tpu.matmul %415, %419, %cst_149 {dimension_numbers = #tpu.dot_dimension_numbers<[1], [1], [0], [0], [0, 0, 1, 0], [], []>} : vector<10x8xf32>, vector<10x8xf32>, vector<10x10xf32> -> vector<10x10xf32>
    %425 = arith.addf %424, %316 : vector<10x10xf32>
    %cst_150 = arith.constant dense<0xFF800000> : vector<10xf32>
    %426 = vector.multi_reduction <maximumf>, %425, %cst_150 [1] : vector<10x10xf32> to vector<10xf32>
    %427 = vector.shape_cast %426 : vector<10xf32> to vector<10x1xf32>
    %428 = vector.broadcast %427 : vector<10x1xf32> to vector<10x10xf32>
    %429 = arith.subf %425, %428 : vector<10x10xf32>
    %430 = math.exp %429 : vector<10x10xf32>
    %cst_151 = arith.constant dense<0.000000e+00> : vector<10xf32>
    %431 = vector.multi_reduction <add>, %430, %cst_151 [1] : vector<10x10xf32> to vector<10xf32>
    %432 = vector.shape_cast %431 : vector<10xf32> to vector<10x1xf32>
    %433 = vector.broadcast %432 : vector<10x1xf32> to vector<10x10xf32>
    %434 = arith.divf %430, %433 : vector<10x10xf32>
    %cst_152 = arith.constant dense<0.000000e+00> : vector<10x8xf32>
    %435 = tpu.matmul %434, %423, %cst_152 {dimension_numbers = #tpu.dot_dimension_numbers<[1], [0], [0], [1], [0, 0, 1, 1], [], []>} : vector<10x10xf32>, vector<10x8xf32>, vector<10x8xf32> -> vector<10x8xf32>
    %436 = vector.extract_strided_slice %328 {offsets = [24, 0], sizes = [8, 32], strides = [1, 1]} : vector<32x32xf32> to vector<8x32xf32>
    %cst_153 = arith.constant dense<0.000000e+00> : vector<10x32xf32>
    %437 = tpu.matmul %435, %436, %cst_153 {dimension_numbers = #tpu.dot_dimension_numbers<[1], [0], [0], [1], [0, 0, 1, 1], [], []>} : vector<10x8xf32>, vector<8x32xf32>, vector<10x32xf32> -> vector<10x32xf32>
    %438 = arith.addf %411, %437 : vector<10x32xf32>
    %439 = vector.extract_strided_slice %324 {offsets = [3, 0], sizes = [1, 32], strides = [1, 1]} : vector<12x32xf32> to vector<1x32xf32>
    %440 = vector.broadcast %439 : vector<1x32xf32> to vector<10x32xf32>
    %441 = arith.addf %438, %440 : vector<10x32xf32>
    %442 = arith.addf %304, %441 : vector<10x32xf32>
    %443 = vector.extract_strided_slice %324 {offsets = [6, 0], sizes = [1, 32], strides = [1, 1]} : vector<12x32xf32> to vector<1x32xf32>
    %444 = vector.extract_strided_slice %324 {offsets = [7, 0], sizes = [1, 32], strides = [1, 1]} : vector<12x32xf32> to vector<1x32xf32>
    %cst_154 = arith.constant dense<0.000000e+00> : vector<10xf32>
    %445 = vector.multi_reduction <add>, %442, %cst_154 [1] : vector<10x32xf32> to vector<10xf32>
    %446 = vector.shape_cast %445 : vector<10xf32> to vector<10x1xf32>
    %cst_155 = arith.constant 3.200000e+01 : f32
    %447 = vector.broadcast %cst_155 : f32 to vector<10x1xf32>
    %448 = arith.divf %446, %447 : vector<10x1xf32>
    %449 = vector.broadcast %448 : vector<10x1xf32> to vector<10x32xf32>
    %450 = arith.subf %442, %449 : vector<10x32xf32>
    %451 = arith.mulf %450, %450 : vector<10x32xf32>
    %cst_156 = arith.constant dense<0.000000e+00> : vector<10xf32>
    %452 = vector.multi_reduction <add>, %451, %cst_156 [1] : vector<10x32xf32> to vector<10xf32>
    %453 = vector.shape_cast %452 : vector<10xf32> to vector<10x1xf32>
    %cst_157 = arith.constant 3.200000e+01 : f32
    %454 = vector.broadcast %cst_157 : f32 to vector<10x1xf32>
    %455 = arith.divf %453, %454 : vector<10x1xf32>
    %456 = vector.broadcast %448 : vector<10x1xf32> to vector<10x32xf32>
    %457 = arith.subf %442, %456 : vector<10x32xf32>
    %cst_158 = arith.constant 9.99999974E-6 : f32
    %458 = vector.broadcast %cst_158 : f32 to vector<10x1xf32>
    %459 = arith.addf %455, %458 : vector<10x1xf32>
    %460 = math.rsqrt %459 : vector<10x1xf32>
    %461 = vector.broadcast %460 : vector<10x1xf32> to vector<10x32xf32>
    %462 = arith.mulf %457, %461 : vector<10x32xf32>
    %463 = vector.broadcast %443 : vector<1x32xf32> to vector<10x32xf32>
    %464 = arith.mulf %462, %463 : vector<10x32xf32>
    %465 = vector.broadcast %444 : vector<1x32xf32> to vector<10x32xf32>
    %466 = arith.addf %464, %465 : vector<10x32xf32>
    %cst_159 = arith.constant dense<0.000000e+00> : vector<2x32xf32>
    %467 = tpu.matmul %323, %466, %cst_159 {dimension_numbers = #tpu.dot_dimension_numbers<[1], [0], [0], [1], [0, 0, 1, 1], [], []>} : vector<2x10xf32>, vector<10x32xf32>, vector<2x32xf32> -> vector<2x32xf32>
    %c0_160 = arith.constant 0 : index
    %c0_161 = arith.constant 0 : index
    %c0_162 = arith.constant 0 : index
    %468 = vector.load %arg18[%c0_160, %c0_161, %c0_162] : memref<1x32x32xf32, #tpu.memory_space<vmem>>, vector<1x32x32xf32>
    %469 = vector.shape_cast %468 : vector<1x32x32xf32> to vector<32x32xf32>
    %cst_163 = arith.constant dense<0.000000e+00> : vector<2x32xf32>
    %470 = tpu.matmul %467, %469, %cst_163 {dimension_numbers = #tpu.dot_dimension_numbers<[1], [0], [0], [1], [0, 0, 1, 1], [], []>} : vector<2x32xf32>, vector<32x32xf32>, vector<2x32xf32> -> vector<2x32xf32>
    %471 = vector.extract_strided_slice %324 {offsets = [4, 0], sizes = [1, 32], strides = [1, 1]} : vector<12x32xf32> to vector<1x32xf32>
    %472 = vector.broadcast %471 : vector<1x32xf32> to vector<2x32xf32>
    %473 = arith.addf %470, %472 : vector<2x32xf32>
    %cst_164 = arith.constant 0.000000e+00 : f32
    %474 = vector.broadcast %cst_164 : f32 to vector<2x32xf32>
    %475 = arith.maximumf %473, %474 : vector<2x32xf32>
    %c0_165 = arith.constant 0 : index
    %c0_166 = arith.constant 0 : index
    %c0_167 = arith.constant 0 : index
    %476 = vector.load %arg19[%c0_165, %c0_166, %c0_167] : memref<1x32x32xf32, #tpu.memory_space<vmem>>, vector<1x32x32xf32>
    %477 = vector.shape_cast %476 : vector<1x32x32xf32> to vector<32x32xf32>
    %cst_168 = arith.constant dense<0.000000e+00> : vector<2x32xf32>
    %478 = tpu.matmul %475, %477, %cst_168 {dimension_numbers = #tpu.dot_dimension_numbers<[1], [0], [0], [1], [0, 0, 1, 1], [], []>} : vector<2x32xf32>, vector<32x32xf32>, vector<2x32xf32> -> vector<2x32xf32>
    %479 = vector.extract_strided_slice %324 {offsets = [5, 0], sizes = [1, 32], strides = [1, 1]} : vector<12x32xf32> to vector<1x32xf32>
    %480 = vector.broadcast %479 : vector<1x32xf32> to vector<2x32xf32>
    %481 = arith.addf %478, %480 : vector<2x32xf32>
    %482 = arith.addf %467, %481 : vector<2x32xf32>
    %483 = vector.extract_strided_slice %324 {offsets = [8, 0], sizes = [1, 32], strides = [1, 1]} : vector<12x32xf32> to vector<1x32xf32>
    %484 = vector.extract_strided_slice %324 {offsets = [9, 0], sizes = [1, 32], strides = [1, 1]} : vector<12x32xf32> to vector<1x32xf32>
    %cst_169 = arith.constant dense<0.000000e+00> : vector<2xf32>
    %485 = vector.multi_reduction <add>, %482, %cst_169 [1] : vector<2x32xf32> to vector<2xf32>
    %486 = vector.shape_cast %485 : vector<2xf32> to vector<2x1xf32>
    %cst_170 = arith.constant 3.200000e+01 : f32
    %487 = vector.broadcast %cst_170 : f32 to vector<2x1xf32>
    %488 = arith.divf %486, %487 : vector<2x1xf32>
    %489 = vector.broadcast %488 : vector<2x1xf32> to vector<2x32xf32>
    %490 = arith.subf %482, %489 : vector<2x32xf32>
    %491 = arith.mulf %490, %490 : vector<2x32xf32>
    %cst_171 = arith.constant dense<0.000000e+00> : vector<2xf32>
    %492 = vector.multi_reduction <add>, %491, %cst_171 [1] : vector<2x32xf32> to vector<2xf32>
    %493 = vector.shape_cast %492 : vector<2xf32> to vector<2x1xf32>
    %cst_172 = arith.constant 3.200000e+01 : f32
    %494 = vector.broadcast %cst_172 : f32 to vector<2x1xf32>
    %495 = arith.divf %493, %494 : vector<2x1xf32>
    %496 = vector.broadcast %488 : vector<2x1xf32> to vector<2x32xf32>
    %497 = arith.subf %482, %496 : vector<2x32xf32>
    %cst_173 = arith.constant 9.99999974E-6 : f32
    %498 = vector.broadcast %cst_173 : f32 to vector<2x1xf32>
    %499 = arith.addf %495, %498 : vector<2x1xf32>
    %500 = math.rsqrt %499 : vector<2x1xf32>
    %501 = vector.broadcast %500 : vector<2x1xf32> to vector<2x32xf32>
    %502 = arith.mulf %497, %501 : vector<2x32xf32>
    %503 = vector.broadcast %483 : vector<1x32xf32> to vector<2x32xf32>
    %504 = arith.mulf %502, %503 : vector<2x32xf32>
    %505 = vector.broadcast %484 : vector<1x32xf32> to vector<2x32xf32>
    %506 = arith.addf %504, %505 : vector<2x32xf32>
    %507 = vector.extract_strided_slice %324 {offsets = [10, 0], sizes = [1, 32], strides = [1, 1]} : vector<12x32xf32> to vector<1x32xf32>
    %508 = vector.extract_strided_slice %324 {offsets = [11, 0], sizes = [1, 32], strides = [1, 1]} : vector<12x32xf32> to vector<1x32xf32>
    %cst_174 = arith.constant dense<0.000000e+00> : vector<2xf32>
    %509 = vector.multi_reduction <add>, %506, %cst_174 [1] : vector<2x32xf32> to vector<2xf32>
    %510 = vector.shape_cast %509 : vector<2xf32> to vector<2x1xf32>
    %cst_175 = arith.constant 3.200000e+01 : f32
    %511 = vector.broadcast %cst_175 : f32 to vector<2x1xf32>
    %512 = arith.divf %510, %511 : vector<2x1xf32>
    %513 = vector.broadcast %512 : vector<2x1xf32> to vector<2x32xf32>
    %514 = arith.subf %506, %513 : vector<2x32xf32>
    %515 = arith.mulf %514, %514 : vector<2x32xf32>
    %cst_176 = arith.constant dense<0.000000e+00> : vector<2xf32>
    %516 = vector.multi_reduction <add>, %515, %cst_176 [1] : vector<2x32xf32> to vector<2xf32>
    %517 = vector.shape_cast %516 : vector<2xf32> to vector<2x1xf32>
    %cst_177 = arith.constant 3.200000e+01 : f32
    %518 = vector.broadcast %cst_177 : f32 to vector<2x1xf32>
    %519 = arith.divf %517, %518 : vector<2x1xf32>
    %520 = vector.broadcast %512 : vector<2x1xf32> to vector<2x32xf32>
    %521 = arith.subf %506, %520 : vector<2x32xf32>
    %cst_178 = arith.constant 9.99999974E-6 : f32
    %522 = vector.broadcast %cst_178 : f32 to vector<2x1xf32>
    %523 = arith.addf %519, %522 : vector<2x1xf32>
    %524 = math.rsqrt %523 : vector<2x1xf32>
    %525 = vector.broadcast %524 : vector<2x1xf32> to vector<2x32xf32>
    %526 = arith.mulf %521, %525 : vector<2x32xf32>
    %527 = vector.broadcast %507 : vector<1x32xf32> to vector<2x32xf32>
    %528 = arith.mulf %526, %527 : vector<2x32xf32>
    %529 = vector.broadcast %508 : vector<1x32xf32> to vector<2x32xf32>
    %530 = arith.addf %528, %529 : vector<2x32xf32>
    %c0_179 = arith.constant 0 : index
    %c0_180 = arith.constant 0 : index
    %531 = vector.load %arg23[%c0_179, %c0_180] : memref<2x32xf32, #tpu.memory_space<vmem>>, vector<2x32xf32>
    %c0_181 = arith.constant 0 : index
    %c0_182 = arith.constant 0 : index
    %532 = vector.load %arg21[%c0_181, %c0_182] : memref<32x32xf32, #tpu.memory_space<vmem>>, vector<32x32xf32>
    %cst_183 = arith.constant dense<0.000000e+00> : vector<2x32xf32>
    %533 = tpu.matmul %530, %532, %cst_183 {dimension_numbers = #tpu.dot_dimension_numbers<[1], [0], [0], [1], [0, 0, 1, 1], [], []>} : vector<2x32xf32>, vector<32x32xf32>, vector<2x32xf32> -> vector<2x32xf32>
    %534 = vector.extract_strided_slice %531 {offsets = [0, 0], sizes = [1, 32], strides = [1, 1]} : vector<2x32xf32> to vector<1x32xf32>
    %535 = vector.broadcast %534 : vector<1x32xf32> to vector<2x32xf32>
    %536 = arith.addf %533, %535 : vector<2x32xf32>
    %cst_184 = arith.constant 0.000000e+00 : f32
    %537 = vector.broadcast %cst_184 : f32 to vector<2x32xf32>
    %538 = arith.maximumf %536, %537 : vector<2x32xf32>
    %c0_185 = arith.constant 0 : index
    %c0_186 = arith.constant 0 : index
    %539 = vector.load %arg22[%c0_185, %c0_186] : memref<32x1xf32, #tpu.memory_space<vmem>>, vector<32x1xf32>
    %cst_187 = arith.constant dense<0.000000e+00> : vector<2x1xf32>
    %540 = tpu.matmul %538, %539, %cst_187 {dimension_numbers = #tpu.dot_dimension_numbers<[1], [0], [0], [1], [0, 0, 1, 1], [], []>} : vector<2x32xf32>, vector<32x1xf32>, vector<2x1xf32> -> vector<2x1xf32>
    %541 = vector.extract_strided_slice %531 {offsets = [1, 0], sizes = [1, 1], strides = [1, 1]} : vector<2x32xf32> to vector<1x1xf32>
    %542 = vector.broadcast %541 : vector<1x1xf32> to vector<2x1xf32>
    %543 = arith.addf %540, %542 : vector<2x1xf32>
    %544 = arith.negf %543 : vector<2x1xf32>
    %545 = math.exp %544 : vector<2x1xf32>
    %cst_188 = arith.constant 1.000000e+00 : f32
    %546 = vector.broadcast %cst_188 : f32 to vector<2x1xf32>
    %547 = arith.addf %546, %545 : vector<2x1xf32>
    %548 = arith.divf %546, %547 : vector<2x1xf32>
    %c0_189 = arith.constant 0 : index
    %c0_190 = arith.constant 0 : index
    %549 = vector.load %arg24[%c0_189, %c0_190] : memref<2x1xf32, #tpu.memory_space<vmem>>, vector<2x1xf32>
    tpu.vector_store %arg24[%c0_189, %c0_190], %548 {strides = array<i32>} : memref<2x1xf32, #tpu.memory_space<vmem>>, vector<2x1xf32>,
    return
  }
  func.func @transform_0(%arg0: i32) -> (i32, i32) {
    %c0_i32 = arith.constant 0 : i32
    %c0_i32_0 = arith.constant 0 : i32
    %c0_i32_1 = arith.constant 0 : i32
    return %c0_i32, %c0_i32_0 : i32, i32
  }
  func.func @transform_1(%arg0: i32) -> (i32, i32) {
    %c0_i32 = arith.constant 0 : i32
    %c0_i32_0 = arith.constant 0 : i32
    %c0_i32_1 = arith.constant 0 : i32
    return %c0_i32, %c0_i32_0 : i32, i32
  }
  func.func @transform_2(%arg0: i32) -> (i32, i32) {
    %c0_i32 = arith.constant 0 : i32
    %c0_i32_0 = arith.constant 0 : i32
    %c0_i32_1 = arith.constant 0 : i32
    return %c0_i32, %c0_i32_0 : i32, i32
  }
  func.func @transform_3(%arg0: i32) -> (i32, i32) {
    %c0_i32 = arith.constant 0 : i32
    %c0_i32_0 = arith.constant 0 : i32
    %c0_i32_1 = arith.constant 0 : i32
    return %c0_i32, %c0_i32_0 : i32, i32
  }
  func.func @transform_4(%arg0: i32) -> (i32, i32) {
    %c0_i32 = arith.constant 0 : i32
    %c0_i32_0 = arith.constant 0 : i32
    %c0_i32_1 = arith.constant 0 : i32
    return %c0_i32, %c0_i32_0 : i32, i32
  }
  func.func @transform_5(%arg0: i32) -> (i32, i32) {
    %c0_i32 = arith.constant 0 : i32
    %c0_i32_0 = arith.constant 0 : i32
    %c0_i32_1 = arith.constant 0 : i32
    return %c0_i32, %c0_i32_0 : i32, i32
  }
  func.func @transform_6(%arg0: i32) -> (i32, i32) {
    %c0_i32 = arith.constant 0 : i32
    %c0_i32_0 = arith.constant 0 : i32
    %c0_i32_1 = arith.constant 0 : i32
    return %c0_i32, %c0_i32_0 : i32, i32
  }
  func.func @transform_7(%arg0: i32) -> (i32, i32, i32) {
    %c0_i32 = arith.constant 0 : i32
    %c0_i32_0 = arith.constant 0 : i32
    %c0_i32_1 = arith.constant 0 : i32
    %c0_i32_2 = arith.constant 0 : i32
    return %c0_i32, %c0_i32_0, %c0_i32_1 : i32, i32, i32
  }
  func.func @transform_8(%arg0: i32) -> (i32, i32) {
    %c0_i32 = arith.constant 0 : i32
    %c0_i32_0 = arith.constant 0 : i32
    %c0_i32_1 = arith.constant 0 : i32
    return %c0_i32, %c0_i32_0 : i32, i32
  }
  func.func @transform_9(%arg0: i32) -> (i32, i32) {
    %c0_i32 = arith.constant 0 : i32
    %c0_i32_0 = arith.constant 0 : i32
    %c0_i32_1 = arith.constant 0 : i32
    return %c0_i32, %c0_i32_0 : i32, i32
  }
  func.func @transform_10(%arg0: i32) -> (i32, i32, i32) {
    %c0_i32 = arith.constant 0 : i32
    %c0_i32_0 = arith.constant 0 : i32
    %c0_i32_1 = arith.constant 0 : i32
    %c0_i32_2 = arith.constant 0 : i32
    return %c0_i32, %c0_i32_0, %c0_i32_1 : i32, i32, i32
  }
  func.func @transform_11(%arg0: i32) -> (i32, i32, i32) {
    %c0_i32 = arith.constant 0 : i32
    %c0_i32_0 = arith.constant 0 : i32
    %c0_i32_1 = arith.constant 0 : i32
    %c0_i32_2 = arith.constant 0 : i32
    return %c0_i32, %c0_i32_0, %c0_i32_1 : i32, i32, i32
  }
  func.func @transform_12(%arg0: i32) -> (i32, i32, i32) {
    %c0_i32 = arith.constant 0 : i32
    %c0_i32_0 = arith.constant 0 : i32
    %c0_i32_1 = arith.constant 0 : i32
    %c0_i32_2 = arith.constant 0 : i32
    return %c0_i32, %c0_i32_0, %c0_i32_1 : i32, i32, i32
  }
  func.func @transform_13(%arg0: i32) -> (i32, i32, i32) {
    %c0_i32 = arith.constant 0 : i32
    %c0_i32_0 = arith.constant 0 : i32
    %c0_i32_1 = arith.constant 0 : i32
    %c0_i32_2 = arith.constant 0 : i32
    return %c0_i32, %c0_i32_0, %c0_i32_1 : i32, i32, i32
  }
  func.func @transform_14(%arg0: i32) -> (i32, i32) {
    %c0_i32 = arith.constant 0 : i32
    %c0_i32_0 = arith.constant 0 : i32
    %c0_i32_1 = arith.constant 0 : i32
    return %c0_i32, %c0_i32_0 : i32, i32
  }
  func.func @transform_15(%arg0: i32) -> (i32, i32, i32) {
    %c0_i32 = arith.constant 0 : i32
    %c0_i32_0 = arith.constant 0 : i32
    %c0_i32_1 = arith.constant 0 : i32
    %c0_i32_2 = arith.constant 0 : i32
    return %c0_i32, %c0_i32_0, %c0_i32_1 : i32, i32, i32
  }
  func.func @transform_16(%arg0: i32) -> (i32, i32, i32) {
    %c0_i32 = arith.constant 0 : i32
    %c0_i32_0 = arith.constant 0 : i32
    %c0_i32_1 = arith.constant 0 : i32
    %c0_i32_2 = arith.constant 0 : i32
    return %c0_i32, %c0_i32_0, %c0_i32_1 : i32, i32, i32
  }
  func.func @transform_17(%arg0: i32) -> (i32, i32, i32) {
    %c0_i32 = arith.constant 0 : i32
    %c0_i32_0 = arith.constant 0 : i32
    %c0_i32_1 = arith.constant 0 : i32
    %c0_i32_2 = arith.constant 0 : i32
    return %c0_i32, %c0_i32_0, %c0_i32_1 : i32, i32, i32
  }
  func.func @transform_18(%arg0: i32) -> (i32, i32, i32) {
    %c0_i32 = arith.constant 0 : i32
    %c0_i32_0 = arith.constant 0 : i32
    %c0_i32_1 = arith.constant 0 : i32
    %c0_i32_2 = arith.constant 0 : i32
    return %c0_i32, %c0_i32_0, %c0_i32_1 : i32, i32, i32
  }
  func.func @transform_19(%arg0: i32) -> (i32, i32) {
    %c0_i32 = arith.constant 0 : i32
    %c0_i32_0 = arith.constant 0 : i32
    %c0_i32_1 = arith.constant 0 : i32
    return %c0_i32, %c0_i32_0 : i32, i32
  }
  func.func @transform_20(%arg0: i32) -> (i32, i32) {
    %c0_i32 = arith.constant 0 : i32
    %c0_i32_0 = arith.constant 0 : i32
    %c0_i32_1 = arith.constant 0 : i32
    return %c0_i32, %c0_i32_0 : i32, i32
  }
  func.func @transform_21(%arg0: i32) -> (i32, i32) {
    %c0_i32 = arith.constant 0 : i32
    %c0_i32_0 = arith.constant 0 : i32
    %c0_i32_1 = arith.constant 0 : i32
    return %c0_i32, %c0_i32_0 : i32, i32
  }
  func.func @transform_22(%arg0: i32) -> (i32, i32) {
    %c0_i32 = arith.constant 0 : i32
    %c0_i32_0 = arith.constant 0 : i32
    %c0_i32_1 = arith.constant 0 : i32
    return %c0_i32, %c0_i32_0 : i32, i32
  }
  func.func @transform_23(%arg0: i32) -> (i32, i32) {
    %c0_i32 = arith.constant 0 : i32
    %c0_i32_0 = arith.constant 0 : i32
    %c0_i32_1 = arith.constant 0 : i32
    return %c0_i32, %c0_i32_0 : i32, i32
  }
}

</mosaic_0001>

<bundles_post_ra>
// kernel: squeeze.29
= control target key start
LH: loop header
LB: loop body
LE: loop exit
PB: predicated region body
PF: predicated region fallthrough
CT: control target
= control target key end

     0   :  { %s30_s8 = smov 64   ;;  %vm7_vm0 = vcmask 261120   ;;  %s47_s0 = inlined_call_operand.vmem [shape: f32[96], index: 0, kind: input, shape index: {}]   ;;  %s48_s1 = inlined_call_operand.vmem [shape: f32[3,32], index: 1, kind: output, shape index: {}]  }
   0x1   :  { %v4_v0 = vld [vmem:[%s47_s0] sm:$0x1]  ;;  %s29_s0 = smov 96  }
   0x2   :  { %5 = vst [vmem:[#allocation1] sm:$0x1] %v4_v0 }
   0x9   :  { %v9_v1 = vld [vmem:[#allocation1] sm:$0x1]  }
   0xa   :  { %10 = vrot.lane.b32.xlu0 %v9_v1, %s29_s0  ;;  %v15_v2 = vld [vmem:[#allocation1] sm:$0x1]  }
   0xb   :  { %v6_v3 = vld [vmem:[#allocation1] sm:$0x1]  }
   0xc   :  { %8 = vst.msk [vmem:[#allocation0] sm:$0x1] %vm7_vm0, %v6_v3  }
  0x12   :  { %16 = vrot.lane.b32.xlu0 %v15_v2, %s30_s8 }
  0x7c   :  { %v11_v4 = vpop.permute.xlu0 %10  }
  0x7d   :  { %14 = vst.msk [vmem:[#allocation0 + $0x1] sm:$0x1] %vm7_vm0, %v11_v4  }
  0x84   :  { %v17_v5 = vpop.permute.xlu0 %16  }
  0x85   :  { %20 = vst.msk [vmem:[#allocation0 + $0x2] sm:$0x1] %vm7_vm0, %v17_v5  }
  0x8c   :  { %v23_v6 = vld [vmem:[#allocation0] sm:$0xf] }
  0x8d   :  { %26 = vst [vmem:[%s48_s1] sm:$0xf] %v23_v6 }

// kernel: temporal_first_transformer_forward.1
= control target key start
LH: loop header
LB: loop body
LE: loop exit
PB: predicated region body
PF: predicated region fallthrough
CT: control target
= control target key end

     0   :  { %vm224_vm0 = vcmask 1045504   ;;  %vm217_vm1 = vcmask 48128   ;;  %vm303_vm2 = vcmask 1043456   ;;  %vm124_vm3 = vcmask 1040384   ;;  %s6482_s30 = smov 96   ;;  %s10028_s28 = smov 48   ;;  %s9955_s5 = inlined_call_operand.vmem [shape: f32[6,32], index: 5, kind: input, shape index: {}]   ;;  %s9956_s2 = inlined_call_operand.vmem [shape: f32[10,6], index: 2, kind: input, shape index: {}]   ;;  %s9957_s6 = inlined_call_operand.vmem [shape: f32[12,32], index: 6, kind: input, shape index: {}]   ;;  %s9958_s4 = inlined_call_operand.vmem [shape: f32[9,32], index: 4, kind: input, shape index: {}]   ;;  %s9959_s1 = inlined_call_operand.vmem [shape: f32[30,9], index: 1, kind: input, shape index: {}]   ;;  %s9960_s7 = inlined_call_operand.vmem [shape: f32[3,32,32], index: 7, kind: input, shape index: {}]   ;;  %s9961_s3 = inlined_call_operand.vmem [shape: f32[16,12], index: 3, kind: input, shape index: {}]   ;;  %s9962_s8 = inlined_call_operand.vmem [shape: f32[7,32], index: 8, kind: input, shape index: {}]   ;;  %s9963_s0 = inlined_call_operand.vmem [shape: s32[112,8], index: 0, kind: input, shape index: {}]   ;;  %s9964_s9 = inlined_call_operand.vmem [shape: f32[16,32], index: 9, kind: input, shape index: {}]   ;;  %s9965_s14 = inlined_call_operand.vmem [shape: f32[12,32], index: 14, kind: input, shape index: {}]   ;;  %s9966_s10 = inlined_call_operand.vmem [shape: f32[1,32,96], index: 10, kind: input, shape index: {}]   ;;  %s9967_s11 = inlined_call_operand.vmem [shape: f32[1,32,32], index: 11, kind: input, shape index: {}]   ;;  %s9968_s12 = inlined_call_operand.vmem [shape: f32[1,32,32], index: 12, kind: input, shape index: {}]   ;;  %s9969_s13 = inlined_call_operand.vmem [shape: f32[1,32,32], index: 13, kind: input, shape index: {}]   ;;  %s9970_s15 = inlined_call_operand.vmem [shape: f32[1,32,96], index: 15, kind: input, shape index: {}]   ;;  %s9971_s19 = inlined_call_operand.vmem [shape: f32[12,32], index: 19, kind: input, shape index: {}]   ;;  %s9972_s16 = inlined_call_operand.vmem [shape: f32[1,32,32], index: 16, kind: input, shape index: {}]   ;;  %s9973_s17 = inlined_call_operand.vmem [shape: f32[1,32,32], index: 17, kind: input, shape index: {}]   ;;  %s9974_s18 = inlined_call_operand.vmem [shape: f32[1,32,32], index: 18, kind: input, shape index: {}]   ;;  %s9975_s20 = inlined_call_operand.vmem [shape: f32[32,32], index: 20, kind: input, shape index: {}]   ;;  %s9976_s21 = inlined_call_operand.vmem [shape: f32[32,1], index: 21, kind: input, shape index: {}]   ;;  %s9977_s22 = inlined_call_operand.vmem [shape: f32[2,32], index: 22, kind: input, shape index: {}]   ;;  %s9978_s23 = inlined_call_operand.vmem [shape: f32[2,1], index: 23, kind: output, shape index: {}]  }
   0x1   :  { %10030 = sst [smem:[#allocation46_spill]] %s9955_s5  ;;  %vm111_vm4 = vcmask 72704   ;;  %vm296_vm5 = vcmask 97280   ;;  %vm4560_vm6 = vcmask 260102   ;;  %v6709_v28 = vld [vmem:[%s9963_s0] sm:$0xff]  ;;  %v6714_v29 = vld [vmem:[%s9963_s0 + $0x8] sm:$0xff] }
   0x2   :  { %10031 = sst [smem:[#allocation47_spill]] %s9956_s2  ;;  %v6475_v31 = vmov 0   ;;  %v6721_v32 = vld [vmem:[%s9963_s0 + $0x10] sm:$0xff]  ;;  %vm89_vm7 = vcmask 261120   ;;  %v6476_v40 = vmov 1   ;;  %v6741_v47 = vld [vmem:[%s9963_s0 + $0x18] sm:$0xff] }
   0x3   :  { %10032 = sst [smem:[#allocation48_spill]] %s9957_s6  ;;  %6001 = vset.pattern.permute.xlu0 %v6475_v31  ;;  %6003 = vset.pattern.permute.xlu1 %v6475_v31  ;;  %v6747_v50 = vld [vmem:[%s9963_s0 + $0x20] sm:$0xff]  ;;  %v6758_v56 = vld [vmem:[%s9963_s0 + $0x30] sm:$0xff]  ;;  %v6768_v61 = vld [vmem:[%s9963_s0 + $0x28] sm:$0xff]  ;;  %v9985_v62 = vmov 0.0   ;;  %vm284_vm8 = vcmask 254976  }
   0x4   :  { %10033 = sst [smem:[#allocation49_spill]] %s9958_s4  ;;  %381 = vperm.xlu0 %6001, %v6709_v28   ;;  %384 = vperm.xlu1 %6003, %v6714_v29   ;;  %94 = vst.msk [vmem:[#allocation2 + $0x20] sm:$0xff] %vm89_vm7, %v9985_v62  ;;  %v6787_v63 = vld [vmem:[%s9963_s0 + $0x48] sm:$0xff]  ;;  %vm206_vm9 = vcmask 259072   ;;  %vm534_vm12 = vcmask 654336   ;;  %s10026_s29 = smov 40  }
   0x5   :  { %10034 = sst [smem:[#allocation50_spill]] %s9959_s1  ;;  %6005 = vset.pattern.permute.xlu2 %v6475_v31  ;;  %90 = vst.msk [vmem:[#allocation2] sm:$0xff] %vm89_vm7, %v9985_v62 }
   0x6   :  { %10035 = sst [smem:[#allocation51_spill]] %s9960_s7  ;;  %387 = vperm.xlu2 %6005, %v6721_v32   ;;  %91 = vst.msk [vmem:[#allocation2 + $0x8] sm:$0xff] %vm89_vm7, %v9985_v62  ;;  %s6486_s7 = smov 112  }
   0x7   :  { %10036 = sst [smem:[#allocation52_spill]] %s9961_s3  ;;  %92 = vst.msk [vmem:[#allocation2 + $0x10] sm:$0xff] %vm89_vm7, %v9985_v62  ;;  %s6487_s3 = smov 104  }
   0x8   :  { %10037 = sst [smem:[#allocation53_spill]] %s9962_s8  ;;  %93 = vst.msk [vmem:[#allocation2 + $0x18] sm:$0xff] %vm89_vm7, %v9985_v62  ;;  %s6488_s8 = smov 56  }
   0x9   :  { %s10038_s24 = sld [smem:[#allocation46_spill]]  ;;  %95 = vst.msk [vmem:[#allocation2 + $0x28] sm:$0xff] %vm89_vm7, %v9985_v62 }
   0xa   :  { %s10039_s2 = sld [smem:[#allocation47_spill]]  ;;  %96 = vst.msk [vmem:[#allocation2 + $0x30] sm:$0xff] %vm89_vm7, %v9985_v62 }
   0xb   :  { %s10040_s6 = sld [smem:[#allocation48_spill]]  ;;  %97 = vst.msk [vmem:[#allocation2 + $0x38] sm:$0xff] %vm89_vm7, %v9985_v62 }
   0xc   :  { %s10041_s4 = sld [smem:[#allocation49_spill]]  ;;  %6002 = vset.pattern.permute.xlu0 %v6476_v40  ;;  %6004 = vset.pattern.permute.xlu1 %v6476_v40  ;;  %98 = vst.msk [vmem:[#allocation2 + $0x40] sm:$0xff] %vm89_vm7, %v9985_v62 }
   0xd   :  { %s10042_s25 = sld [smem:[#allocation50_spill]]  ;;  %451 = vperm.xlu0 %6002, %v6709_v28   ;;  %454 = vperm.xlu1 %6004, %v6714_v29   ;;  %99 = vst.msk [vmem:[#allocation2 + $0x48] sm:$0xff] %vm89_vm7, %v9985_v62 }
   0xe   :  { %s10043_s26 = sld [smem:[#allocation51_spill]]  ;;  %6006 = vset.pattern.permute.xlu2 %v6476_v40 }
   0xf   :  { %v210_v0 = vld [vmem:[%s10038_s24] sm:$0x3f]  ;;  %s10044_s5 = sld [smem:[#allocation52_spill]]  ;;  %457 = vperm.xlu2 %6006, %v6721_v32   ;;  %s6485_s24 = smov 80  }
  0x10   :  { %v208_v1 = vld [vmem:[%s10039_s2] sm:$0xff]  ;;  %5615 = vmatpush.msk.msra.mxu2 %vm224_vm0, %v210_v0  ;;  %v209_v8 = vld [vmem:[%s10039_s2 + $0x8] sm:$0x3]  ;;  %v6805_v0 = vld [vmem:[%s9963_s0 + $0x38] sm:$0xff]  ;;  %s6483_s2 = smov 120  }
  0x11   :  { %v289_v2 = vld [vmem:[%s10040_s6 + $0x8] sm:$0xf]  ;;  %5616 = vmatmul.msk.f32.vlgmr.msra.gmra.mxu2 %vm217_vm1, %v208_v1  ;;  %v288_v3 = vld [vmem:[%s10040_s6] sm:$0xff]  ;;  %s6478_s6 = smov 32  }
  0x12   :  { %v105_v4 = vld [vmem:[%s10041_s4 + $0x8] sm:$0x1]  ;;  %v104_v5 = vld [vmem:[%s10041_s4] sm:$0xff]  ;;  %5624 = vmatpush.msk.msrb.mxu2 %vm303_vm2, %v289_v2  ;;  %v6825_v2 = vld [vmem:[%s9963_s0 + $0x50] sm:$0xff] }
  0x13   :  { %5602 = vmatpush.msk.msra.mxu0 %vm124_vm3, %v105_v4  ;;  %v100_v6 = vld [vmem:[%s10042_s25] sm:$0xff]  ;;  %v101_v9 = vld [vmem:[%s10042_s25 + $0x8] sm:$0xff]  ;;  %v102_v11 = vld [vmem:[%s10042_s25 + $0x10] sm:$0xff] }
  0x14   :  { %v5614_v7 = vld [vmem:[%s10043_s26 + $0x38] sm:$0xff]  ;;  %322 = vmatpush.msrb.mxu2 %v288_v3  ;;  %v5613_v14 = vld [vmem:[%s10043_s26 + $0x30] sm:$0xff]  ;;  %v5612_v15 = vld [vmem:[%s10043_s26 + $0x28] sm:$0xff] }
  0x15   :  { %143 = vmatpush.msra.mxu0 %v104_v5  ;;  %272 = vmatpush.msra.mxu3 %v5614_v7  ;;  %v286_v10 = vld [vmem:[%s10044_s5] sm:$0xff]  ;;  %v287_v12 = vld [vmem:[%s10044_s5 + $0x8] sm:$0xff]  ;;  %v103_v13 = vld [vmem:[%s10042_s25 + $0x18] sm:$0x3f]  ;;  %s10045_s5 = sld [smem:[#allocation53_spill]]  ;;  %s6481_s25 = smov 88  }
  0x16   :  { %5603 = vmatmul.msk.f32.vlgmr.msra.gmra.mxu0 %vm111_vm4, %v100_v6  ;;  %v5611_v17 = vld [vmem:[%s10043_s26 + $0x20] sm:$0xff]  ;;  %v109_v18 = vld [vmem:[%s10043_s26 + $0x18] sm:$0xff]  ;;  %v108_v19 = vld [vmem:[%s10043_s26 + $0x10] sm:$0xff]  ;;  %6007 = vset.pattern.permute.xlu1 %v6475_v31 }
  0x17   :  { %273 = vmatpush.msra.mxu3 %v5613_v14  ;;  %186 = vmatpush.msra.mxu1 %v109_v18  ;;  %v5623_v20 = vld [vmem:[%s10043_s26 + $0x58] sm:$0xff]  ;;  %v107_v21 = vld [vmem:[%s10043_s26 + $0x8] sm:$0xff]  ;;  %v5622_v22 = vld [vmem:[%s10043_s26 + $0x50] sm:$0xff] }
  0x18   :  { %v106_v23 = vld [vmem:[%s10043_s26] sm:$0xff]  ;;  %v5621_v24 = vld [vmem:[%s10043_s26 + $0x48] sm:$0xff]  ;;  %6008 = vset.pattern.permute.xlu0 %v6475_v31  ;;  %390 = vperm.xlu1 %6007, %v6741_v47   ;;  %v85_v3 = vld [vmem:[%s9963_s0 + $0x58] sm:$0xff] }
  0x19   :  { %5617 = vmatmul.msk.f32.gmra.mxu2 %vm217_vm1, %v209_v8  ;;  %274 = vmatpush.msra.mxu3 %v5612_v15  ;;  %v5620_v25 = vld [vmem:[%s10043_s26 + $0x40] sm:$0xff]  ;;  %v365_v5 = vld [vmem:[%s9964_s9 + $0x8] sm:$0xff] }
  0x1a   :  { %187 = vmatpush.msra.mxu1 %v108_v19  ;;  %393 = vperm.xlu0 %6008, %v6747_v50   ;;  %v6815_v1 = vld [vmem:[%s9963_s0 + $0x40] sm:$0xff]  ;;  %367 = vst.msk [vmem:[#allocation2 + $0x48] sm:$0xff] %vm89_vm7, %v365_v5  ;;  %v87_v18 = vld [vmem:[%s9963_s0 + $0x68] sm:$0xff] }
  0x1b   :  { %v6674_v16 = vld [vmem:[%s10045_s5] sm:$0x7f]  ;;  %275 = vmatpush.msra.mxu3 %v5611_v17  ;;  %460 = vperm.xlu2 %6006, %v6741_v47  }
  0x1c   :  { %4561 = vst.msk [vmem:[#allocation3 + $0x2] sm:$0x40] %vm4560_vm6, %v6674_v16  ;;  %188 = vmatpush.msra.mxu1 %v107_v21  ;;  %v110_v26 = vperm.slane %v6674_v16, 0  ;;  %v216_v27 = vperm.slane %v6674_v16, 2  ;;  %v295_v45 = vperm.slane %v6674_v16, 4  ;;  %v161_v4 = vperm.slane %v6674_v16, 1 }
  0x1d   :  { %351 = vmatpush.msrb.mxu3 %v5623_v20  ;;  %v364_v7 = vld [vmem:[%s9964_s9] sm:$0xff]  ;;  %s6484_s9 = smov 72  }
  0x1e   :  { %5604 = vmatmul.msk.f32.gmra.mxu0 %vm111_vm4, %v101_v9  ;;  %189 = vmatpush.msra.mxu1 %v106_v23  ;;  %366 = vst.msk [vmem:[#allocation2 + $0x40] sm:$0xff] %vm89_vm7, %v364_v7  ;;  %v86_v9 = vld [vmem:[%s9963_s0 + $0x60] sm:$0xff] }
  0x1f   :  { %352 = vmatpush.msrb.mxu3 %v5622_v22  ;;  %v6857_v23 = vld [vmem:[%s9965_s14] sm:$0xff] }
  0x20   :  { %6009 = vset.pattern.permute.xlu1 %v6476_v40 }
  0x21   :  { %5625 = vmatmul.msk.f32.vlgmr.msrb.gmra.mxu2 %vm296_vm5, %v286_v10  ;;  %353 = vmatpush.msrb.mxu3 %v5621_v24  ;;  %v253_v10 = vperm.slane %v6674_v16, 3  ;;  %v967_v24 = vperm.slane %v6857_v23, 1 }
  0x22   :  { %6011 = vset.pattern.permute.xlu0 %v6476_v40  ;;  %463 = vperm.xlu1 %6009, %v6747_v50  }
  0x23   :  { %354 = vmatpush.msrb.mxu3 %v5620_v25  ;;  %469 = vperm.xlu0 %6011, %v6758_v56   ;;  %v332_v25 = vperm.slane %v6674_v16, 5 }
  0x24   :  { %6010 = vset.pattern.permute.xlu2 %v6475_v31 }
  0x25   :  { %396 = vperm.xlu2 %6010, %v6768_v61   ;;  %v376_v14 = vld [vmem:[#allocation2 + $0x40] sm:$0xff] }
  0x26   :  { %5605 = vmatmul.msk.f32.gmra.mxu0 %vm111_vm4, %v102_v11  ;;  %v377_v11 = vld [vmem:[#allocation2 + $0x48] sm:$0xff] }
  0x27   :  { %583 = vmatpush.msrb.mxu0 %v377_v11 }
  0x29   :  { %5626 = vmatmul.msk.f32.gmra.mxu2 %vm296_vm5, %v287_v12  ;;  %584 = vmatpush.msrb.mxu0 %v376_v14 }
  0x2a   :  { %466 = vperm.xlu1 %6009, %v6768_v61  }
  0x2b   :  { %6014 = vset.pattern.permute.xlu0 %v6475_v31 }
  0x2c   :  { %408 = vperm.xlu0 %6014, %v6787_v63  }
  0x2d   :  { %399 = vperm.xlu2 %6010, %v6758_v56  }
  0x2e   :  { %5606 = vmatmul.msk.f32.gmra.mxu0 %vm111_vm4, %v103_v13 }
  0x32   :  { %6012 = vset.pattern.permute.xlu1 %v6475_v31 }
  0x33   :  { %402 = vperm.xlu1 %6012, %v6805_v0  }
  0x34   :  { %6017 = vset.pattern.permute.xlu0 %v6476_v40 }
  0x35   :  { %6013 = vset.pattern.permute.xlu2 %v6476_v40  ;;  %484 = vperm.xlu0 %6017, %v85_v3  }
  0x36   :  { %472 = vperm.xlu2 %6013, %v6805_v0  }
  0x3b   :  { %405 = vperm.xlu1 %6012, %v6815_v1  }
  0x3d   :  { %969 = vrot.lane.b32.xlu0 %v967_v24, %s6478_s6 }
  0x3e   :  { %475 = vperm.xlu2 %6013, %v6815_v1  }
  0x43   :  { %6015 = vset.pattern.permute.xlu1 %v6476_v40 }
  0x44   :  { %478 = vperm.xlu1 %6015, %v6787_v63  }
  0x46   :  { %6016 = vset.pattern.permute.xlu2 %v6475_v31 }
  0x47   :  { %411 = vperm.xlu2 %6016, %v6825_v2  }
  0x4c   :  { %481 = vperm.xlu1 %6015, %v6825_v2  }
  0x4f   :  { %414 = vperm.xlu2 %6016, %v85_v3  }
  0x54   :  { %6018 = vset.pattern.permute.xlu1 %v6475_v31 }
  0x55   :  { %417 = vperm.xlu1 %6018, %v86_v9  }
  0x57   :  { %6019 = vset.pattern.permute.xlu2 %v6476_v40 }
  0x58   :  { %487 = vperm.xlu2 %6019, %v86_v9  }
  0x5d   :  { %420 = vperm.xlu1 %6018, %v87_v18  }
  0x60   :  { %490 = vperm.xlu2 %6019, %v87_v18  }
  0x93   :  { %v145_v30 = vpop.f32.mrf.mxu0 }
  0x94   :  { %v146_v33 = vadd.f32 %v145_v30, %v110_v26  ;;  %v245_v34 = vpop.f32.mrf.mxu2 }
  0x95   :  { %v246_v35 = vadd.f32 %v245_v34, %v216_v27 }
  0x96   :  { %v157_v36 = vmax.f32 %v146_v33, 0.0  ;;  %v6479_v33 = vmov 2  }
  0x97   :  { %v251_v37 = vmax.f32 %v246_v35, 0.0  ;;  %6020 = vset.pattern.permute.xlu1 %v6479_v33  ;;  %6021 = vset.pattern.permute.xlu0 %v6479_v33  ;;  %v382_v35 = vpop.permute.xlu0 %381 }
  0x98   :  { %5607 = vmatmul.msk.f32.vlgmr.msra.gmra.mxu1 %vm89_vm7, %v157_v36  ;;  %676 = vperm.xlu1 %6020, %v87_v18   ;;  %v388_v36 = vpop.permute.xlu2 %387 }
  0x99   :  { %5618 = vmatmul.msk.f32.vlgmr.msra.gmra.mxu3 %vm89_vm7, %v251_v37  ;;  %6022 = vset.pattern.permute.xlu2 %v6479_v33  ;;  %v385_v37 = vpop.permute.xlu1 %384 }
  0x9a   :  { %670 = vperm.xlu2 %6022, %v85_v3   ;;  %673 = vperm.xlu0 %6021, %v86_v9  }
  0x9b   :  { %v148_v38 = vpop.f32.mrf.mxu0 }
  0x9c   :  { %v149_v39 = vadd.f32 %v148_v38, %v110_v26  ;;  %v248_v41 = vpop.f32.mrf.mxu2  ;;  %v378_v38 = vlaneseq }
  0x9d   :  { %v249_v42 = vadd.f32 %v248_v41, %v216_v27 }
  0x9e   :  { %v158_v43 = vmax.f32 %v149_v39, 0.0  ;;  %v6870_v41 = vand.u32 127, %v378_v38 }
  0x9f   :  { %v252_v44 = vmax.f32 %v249_v42, 0.0 }
  0xa0   :  { %5608 = vmatmul.msk.f32.gmra.mxu1 %vm89_vm7, %v158_v43  ;;  %664 = vperm.xlu1 %6020, %v6787_v63   ;;  %10046 = vst [vmem:[#allocation4_spill] sm:$0xff] %v6870_v41  ;;  %v452_v43 = vpop.permute.xlu0 %451  ;;  %vm422_vm10 = vcmp.eq.s32.totalorder %v6870_v41, %v382_v35  ;;  %vm423_vm13 = vcmp.eq.s32.totalorder %v6870_v41, %v385_v37 }
  0xa1   :  { %5619 = vmatmul.msk.f32.gmra.mxu3 %vm89_vm7, %v252_v44  ;;  %vm492_vm11 = vcmp.eq.s32.totalorder %v6870_v41, %v452_v43  ;;  %vm424_vm15 = vcmp.eq.s32.totalorder %v6870_v41, %v388_v36  ;;  %v844_v43 = vld [vmem:[%s9966_s10 + $0x8] sm:$0xff] }
  0xa2   :  { %667 = vperm.xlu2 %6022, %v6825_v2   ;;  %661 = vperm.xlu0 %6021, %v6815_v1  }
  0xa3   :  { %v151_v46 = vpop.f32.mrf.mxu0 }
  0xa4   :  { %v152_v48 = vadd.f32 %v151_v46, %v110_v26  ;;  %v324_v49 = vpop.f32.mrf.mxu2  ;;  %v458_v46 = vpop.permute.xlu2 %457 }
  0xa5   :  { %v325_v51 = vadd.f32 %v324_v49, %v295_v45  ;;  %vm494_vm0 = vcmp.eq.s32.totalorder %v6870_v41, %v458_v46 }
  0xa6   :  { %v159_v52 = vmax.f32 %v152_v48, 0.0  ;;  %v455_v48 = vpop.permute.xlu1 %454 }
  0xa7   :  { %v330_v53 = vmax.f32 %v325_v51, 0.0  ;;  %v436_v51 = vsel %vm422_vm10, 1.0, %v9985_v62  ;;  %vm493_vm14 = vcmp.eq.s32.totalorder %v6870_v41, %v455_v48 }
  0xa8   :  { %5609 = vmatmul.msk.f32.gmra.mxu1 %vm89_vm7, %v159_v52  ;;  %655 = vperm.xlu1 %6020, %v6758_v56   ;;  %v506_v52 = vsel %vm492_vm11, 1.0, %v9985_v62  ;;  %v437_v56 = vsel %vm423_vm13, 1.0, %v9985_v62 }
  0xa9   :  { %5627 = vmatmul.msk.f32.vlgmr.msrb.gmra.mxu3 %vm89_vm7, %v330_v53 }
  0xaa   :  { %658 = vperm.xlu2 %6022, %v6805_v0   ;;  %652 = vperm.xlu0 %6021, %v6768_v61   ;;  %v394_v0 = vpop.permute.xlu0 %393 }
  0xab   :  { %v154_v54 = vpop.f32.mrf.mxu0  ;;  %vm426_vm6 = vcmp.eq.s32.totalorder %v6870_v41, %v394_v0 }
  0xac   :  { %v155_v55 = vadd.f32 %v154_v54, %v110_v26  ;;  %v327_v57 = vpop.f32.mrf.mxu2  ;;  %v520_v54 = vadd.f32 %v506_v52, %v436_v51  ;;  %v440_v5 = vsel %vm426_vm6, 1.0, %v9985_v62 }
  0xad   :  { %v328_v58 = vadd.f32 %v327_v57, %v295_v45 }
  0xae   :  { %v160_v59 = vmax.f32 %v155_v55, 0.0 }
  0xaf   :  { %v331_v60 = vmax.f32 %v328_v58, 0.0 }
  0xb0   :  { %5610 = vmatmul.msk.f32.gmra.mxu1 %vm89_vm7, %v160_v59  ;;  %646 = vperm.xlu1 %6020, %v6741_v47   ;;  %v391_v47 = vpop.permute.xlu1 %390 }
  0xb1   :  { %5628 = vmatmul.msk.f32.gmra.mxu3 %vm89_vm7, %v331_v60  ;;  %v438_v60 = vsel %vm424_vm15, 1.0, %v9985_v62  ;;  %vm425_vm2 = vcmp.eq.s32.totalorder %v6870_v41, %v391_v47 }
  0xb2   :  { %649 = vperm.xlu2 %6022, %v6747_v50   ;;  %643 = vperm.xlu0 %6021, %v6721_v32   ;;  %v461_v50 = vpop.permute.xlu2 %460  ;;  %v507_v32 = vsel %vm493_vm14, 1.0, %v9985_v62  ;;  %v439_v63 = vsel %vm425_vm2, 1.0, %v9985_v62  ;;  %v470_v11 = vpop.permute.xlu0 %469 }
  0xb3   :  { %v521_v57 = vadd.f32 %v507_v32, %v437_v56  ;;  %vm495_vm1 = vcmp.eq.s32.totalorder %v6870_v41, %v461_v50  ;;  %vm498_vm13 = vcmp.eq.s32.totalorder %v6870_v41, %v470_v11 }
  0xb8   :  { %637 = vperm.xlu1 %6020, %v6709_v28   ;;  %v464_v59 = vpop.permute.xlu1 %463  ;;  %v508_v28 = vsel %vm494_vm0, 1.0, %v9985_v62 }
  0xb9   :  { %v522_v61 = vadd.f32 %v508_v28, %v438_v60  ;;  %vm496_vm5 = vcmp.eq.s32.totalorder %v6870_v41, %v464_v59  ;;  %v843_v60 = vld [vmem:[%s9966_s10] sm:$0xff] }
  0xba   :  { %640 = vperm.xlu2 %6022, %v6714_v29   ;;  %v397_v58 = vpop.permute.xlu2 %396  ;;  %v509_v29 = vsel %vm495_vm1, 1.0, %v9985_v62 }
  0xbb   :  { %v523_v3 = vadd.f32 %v509_v29, %v439_v63 }
  0xc0   :  { %v467_v2 = vpop.permute.xlu1 %466 }
  0xc1   :  { %vm497_vm10 = vcmp.eq.s32.totalorder %v6870_v41, %v467_v2 }
  0xc2   :  { %v400_v1 = vpop.permute.xlu2 %399 }
  0xc3   :  { %vm428_vm11 = vcmp.eq.s32.totalorder %v6870_v41, %v400_v1 }
  0xc8   :  { %v403_v7 = vpop.permute.xlu1 %402 }
  0xc9   :  { %vm429_vm15 = vcmp.eq.s32.totalorder %v6870_v41, %v403_v7 }
 0x115   :  { %v191_v6 = vpop.f32.mrf.mxu1 }
 0x116   :  { %v192_v8 = vadd.f32 %v191_v6, %v161_v4 }
 0x118   :  { %203 = vst.msk [vmem:[#allocation2] sm:$0xff] %vm89_vm7, %v192_v8  ;;  %v473_v8 = vpop.permute.xlu2 %472 }
 0x119   :  { %vm499_vm14 = vcmp.eq.s32.totalorder %v6870_v41, %v473_v8  ;;  %v986_v8 = vperm.slane %v6857_v23, 2 }
 0x11c   :  { %v277_v12 = vpop.f32.mrf.mxu3 }
 0x11d   :  { %v194_v13 = vpop.f32.mrf.mxu1  ;;  %v278_v15 = vadd.f32 %v277_v12, %v253_v10 }
 0x11e   :  { %v195_v17 = vadd.f32 %v194_v13, %v161_v4  ;;  %v406_v13 = vpop.permute.xlu1 %405 }
 0x11f   :  { %283 = vst.msk [vmem:[#allocation2 + $0x20] sm:$0xff] %vm89_vm7, %v278_v15  ;;  %v368_v55 = vld [vmem:[#allocation2] sm:$0xff]  ;;  %v442_v15 = vsel %vm428_vm11, 1.0, %v9985_v62  ;;  %vm430_vm1 = vcmp.eq.s32.totalorder %v6870_v41, %v406_v13 }
 0x120   :  { %204 = vst.msk [vmem:[#allocation2 + $0x8] sm:$0xff] %vm89_vm7, %v195_v17  ;;  %v476_v14 = vpop.permute.xlu2 %475  ;;  %v512_v17 = vsel %vm498_vm13, 1.0, %v9985_v62  ;;  %vm706_vm13 = vcmask 64512  }
 0x121   :  { %v526_v18 = vadd.f32 %v512_v17, %v442_v15  ;;  %vm500_vm0 = vcmp.eq.s32.totalorder %v6870_v41, %v476_v14 }
 0x124   :  { %v280_v19 = vpop.f32.mrf.mxu3 }
 0x125   :  { %v197_v20 = vpop.f32.mrf.mxu1  ;;  %v281_v21 = vadd.f32 %v280_v19, %v253_v10  ;;  %v511_v10 = vsel %vm497_vm10, 1.0, %v9985_v62 }
 0x126   :  { %v198_v22 = vadd.f32 %v197_v20, %v161_v4  ;;  %v372_v44 = vld [vmem:[#allocation2 + $0x20] sm:$0xff]  ;;  %v479_v19 = vpop.permute.xlu1 %478 }
 0x127   :  { %285 = vst.msk [vmem:[#allocation2 + $0x28] sm:$0x3] %vm284_vm8, %v281_v21  ;;  %v369_v53 = vld [vmem:[#allocation2 + $0x8] sm:$0xff]  ;;  %v513_v21 = vsel %vm499_vm14, 1.0, %v9985_v62  ;;  %vm501_vm2 = vcmp.eq.s32.totalorder %v6870_v41, %v479_v19 }
 0x128   :  { %205 = vst.msk [vmem:[#allocation2 + $0x10] sm:$0xff] %vm89_vm7, %v198_v22  ;;  %v412_v20 = vpop.permute.xlu2 %411  ;;  %v443_v22 = vsel %vm429_vm15, 1.0, %v9985_v62 }
 0x129   :  { %v527_v24 = vadd.f32 %v513_v21, %v443_v22  ;;  %vm432_vm6 = vcmp.eq.s32.totalorder %v6870_v41, %v412_v20 }
 0x12c   :  { %v356_v26 = vpop.f32.mrf.mxu3 }
 0x12d   :  { %v200_v27 = vpop.f32.mrf.mxu1  ;;  %v357_v30 = vadd.f32 %v356_v26, %v332_v25 }
 0x12e   :  { %v201_v31 = vadd.f32 %v200_v27, %v161_v4  ;;  %v373_v42 = vld [vmem:[#allocation2 + $0x28] sm:$0xff]  ;;  %v510_v4 = vsel %vm496_vm5, 1.0, %v9985_v62  ;;  %v482_v26 = vpop.permute.xlu1 %481  ;;  %v514_v27 = vsel %vm500_vm0, 1.0, %v9985_v62 }
 0x12f   :  { %362 = vst.msk [vmem:[#allocation2 + $0x30] sm:$0xff] %vm89_vm7, %v357_v30  ;;  %v370_v49 = vld [vmem:[#allocation2 + $0x10] sm:$0xff]  ;;  %v524_v6 = vadd.f32 %v510_v4, %v440_v5  ;;  %v444_v30 = vsel %vm430_vm1, 1.0, %v9985_v62 }
 0x130   :  { %207 = vst.msk [vmem:[#allocation2 + $0x18] sm:$0x3f] %vm206_vm9, %v201_v31  ;;  %vm427_vm9 = vcmp.eq.s32.totalorder %v6870_v41, %v397_v58  ;;  %v409_v31 = vpop.permute.xlu0 %408  ;;  %v528_v33 = vadd.f32 %v514_v27, %v444_v30 }
 0x131   :  { %v441_v9 = vsel %vm427_vm9, 1.0, %v9985_v62  ;;  %vm431_vm5 = vcmp.eq.s32.totalorder %v6870_v41, %v409_v31  ;;  %vm502_vm9 = vcmp.eq.s32.totalorder %v6870_v41, %v482_v26 }
 0x132   :  { %v525_v12 = vadd.f32 %v511_v10, %v441_v9  ;;  %v445_v35 = vsel %vm431_vm5, 1.0, %v9985_v62 }
 0x134   :  { %v359_v34 = vpop.f32.mrf.mxu3 }
 0x135   :  { %v360_v16 = vadd.f32 %v359_v34, %v332_v25  ;;  %v415_v25 = vpop.permute.xlu2 %414 }
 0x136   :  { %v374_v40 = vld [vmem:[#allocation2 + $0x30] sm:$0xff]  ;;  %v418_v34 = vpop.permute.xlu1 %417  ;;  %vm433_vm10 = vcmp.eq.s32.totalorder %v6870_v41, %v415_v25 }
 0x137   :  { %363 = vst.msk [vmem:[#allocation2 + $0x38] sm:$0xff] %vm89_vm7, %v360_v16  ;;  %v371_v45 = vld [vmem:[#allocation2 + $0x18] sm:$0xff]  ;;  %v515_v16 = vsel %vm501_vm2, 1.0, %v9985_v62  ;;  %v447_v51 = vsel %vm433_vm10, 1.0, %v9985_v62  ;;  %vm434_vm0 = vcmp.eq.s32.totalorder %v6870_v41, %v418_v34 }
 0x138   :  { %v529_v37 = vadd.f32 %v515_v16, %v445_v35  ;;  %v485_v38 = vpop.permute.xlu0 %484 }
 0x139   :  { %vm503_vm11 = vcmp.eq.s32.totalorder %v6870_v41, %v485_v38 }
 0x13a   :  { %v517_v52 = vsel %vm503_vm11, 1.0, %v9985_v62 }
 0x13d   :  { %v488_v36 = vpop.permute.xlu2 %487 }
 0x13e   :  { %v375_v39 = vld [vmem:[#allocation2 + $0x38] sm:$0xff]  ;;  %vm504_vm15 = vcmp.eq.s32.totalorder %v6870_v41, %v488_v36 }
 0x13f   :  { %585 = vmatpush.msrb.mxu0 %v375_v39  ;;  %v846_v39 = vld [vmem:[%s9966_s10 + $0x18] sm:$0xff]  ;;  %v518_v32 = vsel %vm504_vm15, 1.0, %v9985_v62 }
 0x140   :  { %905 = vmatpush.msra.mxu2 %v846_v39 }
 0x141   :  { %586 = vmatpush.msrb.mxu0 %v374_v40  ;;  %v845_v40 = vld [vmem:[%s9966_s10 + $0x10] sm:$0xff]  ;;  %s6480_s10 = smov 64  }
 0x142   :  { %906 = vmatpush.msra.mxu2 %v845_v40  ;;  %988 = vrot.lane.b32.xlu1 %v986_v8, %s6480_s10 }
 0x143   :  { %587 = vmatpush.msrb.mxu0 %v373_v42  ;;  %v421_v42 = vpop.permute.xlu1 %420 }
 0x144   :  { %907 = vmatpush.msra.mxu2 %v844_v43 }
 0x145   :  { %588 = vmatpush.msrb.mxu0 %v372_v44  ;;  %v446_v44 = vsel %vm432_vm6, 1.0, %v9985_v62  ;;  %v491_v46 = vpop.permute.xlu2 %490  ;;  %vm435_vm6 = vcmp.eq.s32.totalorder %v6870_v41, %v421_v42 }
 0x146   :  { %908 = vmatpush.msra.mxu2 %v843_v60  ;;  %vm505_vm5 = vcmp.eq.s32.totalorder %v6870_v41, %v491_v46  ;;  %v449_v0 = vsel %vm435_vm6, 1.0, %v9985_v62 }
 0x147   :  { %589 = vmatpush.msrb.mxu0 %v371_v45  ;;  %v516_v45 = vsel %vm502_vm9, 1.0, %v9985_v62  ;;  %v519_v63 = vsel %vm505_vm5, 1.0, %v9985_v62 }
 0x148   :  { %v530_v48 = vadd.f32 %v516_v45, %v446_v44  ;;  %v533_v1 = vadd.f32 %v519_v63, %v449_v0 }
 0x149   :  { %590 = vmatpush.msrb.mxu0 %v370_v49  ;;  %v6943_v49 = vpop.permute.xlu0 %969 }
 0x14b   :  { %591 = vmatpush.msrb.mxu0 %v369_v53  ;;  %v677_v53 = vpop.permute.xlu1 %676 }
 0x14c   :  { %vm691_vm14 = vcmp.eq.s32.totalorder %v6870_v41, %v677_v53 }
 0x14d   :  { %592 = vmatpush.msrb.mxu0 %v368_v55  ;;  %v531_v55 = vadd.f32 %v517_v52, %v447_v51  ;;  %v6950_v47 = vsel %vm691_vm14, 1.0, %v9985_v62 }
 0x14e   :  { %5629 = vmatmul.msk.f32.vlgmr.msrb.gmra.mxu0 %vm534_vm12, %v520_v54  ;;  %v671_v54 = vpop.permute.xlu2 %670  ;;  %5643 = vmatpush.xpose.msk.msrb.mxu1 %vm706_vm13, %v6950_v47 }
 0x14f   :  { %vm689_vm2 = vcmp.eq.s32.totalorder %v6870_v41, %v671_v54 }
 0x150   :  { %v6967_v59 = vsel %vm689_vm2, 1.0, %v9985_v62 }
 0x151   :  { %v674_v50 = vpop.permute.xlu0 %673 }
 0x152   :  { %vm690_vm1 = vcmp.eq.s32.totalorder %v6870_v41, %v674_v50 }
 0x153   :  { %v6959_v56 = vsel %vm690_vm1, 1.0, %v9985_v62 }
 0x154   :  { %5644 = vmatpush.xpose.msk.msrb.mxu1 %vm706_vm13, %v6959_v56 }
 0x156   :  { %5630 = vmatmul.msk.f32.gmra.mxu0 %vm534_vm12, %v521_v57  ;;  %v448_v57 = vsel %vm434_vm0, 1.0, %v9985_v62  ;;  %v668_v28 = vpop.permute.xlu2 %667 }
 0x157   :  { %v532_v58 = vadd.f32 %v518_v32, %v448_v57  ;;  %vm688_vm9 = vcmp.eq.s32.totalorder %v6870_v41, %v668_v28 }
 0x158   :  { %5645 = vmatpush.xpose.msk.msrb.mxu1 %vm706_vm13, %v6967_v59  ;;  %v6978_v29 = vsel %vm688_vm9, 1.0, %v9985_v62  ;;  %vm1176_vm9 = vcmask 916480  }
 0x15c   :  { %5646 = vmatpush.xpose.msk.msrb.mxu1 %vm706_vm13, %v6978_v29 }
 0x15e   :  { %5631 = vmatmul.msk.f32.gmra.mxu0 %vm534_vm12, %v522_v61  ;;  %v665_v61 = vpop.permute.xlu1 %664  ;;  %v659_v4 = vpop.permute.xlu2 %658 }
 0x15f   :  { %vm687_vm10 = vcmp.eq.s32.totalorder %v6870_v41, %v665_v61  ;;  %vm685_vm14 = vcmp.eq.s32.totalorder %v6870_v41, %v659_v4 }
 0x160   :  { %v6987_v2 = vsel %vm687_vm10, 1.0, %v9985_v62 }
 0x161   :  { %5647 = vmatpush.xpose.msk.msrb.mxu1 %vm706_vm13, %v6987_v2 }
 0x166   :  { %5632 = vmatmul.msk.f32.gmra.mxu0 %vm534_vm12, %v523_v3  ;;  %v662_v3 = vpop.permute.xlu0 %661  ;;  %v656_v7 = vpop.permute.xlu1 %655 }
 0x167   :  { %vm686_vm11 = vcmp.eq.s32.totalorder %v6870_v41, %v662_v3  ;;  %vm684_vm15 = vcmp.eq.s32.totalorder %v6870_v41, %v656_v7 }
 0x168   :  { %v6994_v5 = vsel %vm686_vm11, 1.0, %v9985_v62  ;;  %v698_v10 = vsel %vm684_vm15, 1.0, %v9985_v62 }
 0x169   :  { %5648 = vmatpush.xpose.msk.msrb.mxu1 %vm706_vm13, %v6994_v5 }
 0x16e   :  { %5633 = vmatmul.msk.f32.gmra.mxu0 %vm534_vm12, %v524_v6  ;;  %v699_v6 = vsel %vm685_vm14, 1.0, %v9985_v62  ;;  %v653_v9 = vpop.permute.xlu0 %652  ;;  %v647_v13 = vpop.permute.xlu1 %646 }
 0x16f   :  { %5649 = vmatpush.xpose.msk.msrb.mxu1 %vm706_vm13, %v699_v6  ;;  %vm681_vm1 = vcmp.eq.s32.totalorder %v6870_v41, %v647_v13 }
 0x170   :  { %v695_v15 = vsel %vm681_vm1, 1.0, %v9985_v62 }
 0x173   :  { %5650 = vmatpush.xpose.msk.msrb.mxu1 %vm706_vm13, %v698_v10 }
 0x176   :  { %5634 = vmatmul.msk.f32.gmra.mxu0 %vm534_vm12, %v525_v12  ;;  %v650_v12 = vpop.permute.xlu2 %649 }
 0x177   :  { %vm682_vm0 = vcmp.eq.s32.totalorder %v6870_v41, %v650_v12 }
 0x178   :  { %v696_v14 = vsel %vm682_vm0, 1.0, %v9985_v62 }
 0x17e   :  { %5635 = vmatmul.msk.f32.gmra.mxu0 %vm534_vm12, %v526_v18  ;;  %v644_v18 = vpop.permute.xlu0 %643  ;;  %v641_v19 = vpop.permute.xlu2 %640 }
 0x17f   :  { %vm680_vm2 = vcmp.eq.s32.totalorder %v6870_v41, %v644_v18  ;;  %vm679_vm5 = vcmp.eq.s32.totalorder %v6870_v41, %v641_v19 }
 0x180   :  { %v694_v20 = vsel %vm680_vm2, 1.0, %v9985_v62  ;;  %v693_v21 = vsel %vm679_vm5, 1.0, %v9985_v62 }
 0x186   :  { %5636 = vmatmul.msk.f32.gmra.mxu0 %vm534_vm12, %v527_v24  ;;  %v638_v24 = vpop.permute.xlu1 %637 }
 0x187   :  { %vm678_vm6 = vcmp.eq.s32.totalorder %v6870_v41, %v638_v24 }
 0x188   :  { %v692_v25 = vsel %vm678_vm6, 1.0, %v9985_v62 }
 0x18e   :  { %5637 = vmatmul.msk.f32.gmra.mxu0 %vm534_vm12, %v528_v33 }
 0x196   :  { %5638 = vmatmul.msk.f32.gmra.mxu0 %vm534_vm12, %v529_v37 }
 0x19e   :  { %5639 = vmatmul.msk.f32.gmra.mxu0 %vm534_vm12, %v530_v48 }
 0x1a6   :  { %5640 = vmatmul.msk.f32.gmra.mxu0 %vm534_vm12, %v531_v55 }
 0x1ae   :  { %5641 = vmatmul.msk.f32.gmra.mxu0 %vm534_vm12, %v532_v58 }
 0x1b4   :  { %v7110_v43 = vpop.permute.xlu1 %988 }
 0x1b6   :  { %5642 = vmatmul.msk.f32.gmra.mxu0 %vm534_vm12, %v533_v1  ;;  %vm683_vm12 = vcmp.eq.s32.totalorder %v6870_v41, %v653_v9 }
 0x1b7   :  { %v697_v11 = vsel %vm683_vm12, 1.0, %v9985_v62 }
 0x1b8   :  { %5651 = vmatpush.xpose.msk.msrb.mxu1 %vm706_vm13, %v697_v11 }
 0x1bc   :  { %5652 = vmatpush.xpose.msk.msrb.mxu1 %vm706_vm13, %v696_v14 }
 0x1c0   :  { %5653 = vmatpush.xpose.msk.msrb.mxu1 %vm706_vm13, %v695_v15 }
 0x1c4   :  { %5654 = vmatpush.xpose.msk.msrb.mxu1 %vm706_vm13, %v694_v20 }
 0x1c8   :  { %5655 = vmatpush.xpose.msk.msrb.mxu1 %vm706_vm13, %v693_v21 }
 0x1cb   :  { %v7014_v17 = vpop.f32.mrf.mxu0 }
 0x1cc   :  { %10047 = vst [vmem:[#allocation5_spill] sm:$0xff] %v7014_v17  ;;  %5685 = vmatmul.msk.f32.vlgmr.msra.gmra.mxu2 %vm89_vm7, %v7014_v17  ;;  %5656 = vmatpush.xpose.msk.msrb.mxu1 %vm706_vm13, %v692_v25 }
 0x1cf   :  { %5657 = vmatmul.msk.f32.vlgmr.msrb.gmra.mxu1 %vm706_vm13, %v692_v25 }
 0x1d3   :  { %v7024_v22 = vpop.f32.mrf.mxu0 }
 0x1d4   :  { %10048 = vst [vmem:[#allocation6_spill] sm:$0xff] %v7024_v22  ;;  %5686 = vmatmul.msk.f32.gmra.mxu2 %vm89_vm7, %v7024_v22 }
 0x1d7   :  { %5658 = vmatmul.msk.f32.gmra.mxu1 %vm706_vm13, %v693_v21 }
 0x1db   :  { %v7033_v26 = vpop.f32.mrf.mxu0 }
 0x1dc   :  { %10049 = vst [vmem:[#allocation7_spill] sm:$0xff] %v7033_v26  ;;  %5687 = vmatmul.msk.f32.gmra.mxu2 %vm89_vm7, %v7033_v26 }
 0x1df   :  { %5659 = vmatmul.msk.f32.gmra.mxu1 %vm706_vm13, %v694_v20 }
 0x1e3   :  { %v7038_v27 = vpop.f32.mrf.mxu0 }
 0x1e4   :  { %10050 = vst [vmem:[#allocation8_spill] sm:$0xff] %v7038_v27  ;;  %5688 = vmatmul.msk.f32.gmra.mxu2 %vm89_vm7, %v7038_v27 }
 0x1e7   :  { %5660 = vmatmul.msk.f32.gmra.mxu1 %vm706_vm13, %v695_v15 }
 0x1eb   :  { %v7043_v30 = vpop.f32.mrf.mxu0 }
 0x1ec   :  { %10051 = vst [vmem:[#allocation9_spill] sm:$0xff] %v7043_v30  ;;  %5689 = vmatmul.msk.f32.gmra.mxu2 %vm89_vm7, %v7043_v30 }
 0x1ef   :  { %5661 = vmatmul.msk.f32.gmra.mxu1 %vm706_vm13, %v696_v14 }
 0x1f3   :  { %v7048_v31 = vpop.f32.mrf.mxu0 }
 0x1f4   :  { %10052 = vst [vmem:[#allocation10_spill] sm:$0xff] %v7048_v31  ;;  %5690 = vmatmul.msk.f32.gmra.mxu2 %vm89_vm7, %v7048_v31 }
 0x1f7   :  { %5662 = vmatmul.msk.f32.gmra.mxu1 %vm706_vm13, %v697_v11 }
 0x1fb   :  { %v7053_v33 = vpop.f32.mrf.mxu0 }
 0x1fc   :  { %10053 = vst [vmem:[#allocation11_spill] sm:$0xff] %v7053_v33  ;;  %5691 = vmatmul.msk.f32.gmra.mxu2 %vm89_vm7, %v7053_v33 }
 0x1ff   :  { %5663 = vmatmul.msk.f32.gmra.mxu1 %vm706_vm13, %v698_v10 }
 0x203   :  { %v7058_v34 = vpop.f32.mrf.mxu0 }
 0x204   :  { %10054 = vst [vmem:[#allocation12_spill] sm:$0xff] %v7058_v34  ;;  %5692 = vmatmul.msk.f32.gmra.mxu2 %vm89_vm7, %v7058_v34 }
 0x207   :  { %5664 = vmatmul.msk.f32.gmra.mxu1 %vm706_vm13, %v699_v6 }
 0x20b   :  { %v7063_v16 = vpop.f32.mrf.mxu0 }
 0x20c   :  { %10055 = vst [vmem:[#allocation13_spill] sm:$0xff] %v7063_v16  ;;  %5693 = vmatmul.msk.f32.gmra.mxu2 %vm89_vm7, %v7063_v16 }
 0x20f   :  { %5665 = vmatmul.msk.f32.gmra.mxu1 %vm706_vm13, %v6994_v5 }
 0x213   :  { %v7068_v35 = vpop.f32.mrf.mxu0 }
 0x214   :  { %10056 = vst [vmem:[#allocation14_spill] sm:$0xff] %v7068_v35  ;;  %5694 = vmatmul.msk.f32.gmra.mxu2 %vm89_vm7, %v7068_v35 }
 0x217   :  { %5666 = vmatmul.msk.f32.gmra.mxu1 %vm706_vm13, %v6987_v2 }
 0x21b   :  { %v7074_v36 = vpop.f32.mrf.mxu0 }
 0x21c   :  { %10057 = vst [vmem:[#allocation15_spill] sm:$0xff] %v7074_v36  ;;  %5695 = vmatmul.msk.f32.gmra.mxu2 %vm89_vm7, %v7074_v36 }
 0x21f   :  { %5667 = vmatmul.msk.f32.gmra.mxu1 %vm706_vm13, %v6978_v29 }
 0x223   :  { %v7080_v37 = vpop.f32.mrf.mxu0 }
 0x224   :  { %10058 = vst [vmem:[#allocation16_spill] sm:$0xff] %v7080_v37  ;;  %5696 = vmatmul.msk.f32.gmra.mxu2 %vm89_vm7, %v7080_v37 }
 0x227   :  { %5668 = vmatmul.msk.f32.gmra.mxu1 %vm706_vm13, %v6967_v59 }
 0x22b   :  { %v7086_v38 = vpop.f32.mrf.mxu0 }
 0x22c   :  { %10059 = vst [vmem:[#allocation17_spill] sm:$0xff] %v7086_v38  ;;  %5697 = vmatmul.msk.f32.gmra.mxu2 %vm89_vm7, %v7086_v38 }
 0x22f   :  { %5669 = vmatmul.msk.f32.gmra.mxu1 %vm706_vm13, %v6959_v56 }
 0x233   :  { %v7092_v39 = vpop.f32.mrf.mxu0 }
 0x234   :  { %10060 = vst [vmem:[#allocation18_spill] sm:$0xff] %v7092_v39  ;;  %5698 = vmatmul.msk.f32.gmra.mxu2 %vm89_vm7, %v7092_v39 }
 0x237   :  { %5670 = vmatmul.msk.f32.gmra.mxu1 %vm706_vm13, %v6950_v47 }
 0x24f   :  { %v7100_v40 = vpop.f32.mrf.mxu2 }
 0x250   :  { %v7104_v42 = vadd.f32 %v6943_v49, %v7100_v40  ;;  %v991_v45 = vadd.f32 %v7110_v43, %v7100_v40 }
 0x252   :  { %1698 = vrot.lane.b32.xlu0 %v7104_v42, %s6481_s25  ;;  %1019 = vrot.lane.b32.xlu2 %v7104_v42, %s6482_s30 }
 0x257   :  { %v7112_v44 = vpop.f32.mrf.mxu2 }
 0x258   :  { %v7118_v46 = vadd.f32 %v6943_v49, %v7112_v44  ;;  %v992_v48 = vadd.f32 %v7110_v43, %v7112_v44 }
 0x25a   :  { %1021 = vrot.lane.b32.xlu0 %v7118_v46, %s6482_s30  ;;  %1700 = vrot.lane.b32.xlu2 %v7118_v46, %s6481_s25  ;;  %v7126_v51 = vpack.i.bf16 %v991_v45, %v992_v48  ;;  %v7266_v45 = vperm.slane %v6857_v23, 0 }
 0x25c   :  { %10061 = vst [vmem:[#allocation19_spill] sm:$0xff] %v7126_v51 }
 0x25f   :  { %v7128_v52 = vpop.f32.mrf.mxu2 }
 0x260   :  { %v7132_v53 = vadd.f32 %v6943_v49, %v7128_v52  ;;  %v993_v55 = vadd.f32 %v7110_v43, %v7128_v52 }
 0x262   :  { %1023 = vrot.lane.b32.xlu1 %v7132_v53, %s6482_s30  ;;  %6024 = vrot.lane.b32.xlu0 %v7126_v51, %s6480_s10 }
 0x267   :  { %v7138_v54 = vpop.f32.mrf.mxu2 }
 0x268   :  { %v7144_v47 = vadd.f32 %v6943_v49, %v7138_v54  ;;  %v994_v50 = vadd.f32 %v7110_v43, %v7138_v54 }
 0x26a   :  { %1702 = vrot.lane.b32.xlu1 %v7132_v53, %s6481_s25  ;;  %1025 = vrot.lane.b32.xlu2 %v7144_v47, %s6482_s30  ;;  %v7152_v56 = vpack.i.bf16 %v993_v55, %v994_v50 }
 0x26c   :  { %10062 = vst [vmem:[#allocation20_spill] sm:$0xff] %v7152_v56  ;;  %6029 = vrot.lane.b32.xlu0 %v7152_v56, %s6480_s10 }
 0x26f   :  { %v7156_v32 = vpop.f32.mrf.mxu2 }
 0x270   :  { %v7160_v57 = vadd.f32 %v6943_v49, %v7156_v32  ;;  %v995_v59 = vadd.f32 %v7110_v43, %v7156_v32 }
 0x272   :  { %1706 = vrot.lane.b32.xlu1 %v7160_v57, %s6481_s25  ;;  %1704 = vrot.lane.b32.xlu2 %v7144_v47, %s6481_s25 }
 0x274   :  { %1027 = vrot.lane.b32.xlu0 %v7160_v57, %s6482_s30 }
 0x277   :  { %v925_v58 = vpop.f32.mrf.mxu2 }
 0x278   :  { %v7171_v60 = vadd.f32 %v6943_v49, %v925_v58  ;;  %v996_v28 = vadd.f32 %v7110_v43, %v925_v58  ;;  %v7271_v55 = vadd.f32 %v7266_v45, %v925_v58 }
 0x27a   :  { %1029 = vrot.lane.b32.xlu1 %v7171_v60, %s6482_s30  ;;  %1708 = vrot.lane.b32.xlu2 %v7171_v60, %s6481_s25  ;;  %v7178_v61 = vpack.i.bf16 %v995_v59, %v996_v28  ;;  %v7279_v28 = vadd.f32 %v7266_v45, %v7112_v44 }
 0x27c   :  { %10063 = vst [vmem:[#allocation21_spill] sm:$0xff] %v7178_v61 }
 0x27f   :  { %v7180_v29 = vpop.f32.mrf.mxu2 }
 0x280   :  { %v7184_v63 = vadd.f32 %v6943_v49, %v7180_v29  ;;  %v997_v1 = vadd.f32 %v7110_v43, %v7180_v29 }
 0x282   :  { %6034 = vrot.lane.b32.xlu1 %v7178_v61, %s6480_s10  ;;  %1031 = vrot.lane.b32.xlu2 %v7184_v63, %s6482_s30 }
 0x287   :  { %v7190_v0 = vpop.f32.mrf.mxu2 }
 0x288   :  { %v7196_v2 = vadd.f32 %v6943_v49, %v7190_v0  ;;  %v998_v3 = vadd.f32 %v7110_v43, %v7190_v0 }
 0x28a   :  { %1710 = vrot.lane.b32.xlu1 %v7184_v63, %s6481_s25  ;;  %1033 = vrot.lane.b32.xlu0 %v7196_v2, %s6482_s30  ;;  %v7204_v4 = vpack.i.bf16 %v997_v1, %v998_v3  ;;  %v7307_v3 = vadd.f32 %v7266_v45, %v7128_v52 }
 0x28c   :  { %10064 = vst [vmem:[#allocation22_spill] sm:$0xff] %v7204_v4  ;;  %6039 = vrot.lane.b32.xlu2 %v7204_v4, %s6480_s10 }
 0x28f   :  { %v7208_v5 = vpop.f32.mrf.mxu2 }
 0x290   :  { %v7212_v6 = vadd.f32 %v6943_v49, %v7208_v5  ;;  %v999_v8 = vadd.f32 %v7110_v43, %v7208_v5 }
 0x292   :  { %1035 = vrot.lane.b32.xlu1 %v7212_v6, %s6482_s30 }
 0x294   :  { %1712 = vrot.lane.b32.xlu2 %v7196_v2, %s6481_s25 }
 0x297   :  { %v937_v7 = vpop.f32.mrf.mxu2 }
 0x298   :  { %v1000_v9 = vadd.f32 %v7110_v43, %v937_v7  ;;  %v7222_v10 = vadd.f32 %v6943_v49, %v937_v7  ;;  %v7325_v52 = vadd.f32 %v7266_v45, %v937_v7  ;;  %v7343_v7 = vadd.f32 %v7266_v45, %v7190_v0 }
 0x29a   :  { %1714 = vrot.lane.b32.xlu1 %v7212_v6, %s6481_s25  ;;  %v7226_v11 = vpack.i.bf16 %v999_v8, %v1000_v9  ;;  %v7322_v8 = vadd.f32 %v7266_v45, %v7156_v32 }
 0x29c   :  { %10065 = vst [vmem:[#allocation23_spill] sm:$0xff] %v7226_v11  ;;  %1037 = vrot.lane.b32.xlu2 %v7222_v10, %s6482_s30 }
 0x29f   :  { %v7230_v12 = vpop.f32.mrf.mxu2 }
 0x2a0   :  { %v7234_v13 = vadd.f32 %v6943_v49, %v7230_v12  ;;  %v1001_v15 = vadd.f32 %v7110_v43, %v7230_v12 }
 0x2a2   :  { %6044 = vrot.lane.b32.xlu1 %v7226_v11, %s6480_s10  ;;  %1039 = vrot.lane.b32.xlu0 %v7234_v13, %s6482_s30 }
 0x2a4   :  { %1716 = vrot.lane.b32.xlu2 %v7222_v10, %s6481_s25 }
 0x2a7   :  { %v7242_v14 = vpop.f32.mrf.mxu2 }
 0x2a8   :  { %v983_v18 = vadd.f32 %v6943_v49, %v7242_v14  ;;  %v1002_v19 = vadd.f32 %v7110_v43, %v7242_v14 }
 0x2aa   :  { %1041 = vrot.lane.b32.xlu1 %v983_v18, %s6482_s30  ;;  %v7251_v20 = vpack.i.bf16 %v1001_v15, %v1002_v19 }
 0x2ac   :  { %10066 = vst [vmem:[#allocation24_spill] sm:$0xff] %v7251_v20  ;;  %1718 = vrot.lane.b32.xlu2 %v7234_v13, %s6481_s25  ;;  %v7259_v25 = vpop.permute.xlu2 %1019 }
 0x2af   :  { %v7255_v21 = vpop.f32.mrf.mxu2 }
 0x2b0   :  { %v984_v24 = vadd.f32 %v6943_v49, %v7255_v21  ;;  %v1003_v50 = vadd.f32 %v7110_v43, %v7255_v21  ;;  %v7391_v22 = vadd.f32 %v7266_v45, %v7255_v21  ;;  %v7411_v21 = vadd.f32 %v7266_v45, %v7242_v14 }
 0x2b2   :  { %1720 = vrot.lane.b32.xlu1 %v983_v18, %s6481_s25  ;;  %1722 = vrot.lane.b32.xlu0 %v984_v24, %s6481_s25 }
 0x2b4   :  { %6049 = vrot.lane.b32.xlu2 %v7251_v20, %s6480_s10  ;;  %v7286_v58 = vpop.permute.xlu2 %1700 }
 0x2b7   :  { %v7268_v48 = vpop.f32.mrf.mxu2 }
 0x2b8   :  { %v1004_v59 = vadd.f32 %v7110_v43, %v7268_v48  ;;  %v7292_v43 = vadd.f32 %v7266_v45, %v7100_v40  ;;  %v7296_v44 = vadd.f32 %v6943_v49, %v7268_v48  ;;  %v7311_v40 = vadd.f32 %v7266_v45, %v7138_v54 }
 0x2b9   :  { %v7329_v54 = vadd.f32 %v7266_v45, %v7180_v29  ;;  %v7347_v29 = vadd.f32 %v7266_v45, %v7208_v5 }
 0x2ba   :  { %1043 = vrot.lane.b32.xlu1 %v984_v24, %s6482_s30  ;;  %1680 = vrot.lane.b32.xlu0 %v7271_v55, %s6483_s2  ;;  %v7284_v23 = vpack.i.bf16 %v1003_v50, %v1004_v59 }
 0x2bc   :  { %1672 = vrot.lane.b32.xlu2 %v7279_v28, %s6483_s2 }
 0x2c2   :  { %1670 = vrot.lane.b32.xlu1 %v7292_v43, %s6483_s2  ;;  %3339 = vrot.lane.b32.xlu0 %v984_v24, %s6484_s9 }
 0x2c4   :  { %1045 = vrot.lane.b32.xlu2 %v7296_v44, %s6482_s30  ;;  %v7303_v1 = vpop.permute.xlu2 %1025  ;;  %v7366_v5 = vpop.permute.xlu0 %1698 }
 0x2ca   :  { %1674 = vrot.lane.b32.xlu1 %v7307_v3, %s6483_s2  ;;  %3337 = vrot.lane.b32.xlu0 %v983_v18, %s6484_s9 }
 0x2cc   :  { %1676 = vrot.lane.b32.xlu2 %v7311_v40, %s6483_s2  ;;  %v7318_v49 = vpop.permute.xlu2 %1704  ;;  %v7379_v62 = vpop.permute.xlu0 %1021 }
 0x2d2   :  { %1678 = vrot.lane.b32.xlu1 %v7322_v8, %s6483_s2  ;;  %1688 = vrot.lane.b32.xlu0 %v7325_v52, %s6483_s2 }
 0x2d4   :  { %v7335_v9 = vpop.permute.xlu1 %1023  ;;  %1682 = vrot.lane.b32.xlu2 %v7329_v54, %s6483_s2  ;;  %v7339_v32 = vpop.permute.xlu2 %1708 }
 0x2d5   :  { %v7393_v30 = vpop.permute.xlu0 %6024 }
 0x2da   :  { %1684 = vrot.lane.b32.xlu1 %v7343_v7, %s6483_s2  ;;  %2566 = vrot.lane.b32.xlu0 %v7212_v6, %s6485_s24 }
 0x2dc   :  { %v7353_v15 = vpop.permute.xlu1 %1702  ;;  %1686 = vrot.lane.b32.xlu2 %v7347_v29, %s6483_s2  ;;  %v7357_v19 = vpop.permute.xlu2 %1031 }
 0x2de   :  { %v7413_v39 = vpop.permute.xlu0 %6029 }
 0x2e2   :  { %2574 = vrot.lane.b32.xlu1 %v984_v24, %s6485_s24  ;;  %2564 = vrot.lane.b32.xlu0 %v7196_v2, %s6485_s24 }
 0x2e4   :  { %v7362_v0 = vpop.permute.xlu1 %1706  ;;  %2570 = vrot.lane.b32.xlu2 %v7234_v13, %s6485_s24 }
 0x2e6   :  { %v7368_v50 = vpop.permute.xlu2 %6039 }
 0x2ea   :  { %2572 = vrot.lane.b32.xlu1 %v983_v18, %s6485_s24  ;;  %3327 = vrot.lane.b32.xlu0 %v7184_v63, %s6484_s9 }
 0x2ec   :  { %v7373_v59 = vpop.permute.xlu1 %1029  ;;  %2568 = vrot.lane.b32.xlu2 %v7222_v10, %s6485_s24 }
 0x2ee   :  { %v7377_v24 = vpop.permute.xlu2 %1712 }
 0x2f2   :  { %3335 = vrot.lane.b32.xlu1 %v7234_v13, %s6484_s9  ;;  %3325 = vrot.lane.b32.xlu0 %v7171_v60, %s6484_s9 }
 0x2f4   :  { %v7385_v41 = vpop.permute.xlu1 %6034  ;;  %3331 = vrot.lane.b32.xlu2 %v7212_v6, %s6484_s9  ;;  %v7407_v6 = vadd.f32 %v7266_v45, %v7230_v12  ;;  %v1028_v12 = vpop.permute.xlu0 %1027 }
 0x2f6   :  { %v1038_v18 = vpop.permute.xlu2 %1037 }
 0x2fa   :  { %3333 = vrot.lane.b32.xlu1 %v7222_v10, %s6484_s9  ;;  %1694 = vrot.lane.b32.xlu0 %v7391_v22, %s6483_s2 }
 0x2fc   :  { %v7399_v13 = vpop.permute.xlu1 %1710  ;;  %3329 = vrot.lane.b32.xlu2 %v7196_v2, %s6484_s9  ;;  %v1034_v27 = vpop.permute.xlu0 %1033 }
 0x2fe   :  { %v7403_v34 = vpop.permute.xlu2 %1716 }
 0x302   :  { %1690 = vrot.lane.b32.xlu1 %v7407_v6, %s6483_s2  ;;  %2554 = vrot.lane.b32.xlu0 %v7132_v53, %s6485_s24 }
 0x304   :  { %v1036_v10 = vpop.permute.xlu1 %1035  ;;  %1692 = vrot.lane.b32.xlu2 %v7411_v21, %s6483_s2 }
 0x306   :  { %v7421_v2 = vpop.permute.xlu2 %1718 }
 0x30a   :  { %2562 = vrot.lane.b32.xlu1 %v7184_v63, %s6485_s24  ;;  %2552 = vrot.lane.b32.xlu0 %v7118_v46, %s6485_s24 }
 0x30c   :  { %v7427_v14 = vpop.permute.xlu1 %1714  ;;  %2558 = vrot.lane.b32.xlu2 %v7160_v57, %s6485_s24 }
 0x30e   :  { %v7431_v17 = vpop.permute.xlu2 %6049 }
 0x312   :  { %2560 = vrot.lane.b32.xlu1 %v7171_v60, %s6485_s24  ;;  %3315 = vrot.lane.b32.xlu0 %v7104_v42, %s6484_s9 }
 0x314   :  { %v7437_v26 = vpop.permute.xlu1 %6044  ;;  %2556 = vrot.lane.b32.xlu2 %v7144_v47, %s6485_s24  ;;  %v1040_v33 = vpop.permute.xlu0 %1039 }
 0x316   :  { %v7441_v63 = vpop.permute.xlu2 %1672 }
 0x31a   :  { %3323 = vrot.lane.b32.xlu1 %v7160_v57, %s6484_s9  ;;  %2524 = vrot.lane.b32.xlu0 %v7279_v28, %s6486_s7 }
 0x31c   :  { %v1042_v60 = vpop.permute.xlu1 %1041  ;;  %3319 = vrot.lane.b32.xlu2 %v7132_v53, %s6484_s9 }
 0x31e   :  { %v1046_v31 = vpop.permute.xlu2 %1045 }
 0x31f   :  { %5699 = vmatpush.xpose.msk.msra.mxu3 %vm706_vm13, %v1046_v31 }
 0x322   :  { %3321 = vrot.lane.b32.xlu1 %v7144_v47, %s6484_s9  ;;  %3291 = vrot.lane.b32.xlu0 %v7307_v3, %s6487_s3 }
 0x324   :  { %v7454_v57 = vpop.permute.xlu1 %1720  ;;  %3317 = vrot.lane.b32.xlu2 %v7118_v46, %s6484_s9  ;;  %v7458_v38 = vpop.permute.xlu0 %1722 }
 0x326   :  { %v7460_v16 = vpop.permute.xlu2 %1676 }
 0x32a   :  { %2550 = vrot.lane.b32.xlu1 %v7104_v42, %s6485_s24  ;;  %2530 = vrot.lane.b32.xlu0 %v7322_v8, %s6486_s7 }
 0x32c   :  { %v1044_v31 = vpop.permute.xlu1 %1043  ;;  %2522 = vrot.lane.b32.xlu2 %v7292_v43, %s6486_s7  ;;  %v7468_v53 = vpop.permute.xlu0 %1680 }
 0x32d   :  { %5700 = vmatpush.xpose.msk.msra.mxu3 %vm706_vm13, %v1044_v31 }
 0x32e   :  { %v7471_v47 = vpop.permute.xlu2 %1682 }
 0x331   :  { %5701 = vmatpush.xpose.msk.msra.mxu3 %vm706_vm13, %v1042_v60 }
 0x332   :  { %3287 = vrot.lane.b32.xlu1 %v7292_v43, %s6487_s3  ;;  %3297 = vrot.lane.b32.xlu0 %v7271_v55, %s6487_s3 }
 0x334   :  { %3289 = vrot.lane.b32.xlu2 %v7279_v28, %s6487_s3  ;;  %v7480_v42 = vpop.permute.xlu0 %3339  ;;  %v7577_v36 = vpop.permute.xlu1 %1670 }
 0x335   :  { %5702 = vmatpush.xpose.msk.msra.mxu3 %vm706_vm13, %v1040_v33 }
 0x336   :  { %v7483_v46 = vpop.permute.xlu2 %1686 }
 0x339   :  { %5703 = vmatpush.xpose.msk.msra.mxu3 %vm706_vm13, %v1038_v18 }
 0x33a   :  { %2526 = vrot.lane.b32.xlu1 %v7307_v3, %s6486_s7  ;;  %6054 = vrot.lane.b32.xlu0 %v7284_v23, %s6480_s10 }
 0x33c   :  { %2528 = vrot.lane.b32.xlu2 %v7311_v40, %s6486_s7  ;;  %v7492_v60 = vpop.permute.xlu0 %3337 }
 0x33d   :  { %5704 = vmatpush.xpose.msk.msra.mxu3 %vm706_vm13, %v1036_v10 }
 0x33e   :  { %v7495_v31 = vpop.permute.xlu2 %2570 }
 0x341   :  { %5705 = vmatpush.xpose.msk.msra.mxu3 %vm706_vm13, %v1034_v27 }
 0x342   :  { %3293 = vrot.lane.b32.xlu1 %v7311_v40, %s6487_s3  ;;  %2576 = vrot.lane.b32.xlu0 %v7296_v44, %s6485_s24 }
 0x344   :  { %3295 = vrot.lane.b32.xlu2 %v7322_v8, %s6487_s3  ;;  %v7504_v33 = vpop.permute.xlu0 %1688 }
 0x345   :  { %5706 = vmatpush.xpose.msk.msra.mxu3 %vm706_vm13, %v7357_v19 }
 0x346   :  { %v7508_v18 = vpop.permute.xlu2 %2568 }
 0x349   :  { %5707 = vmatpush.xpose.msk.msra.mxu3 %vm706_vm13, %v7373_v59 }
 0x34a   :  { %2532 = vrot.lane.b32.xlu1 %v7271_v55, %s6486_s7 }
 0x34c   :  { %2534 = vrot.lane.b32.xlu2 %v7329_v54, %s6486_s7  ;;  %v7516_v27 = vpop.permute.xlu0 %2566 }
 0x34d   :  { %5708 = vmatpush.xpose.msk.msra.mxu3 %vm706_vm13, %v1028_v12 }
 0x34e   :  { %v7519_v10 = vpop.permute.xlu2 %3331 }
 0x34f   :  { %10067 = vst [vmem:[#allocation25_spill] sm:$0xff] %v7519_v10  ;;  %v6047_v10 = vunpack.i.h.bf16 %v7437_v26 }
 0x351   :  { %5709 = vmatpush.xpose.msk.msra.mxu3 %vm706_vm13, %v7303_v1 }
 0x352   :  { %3299 = vrot.lane.b32.xlu1 %v7329_v54, %s6487_s3 }
 0x354   :  { %2536 = vrot.lane.b32.xlu2 %v7343_v7, %s6486_s7  ;;  %v7527_v19 = vpop.permute.xlu0 %2564 }
 0x355   :  { %5710 = vmatpush.xpose.msk.msra.mxu3 %vm706_vm13, %v7335_v9 }
 0x356   :  { %v7531_v59 = vpop.permute.xlu2 %3329 }
 0x357   :  { %10068 = vst [vmem:[#allocation26_spill] sm:$0xff] %v7531_v59 }
 0x359   :  { %5711 = vmatpush.xpose.msk.msra.mxu3 %vm706_vm13, %v7379_v62 }
 0x35a   :  { %3301 = vrot.lane.b32.xlu1 %v7343_v7, %s6487_s3 }
 0x35c   :  { %1724 = vrot.lane.b32.xlu2 %v7296_v44, %s6481_s25  ;;  %v7539_v1 = vpop.permute.xlu0 %3327 }
 0x35d   :  { %10069 = vst [vmem:[#allocation27_spill] sm:$0xff] %v7539_v1  ;;  %5712 = vmatpush.xpose.msk.msra.mxu3 %vm706_vm13, %v7259_v25 }
 0x35e   :  { %v7543_v12 = vpop.permute.xlu2 %1692 }
 0x360   :  { %5713 = vmatmul.msk.f32.vlgmr.msra.gmra.mxu3 %vm706_vm13, %v7292_v43  ;;  %v7565_v43 = vadd.f32 %v7266_v45, %v7268_v48  ;;  %v7585_v45 = vpop.permute.xlu1 %1674 }
 0x362   :  { %2538 = vrot.lane.b32.xlu1 %v7347_v29, %s6486_s7 }
 0x364   :  { %3341 = vrot.lane.b32.xlu2 %v7296_v44, %s6484_s9  ;;  %v7551_v62 = vpop.permute.xlu0 %3325 }
 0x365   :  { %10070 = vst [vmem:[#allocation28_spill] sm:$0xff] %v7551_v62 }
 0x366   :  { %v7553_v9 = vpop.permute.xlu2 %2558 }
 0x368   :  { %5714 = vmatmul.msk.f32.gmra.mxu3 %vm706_vm13, %v7279_v28 }
 0x36a   :  { %3303 = vrot.lane.b32.xlu1 %v7347_v29, %s6487_s3 }
 0x36c   :  { %v7559_v25 = vpop.permute.xlu0 %1694 }
 0x36e   :  { %v7561_v37 = vpop.permute.xlu2 %2556 }
 0x370   :  { %5715 = vmatmul.msk.f32.gmra.mxu3 %vm706_vm13, %v7307_v3 }
 0x372   :  { %1696 = vrot.lane.b32.xlu1 %v7565_v43, %s6483_s2 }
 0x374   :  { %v7571_v44 = vpop.permute.xlu0 %2554 }
 0x376   :  { %v7573_v28 = vpop.permute.xlu2 %3319 }
 0x377   :  { %10071 = vst [vmem:[#allocation29_spill] sm:$0xff] %v7573_v28 }
 0x378   :  { %5716 = vmatmul.msk.f32.gmra.mxu3 %vm706_vm13, %v7311_v40  ;;  %v7595_v40 = vpop.permute.xlu1 %1678 }
 0x37c   :  { %v7579_v35 = vpop.permute.xlu0 %2552 }
 0x37e   :  { %v7581_v51 = vpop.permute.xlu2 %3317 }
 0x37f   :  { %10072 = vst [vmem:[#allocation30_spill] sm:$0xff] %v7581_v51 }
 0x380   :  { %5717 = vmatmul.msk.f32.gmra.mxu3 %vm706_vm13, %v7322_v8  ;;  %v7605_v4 = vpop.permute.xlu1 %1684 }
 0x384   :  { %v7587_v48 = vpop.permute.xlu0 %3315 }
 0x385   :  { %10073 = vst [vmem:[#allocation31_spill] sm:$0xff] %v7587_v48 }
 0x386   :  { %v7589_v3 = vpop.permute.xlu2 %2522 }
 0x388   :  { %5718 = vmatmul.msk.f32.gmra.mxu3 %vm706_vm13, %v7271_v55 }
 0x38c   :  { %v7593_v56 = vpop.permute.xlu0 %2524 }
 0x38e   :  { %v7597_v61 = vpop.permute.xlu2 %3289 }
 0x38f   :  { %10074 = vst [vmem:[#allocation32_spill] sm:$0xff] %v7597_v61  ;;  %v7615_v61 = vpop.permute.xlu1 %2574 }
 0x390   :  { %5719 = vmatmul.msk.f32.gmra.mxu3 %vm706_vm13, %v7329_v54 }
 0x394   :  { %v7601_v20 = vpop.permute.xlu0 %3291 }
 0x395   :  { %10075 = vst [vmem:[#allocation33_spill] sm:$0xff] %v7601_v20 }
 0x396   :  { %v7603_v8 = vpop.permute.xlu2 %2528 }
 0x397   :  { %v2573_v20 = vpop.permute.xlu1 %2572 }
 0x398   :  { %5720 = vmatmul.msk.f32.gmra.mxu3 %vm706_vm13, %v7343_v7 }
 0x39c   :  { %v7609_v48 = vpop.permute.xlu0 %2530 }
 0x39e   :  { %v7611_v55 = vpop.permute.xlu2 %3295 }
 0x39f   :  { %10076 = vst [vmem:[#allocation34_spill] sm:$0xff] %v7611_v55  ;;  %v6046_v55 = vunpack.i.l.bf16 %v7437_v26  ;;  %v7630_v1 = vpop.permute.xlu1 %3335  ;;  %v6037_v26 = vunpack.i.h.bf16 %v7385_v41 }
 0x3a0   :  { %5721 = vmatmul.msk.f32.gmra.mxu3 %vm706_vm13, %v7347_v29  ;;  %v6051_v29 = vunpack.i.l.bf16 %v7431_v17 }
 0x3a4   :  { %v7617_v51 = vpop.permute.xlu0 %3297 }
 0x3a5   :  { %10077 = vst [vmem:[#allocation35_spill] sm:$0xff] %v7617_v51  ;;  %v6052_v51 = vunpack.i.h.bf16 %v7431_v17  ;;  %v6042_v17 = vunpack.i.h.bf16 %v7368_v50 }
 0x3a6   :  { %v7619_v54 = vpop.permute.xlu2 %2534 }
 0x3a8   :  { %5722 = vmatmul.msk.f32.gmra.mxu3 %vm706_vm13, %v7325_v52 }
 0x3ac   :  { %v6055_v11 = vpop.permute.xlu0 %6054 }
 0x3ad   :  { %v6056_v28 = vunpack.i.l.bf16 %v6055_v11  ;;  %v6057_v62 = vunpack.i.h.bf16 %v6055_v11  ;;  %v6041_v11 = vunpack.i.l.bf16 %v7368_v50  ;;  %v6031_v50 = vunpack.i.l.bf16 %v7413_v39 }
 0x3ae   :  { %v7623_v7 = vpop.permute.xlu2 %2536 }
 0x3af   :  { %1613 = vmatpush.msrb.mxu2 %v6056_v28 }
 0x3b0   :  { %5723 = vmatmul.msk.f32.gmra.mxu3 %vm706_vm13, %v7407_v6 }
 0x3b1   :  { %1614 = vmatpush.msrb.mxu2 %v6057_v62  ;;  %v7642_v62 = vpop.permute.xlu1 %3333 }
 0x3b3   :  { %1615 = vmatpush.msrb.mxu2 %v6051_v29 }
 0x3b5   :  { %1616 = vmatpush.msrb.mxu2 %v6052_v51  ;;  %v6036_v51 = vunpack.i.l.bf16 %v7385_v41  ;;  %v6026_v41 = vunpack.i.l.bf16 %v7393_v30 }
 0x3b6   :  { %v1725_v59 = vpop.permute.xlu2 %1724 }
 0x3b7   :  { %1617 = vmatpush.msrb.mxu2 %v6046_v55  ;;  %5741 = vmatpush.xpose.msk.msra.mxu0 %vm706_vm13, %v1725_v59 }
 0x3b8   :  { %5724 = vmatmul.msk.f32.gmra.mxu3 %vm706_vm13, %v7411_v21 }
 0x3b9   :  { %1618 = vmatpush.msrb.mxu2 %v6047_v10  ;;  %v6032_v10 = vunpack.i.h.bf16 %v7413_v39 }
 0x3bb   :  { %1619 = vmatpush.msrb.mxu2 %v6041_v11  ;;  %5742 = vmatpush.xpose.msk.msra.mxu0 %vm706_vm13, %v7458_v38  ;;  %v6027_v38 = vunpack.i.h.bf16 %v7393_v30 }
 0x3bd   :  { %1620 = vmatpush.msrb.mxu2 %v6042_v17 }
 0x3bf   :  { %1621 = vmatpush.msrb.mxu2 %v6036_v51  ;;  %5743 = vmatpush.xpose.msk.msra.mxu0 %vm706_vm13, %v7454_v57  ;;  %v1691_v57 = vpop.permute.xlu1 %1690 }
 0x3c0   :  { %5725 = vmatmul.msk.f32.gmra.mxu3 %vm706_vm13, %v7391_v22 }
 0x3c1   :  { %1622 = vmatpush.msrb.mxu2 %v6037_v26 }
 0x3c3   :  { %1623 = vmatpush.msrb.mxu2 %v6031_v50  ;;  %5744 = vmatpush.xpose.msk.msra.mxu0 %vm706_vm13, %v7421_v2 }
 0x3c5   :  { %1624 = vmatpush.msrb.mxu2 %v6032_v10 }
 0x3c7   :  { %1625 = vmatpush.msrb.mxu2 %v6026_v41  ;;  %5745 = vmatpush.xpose.msk.msra.mxu0 %vm706_vm13, %v7403_v34  ;;  %v2563_v39 = vpop.permute.xlu1 %2562 }
 0x3c8   :  { %5726 = vmatmul.msk.f32.gmra.mxu3 %vm706_vm13, %v7565_v43 }
 0x3c9   :  { %1626 = vmatpush.msrb.mxu2 %v6027_v38 }
 0x3cb   :  { %5746 = vmatpush.xpose.msk.msra.mxu0 %vm706_vm13, %v7427_v14 }
 0x3cf   :  { %5747 = vmatpush.xpose.msk.msra.mxu0 %vm706_vm13, %v7377_v24  ;;  %v2561_v30 = vpop.permute.xlu1 %2560  ;;  %v2577_v24 = vpop.permute.xlu0 %2576 }
 0x3d3   :  { %5748 = vmatpush.xpose.msk.msra.mxu0 %vm706_vm13, %v7399_v13 }
 0x3d7   :  { %5749 = vmatpush.xpose.msk.msra.mxu0 %vm706_vm13, %v7339_v32  ;;  %v7672_v34 = vpop.permute.xlu1 %3323 }
 0x3db   :  { %5750 = vmatpush.xpose.msk.msra.mxu0 %vm706_vm13, %v7362_v0 }
 0x3df   :  { %5751 = vmatpush.xpose.msk.msra.mxu0 %vm706_vm13, %v7318_v49  ;;  %v7683_v49 = vpop.permute.xlu1 %3321 }
 0x3e3   :  { %5752 = vmatpush.xpose.msk.msra.mxu0 %vm706_vm13, %v7353_v15  ;;  %v1134_v15 = vpop.f32.mrf.mxu3 }
 0x3e7   :  { %5753 = vmatpush.xpose.msk.msra.mxu0 %vm706_vm13, %v7286_v58  ;;  %v2551_v58 = vpop.permute.xlu1 %2550 }
 0x3eb   :  { %5754 = vmatpush.xpose.msk.msra.mxu0 %vm706_vm13, %v7366_v5  ;;  %v1137_v5 = vpop.f32.mrf.mxu3 }
 0x3ee   :  { %5755 = vmatmul.msk.f32.vlgmr.msra.gmra.mxu0 %vm706_vm13, %v7577_v36 }
 0x3ef   :  { %5811 = vmatpush.xpose.msk.msrb.mxu0 %vm706_vm13, %v2577_v24  ;;  %v7698_v36 = vpop.permute.xlu1 %3287 }
 0x3f0   :  { %10078 = vst [vmem:[#allocation36_spill] sm:$0xff] %v7698_v36 }
 0x3f3   :  { %5812 = vmatpush.xpose.msk.msrb.mxu0 %vm706_vm13, %v7615_v61 }
 0x3f6   :  { %5756 = vmatmul.msk.f32.gmra.mxu0 %vm706_vm13, %v7441_v63 }
 0x3f7   :  { %5813 = vmatpush.xpose.msk.msrb.mxu0 %vm706_vm13, %v2573_v20  ;;  %v2527_v61 = vpop.permute.xlu1 %2526 }
 0x3fb   :  { %5814 = vmatpush.xpose.msk.msrb.mxu0 %vm706_vm13, %v7495_v31 }
 0x3fe   :  { %5757 = vmatmul.msk.f32.gmra.mxu0 %vm706_vm13, %v7585_v45 }
 0x3ff   :  { %5815 = vmatpush.xpose.msk.msrb.mxu0 %vm706_vm13, %v7508_v18 }
 0x403   :  { %5816 = vmatpush.xpose.msk.msrb.mxu0 %vm706_vm13, %v7516_v27 }
 0x406   :  { %5758 = vmatmul.msk.f32.gmra.mxu0 %vm706_vm13, %v7460_v16  ;;  %v7714_v16 = vpop.permute.xlu1 %3293 }
 0x407   :  { %5817 = vmatpush.xpose.msk.msrb.mxu0 %vm706_vm13, %v7527_v19  ;;  %10079 = vst [vmem:[#allocation37_spill] sm:$0xff] %v7714_v16 }
 0x40b   :  { %5818 = vmatpush.xpose.msk.msrb.mxu0 %vm706_vm13, %v2563_v39 }
 0x40e   :  { %5759 = vmatmul.msk.f32.gmra.mxu0 %vm706_vm13, %v7595_v40  ;;  %v7721_v20 = vpop.permute.xlu1 %2532 }
 0x40f   :  { %5819 = vmatpush.xpose.msk.msrb.mxu0 %vm706_vm13, %v2561_v30 }
 0x413   :  { %5820 = vmatpush.xpose.msk.msrb.mxu0 %vm706_vm13, %v7553_v9 }
 0x416   :  { %5760 = vmatmul.msk.f32.gmra.mxu0 %vm706_vm13, %v7468_v53  ;;  %v7725_v32 = vpop.permute.xlu1 %3299 }
 0x417   :  { %5821 = vmatpush.xpose.msk.msrb.mxu0 %vm706_vm13, %v7561_v37  ;;  %v766_v37 = vpop.f32.mrf.mxu1  ;;  %10080 = vst [vmem:[#allocation38_spill] sm:$0xff] %v7725_v32 }
 0x418   :  { %v5671_v19 = vadd.f32 -1.0, %v766_v37 }
 0x41b   :  { %5822 = vmatpush.xpose.msk.msrb.mxu0 %vm706_vm13, %v7571_v44 }
 0x41e   :  { %5761 = vmatmul.msk.f32.gmra.mxu0 %vm706_vm13, %v7471_v47 }
 0x41f   :  { %5823 = vmatpush.xpose.msk.msrb.mxu0 %vm706_vm13, %v7579_v35  ;;  %v769_v0 = vpop.f32.mrf.mxu1  ;;  %v7731_v35 = vpop.permute.xlu1 %3301 }
 0x420   :  { %10081 = vst [vmem:[#allocation39_spill] sm:$0xff] %v7731_v35  ;;  %v5672_v28 = vadd.f32 -1.0, %v769_v0 }
 0x423   :  { %5824 = vmatpush.xpose.msk.msrb.mxu0 %vm706_vm13, %v2551_v58 }
 0x426   :  { %5762 = vmatmul.msk.f32.gmra.mxu0 %vm706_vm13, %v7605_v4  ;;  %v1140_v4 = vpop.f32.mrf.mxu3 }
 0x427   :  { %v772_v13 = vpop.f32.mrf.mxu1  ;;  %v7734_v2 = vpop.permute.xlu1 %2538 }
 0x428   :  { %v5673_v11 = vadd.f32 -1.0, %v772_v13 }
 0x42a   :  { %v7781_v50 = vmul.f32 1e+30, %v5673_v11 }
 0x42e   :  { %5763 = vmatmul.msk.f32.gmra.mxu0 %vm706_vm13, %v7483_v46  ;;  %v1143_v53 = vpop.f32.mrf.mxu3 }
 0x42f   :  { %v775_v14 = vpop.f32.mrf.mxu1  ;;  %v7738_v63 = vpop.permute.xlu1 %3303 }
 0x430   :  { %10082 = vst [vmem:[#allocation40_spill] sm:$0xff] %v7738_v63  ;;  %v5674_v38 = vadd.f32 -1.0, %v775_v14 }
 0x432   :  { %v7795_v24 = vmul.f32 1e+30, %v5674_v38 }
 0x434   :  { %v7803_v37 = vadd.f32 %v1143_v53, %v7795_v24 }
 0x436   :  { %5764 = vmatmul.msk.f32.gmra.mxu0 %vm706_vm13, %v7504_v33  ;;  %v7744_v31 = vpop.f32.mrf.mxu3  ;;  %v1186_v0 = vsel %vm1176_vm9, %v7803_v37, -inf }
 0x437   :  { %v7742_v47 = vpop.f32.mrf.mxu1  ;;  %v1697_v46 = vpop.permute.xlu1 %1696 }
 0x43e   :  { %5765 = vmatmul.msk.f32.gmra.mxu0 %vm706_vm13, %v1691_v57  ;;  %v7751_v18 = vpop.f32.mrf.mxu3 }
 0x43f   :  { %v7747_v33 = vpop.f32.mrf.mxu1 }
 0x446   :  { %5766 = vmatmul.msk.f32.gmra.mxu0 %vm706_vm13, %v7543_v12  ;;  %v1152_v59 = vpop.f32.mrf.mxu3  ;;  %v7755_v12 = vmul.f32 1e+30, %v5671_v19 }
 0x447   :  { %v784_v27 = vpop.f32.mrf.mxu1 }
 0x44e   :  { %5767 = vmatmul.msk.f32.gmra.mxu0 %vm706_vm13, %v7559_v25  ;;  %v7770_v40 = vpop.f32.mrf.mxu3 }
 0x44f   :  { %v7760_v44 = vpop.f32.mrf.mxu1 }
 0x456   :  { %5768 = vmatmul.msk.f32.gmra.mxu0 %vm706_vm13, %v1697_v46 }
 0x457   :  { %v790_v26 = vpop.f32.mrf.mxu1 }
 0x45e   :  { %5825 = vmatmul.msk.f32.vlgmr.msrb.gmra.mxu0 %vm706_vm13, %v7589_v3  ;;  %v7765_v3 = vmul.f32 1e+30, %v5672_v28 }
 0x45f   :  { %v7797_v58 = vpop.f32.mrf.mxu1 }
 0x460   :  { %v7784_v10 = vadd.f32 %v1137_v5, %v7765_v3 }
 0x462   :  { %v1180_v30 = vsel %vm1176_vm9, %v7784_v10, -inf }
 0x466   :  { %5826 = vmatmul.msk.f32.gmra.mxu0 %vm706_vm13, %v7593_v56  ;;  %v7768_v56 = vadd.f32 %v1134_v15, %v7755_v12  ;;  %v5677_v15 = vadd.f32 -1.0, %v784_v27 }
 0x467   :  { %v796_v14 = vpop.f32.mrf.mxu1 }
 0x468   :  { %v1177_v51 = vsel %vm1176_vm9, %v7768_v56, -inf  ;;  %v7813_v13 = vmul.f32 1e+30, %v5677_v15 }
 0x46b   :  { %v1799_v9 = vpop.f32.mrf.mxu0 }
 0x46c   :  { %v7758_v25 = vadd.f32 %v1799_v9, %v7755_v12 }
 0x46e   :  { %5827 = vmatmul.msk.f32.gmra.mxu0 %vm706_vm13, %v2527_v61  ;;  %v1841_v45 = vsel %vm1176_vm9, %v7758_v25, -inf  ;;  %v7800_v61 = vadd.f32 %v1140_v4, %v7781_v50  ;;  %v7816_v4 = vadd.f32 %v1152_v59, %v7813_v13  ;;  %v5681_v59 = vadd.f32 -1.0, %v796_v14 }
 0x46f   :  { %1842 = vmax.xlane.f32.xlu0 %v1841_v45  ;;  %v799_v9 = vpop.f32.mrf.mxu1 }
 0x470   :  { %v1195_v53 = vsel %vm1176_vm9, %v7816_v4, -inf  ;;  %v5682_v11 = vadd.f32 -1.0, %v799_v9 }
 0x473   :  { %v1802_v55 = vpop.f32.mrf.mxu0 }
 0x474   :  { %v7773_v29 = vadd.f32 %v1802_v55, %v7765_v3 }
 0x476   :  { %5828 = vmatmul.msk.f32.gmra.mxu0 %vm706_vm13, %v7603_v8  ;;  %v1844_v17 = vsel %vm1176_vm9, %v7773_v29, -inf  ;;  %v1158_v8 = vpop.f32.mrf.mxu3 }
 0x477   :  { %1845 = vmax.xlane.f32.xlu2 %v1844_v17  ;;  %1178 = vmax.xlane.f32.xlu0 %v1177_v51  ;;  %v802_v51 = vpop.f32.mrf.mxu1 }
 0x47b   :  { %v1805_v41 = vpop.f32.mrf.mxu0 }
 0x47c   :  { %v7787_v57 = vadd.f32 %v1805_v41, %v7781_v50  ;;  %v5683_v41 = vadd.f32 -1.0, %v802_v51 }
 0x47e   :  { %5829 = vmatmul.msk.f32.gmra.mxu0 %vm706_vm13, %v7609_v48  ;;  %v1847_v39 = vsel %vm1176_vm9, %v7787_v57, -inf  ;;  %v1183_v48 = vsel %vm1176_vm9, %v7800_v61, -inf  ;;  %v7811_v5 = vpop.f32.mrf.mxu3 }
 0x47f   :  { %1848 = vmax.xlane.f32.xlu1 %v1847_v39  ;;  %1181 = vmax.xlane.f32.xlu2 %v1180_v30  ;;  %v805_v39 = vpop.f32.mrf.mxu1 }
 0x480   :  { %v5684_v15 = vadd.f32 -1.0, %v805_v39 }
 0x482   :  { %v7858_v14 = vmul.f32 1e+30, %v5684_v15  ;;  %v7906_v15 = vpop.permute.xlu2 %3341 }
 0x484   :  { %10086 = vst [vmem:[#allocation44_spill] sm:$0xff] %v7858_v14 }
 0x486   :  { %5830 = vmatmul.msk.f32.gmra.mxu0 %vm706_vm13, %v7721_v20  ;;  %v5679_v20 = vadd.f32 -1.0, %v790_v26  ;;  %v1164_v27 = vpop.f32.mrf.mxu3 }
 0x487   :  { %1184 = vmax.xlane.f32.xlu1 %v1183_v48  ;;  %1187 = vmax.xlane.f32.xlu2 %v1186_v0  ;;  %v1808_v48 = vpop.f32.mrf.mxu0 }
 0x488   :  { %v7824_v46 = vmul.f32 1e+30, %v5679_v20  ;;  %v7861_v20 = vadd.f32 %v1808_v48, %v7795_v24 }
 0x48a   :  { %v7827_v19 = vadd.f32 %v1158_v8, %v7824_v46 }
 0x48b   :  { %2540 = vrot.lane.b32.xlu0 %v7325_v52, %s6486_s7 }
 0x48c   :  { %v1201_v28 = vsel %vm1176_vm9, %v7827_v19, -inf }
 0x48e   :  { %5831 = vmatmul.msk.f32.gmra.mxu0 %vm706_vm13, %v7619_v54  ;;  %v7833_v54 = vmul.f32 1e+30, %v5681_v59  ;;  %v1167_v55 = vpop.f32.mrf.mxu3  ;;  %v1850_v59 = vsel %vm1176_vm9, %v7861_v20, -inf }
 0x48f   :  { %1196 = vmax.xlane.f32.xlu1 %v1195_v53  ;;  %v5675_v53 = vadd.f32 -1.0, %v7742_v47  ;;  %v8002_v16 = vpop.f32.mrf.mxu0 }
 0x490   :  { %10083 = vst [vmem:[#allocation41_spill] sm:$0xff] %v7833_v54  ;;  %v7836_v45 = vadd.f32 %v1164_v27, %v7833_v54 }
 0x491   :  { %v7869_v9 = vmul.f32 1e+30, %v5675_v53 }
 0x492   :  { %v1207_v17 = vsel %vm1176_vm9, %v7836_v45, -inf }
 0x496   :  { %5832 = vmatmul.msk.f32.gmra.mxu0 %vm706_vm13, %v7623_v7  ;;  %v7844_v7 = vmul.f32 1e+30, %v5682_v11  ;;  %v1170_v38 = vpop.f32.mrf.mxu3  ;;  %v5678_v11 = vadd.f32 -1.0, %v7760_v44 }
 0x497   :  { %1202 = vmax.xlane.f32.xlu1 %v1201_v28 }
 0x498   :  { %10084 = vst [vmem:[#allocation42_spill] sm:$0xff] %v7844_v7  ;;  %v7847_v26 = vadd.f32 %v1167_v55, %v7844_v7  ;;  %v7875_v55 = vadd.f32 %v7744_v31, %v7869_v9  ;;  %v7881_v51 = vmul.f32 1e+30, %v5678_v11 }
 0x49a   :  { %v1210_v8 = vsel %vm1176_vm9, %v7847_v26, -inf  ;;  %v1189_v47 = vsel %vm1176_vm9, %v7875_v55, -inf }
 0x49e   :  { %5833 = vmatmul.msk.f32.gmra.mxu0 %vm706_vm13, %v7734_v2  ;;  %v7851_v2 = vmul.f32 1e+30, %v5683_v41  ;;  %v1173_v0 = vpop.f32.mrf.mxu3  ;;  %v7885_v41 = vadd.f32 %v7770_v40, %v7881_v51 }
 0x49f   :  { %1208 = vmax.xlane.f32.xlu1 %v1207_v17  ;;  %3305 = vrot.lane.b32.xlu2 %v7325_v52, %s6487_s3  ;;  %v7865_v27 = vadd.f32 %v1173_v0, %v7858_v14  ;;  %v5676_v17 = vadd.f32 -1.0, %v7747_v33 }
 0x4a0   :  { %10085 = vst [vmem:[#allocation43_spill] sm:$0xff] %v7851_v2  ;;  %v7854_v30 = vadd.f32 %v1170_v38, %v7851_v2  ;;  %v1198_v44 = vsel %vm1176_vm9, %v7885_v41, -inf }
 0x4a1   :  { %v1216_v28 = vsel %vm1176_vm9, %v7865_v27, -inf  ;;  %v7887_v38 = vmul.f32 1e+30, %v5676_v17 }
 0x4a2   :  { %v1213_v52 = vsel %vm1176_vm9, %v7854_v30, -inf }
 0x4a3   :  { %v7891_v31 = vadd.f32 %v7751_v18, %v7887_v38 }
 0x4a5   :  { %v1192_v33 = vsel %vm1176_vm9, %v7891_v31, -inf }
 0x4a7   :  { %1211 = vmax.xlane.f32.xlu1 %v1210_v8  ;;  %v5680_v8 = vadd.f32 -1.0, %v7797_v58 }
 0x4a9   :  { %v7898_v39 = vmul.f32 1e+30, %v5680_v8 }
 0x4ab   :  { %v7902_v40 = vadd.f32 %v7811_v5, %v7898_v39 }
 0x4ad   :  { %v1204_v18 = vsel %vm1176_vm9, %v7902_v40, -inf }
 0x4af   :  { %1214 = vmax.xlane.f32.xlu1 %v1213_v52 }
 0x4b5   :  { %1851 = vmax.xlane.f32.xlu0 %v1850_v59 }
 0x4b7   :  { %1217 = vmax.xlane.f32.xlu1 %v1216_v28 }
 0x4bd   :  { %1190 = vmax.xlane.f32.xlu0 %v1189_v47 }
 0x4c5   :  { %1199 = vmax.xlane.f32.xlu0 %v1198_v44 }
 0x4c8   :  { %1193 = vmax.xlane.f32.xlu2 %v1192_v33 }
 0x4d0   :  { %1205 = vmax.xlane.f32.xlu2 %v1204_v18 }
 0x4e2   :  { %v7908_v48 = vpop.xlane.xlu0 %1842 }
 0x4ea   :  { %v7910_v58 = vpop.xlane.xlu2 %1845  ;;  %v1179_v52 = vpop.xlane.xlu0 %1178 }
 0x4eb   :  { %v1219_v0 = vsub.f32 %v7768_v56, %v1179_v52 }
 0x4ed   :  { %v1233_v53 = vmul.f32 1.442695, %v1219_v0 }
 0x4ef   :  { %6169 = vpow2.f32 %v1233_v53 }
 0x4f2   :  { %v7913_v59 = vpop.xlane.xlu1 %1848  ;;  %v1182_v28 = vpop.xlane.xlu2 %1181 }
 0x4f3   :  { %v1220_v5 = vsub.f32 %v7784_v10, %v1182_v28 }
 0x4f5   :  { %v1235_v11 = vmul.f32 1.442695, %v1220_v5  ;;  %v7916_v47 = vpop.eup %6169 }
 0x4f6   :  { %v1261_v17 = vsel %vm1176_vm9, %v7916_v47, 0.0 }
 0x4f7   :  { %6171 = vpow2.f32 %v1235_v11  ;;  %1262 = vadd.xlane.f32.xlu1 %v1261_v17 }
 0x4fa   :  { %v1185_v44 = vpop.xlane.xlu1 %1184  ;;  %v1188_v8 = vpop.xlane.xlu2 %1187 }
 0x4fb   :  { %v1221_v33 = vsub.f32 %v7800_v61, %v1185_v44  ;;  %v1222_v56 = vsub.f32 %v7803_v37, %v1188_v8 }
 0x4fd   :  { %v1237_v18 = vmul.f32 1.442695, %v1221_v33  ;;  %v1239_v52 = vmul.f32 1.442695, %v1222_v56  ;;  %v2541_v0 = vpop.permute.xlu0 %2540  ;;  %v7922_v53 = vpop.eup %6171 }
 0x4fe   :  { %5834 = vmatmul.msk.f32.gmra.mxu0 %vm706_vm13, %v2541_v0  ;;  %v1264_v10 = vsel %vm1176_vm9, %v7922_v53, 0.0 }
 0x4ff   :  { %6173 = vpow2.f32 %v1237_v18  ;;  %1265 = vadd.xlane.f32.xlu2 %v1264_v10 }
 0x500   :  { %6175 = vpow2.f32 %v1239_v52 }
 0x502   :  { %v1197_v28 = vpop.xlane.xlu1 %1196 }
 0x505   :  { %v7927_v5 = vpop.eup %6173 }
 0x506   :  { %v7929_v11 = vpop.eup %6175  ;;  %v1267_v61 = vsel %vm1176_vm9, %v7927_v5, 0.0 }
 0x507   :  { %v1270_v37 = vsel %vm1176_vm9, %v7929_v11, 0.0  ;;  %1268 = vadd.xlane.f32.xlu2 %v1267_v61 }
 0x508   :  { %1271 = vadd.xlane.f32.xlu0 %v1270_v37 }
 0x50a   :  { %v1203_v17 = vpop.xlane.xlu1 %1202 }
 0x50b   :  { %v1227_v10 = vsub.f32 %v7827_v19, %v1203_v17 }
 0x50d   :  { %v1249_v61 = vmul.f32 1.442695, %v1227_v10 }
 0x510   :  { %2542 = vrot.lane.b32.xlu1 %v7407_v6, %s6486_s7 }
 0x512   :  { %v1209_v44 = vpop.xlane.xlu1 %1208 }
 0x513   :  { %v1229_v63 = vsub.f32 %v7836_v45, %v1209_v44  ;;  %v1225_v44 = vsub.f32 %v7816_v4, %v1197_v28 }
 0x51a   :  { %v1212_v8 = vpop.xlane.xlu1 %1211 }
 0x51b   :  { %v1230_v33 = vsub.f32 %v7847_v26, %v1212_v8  ;;  %v7947_v26 = vpop.permute.xlu2 %3305 }
 0x51c   :  { %10087 = vst [vmem:[#allocation45_spill] sm:$0xff] %v7947_v26 }
 0x51d   :  { %v1255_v56 = vmul.f32 1.442695, %v1230_v33  ;;  %v1253_v33 = vmul.f32 1.442695, %v1229_v63 }
 0x51f   :  { %6177 = vpow2.f32 %v1255_v56 }
 0x520   :  { %6179 = vpow2.f32 %v1249_v61  ;;  %v1245_v61 = vmul.f32 1.442695, %v1225_v44 }
 0x522   :  { %v1215_v56 = vpop.xlane.xlu1 %1214 }
 0x525   :  { %v7938_v18 = vpop.eup %6177 }
 0x526   :  { %v1294_v52 = vsel %vm1176_vm9, %v7938_v18, 0.0  ;;  %v7949_v32 = vpop.eup %6179 }
 0x527   :  { %1295 = vadd.xlane.f32.xlu0 %v1294_v52  ;;  %v1231_v52 = vsub.f32 %v7854_v30, %v1215_v56  ;;  %v1285_v19 = vsel %vm1176_vm9, %v7949_v32, 0.0 }
 0x528   :  { %v7942_v0 = vpop.xlane.xlu0 %1851 }
 0x530   :  { %v1191_v37 = vpop.xlane.xlu0 %1190 }
 0x531   :  { %v1223_v35 = vsub.f32 %v7875_v55, %v1191_v37  ;;  %v1257_v55 = vmul.f32 1.442695, %v1231_v52 }
 0x533   :  { %v1241_v8 = vmul.f32 1.442695, %v1223_v35 }
 0x535   :  { %6181 = vpow2.f32 %v1241_v8 }
 0x536   :  { %6183 = vpow2.f32 %v1253_v33 }
 0x538   :  { %v1200_v8 = vpop.xlane.xlu0 %1199 }
 0x539   :  { %v1226_v33 = vsub.f32 %v7885_v41, %v1200_v8 }
 0x53a   :  { %1286 = vadd.xlane.f32.xlu1 %v1285_v19 }
 0x53b   :  { %v7954_v17 = vpop.eup %6181  ;;  %v1194_v45 = vpop.xlane.xlu2 %1193  ;;  %3309 = vrot.lane.b32.xlu0 %v7411_v21, %s6487_s3  ;;  %v1247_v56 = vmul.f32 1.442695, %v1226_v33 }
 0x53c   :  { %v1224_v35 = vsub.f32 %v7891_v31, %v1194_v45  ;;  %v1273_v63 = vsel %vm1176_vm9, %v7954_v17, 0.0  ;;  %v7962_v10 = vpop.eup %6183 }
 0x53d   :  { %1274 = vadd.xlane.f32.xlu2 %v1273_v63  ;;  %v1291_v37 = vsel %vm1176_vm9, %v7962_v10, 0.0 }
 0x53e   :  { %v1243_v30 = vmul.f32 1.442695, %v1224_v35 }
 0x540   :  { %6185 = vpow2.f32 %v1243_v30  ;;  %v1218_v30 = vpop.xlane.xlu1 %1217 }
 0x541   :  { %6187 = vpow2.f32 %v1257_v55 }
 0x542   :  { %1292 = vadd.xlane.f32.xlu1 %v1291_v37  ;;  %6189 = vpow2.f32 %v1245_v61  ;;  %v1232_v61 = vsub.f32 %v7865_v27, %v1218_v30 }
 0x543   :  { %2546 = vrot.lane.b32.xlu0 %v7391_v22, %s6486_s7  ;;  %v1206_v19 = vpop.xlane.xlu2 %1205  ;;  %6191 = vpow2.f32 %v1247_v56 }
 0x544   :  { %v1228_v35 = vsub.f32 %v7902_v40, %v1206_v19  ;;  %v847_v40 = vld [vmem:[%s9967_s11] sm:$0xff]  ;;  %v1259_v8 = vmul.f32 1.442695, %v1232_v61 }
 0x545   :  { %2478 = vmatpush.msra.mxu2 %v847_v40 }
 0x546   :  { %v7968_v31 = vpop.eup %6185  ;;  %v1251_v63 = vmul.f32 1.442695, %v1228_v35 }
 0x547   :  { %v7971_v4 = vpop.eup %6187  ;;  %v1276_v28 = vsel %vm1176_vm9, %v7968_v31, 0.0 }
 0x548   :  { %1277 = vadd.xlane.f32.xlu2 %v1276_v28  ;;  %v1297_v52 = vsel %vm1176_vm9, %v7971_v4, 0.0  ;;  %v7977_v45 = vpop.eup %6189  ;;  %6193 = vpow2.f32 %v1251_v63 }
 0x549   :  { %v1279_v41 = vsel %vm1176_vm9, %v7977_v45, 0.0  ;;  %v7982_v55 = vpop.eup %6191  ;;  %6195 = vpow2.f32 %v1259_v8 }
 0x54a   :  { %1298 = vadd.xlane.f32.xlu1 %v1297_v52  ;;  %v1282_v44 = vsel %vm1176_vm9, %v7982_v55, 0.0 }
 0x54e   :  { %v7987_v37 = vpop.eup %6193 }
 0x54f   :  { %v1288_v33 = vsel %vm1176_vm9, %v7987_v37, 0.0  ;;  %v7996_v28 = vpop.eup %6195 }
 0x550   :  { %1280 = vadd.xlane.f32.xlu2 %v1279_v41  ;;  %v1300_v27 = vsel %vm1176_vm9, %v7996_v28, 0.0 }
 0x558   :  { %1283 = vadd.xlane.f32.xlu2 %v1282_v44 }
 0x560   :  { %1289 = vadd.xlane.f32.xlu2 %v1288_v33 }
 0x563   :  { %2544 = vrot.lane.b32.xlu1 %v7411_v21, %s6486_s7 }
 0x56a   :  { %v1263_v56 = vpop.xlane.xlu1 %1262 }
 0x56b   :  { %6197 = vrcp.f32 %v1263_v56  ;;  %v1314_v63 = vand.u32 2147483648, %v1263_v56  ;;  %v1312_v30 = vand.u32 2147483647, %v1263_v56  ;;  %vm1308_vm11 = vweird.f32 %v1263_v56 }
 0x56d   :  { %1301 = vadd.xlane.f32.xlu0 %v1300_v27  ;;  %v1315_v40 = vor.u32 1.1754944e-38, %v1314_v63  ;;  %vm1313_vm15 = vcmp.eq.f32.partialorder %v1312_v30, 8.507059e+37 }
 0x571   :  { %v6198_v52 = vpop.eup %6197 }
 0x572   :  { %v1304_v19 = vmul.f32 %v6198_v52, %v1263_v56  ;;  %v1266_v35 = vpop.xlane.xlu2 %1265  ;;  %vm1309_vm10 = vweird.f32 %v6198_v52 }
 0x573   :  { %6199 = vrcp.f32 %v1266_v35  ;;  %vm1310_vm14 = vmor %vm1308_vm11, %vm1309_vm10  ;;  %v1329_v54 = vand.u32 2147483648, %v1266_v35  ;;  %v1327_v56 = vand.u32 2147483647, %v1266_v35  ;;  %vm1323_vm0 = vweird.f32 %v1266_v35 }
 0x574   :  { %v1305_v41 = vsub.f32 1.0, %v1304_v19 }
 0x575   :  { %vm1328_vm2 = vcmp.eq.f32.partialorder %v1327_v56, 8.507059e+37 }
 0x576   :  { %v1306_v44 = vmul.f32 %v6198_v52, %v1305_v41 }
 0x578   :  { %3307 = vrot.lane.b32.xlu2 %v7407_v6, %s6487_s3  ;;  %v1307_v21 = vadd.f32 %v6198_v52, %v1306_v44  ;;  %v1330_v44 = vor.u32 1.1754944e-38, %v1329_v54 }
 0x579   :  { %v6200_v61 = vpop.eup %6199 }
 0x57a   :  { %v1311_v8 = vsel %vm1310_vm14, %v6198_v52, %v1307_v21  ;;  %v1319_v33 = vmul.f32 %v6200_v61, %v1266_v35  ;;  %v1269_v27 = vpop.xlane.xlu2 %1268  ;;  %vm1324_vm12 = vweird.f32 %v6200_v61 }
 0x57b   :  { %v1272_v26 = vpop.xlane.xlu0 %1271  ;;  %6201 = vrcp.f32 %v1269_v27  ;;  %v1316_v19 = vsel %vm1313_vm15, %v1315_v40, %v1311_v8  ;;  %vm1325_vm1 = vmor %vm1323_vm0, %vm1324_vm12  ;;  %vm1338_vm6 = vweird.f32 %v1269_v27 }
 0x57c   :  { %v1320_v41 = vsub.f32 1.0, %v1319_v33  ;;  %6203 = vrcp.f32 %v1272_v26  ;;  %v1317_v36 = vmul.f32 %v7916_v47, %v1316_v19  ;;  %v1814_v19 = vpop.f32.mrf.mxu0  ;;  %vm1353_vm15 = vweird.f32 %v1272_v26 }
 0x57e   :  { %5727 = vmatmul.msk.f32.vlgmr.msrb.gmra.mxu2 %vm1176_vm9, %v1317_v36  ;;  %v1321_v6 = vmul.f32 %v6200_v61, %v1320_v41  ;;  %v1344_v41 = vand.u32 2147483648, %v1269_v27 }
 0x57f   :  { %5867 = vmatpush.xpose.msk.msrb.mxu2 %vm706_vm13, %v7906_v15 }
 0x580   :  { %v1322_v52 = vadd.f32 %v6200_v61, %v1321_v6  ;;  %v1342_v6 = vand.u32 2147483647, %v1269_v27 }
 0x581   :  { %6059 = vrot.lane.b32.xlu0 %v7284_v23, %s6488_s8  ;;  %v6202_v63 = vpop.eup %6201 }
 0x582   :  { %v6204_v30 = vpop.eup %6203  ;;  %v1334_v47 = vmul.f32 %v6202_v63, %v1269_v27  ;;  %v2543_v21 = vpop.permute.xlu1 %2542  ;;  %v1326_v40 = vsel %vm1325_vm1, %v6200_v61, %v1322_v52  ;;  %vm1339_vm5 = vweird.f32 %v6202_v63  ;;  %v1345_v52 = vor.u32 1.1754944e-38, %v1344_v41  ;;  %v10093_v41 = vld [vmem:[#allocation23_spill] sm:$0xff] }
 0x583   :  { %v1349_v36 = vmul.f32 %v6204_v30, %v1272_v26  ;;  %5868 = vmatpush.xpose.msk.msrb.mxu2 %vm706_vm13, %v7480_v42  ;;  %5835 = vmatmul.msk.f32.gmra.mxu0 %vm706_vm13, %v2543_v21  ;;  %v1331_v15 = vsel %vm1328_vm2, %v1330_v44, %v1326_v40  ;;  %v8018_v42 = vadd.f32 %v1814_v19, %v7887_v38  ;;  %vm1340_vm10 = vmor %vm1338_vm6, %vm1339_vm5  ;;  %vm1343_vm11 = vcmp.eq.f32.partialorder %v1342_v6, 8.507059e+37  ;;  %v10095_v6 = vld [vmem:[#allocation31_spill] sm:$0xff] }
 0x584   :  { %v1335_v8 = vsub.f32 1.0, %v1334_v47  ;;  %v1332_v33 = vmul.f32 %v7922_v53, %v1331_v15  ;;  %vm1354_vm14 = vweird.f32 %v6204_v30  ;;  %v1359_v21 = vand.u32 2147483648, %v1272_v26  ;;  %v10088_v15 = vld [vmem:[#allocation25_spill] sm:$0xff] }
 0x585   :  { %v1350_v35 = vsub.f32 1.0, %v1349_v36  ;;  %v1357_v36 = vand.u32 2147483647, %v1272_v26  ;;  %vm1355_vm12 = vmor %vm1353_vm15, %vm1354_vm14  ;;  %v8036_v26 = vadd.f32 %v8002_v16, %v7869_v9 }
 0x586   :  { %5728 = vmatmul.msk.f32.gmra.mxu2 %vm1176_vm9, %v1332_v33  ;;  %v1336_v54 = vmul.f32 %v6202_v63, %v1335_v8 }
 0x587   :  { %5869 = vmatpush.xpose.msk.msrb.mxu2 %vm706_vm13, %v7492_v60  ;;  %v1351_v61 = vmul.f32 %v6204_v30, %v1350_v35  ;;  %v1856_v60 = vsel %vm1176_vm9, %v8018_v42, -inf  ;;  %vm1358_vm0 = vcmp.eq.f32.partialorder %v1357_v36, 8.507059e+37  ;;  %v1853_v33 = vsel %vm1176_vm9, %v8036_v26, -inf  ;;  %v10092_v35 = vld [vmem:[#allocation29_spill] sm:$0xff]  ;;  %v10096_v36 = vld [vmem:[#allocation22_spill] sm:$0xff] }
 0x588   :  { %v1337_v56 = vadd.f32 %v6202_v63, %v1336_v54 }
 0x589   :  { %v1352_v44 = vadd.f32 %v6204_v30, %v1351_v61 }
 0x58a   :  { %v1341_v53 = vsel %vm1340_vm10, %v6202_v63, %v1337_v56  ;;  %v1360_v63 = vor.u32 1.1754944e-38, %v1359_v21 }
 0x58b   :  { %5870 = vmatpush.xpose.msk.msrb.mxu2 %vm706_vm13, %v7630_v1  ;;  %v1346_v47 = vsel %vm1343_vm11, %v1345_v52, %v1341_v53  ;;  %v1356_v27 = vsel %vm1355_vm12, %v6204_v30, %v1352_v44  ;;  %v10090_v30 = vld [vmem:[#allocation27_spill] sm:$0xff] }
 0x58c   :  { %v1347_v40 = vmul.f32 %v7927_v5, %v1346_v47  ;;  %v1361_v1 = vsel %vm1358_vm0, %v1360_v63, %v1356_v27  ;;  %v10089_v5 = vld [vmem:[#allocation26_spill] sm:$0xff] }
 0x58d   :  { %1857 = vmax.xlane.f32.xlu1 %v1856_v60  ;;  %v1362_v8 = vmul.f32 %v7929_v11, %v1361_v1  ;;  %v1817_v11 = vpop.f32.mrf.mxu0 }
 0x58e   :  { %5729 = vmatmul.msk.f32.gmra.mxu2 %vm1176_vm9, %v1347_v40  ;;  %v8047_v19 = vadd.f32 %v1817_v11, %v7813_v13 }
 0x58f   :  { %5871 = vmatpush.xpose.msk.msrb.mxu2 %vm706_vm13, %v7642_v62  ;;  %v10091_v62 = vld [vmem:[#allocation28_spill] sm:$0xff] }
 0x590   :  { %v1859_v16 = vsel %vm1176_vm9, %v8047_v19, -inf }
 0x593   :  { %5872 = vmatpush.xpose.msk.msrb.mxu2 %vm706_vm13, %v10088_v15 }
 0x595   :  { %v8063_v56 = vpop.f32.mrf.mxu0 }
 0x596   :  { %5730 = vmatmul.msk.f32.gmra.mxu2 %vm1176_vm9, %v1362_v8 }
 0x597   :  { %5873 = vmatpush.xpose.msk.msrb.mxu2 %vm706_vm13, %v10089_v5 }
 0x59b   :  { %5874 = vmatpush.xpose.msk.msrb.mxu2 %vm706_vm13, %v10090_v30 }
 0x59d   :  { %v8074_v5 = vpop.f32.mrf.mxu0 }
 0x59f   :  { %5875 = vmatpush.xpose.msk.msrb.mxu2 %vm706_vm13, %v10091_v62 }
 0x5a1   :  { %1854 = vmax.xlane.f32.xlu2 %v1853_v33 }
 0x5a3   :  { %5876 = vmatpush.xpose.msk.msrb.mxu2 %vm706_vm13, %v7672_v34  ;;  %v10094_v34 = vld [vmem:[#allocation30_spill] sm:$0xff] }
 0x5a6   :  { %2548 = vrot.lane.b32.xlu1 %v7565_v43, %s6486_s7 }
 0x5a7   :  { %5877 = vmatpush.xpose.msk.msrb.mxu2 %vm706_vm13, %v7683_v49 }
 0x5ab   :  { %1860 = vmax.xlane.f32.xlu0 %v1859_v16  ;;  %5878 = vmatpush.xpose.msk.msrb.mxu2 %vm706_vm13, %v10092_v35 }
 0x5ad   :  { %v8067_v52 = vpop.xlane.xlu1 %1286 }
 0x5ae   :  { %6069 = vrot.lane.b32.xlu1 %v10093_v41, %s6488_s8 }
 0x5af   :  { %5879 = vmatpush.xpose.msk.msrb.mxu2 %vm706_vm13, %v10094_v34 }
 0x5b0   :  { %v1275_v54 = vpop.xlane.xlu2 %1274 }
 0x5b1   :  { %6205 = vrcp.f32 %v1275_v54  ;;  %v1374_v47 = vand.u32 2147483648, %v1275_v54  ;;  %v1372_v60 = vand.u32 2147483647, %v1275_v54  ;;  %vm1368_vm2 = vweird.f32 %v1275_v54 }
 0x5b3   :  { %5880 = vmatpush.xpose.msk.msrb.mxu2 %vm706_vm13, %v10095_v6  ;;  %v1375_v27 = vor.u32 1.1754944e-38, %v1374_v47  ;;  %vm1373_vm6 = vcmp.eq.f32.partialorder %v1372_v60, 8.507059e+37 }
 0x5b5   :  { %v8076_v33 = vpop.xlane.xlu1 %1292 }
 0x5b7   :  { %v6206_v61 = vpop.eup %6205 }
 0x5b8   :  { %v1364_v49 = vmul.f32 %v6206_v61, %v1275_v54  ;;  %vm1369_vm1 = vweird.f32 %v6206_v61 }
 0x5b9   :  { %3311 = vrot.lane.b32.xlu2 %v7391_v22, %s6487_s3  ;;  %vm1370_vm5 = vmor %vm1368_vm2, %vm1369_vm1  ;;  %v10097_v22 = vld [vmem:[#allocation24_spill] sm:$0xff] }
 0x5ba   :  { %v1365_v53 = vsub.f32 1.0, %v1364_v49 }
 0x5bb   :  { %v1278_v44 = vpop.xlane.xlu2 %1277 }
 0x5bc   :  { %6207 = vrcp.f32 %v1278_v44  ;;  %v1366_v21 = vmul.f32 %v6206_v61, %v1365_v53  ;;  %v1389_v16 = vand.u32 2147483648, %v1278_v44  ;;  %v1387_v34 = vand.u32 2147483647, %v1278_v44 }
 0x5bd   :  { %vm1383_vm11 = vweird.f32 %v1278_v44 }
 0x5be   :  { %v1367_v40 = vadd.f32 %v6206_v61, %v1366_v21  ;;  %v1390_v6 = vor.u32 1.1754944e-38, %v1389_v16  ;;  %vm1388_vm15 = vcmp.eq.f32.partialorder %v1387_v34, 8.507059e+37  ;;  %v8084_v21 = vpop.xlane.xlu0 %1295 }
 0x5bf   :  { %6074 = vrot.lane.b32.xlu0 %v10096_v36, %s6488_s8 }
 0x5c0   :  { %v1371_v63 = vsel %vm1370_vm5, %v6206_v61, %v1367_v40  ;;  %v8086_v40 = vpop.f32.mrf.mxu0 }
 0x5c1   :  { %6064 = vrot.lane.b32.xlu2 %v10097_v22, %s6488_s8  ;;  %v1376_v1 = vsel %vm1373_vm6, %v1375_v27, %v1371_v63  ;;  %v8089_v63 = vpop.xlane.xlu1 %1298 }
 0x5c2   :  { %v6208_v15 = vpop.eup %6207  ;;  %v1377_v8 = vmul.f32 %v7954_v17, %v1376_v1 }
 0x5c3   :  { %v1379_v30 = vmul.f32 %v6208_v15, %v1278_v44  ;;  %v1281_v62 = vpop.xlane.xlu2 %1280  ;;  %vm1384_vm10 = vweird.f32 %v6208_v15 }
 0x5c4   :  { %6209 = vrcp.f32 %v1281_v62  ;;  %5731 = vmatmul.msk.f32.gmra.mxu2 %vm1176_vm9, %v1377_v8  ;;  %vm1385_vm14 = vmor %vm1383_vm11, %vm1384_vm10  ;;  %v1404_v44 = vand.u32 2147483648, %v1281_v62  ;;  %vm1398_vm0 = vweird.f32 %v1281_v62 }
 0x5c5   :  { %v1380_v11 = vsub.f32 1.0, %v1379_v30  ;;  %6211 = vrcp.f32 %v8067_v52 }
 0x5c6   :  { %v1405_v16 = vor.u32 1.1754944e-38, %v1404_v44 }
 0x5c7   :  { %v1381_v35 = vmul.f32 %v6208_v15, %v1380_v11 }
 0x5c9   :  { %3313 = vrot.lane.b32.xlu2 %v7565_v43, %s6487_s3  ;;  %v1382_v17 = vadd.f32 %v6208_v15, %v1381_v35 }
 0x5ca   :  { %v6210_v54 = vpop.eup %6209 }
 0x5cb   :  { %v1394_v61 = vmul.f32 %v6210_v54, %v1281_v62  ;;  %v1284_v49 = vpop.xlane.xlu2 %1283  ;;  %v1386_v53 = vsel %vm1385_vm14, %v6208_v15, %v1382_v17  ;;  %v8082_v47 = vpop.eup %6211  ;;  %vm1399_vm12 = vweird.f32 %v6210_v54  ;;  %v1402_v15 = vand.u32 2147483647, %v1281_v62 }
 0x5cc   :  { %6213 = vrcp.f32 %v1284_v49  ;;  %v1391_v60 = vsel %vm1388_vm15, %v1390_v6, %v1386_v53  ;;  %v1424_v1 = vmul.f32 %v8082_v47, %v8067_v52  ;;  %vm1400_vm1 = vmor %vm1398_vm0, %vm1399_vm12  ;;  %v8098_v6 = vadd.f32 %v8063_v56, %v7881_v51  ;;  %v8102_v53 = vpop.permute.xlu0 %3309  ;;  %v8109_v56 = vpop.f32.mrf.mxu0 }
 0x5cd   :  { %v1395_v27 = vsub.f32 1.0, %v1394_v61  ;;  %v1392_v43 = vmul.f32 %v7968_v31, %v1391_v60  ;;  %vm1403_vm2 = vcmp.eq.f32.partialorder %v1402_v15, 8.507059e+37  ;;  %v1884_v61 = vsub.f32 %v7773_v29, %v7910_v58 }
 0x5ce   :  { %v1425_v35 = vsub.f32 1.0, %v1424_v1  ;;  %v1417_v58 = vand.u32 2147483647, %v1284_v49  ;;  %vm1413_vm6 = vweird.f32 %v1284_v49  ;;  %vm1429_vm10 = vweird.f32 %v8082_v47 }
 0x5cf   :  { %v1396_v8 = vmul.f32 %v6210_v54, %v1395_v27  ;;  %5732 = vmatmul.msk.f32.gmra.mxu2 %vm1176_vm9, %v1392_v43  ;;  %v1885_v43 = vsub.f32 %v7787_v57, %v7913_v59  ;;  %vm1428_vm15 = vweird.f32 %v8067_v52 }
 0x5d0   :  { %v1426_v1 = vmul.f32 %v8082_v47, %v1425_v35  ;;  %vm1418_vm14 = vcmp.eq.f32.partialorder %v1417_v58, 8.507059e+37  ;;  %vm8137_vm12 = vmor %vm1428_vm15, %vm1429_vm10 }
 0x5d1   :  { %v1397_v30 = vadd.f32 %v6210_v54, %v1396_v8  ;;  %v1899_v8 = vmul.f32 1.442695, %v1884_v61  ;;  %v1901_v15 = vmul.f32 1.442695, %v1885_v43  ;;  %v1434_v61 = vand.u32 2147483648, %v8067_v52 }
 0x5d2   :  { %v6214_v11 = vpop.eup %6213  ;;  %v1886_v43 = vsub.f32 %v7861_v20, %v7942_v0  ;;  %v1883_v0 = vsub.f32 %v7758_v25, %v7908_v48 }
 0x5d3   :  { %v1409_v34 = vmul.f32 %v6214_v11, %v1284_v49  ;;  %v8094_v17 = vpop.xlane.xlu2 %1289  ;;  %v1401_v31 = vsel %vm1400_vm1, %v6210_v54, %v1397_v30  ;;  %v1419_v54 = vand.u32 2147483648, %v1284_v49  ;;  %vm1414_vm5 = vweird.f32 %v6214_v11 }
 0x5d4   :  { %6215 = vrcp.f32 %v8094_v17  ;;  %v1406_v62 = vsel %vm1403_vm2, %v1405_v16, %v1401_v31  ;;  %vm1415_vm11 = vmor %vm1413_vm6, %vm1414_vm5  ;;  %v8126_v49 = vadd.f32 %v8074_v5, %v7824_v46  ;;  %v1897_v25 = vmul.f32 1.442695, %v1883_v0 }
 0x5d5   :  { %v1410_v60 = vsub.f32 1.0, %v1409_v34  ;;  %v1407_v27 = vmul.f32 %v7977_v45, %v1406_v62  ;;  %6217 = vrcp.f32 %v8076_v33  ;;  %v2545_v44 = vpop.permute.xlu1 %2544  ;;  %v1862_v45 = vsel %vm1176_vm9, %v8098_v6, -inf }
 0x5d6   :  { %5836 = vmatmul.msk.f32.gmra.mxu0 %vm706_vm13, %v2545_v44  ;;  %v1420_v30 = vor.u32 1.1754944e-38, %v1419_v54  ;;  %v1427_v34 = vadd.f32 %v8082_v47, %v1426_v1  ;;  %6219 = vpow2.f32 %v1899_v8  ;;  %v2547_v54 = vpop.permute.xlu0 %2546  ;;  %v1865_v1 = vsel %vm1176_vm9, %v8126_v49, -inf }
 0x5d7   :  { %v1411_v29 = vmul.f32 %v6214_v11, %v1410_v60  ;;  %5733 = vmatmul.msk.f32.gmra.mxu2 %vm1176_vm9, %v1407_v27  ;;  %6221 = vrcp.f32 %v8084_v21  ;;  %v1449_v48 = vand.u32 2147483648, %v8094_v17  ;;  %vm1443_vm2 = vweird.f32 %v8094_v17 }
 0x5d8   :  { %1863 = vmax.xlane.f32.xlu1 %v1862_v45  ;;  %6223 = vpow2.f32 %v1901_v15  ;;  %v1431_v20 = vsel %vm8137_vm12, %v8082_v47, %v1427_v34  ;;  %v1903_v45 = vmul.f32 1.442695, %v1886_v43 }
 0x5d9   :  { %v1412_v57 = vadd.f32 %v6214_v11, %v1411_v29  ;;  %v8153_v29 = vpop.f32.mrf.mxu0  ;;  %6225 = vrcp.f32 %v8089_v63 }
 0x5da   :  { %v8116_v59 = vpop.eup %6215  ;;  %6227 = vpow2.f32 %v1903_v45 }
 0x5db   :  { %v1439_v16 = vmul.f32 %v8116_v59, %v8094_v17  ;;  %v1416_v35 = vsel %vm1415_vm11, %v6214_v11, %v1412_v57  ;;  %v8122_v31 = vpop.eup %6217  ;;  %v1432_v11 = vand.u32 2147483647, %v8067_v52  ;;  %v1435_v52 = vor.u32 1.1754944e-38, %v1434_v61 }
 0x5dc   :  { %v1421_v62 = vsel %vm1418_vm14, %v1420_v30, %v1416_v35  ;;  %v1454_v44 = vmul.f32 %v8122_v31, %v8076_v33  ;;  %v8155_v58 = vpop.eup %6219  ;;  %vm1444_vm1 = vweird.f32 %v8116_v59  ;;  %v1447_v35 = vand.u32 2147483647, %v8094_v17 }
 0x5dd   :  { %v1440_v60 = vsub.f32 1.0, %v1439_v16  ;;  %v1422_v27 = vmul.f32 %v7982_v55, %v1421_v62  ;;  %vm1433_vm0 = vcmp.eq.f32.partialorder %v1432_v11, 8.507059e+37  ;;  %v8159_v15 = vpop.eup %6221  ;;  %vm1445_vm5 = vmor %vm1443_vm2, %vm1444_vm1  ;;  %6229 = vpow2.f32 %v1897_v25 }
 0x5de   :  { %5837 = vmatmul.msk.f32.gmra.mxu0 %vm706_vm13, %v2547_v54  ;;  %v1436_v8 = vsel %vm1433_vm0, %v1435_v52, %v1431_v20  ;;  %v1455_v57 = vsub.f32 1.0, %v1454_v44  ;;  %v8162_v30 = vpop.eup %6223  ;;  %v1469_v34 = vmul.f32 %v8159_v15, %v8084_v21  ;;  %v1928_v17 = vsel %vm1176_vm9, %v8155_v58, 0.0 }
 0x5df   :  { %v1441_v55 = vmul.f32 %v8116_v59, %v1440_v60  ;;  %5734 = vmatmul.msk.f32.gmra.mxu2 %vm1176_vm9, %v1422_v27  ;;  %v1437_v16 = vmul.f32 %v7949_v32, %v1436_v8  ;;  %v1450_v60 = vor.u32 1.1754944e-38, %v1449_v48  ;;  %v1931_v32 = vsel %vm1176_vm9, %v8162_v30, 0.0  ;;  %v8181_v54 = vpop.eup %6225 }
 0x5e0   :  { %1866 = vmax.xlane.f32.xlu1 %v1865_v1  ;;  %v1456_v61 = vmul.f32 %v8122_v31, %v1455_v57  ;;  %vm1448_vm6 = vcmp.eq.f32.partialorder %v1447_v35, 8.507059e+37  ;;  %v1470_v43 = vsub.f32 1.0, %v1469_v34  ;;  %vm1459_vm10 = vweird.f32 %v8122_v31  ;;  %v8178_v5 = vpop.xlane.xlu0 %1301  ;;  %v8188_v20 = vpop.eup %6227 }
 0x5e1   :  { %v1442_v47 = vadd.f32 %v8116_v59, %v1441_v55  ;;  %v1835_v11 = vpop.f32.mrf.mxu0  ;;  %v8185_v44 = vadd.f32 %v8086_v40, %v7898_v39  ;;  %v1464_v55 = vand.u32 2147483648, %v8076_v33  ;;  %vm1458_vm11 = vweird.f32 %v8076_v33 }
 0x5e2   :  { %v1462_v52 = vand.u32 2147483647, %v8076_v33  ;;  %vm1460_vm14 = vmor %vm1458_vm11, %vm1459_vm10  ;;  %6231 = vrcp.f32 %v8178_v5  ;;  %v1471_v8 = vmul.f32 %v8159_v15, %v1470_v43  ;;  %v1484_v40 = vmul.f32 %v8181_v54, %v8089_v63 }
 0x5e3   :  { %v1446_v62 = vsel %vm1445_vm5, %v8116_v59, %v1442_v47  ;;  %v1457_v59 = vadd.f32 %v8122_v31, %v1456_v61  ;;  %v8193_v1 = vpop.eup %6229  ;;  %v1465_v57 = vor.u32 1.1754944e-38, %v1464_v55  ;;  %v1934_v33 = vsel %vm1176_vm9, %v8188_v20, 0.0 }
 0x5e4   :  { %v1451_v27 = vsel %vm1448_vm6, %v1450_v60, %v1446_v62  ;;  %v1925_v47 = vsel %vm1176_vm9, %v8193_v1, 0.0  ;;  %vm1463_vm15 = vcmp.eq.f32.partialorder %v1462_v52, 8.507059e+37  ;;  %vm1474_vm12 = vweird.f32 %v8159_v15 }
 0x5e5   :  { %v1452_v0 = vmul.f32 %v7987_v37, %v1451_v27  ;;  %v1461_v45 = vsel %vm1460_vm14, %v8122_v31, %v1457_v59  ;;  %v1868_v37 = vsel %vm1176_vm9, %v8185_v44, -inf  ;;  %v1485_v48 = vsub.f32 1.0, %v1484_v40 }
 0x5e6   :  { %v1466_v25 = vsel %vm1463_vm15, %v1465_v57, %v1461_v45  ;;  %v1472_v31 = vadd.f32 %v8159_v15, %v1471_v8  ;;  %v8211_v34 = vadd.f32 %v8153_v29, %v7844_v7  ;;  %v1479_v61 = vand.u32 2147483648, %v8084_v21 }
 0x5e7   :  { %5735 = vmatmul.msk.f32.gmra.mxu2 %vm1176_vm9, %v1437_v16  ;;  %vm1473_vm0 = vweird.f32 %v8084_v21  ;;  %v1486_v43 = vmul.f32 %v8181_v54, %v1485_v48  ;;  %vm1489_vm5 = vweird.f32 %v8181_v54  ;;  %v8226_v8 = vadd.f32 %v1835_v11, %v7851_v2 }
 0x5e8   :  { %1932 = vadd.xlane.f32.xlu1 %v1931_v32  ;;  %v6232_v35 = vpop.eup %6231  ;;  %v1467_v32 = vmul.f32 %v7962_v10, %v1466_v25  ;;  %vm1475_vm1 = vmor %vm1473_vm0, %vm1474_vm12  ;;  %v1480_v55 = vor.u32 1.1754944e-38, %v1479_v61  ;;  %v1494_v40 = vand.u32 2147483648, %v8089_v63  ;;  %vm1488_vm6 = vweird.f32 %v8089_v63 }
 0x5e9   :  { %1929 = vadd.xlane.f32.xlu0 %v1928_v17  ;;  %v1838_v60 = vpop.f32.mrf.mxu0  ;;  %v1477_v17 = vand.u32 2147483647, %v8084_v21  ;;  %v1499_v59 = vmul.f32 %v6232_v35, %v8178_v5  ;;  %v1476_v29 = vsel %vm1475_vm1, %v8159_v15, %v1472_v31  ;;  %v1487_v52 = vadd.f32 %v8181_v54, %v1486_v43  ;;  %vm1490_vm10 = vmor %vm1488_vm6, %vm1489_vm5 }
 0x5ea   :  { %v1492_v45 = vand.u32 2147483647, %v8089_v63  ;;  %v1877_v11 = vsel %vm1176_vm9, %v8226_v8, -inf  ;;  %vm1504_vm14 = vweird.f32 %v6232_v35  ;;  %v1509_v63 = vand.u32 2147483648, %v8178_v5 }
 0x5eb   :  { %vm1478_vm2 = vcmp.eq.f32.partialorder %v1477_v17, 8.507059e+37  ;;  %v1500_v21 = vsub.f32 1.0, %v1499_v59  ;;  %vm1503_vm15 = vweird.f32 %v8178_v5 }
 0x5ec   :  { %v1481_v10 = vsel %vm1478_vm2, %v1480_v55, %v1476_v29  ;;  %vm1493_vm11 = vcmp.eq.f32.partialorder %v1492_v45, 8.507059e+37  ;;  %vm1505_vm12 = vmor %vm1503_vm15, %vm1504_vm14  ;;  %v1510_v61 = vor.u32 1.1754944e-38, %v1509_v63  ;;  %v10101_v29 = vld [vmem:[#allocation20_spill] sm:$0xff] }
 0x5ed   :  { %v1482_v15 = vmul.f32 %v7938_v18, %v1481_v10  ;;  %v8237_v18 = vadd.f32 %v1838_v60, %v7858_v14  ;;  %v10100_v60 = vld [vmem:[#allocation21_spill] sm:$0xff] }
 0x5ef   :  { %5736 = vmatmul.msk.f32.gmra.mxu2 %vm1176_vm9, %v1452_v0  ;;  %v1874_v0 = vsel %vm1176_vm9, %v8211_v34, -inf }
 0x5f0   :  { %1869 = vmax.xlane.f32.xlu1 %v1868_v37  ;;  %v1501_v37 = vmul.f32 %v6232_v35, %v1500_v21 }
 0x5f1   :  { %1935 = vadd.xlane.f32.xlu0 %v1934_v33  ;;  %v2651_v57 = vpop.f32.mrf.mxu0  ;;  %v1491_v33 = vsel %vm1490_vm10, %v8181_v54, %v1487_v52  ;;  %v1507_v54 = vand.u32 2147483647, %v8178_v5 }
 0x5f2   :  { %1926 = vadd.xlane.f32.xlu2 %v1925_v47  ;;  %v1495_v47 = vor.u32 1.1754944e-38, %v1494_v40  ;;  %v1502_v48 = vadd.f32 %v6232_v35, %v1501_v37 }
 0x5f3   :  { %v6060_v16 = vpop.permute.xlu0 %6059  ;;  %vm1508_vm0 = vcmp.eq.f32.partialorder %v1507_v54, 8.507059e+37 }
 0x5f4   :  { %v6061_v62 = vunpack.i.l.bf16 %v6060_v16  ;;  %v6062_v27 = vunpack.i.h.bf16 %v6060_v16  ;;  %v1496_v25 = vsel %vm1493_vm11, %v1495_v47, %v1491_v33  ;;  %v1506_v31 = vsel %vm1505_vm12, %v6232_v35, %v1502_v48 }
 0x5f5   :  { %v1497_v16 = vmul.f32 %v7971_v4, %v1496_v25  ;;  %v1511_v17 = vsel %vm1508_vm0, %v1510_v61, %v1506_v31  ;;  %v8251_v4 = vpop.permute.xlu2 %3307 }
 0x5f6   :  { %2263 = vmatpush.msra.mxu1 %v6061_v62  ;;  %v1880_v62 = vsel %vm1176_vm9, %v8237_v18, -inf  ;;  %v1512_v5 = vmul.f32 %v7996_v28, %v1511_v17 }
 0x5f7   :  { %5737 = vmatmul.msk.f32.gmra.mxu2 %vm1176_vm9, %v1467_v32 }
 0x5f8   :  { %2264 = vmatpush.msra.mxu1 %v6062_v27  ;;  %v8249_v27 = vadd.f32 %v2651_v57, %v7755_v12  ;;  %v10102_v57 = vld [vmem:[#allocation19_spill] sm:$0xff] }
 0x5f9   :  { %1875 = vmax.xlane.f32.xlu0 %v1874_v0  ;;  %v2654_v32 = vpop.f32.mrf.mxu0 }
 0x5fa   :  { %v2693_v43 = vsel %vm1176_vm9, %v8249_v27, -inf  ;;  %v8260_v0 = vadd.f32 %v2654_v32, %v7765_v3 }
 0x5fc   :  { %v2696_v40 = vsel %vm1176_vm9, %v8260_v0, -inf }
 0x5ff   :  { %5738 = vmatmul.msk.f32.gmra.mxu2 %vm1176_vm9, %v1482_v15 }
 0x600   :  { %v1858_v59 = vpop.xlane.xlu1 %1857 }
 0x601   :  { %1878 = vmax.xlane.f32.xlu0 %v1877_v11  ;;  %v1628_v35 = vpop.f32.mrf.mxu2  ;;  %v2657_v55 = vpop.f32.mrf.mxu0  ;;  %v1888_v28 = vsub.f32 %v8018_v42, %v1858_v59 }
 0x603   :  { %v1907_v37 = vmul.f32 1.442695, %v1888_v28 }
 0x607   :  { %5739 = vmatmul.msk.f32.gmra.mxu2 %vm1176_vm9, %v1497_v16 }
 0x609   :  { %1881 = vmax.xlane.f32.xlu0 %v1880_v62  ;;  %v1631_v45 = vpop.f32.mrf.mxu2  ;;  %v2660_v33 = vpop.f32.mrf.mxu0 }
 0x60a   :  { %6079 = vrot.lane.b32.xlu2 %v10100_v60, %s6488_s8  ;;  %v8284_v54 = vadd.f32 %v2660_v33, %v7795_v24 }
 0x60f   :  { %5740 = vmatmul.msk.f32.gmra.mxu2 %vm1176_vm9, %v1512_v5 }
 0x611   :  { %2694 = vmax.xlane.f32.xlu0 %v2693_v43  ;;  %v1634_v31 = vpop.f32.mrf.mxu2 }
 0x612   :  { %6084 = vrot.lane.b32.xlu2 %v10101_v29, %s6488_s8 }
 0x614   :  { %v1855_v10 = vpop.xlane.xlu2 %1854 }
 0x615   :  { %v1887_v21 = vsub.f32 %v8036_v26, %v1855_v10  ;;  %v8271_v26 = vadd.f32 %v2657_v55, %v7781_v50 }
 0x617   :  { %v1905_v52 = vmul.f32 1.442695, %v1887_v21  ;;  %5797 = vmatmul.msk.f32.vlgmr.msra.gmra.mxu2 %vm706_vm13, %v1628_v35  ;;  %v2699_v48 = vsel %vm1176_vm9, %v8271_v26, -inf  ;;  %v2702_v35 = vsel %vm1176_vm9, %v8284_v54, -inf }
 0x618   :  { %v2549_v15 = vpop.permute.xlu1 %2548 }
 0x619   :  { %6233 = vpow2.f32 %v1905_v52  ;;  %2697 = vmax.xlane.f32.xlu0 %v2696_v40  ;;  %5838 = vmatmul.msk.f32.gmra.mxu0 %vm706_vm13, %v2549_v15  ;;  %v1637_v28 = vpop.f32.mrf.mxu2 }
 0x61a   :  { %6089 = vrot.lane.b32.xlu2 %v10102_v57, %s6488_s8  ;;  %6235 = vpow2.f32 %v1907_v37 }
 0x61c   :  { %v8273_v42 = vpop.permute.xlu2 %3311 }
 0x61e   :  { %v1861_v47 = vpop.xlane.xlu0 %1860 }
 0x61f   :  { %v8275_v11 = vpop.eup %6233  ;;  %v1889_v25 = vsub.f32 %v8047_v19, %v1861_v47  ;;  %5798 = vmatmul.msk.f32.gmra.mxu2 %vm706_vm13, %v1631_v45  ;;  %v2663_v19 = vpop.f32.mrf.mxu0 }
 0x620   :  { %v1937_v63 = vsel %vm1176_vm9, %v8275_v11, 0.0  ;;  %v8286_v62 = vpop.eup %6235  ;;  %v6070_v17 = vpop.permute.xlu1 %6069  ;;  %v8294_v55 = vadd.f32 %v2663_v19, %v7869_v9 }
 0x621   :  { %2700 = vmax.xlane.f32.xlu0 %v2699_v48  ;;  %1938 = vadd.xlane.f32.xlu1 %v1937_v63  ;;  %v1909_v16 = vmul.f32 1.442695, %v1889_v25  ;;  %v1940_v43 = vsel %vm1176_vm9, %v8286_v62, 0.0  ;;  %v6071_v59 = vunpack.i.l.bf16 %v6070_v17  ;;  %v6072_v10 = vunpack.i.h.bf16 %v6070_v17  ;;  %v10105_v48 = vld [vmem:[#allocation41_spill] sm:$0xff] }
 0x622   :  { %10103 = vst [vmem:[#allocation25_spill] sm:$0xff] %v8294_v55  ;;  %v2705_v52 = vsel %vm1176_vm9, %v8294_v55, -inf  ;;  %v8310_v63 = vadd.f32 %v8109_v56, %v10105_v48 }
 0x623   :  { %6237 = vpow2.f32 %v1909_v16 }
 0x624   :  { %v6065_v61 = vpop.permute.xlu2 %6064  ;;  %v1871_v16 = vsel %vm1176_vm9, %v8310_v63, -inf }
 0x625   :  { %v6066_v32 = vunpack.i.l.bf16 %v6065_v61  ;;  %v6067_v5 = vunpack.i.h.bf16 %v6065_v61 }
 0x627   :  { %2265 = vmatpush.msra.mxu1 %v6066_v32  ;;  %5799 = vmatmul.msk.f32.gmra.mxu2 %vm706_vm13, %v1634_v31  ;;  %v2666_v15 = vpop.f32.mrf.mxu0 }
 0x628   :  { %v8304_v33 = vadd.f32 %v2666_v15, %v7887_v38 }
 0x629   :  { %2703 = vmax.xlane.f32.xlu0 %v2702_v35  ;;  %1941 = vadd.xlane.f32.xlu1 %v1940_v43  ;;  %v8296_v21 = vpop.eup %6237 }
 0x62a   :  { %2266 = vmatpush.msra.mxu1 %v6067_v5  ;;  %v1943_v40 = vsel %vm1176_vm9, %v8296_v21, 0.0  ;;  %10104 = vst [vmem:[#allocation26_spill] sm:$0xff] %v8304_v33  ;;  %v2708_v25 = vsel %vm1176_vm9, %v8304_v33, -inf }
 0x62c   :  { %2267 = vmatpush.msra.mxu1 %v6071_v59 }
 0x62e   :  { %2268 = vmatpush.msra.mxu1 %v6072_v10 }
 0x62f   :  { %5800 = vmatmul.msk.f32.gmra.mxu2 %vm706_vm13, %v1637_v28  ;;  %v8329_v28 = vpop.permute.xlu2 %3313 }
 0x631   :  { %2706 = vmax.xlane.f32.xlu0 %v2705_v52  ;;  %1944 = vadd.xlane.f32.xlu1 %v1943_v40  ;;  %v6075_v45 = vpop.permute.xlu0 %6074  ;;  %v2669_v40 = vpop.f32.mrf.mxu0 }
 0x632   :  { %v6076_v37 = vunpack.i.l.bf16 %v6075_v45  ;;  %v6077_v47 = vunpack.i.h.bf16 %v6075_v45  ;;  %v8339_v45 = vadd.f32 %v2669_v40, %v7813_v13 }
 0x634   :  { %2269 = vmatpush.msra.mxu1 %v6076_v37  ;;  %10106 = vst [vmem:[#allocation27_spill] sm:$0xff] %v8339_v45 }
 0x636   :  { %2270 = vmatpush.msra.mxu1 %v6077_v47 }
 0x639   :  { %2709 = vmax.xlane.f32.xlu0 %v2708_v25 }
 0x643   :  { %1872 = vmax.xlane.f32.xlu2 %v1871_v16 }
 0x647   :  { %v1640_v31 = vpop.f32.mrf.mxu2 }
 0x648   :  { %5801 = vmatmul.msk.f32.gmra.mxu2 %vm706_vm13, %v1640_v31 }
 0x64b   :  { %v1864_v61 = vpop.xlane.xlu1 %1863 }
 0x64c   :  { %v1890_v32 = vsub.f32 %v8098_v6, %v1864_v61  ;;  %v2711_v61 = vsel %vm1176_vm9, %v8339_v45, -inf }
 0x64d   :  { %6094 = vrot.lane.b32.xlu0 %v7284_v23, %s10028_s28 }
 0x64e   :  { %v1911_v19 = vmul.f32 1.442695, %v1890_v32 }
 0x650   :  { %6239 = vpow2.f32 %v1911_v19 }
 0x652   :  { %v1643_v17 = vpop.f32.mrf.mxu2 }
 0x653   :  { %5802 = vmatmul.msk.f32.gmra.mxu2 %vm706_vm13, %v1643_v17  ;;  %v1867_v56 = vpop.xlane.xlu1 %1866 }
 0x654   :  { %v1891_v5 = vsub.f32 %v8126_v49, %v1867_v56 }
 0x655   :  { %6109 = vrot.lane.b32.xlu0 %v7284_v23, %s10026_s29 }
 0x656   :  { %v8322_v35 = vpop.eup %6239  ;;  %v1913_v43 = vmul.f32 1.442695, %v1891_v5 }
 0x657   :  { %v1946_v6 = vsel %vm1176_vm9, %v8322_v35, 0.0 }
 0x658   :  { %6241 = vpow2.f32 %v1913_v43  ;;  %1947 = vadd.xlane.f32.xlu1 %v1946_v6 }
 0x65a   :  { %v1646_v59 = vpop.f32.mrf.mxu2 }
 0x65b   :  { %5803 = vmatmul.msk.f32.gmra.mxu2 %vm706_vm13, %v1646_v59  ;;  %v8327_v10 = vpop.xlane.xlu1 %1932 }
 0x65c   :  { %v8331_v49 = vpop.xlane.xlu0 %1929  ;;  %vm2002_vm0 = vweird.f32 %v8327_v10 }
 0x65d   :  { %vm1987_vm11 = vweird.f32 %v8331_v49 }
 0x65e   :  { %v8333_v52 = vpop.eup %6241 }
 0x65f   :  { %v1949_v23 = vsel %vm1176_vm9, %v8333_v52, 0.0 }
 0x660   :  { %1950 = vadd.xlane.f32.xlu1 %v1949_v23 }
 0x662   :  { %v1649_v15 = vpop.f32.mrf.mxu2 }
 0x663   :  { %5804 = vmatmul.msk.f32.gmra.mxu2 %vm706_vm13, %v1649_v15  ;;  %v1870_v37 = vpop.xlane.xlu1 %1869 }
 0x664   :  { %v1892_v47 = vsub.f32 %v8185_v44, %v1870_v37  ;;  %v8342_v25 = vpop.xlane.xlu0 %1935 }
 0x665   :  { %v1927_v16 = vpop.xlane.xlu2 %1926 }
 0x666   :  { %v1915_v31 = vmul.f32 1.442695, %v1892_v47  ;;  %6243 = vrcp.f32 %v1927_v16  ;;  %vm1972_vm2 = vweird.f32 %v1927_v16  ;;  %v1976_v2 = vand.u32 2147483647, %v1927_v16 }
 0x668   :  { %6245 = vpow2.f32 %v1915_v31  ;;  %2712 = vmax.xlane.f32.xlu1 %v2711_v61  ;;  %vm1977_vm6 = vcmp.eq.f32.partialorder %v1976_v2, 8.507059e+37 }
 0x669   :  { %6247 = vrcp.f32 %v8331_v49 }
 0x66a   :  { %v1652_v32 = vpop.f32.mrf.mxu2  ;;  %6249 = vrcp.f32 %v8327_v10 }
 0x66b   :  { %5805 = vmatmul.msk.f32.gmra.mxu2 %vm706_vm13, %v1652_v32  ;;  %6251 = vrcp.f32 %v8342_v25 }
 0x66c   :  { %v6244_v19 = vpop.eup %6243  ;;  %v8348_v17 = vpop.xlane.xlu0 %1875 }
 0x66d   :  { %v6080_v56 = vpop.permute.xlu2 %6079  ;;  %v1968_v44 = vmul.f32 %v6244_v19, %v1927_v16  ;;  %vm1973_vm1 = vweird.f32 %v6244_v19 }
 0x66e   :  { %v8350_v5 = vpop.eup %6245  ;;  %v6081_v43 = vunpack.i.l.bf16 %v6080_v56  ;;  %v6082_v40 = vunpack.i.h.bf16 %v6080_v56  ;;  %vm1974_vm5 = vmor %vm1972_vm2, %vm1973_vm1 }
 0x66f   :  { %v8352_v6 = vpop.eup %6247  ;;  %v1969_v59 = vsub.f32 1.0, %v1968_v44  ;;  %v1952_v23 = vsel %vm1176_vm9, %v8350_v5, 0.0  ;;  %v2672_v44 = vpop.f32.mrf.mxu0 }
 0x670   :  { %1953 = vadd.xlane.f32.xlu2 %v1952_v23  ;;  %2271 = vmatpush.msra.mxu1 %v6081_v43  ;;  %v1983_v37 = vmul.f32 %v8352_v6, %v8331_v49  ;;  %v8362_v56 = vpop.eup %6249  ;;  %v1978_v43 = vand.u32 2147483648, %v1927_v16  ;;  %vm1988_vm10 = vweird.f32 %v8352_v6 }
 0x671   :  { %v1970_v47 = vmul.f32 %v6244_v19, %v1969_v59  ;;  %v8365_v59 = vadd.f32 %v2672_v44, %v7881_v51  ;;  %vm1989_vm14 = vmor %vm1987_vm11, %vm1988_vm10  ;;  %vm2003_vm12 = vweird.f32 %v8362_v56 }
 0x672   :  { %v1655_v15 = vpop.f32.mrf.mxu2  ;;  %2272 = vmatpush.msra.mxu1 %v6082_v40  ;;  %v1984_v14 = vsub.f32 1.0, %v1983_v37  ;;  %vm2004_vm1 = vmor %vm2002_vm0, %vm2003_vm12 }
 0x673   :  { %5806 = vmatmul.msk.f32.gmra.mxu2 %vm706_vm13, %v1655_v15  ;;  %v1971_v55 = vadd.f32 %v6244_v19, %v1970_v47  ;;  %v1998_v15 = vmul.f32 %v8362_v56, %v8327_v10  ;;  %v2714_v45 = vsel %vm1176_vm9, %v8365_v59, -inf }
 0x674   :  { %v8360_v31 = vpop.xlane.xlu0 %1878  ;;  %v1985_v47 = vmul.f32 %v8352_v6, %v1984_v14  ;;  %v1993_v14 = vand.u32 2147483648, %v8331_v49 }
 0x675   :  { %v6085_v61 = vpop.permute.xlu2 %6084  ;;  %v1975_v37 = vsel %vm1974_vm5, %v6244_v19, %v1971_v55  ;;  %v1999_v33 = vsub.f32 1.0, %v1998_v15  ;;  %v6252_v55 = vpop.eup %6251 }
 0x676   :  { %v6086_v32 = vunpack.i.l.bf16 %v6085_v61  ;;  %v6087_v23 = vunpack.i.h.bf16 %v6085_v61  ;;  %v1979_v61 = vor.u32 1.1754944e-38, %v1978_v43  ;;  %v1991_v43 = vand.u32 2147483647, %v8331_v49 }
 0x677   :  { %vm2018_vm5 = vweird.f32 %v6252_v55 }
 0x678   :  { %2273 = vmatpush.msra.mxu1 %v6086_v32  ;;  %v1980_v7 = vsel %vm1977_vm6, %v1979_v61, %v1975_v37  ;;  %vm1992_vm15 = vcmp.eq.f32.partialorder %v1991_v43, 8.507059e+37  ;;  %vm2017_vm6 = vweird.f32 %v8342_v25 }
 0x679   :  { %v1981_v2 = vmul.f32 %v8193_v1, %v1980_v7  ;;  %v2000_v7 = vmul.f32 %v8362_v56, %v1999_v33  ;;  %v1994_v1 = vor.u32 1.1754944e-38, %v1993_v14  ;;  %vm2019_vm10 = vmor %vm2017_vm6, %vm2018_vm5 }
 0x67a   :  { %v1658_v40 = vpop.f32.mrf.mxu2  ;;  %2274 = vmatpush.msra.mxu1 %v6087_v23  ;;  %v1986_v23 = vadd.f32 %v8352_v6, %v1985_v47 }
 0x67b   :  { %5807 = vmatmul.msk.f32.gmra.mxu2 %vm706_vm13, %v1658_v40  ;;  %v2001_v61 = vadd.f32 %v8362_v56, %v2000_v7 }
 0x67c   :  { %v8372_v32 = vpop.xlane.xlu0 %1881  ;;  %v1990_v15 = vsel %vm1989_vm14, %v8352_v6, %v1986_v23  ;;  %v2006_v6 = vand.u32 2147483647, %v8327_v10 }
 0x67d   :  { %v6090_v16 = vpop.permute.xlu2 %6089  ;;  %v1995_v49 = vsel %vm1992_vm15, %v1994_v1, %v1990_v15  ;;  %v2005_v23 = vsel %vm2004_vm1, %v8362_v56, %v2001_v61 }
 0x67e   :  { %v6091_v44 = vunpack.i.l.bf16 %v6090_v16  ;;  %v6092_v19 = vunpack.i.h.bf16 %v6090_v16  ;;  %v2008_v16 = vand.u32 2147483648, %v8327_v10  ;;  %vm2007_vm2 = vcmp.eq.f32.partialorder %v2006_v6, 8.507059e+37 }
 0x67f   :  { %2715 = vmax.xlane.f32.xlu0 %v2714_v45  ;;  %v2013_v45 = vmul.f32 %v6252_v55, %v8342_v25  ;;  %v2023_v10 = vand.u32 2147483648, %v8342_v25 }
 0x680   :  { %2275 = vmatpush.msra.mxu1 %v6091_v44  ;;  %v1996_v44 = vmul.f32 %v8155_v58, %v1995_v49  ;;  %v2009_v14 = vor.u32 1.1754944e-38, %v2008_v16  ;;  %v10107_v16 = vld [vmem:[#allocation36_spill] sm:$0xff] }
 0x681   :  { %6099 = vrot.lane.b32.xlu1 %v10097_v22, %s10028_s28  ;;  %v2014_v47 = vsub.f32 1.0, %v2013_v45  ;;  %v2021_v45 = vand.u32 2147483647, %v8342_v25  ;;  %v2024_v1 = vor.u32 1.1754944e-38, %v2023_v10 }
 0x682   :  { %v1661_v40 = vpop.f32.mrf.mxu2  ;;  %2276 = vmatpush.msra.mxu1 %v6092_v19 }
 0x683   :  { %5769 = vmatmul.msk.f32.vlgmr.msra.gmra.mxu1 %vm1176_vm9, %v1981_v2  ;;  %5808 = vmatmul.msk.f32.gmra.mxu2 %vm706_vm13, %v1661_v40  ;;  %v2015_v19 = vmul.f32 %v6252_v55, %v2014_v47  ;;  %v2010_v2 = vsel %vm2007_vm2, %v2009_v14, %v2005_v23  ;;  %vm2022_vm11 = vcmp.eq.f32.partialorder %v2021_v45, 8.507059e+37 }
 0x684   :  { %v8389_v37 = vpop.xlane.xlu0 %2694  ;;  %v2011_v40 = vmul.f32 %v8162_v30, %v2010_v2 }
 0x685   :  { %v2016_v43 = vadd.f32 %v6252_v55, %v2015_v19 }
 0x687   :  { %v2020_v15 = vsel %vm2019_vm10, %v6252_v55, %v2016_v43  ;;  %v10108_v43 = vld [vmem:[#allocation32_spill] sm:$0xff] }
 0x688   :  { %v2025_v30 = vsel %vm2022_vm11, %v2024_v1, %v2020_v15 }
 0x689   :  { %6124 = vrot.lane.b32.xlu1 %v10100_v60, %s10028_s28  ;;  %v2026_v25 = vmul.f32 %v8188_v20, %v2025_v30 }
 0x68a   :  { %v1664_v33 = vpop.f32.mrf.mxu2 }
 0x68b   :  { %5770 = vmatmul.msk.f32.gmra.mxu1 %vm1176_vm9, %v1996_v44  ;;  %5809 = vmatmul.msk.f32.gmra.mxu2 %vm706_vm13, %v1664_v33 }
 0x68c   :  { %v8402_v58 = vpop.xlane.xlu0 %2697 }
 0x691   :  { %6134 = vrot.lane.b32.xlu1 %v10101_v29, %s10028_s28 }
 0x692   :  { %v1667_v56 = vpop.f32.mrf.mxu2 }
 0x693   :  { %6129 = vrot.lane.b32.xlu0 %v10093_v41, %s10026_s29  ;;  %5771 = vmatmul.msk.f32.gmra.mxu1 %vm1176_vm9, %v2011_v40 }
 0x694   :  { %5810 = vmatmul.msk.f32.gmra.mxu2 %vm706_vm13, %v1667_v56  ;;  %v1939_v7 = vpop.xlane.xlu1 %1938  ;;  %v8414_v49 = vpop.xlane.xlu0 %2700 }
 0x695   :  { %6253 = vrcp.f32 %v1939_v7  ;;  %v2038_v6 = vand.u32 2147483648, %v1939_v7  ;;  %v2036_v23 = vand.u32 2147483647, %v1939_v7  ;;  %vm2032_vm15 = vweird.f32 %v1939_v7 }
 0x697   :  { %vm2037_vm0 = vcmp.eq.f32.partialorder %v2036_v23, 8.507059e+37 }
 0x699   :  { %6149 = vrot.lane.b32.xlu1 %v10100_v60, %s10026_s29  ;;  %v2039_v60 = vor.u32 1.1754944e-38, %v2038_v6  ;;  %v10109_v6 = vld [vmem:[#allocation33_spill] sm:$0xff] }
 0x69a   :  { %v8427_v30 = vpop.f32.mrf.mxu2 }
 0x69b   :  { %v6254_v47 = vpop.eup %6253  ;;  %5772 = vmatmul.msk.f32.gmra.mxu1 %vm1176_vm9, %v2026_v25 }
 0x69c   :  { %v2028_v61 = vmul.f32 %v6254_v47, %v1939_v7  ;;  %5881 = vmatmul.msk.f32.vlgmr.msrb.gmra.mxu2 %vm706_vm13, %v10107_v16  ;;  %v1942_v55 = vpop.xlane.xlu1 %1941  ;;  %vm2033_vm14 = vweird.f32 %v6254_v47  ;;  %v8422_v14 = vpop.xlane.xlu0 %2703 }
 0x69d   :  { %6255 = vrcp.f32 %v1942_v55  ;;  %vm2034_vm12 = vmor %vm2032_vm15, %vm2033_vm14  ;;  %v2053_v1 = vand.u32 2147483648, %v1942_v55  ;;  %v2051_v25 = vand.u32 2147483647, %v1942_v55  ;;  %vm2047_vm2 = vweird.f32 %v1942_v55 }
 0x69e   :  { %v2029_v44 = vsub.f32 1.0, %v2028_v61 }
 0x69f   :  { %vm2052_vm6 = vcmp.eq.f32.partialorder %v2051_v25, 8.507059e+37 }
 0x6a0   :  { %v2030_v33 = vmul.f32 %v6254_v47, %v2029_v44  ;;  %v2054_v44 = vor.u32 1.1754944e-38, %v2053_v1 }
 0x6a2   :  { %v2031_v19 = vadd.f32 %v6254_v47, %v2030_v33 }
 0x6a3   :  { %v6256_v20 = vpop.eup %6255 }
 0x6a4   :  { %v2043_v2 = vmul.f32 %v6256_v20, %v1942_v55  ;;  %5882 = vmatmul.msk.f32.gmra.mxu2 %vm706_vm13, %v10108_v43  ;;  %v1945_v10 = vpop.xlane.xlu1 %1944  ;;  %v2035_v40 = vsel %vm2034_vm12, %v6254_v47, %v2031_v19  ;;  %vm2048_vm1 = vweird.f32 %v6256_v20 }
 0x6a5   :  { %6257 = vrcp.f32 %v1945_v10  ;;  %v2040_v45 = vsel %vm2037_vm0, %v2039_v60, %v2035_v40  ;;  %vm2049_vm5 = vmor %vm2047_vm2, %vm2048_vm1  ;;  %v2066_v55 = vand.u32 2147483647, %v1945_v10  ;;  %v2737_v40 = vsub.f32 %v8271_v26, %v8414_v49 }
 0x6a6   :  { %v2044_v56 = vsub.f32 1.0, %v2043_v2  ;;  %v2041_v15 = vmul.f32 %v8275_v11, %v2040_v45  ;;  %v8432_v11 = vpop.xlane.xlu0 %2706  ;;  %v2068_v2 = vand.u32 2147483648, %v1945_v10  ;;  %v8438_v45 = vpop.f32.mrf.mxu2  ;;  %vm2062_vm11 = vweird.f32 %v1945_v10 }
 0x6a7   :  { %10110 = vst [vmem:[#allocation28_spill] sm:$0xff] %v8438_v45  ;;  %vm2067_vm15 = vcmp.eq.f32.partialorder %v2066_v55, 8.507059e+37  ;;  %v2753_v25 = vmul.f32 1.442695, %v2737_v40  ;;  %v10113_v40 = vld [vmem:[#allocation35_spill] sm:$0xff] }
 0x6a8   :  { %5773 = vmatmul.msk.f32.gmra.mxu1 %vm1176_vm9, %v2041_v15  ;;  %v2045_v7 = vmul.f32 %v6256_v20, %v2044_v56  ;;  %v2069_v56 = vor.u32 1.1754944e-38, %v2068_v2  ;;  %v10111_v15 = vld [vmem:[#allocation37_spill] sm:$0xff] }
 0x6a9   :  { %6259 = vpow2.f32 %v2753_v25 }
 0x6aa   :  { %v2046_v61 = vadd.f32 %v6256_v20, %v2045_v7 }
 0x6ab   :  { %v6258_v16 = vpop.eup %6257 }
 0x6ac   :  { %v2058_v47 = vmul.f32 %v6258_v16, %v1945_v10  ;;  %5883 = vmatmul.msk.f32.gmra.mxu2 %vm706_vm13, %v10109_v6  ;;  %v2050_v33 = vsel %vm2049_vm5, %v6256_v20, %v2046_v61  ;;  %vm2063_vm10 = vweird.f32 %v6258_v16  ;;  %v1894_v10 = vsub.f32 %v8211_v34, %v8348_v17 }
 0x6ad   :  { %v2055_v23 = vsel %vm2052_vm6, %v2054_v44, %v2050_v33  ;;  %vm2064_vm14 = vmor %vm2062_vm11, %vm2063_vm10  ;;  %v10112_v33 = vld [vmem:[#allocation34_spill] sm:$0xff]  ;;  %v1895_v34 = vsub.f32 %v8226_v8, %v8360_v31 }
 0x6ae   :  { %v2059_v19 = vsub.f32 1.0, %v2058_v47  ;;  %v2056_v60 = vmul.f32 %v8286_v62, %v2055_v23  ;;  %v2675_v62 = vpop.f32.mrf.mxu0  ;;  %v8443_v47 = vpop.xlane.xlu0 %2709 }
 0x6af   :  { %v8447_v49 = vadd.f32 %v2675_v62, %v7824_v46  ;;  %v8452_v6 = vpop.f32.mrf.mxu2 }
 0x6b0   :  { %v2060_v43 = vmul.f32 %v6258_v16, %v2059_v19  ;;  %5774 = vmatmul.msk.f32.gmra.mxu1 %vm1176_vm9, %v2056_v60  ;;  %v8458_v19 = vpop.eup %6259 }
 0x6b1   :  { %v2783_v55 = vsel %vm1176_vm9, %v8458_v19, 0.0 }
 0x6b2   :  { %v2061_v20 = vadd.f32 %v6258_v16, %v2060_v43 }
 0x6b4   :  { %5884 = vmatmul.msk.f32.gmra.mxu2 %vm706_vm13, %v10111_v15  ;;  %v2065_v1 = vsel %vm2064_vm14, %v6258_v16, %v2061_v20  ;;  %v1921_v20 = vmul.f32 1.442695, %v1895_v34 }
 0x6b5   :  { %v2070_v7 = vsel %vm2067_vm15, %v2069_v56, %v2065_v1  ;;  %v1896_v1 = vsub.f32 %v8237_v18, %v8372_v32 }
 0x6b6   :  { %v1873_v61 = vpop.xlane.xlu2 %1872  ;;  %v2071_v44 = vmul.f32 %v8296_v21, %v2070_v7  ;;  %v2717_v21 = vsel %vm1176_vm9, %v8447_v49, -inf }
 0x6b7   :  { %v1893_v26 = vsub.f32 %v8310_v63, %v1873_v61  ;;  %v1919_v63 = vmul.f32 1.442695, %v1894_v10  ;;  %v8470_v56 = vpop.f32.mrf.mxu2  ;;  %v10114_v61 = vld [vmem:[#allocation38_spill] sm:$0xff] }
 0x6b8   :  { %5775 = vmatmul.msk.f32.gmra.mxu1 %vm1176_vm9, %v2071_v44  ;;  %v1923_v44 = vmul.f32 1.442695, %v1896_v1  ;;  %v10116_v1 = vld [vmem:[#allocation40_spill] sm:$0xff] }
 0x6b9   :  { %v1917_v16 = vmul.f32 1.442695, %v1893_v26 }
 0x6bb   :  { %6261 = vpow2.f32 %v1917_v16 }
 0x6bc   :  { %5885 = vmatmul.msk.f32.gmra.mxu2 %vm706_vm13, %v10112_v33  ;;  %6263 = vpow2.f32 %v1919_v63 }
 0x6bd   :  { %2718 = vmax.xlane.f32.xlu0 %v2717_v21  ;;  %6265 = vpow2.f32 %v1921_v20  ;;  %v10115_v21 = vld [vmem:[#allocation39_spill] sm:$0xff] }
 0x6bf   :  { %v6095_v23 = vpop.permute.xlu0 %6094 }
 0x6c0   :  { %v6096_v60 = vunpack.i.l.bf16 %v6095_v23  ;;  %v6097_v43 = vunpack.i.h.bf16 %v6095_v23 }
 0x6c1   :  { %v8460_v2 = vpop.eup %6261 }
 0x6c2   :  { %3115 = vmatpush.msrb.mxu1 %v6096_v60  ;;  %v1955_v17 = vsel %vm1176_vm9, %v8460_v2, 0.0  ;;  %v8472_v15 = vpop.eup %6263 }
 0x6c3   :  { %1956 = vadd.xlane.f32.xlu2 %v1955_v17  ;;  %2784 = vadd.xlane.f32.xlu1 %v2783_v55  ;;  %v1958_v7 = vsel %vm1176_vm9, %v8472_v15, 0.0  ;;  %v8482_v10 = vpop.eup %6265 }
 0x6c4   :  { %5886 = vmatmul.msk.f32.gmra.mxu2 %vm706_vm13, %v10113_v40  ;;  %3116 = vmatpush.msrb.mxu1 %v6097_v43  ;;  %v1961_v18 = vsel %vm1176_vm9, %v8482_v10, 0.0 }
 0x6c7   :  { %v6110_v8 = vpop.permute.xlu0 %6109 }
 0x6c8   :  { %v6111_v31 = vunpack.i.l.bf16 %v6110_v8  ;;  %v6112_v62 = vunpack.i.h.bf16 %v6110_v8 }
 0x6ca   :  { %3880 = vmatpush.msra.mxu0 %v6111_v31 }
 0x6cb   :  { %1959 = vadd.xlane.f32.xlu2 %v1958_v7  ;;  %v1948_v25 = vpop.xlane.xlu1 %1947  ;;  %v8480_v26 = vpop.f32.mrf.mxu2 }
 0x6cc   :  { %5887 = vmatmul.msk.f32.gmra.mxu2 %vm706_vm13, %v10114_v61  ;;  %3881 = vmatpush.msra.mxu0 %v6112_v62  ;;  %6267 = vrcp.f32 %v1948_v25  ;;  %v2083_v34 = vand.u32 2147483648, %v1948_v25  ;;  %v2081_v43 = vand.u32 2147483647, %v1948_v25  ;;  %vm2077_vm0 = vweird.f32 %v1948_v25 }
 0x6cd   :  { %6269 = vpow2.f32 %v1923_v44 }
 0x6ce   :  { %v2084_v8 = vor.u32 1.1754944e-38, %v2083_v34  ;;  %vm2082_vm2 = vcmp.eq.f32.partialorder %v2081_v43, 8.507059e+37  ;;  %v10117_v43 = vld [vmem:[#allocation45_spill] sm:$0xff] }
 0x6d1   :  { %6144 = vrot.lane.b32.xlu0 %v10102_v57, %s10028_s28 }
 0x6d2   :  { %v6268_v32 = vpop.eup %6267 }
 0x6d3   :  { %1962 = vadd.xlane.f32.xlu2 %v1961_v18  ;;  %v2073_v16 = vmul.f32 %v6268_v32, %v1948_v25  ;;  %v1951_v33 = vpop.xlane.xlu1 %1950  ;;  %v8492_v60 = vpop.eup %6269  ;;  %vm2078_vm12 = vweird.f32 %v6268_v32 }
 0x6d4   :  { %5888 = vmatmul.msk.f32.gmra.mxu2 %vm706_vm13, %v10115_v21  ;;  %6271 = vrcp.f32 %v1951_v33  ;;  %v1964_v55 = vsel %vm1176_vm9, %v8492_v60, 0.0  ;;  %vm2079_vm1 = vmor %vm2077_vm0, %vm2078_vm12  ;;  %v2098_v18 = vand.u32 2147483648, %v1951_v33  ;;  %v2096_v21 = vand.u32 2147483647, %v1951_v33 }
 0x6d5   :  { %v2074_v63 = vsub.f32 1.0, %v2073_v16  ;;  %vm2092_vm6 = vweird.f32 %v1951_v33 }
 0x6d6   :  { %v8490_v23 = vpop.f32.mrf.mxu2  ;;  %v2099_v34 = vor.u32 1.1754944e-38, %v2098_v18  ;;  %vm2097_vm11 = vcmp.eq.f32.partialorder %v2096_v21, 8.507059e+37 }
 0x6d7   :  { %v2075_v17 = vmul.f32 %v6268_v32, %v2074_v63  ;;  %v848_v63 = vld [vmem:[%s9967_s11 + $0x8] sm:$0xff] }
 0x6d8   :  { %2377 = vmatpush.msrb.mxu3 %v848_v63 }
 0x6d9   :  { %v2076_v40 = vadd.f32 %v6268_v32, %v2075_v17 }
 0x6da   :  { %v6272_v20 = vpop.eup %6271 }
 0x6db   :  { %1965 = vadd.xlane.f32.xlu2 %v1964_v55  ;;  %v2088_v31 = vmul.f32 %v6272_v20, %v1951_v33  ;;  %v2080_v62 = vsel %vm2079_vm1, %v6268_v32, %v2076_v40  ;;  %vm2093_vm5 = vweird.f32 %v6272_v20 }
 0x6dc   :  { %5889 = vmatmul.msk.f32.gmra.mxu2 %vm706_vm13, %v10116_v1  ;;  %v2085_v7 = vsel %vm2082_vm2, %v2084_v8, %v2080_v62  ;;  %vm2094_vm10 = vmor %vm2092_vm6, %vm2093_vm5  ;;  %v8511_v1 = vpop.xlane.xlu1 %2712 }
 0x6dd   :  { %v2089_v61 = vsub.f32 1.0, %v2088_v31  ;;  %v2086_v25 = vmul.f32 %v8322_v35, %v2085_v7 }
 0x6de   :  { %v8498_v44 = vpop.f32.mrf.mxu2 }
 0x6df   :  { %v2090_v16 = vmul.f32 %v6272_v20, %v2089_v61  ;;  %5776 = vmatmul.msk.f32.gmra.mxu1 %vm1176_vm9, %v2086_v25 }
 0x6e1   :  { %v2091_v32 = vadd.f32 %v6272_v20, %v2090_v16  ;;  %v2678_v16 = vpop.f32.mrf.mxu0 }
 0x6e3   :  { %v1954_v17 = vpop.xlane.xlu2 %1953  ;;  %v2095_v35 = vsel %vm2094_vm10, %v6272_v20, %v2091_v32 }
 0x6e4   :  { %5890 = vmatmul.msk.f32.gmra.mxu2 %vm706_vm13, %v10117_v43  ;;  %6273 = vrcp.f32 %v1954_v17  ;;  %v2100_v55 = vsel %vm2097_vm11, %v2099_v34, %v2095_v35  ;;  %v2113_v20 = vand.u32 2147483648, %v1954_v17  ;;  %v2111_v25 = vand.u32 2147483647, %v1954_v17 }
 0x6e5   :  { %v2101_v8 = vmul.f32 %v8333_v52, %v2100_v55  ;;  %vm2107_vm15 = vweird.f32 %v1954_v17  ;;  %v8522_v34 = vadd.f32 %v2678_v16, %v7898_v39 }
 0x6e6   :  { %v8507_v40 = vpop.f32.mrf.mxu2  ;;  %v2114_v52 = vor.u32 1.1754944e-38, %v2113_v20  ;;  %vm2112_vm0 = vcmp.eq.f32.partialorder %v2111_v25, 8.507059e+37  ;;  %v2735_v20 = vsub.f32 %v8249_v27, %v8389_v37 }
 0x6e7   :  { %5777 = vmatmul.msk.f32.gmra.mxu1 %vm1176_vm9, %v2101_v8 }
 0x6e8   :  { %v2749_v25 = vmul.f32 1.442695, %v2735_v20  ;;  %v2738_v20 = vsub.f32 %v8284_v54, %v8422_v14 }
 0x6ea   :  { %v6274_v31 = vpop.eup %6273  ;;  %6275 = vpow2.f32 %v2749_v25 }
 0x6eb   :  { %v2103_v33 = vmul.f32 %v6274_v31, %v1954_v17  ;;  %vm2108_vm14 = vweird.f32 %v6274_v31 }
 0x6ec   :  { %5891 = vmatmul.msk.f32.gmra.mxu2 %vm706_vm13, %v8251_v4  ;;  %vm2109_vm12 = vmor %vm2107_vm15, %vm2108_vm14 }
 0x6ed   :  { %v2104_v62 = vsub.f32 1.0, %v2103_v33 }
 0x6ee   :  { %v8515_v7 = vpop.f32.mrf.mxu2 }
 0x6ef   :  { %v2105_v61 = vmul.f32 %v6274_v31, %v2104_v62 }
 0x6f1   :  { %v2106_v18 = vadd.f32 %v6274_v31, %v2105_v61 }
 0x6f3   :  { %6104 = vrot.lane.b32.xlu2 %v10093_v41, %s10028_s28  ;;  %v6100_v21 = vpop.permute.xlu1 %6099  ;;  %v2110_v4 = vsel %vm2109_vm12, %v6274_v31, %v2106_v18  ;;  %v2720_v41 = vsel %vm1176_vm9, %v8522_v34, -inf }
 0x6f4   :  { %5892 = vmatmul.msk.f32.gmra.mxu2 %vm706_vm13, %v8102_v53  ;;  %v6101_v63 = vunpack.i.l.bf16 %v6100_v21  ;;  %v2115_v32 = vsel %vm2112_vm0, %v2114_v52, %v2110_v4  ;;  %v6102_v35 = vunpack.i.h.bf16 %v6100_v21  ;;  %v8568_v4 = vpop.eup %6275 }
 0x6f5   :  { %v2116_v17 = vmul.f32 %v8350_v5, %v2115_v32 }
 0x6f6   :  { %v8524_v43 = vpop.f32.mrf.mxu2  ;;  %3117 = vmatpush.msrb.mxu1 %v6101_v63 }
 0x6f7   :  { %5778 = vmatmul.msk.f32.gmra.mxu1 %vm1176_vm9, %v2116_v17 }
 0x6f8   :  { %3118 = vmatpush.msrb.mxu1 %v6102_v35 }
 0x6fb   :  { %2721 = vmax.xlane.f32.xlu0 %v2720_v41  ;;  %6114 = vrot.lane.b32.xlu2 %v10096_v36, %s10028_s28 }
 0x6fc   :  { %5893 = vmatmul.msk.f32.gmra.mxu2 %vm706_vm13, %v8273_v42 }
 0x6fe   :  { %v8534_v53 = vpop.f32.mrf.mxu2 }
 0x700   :  { %v2278_v55 = vpop.f32.mrf.mxu1 }
 0x701   :  { %5783 = vmatmul.msk.f32.vlgmr.msrb.gmra.mxu3 %vm706_vm13, %v2278_v55 }
 0x703   :  { %6119 = vrot.lane.b32.xlu2 %v10097_v22, %s10026_s29 }
 0x704   :  { %5894 = vmatmul.msk.f32.gmra.mxu2 %vm706_vm13, %v8329_v28 }
 0x706   :  { %v8541_v5 = vpop.f32.mrf.mxu2 }
 0x708   :  { %v2281_v8 = vpop.f32.mrf.mxu1 }
 0x709   :  { %5784 = vmatmul.msk.f32.gmra.mxu3 %vm706_vm13, %v2281_v8 }
 0x70b   :  { %6139 = vrot.lane.b32.xlu2 %v10096_v36, %s10026_s29 }
 0x70e   :  { %v8546_v42 = vpop.f32.mrf.mxu2 }
 0x710   :  { %v2284_v31 = vpop.f32.mrf.mxu1 }
 0x711   :  { %5785 = vmatmul.msk.f32.gmra.mxu3 %vm706_vm13, %v2284_v31 }
 0x717   :  { %v8549_v33 = vpop.f32.mrf.mxu2 }
 0x718   :  { %v2287_v62 = vpop.f32.mrf.mxu1 }
 0x719   :  { %5786 = vmatmul.msk.f32.gmra.mxu3 %vm706_vm13, %v2287_v62 }
 0x71f   :  { %v3416_v22 = vpop.f32.mrf.mxu2 }
 0x720   :  { %v8553_v28 = vadd.f32 %v3416_v22, %v7755_v12  ;;  %v2736_v12 = vsub.f32 %v8260_v0, %v8402_v58  ;;  %v2777_v0 = vsel %vm1176_vm9, %v8568_v4, 0.0 }
 0x722   :  { %v3458_v36 = vsel %vm1176_vm9, %v8553_v28, -inf  ;;  %v2751_v37 = vmul.f32 1.442695, %v2736_v12 }
 0x723   :  { %3459 = vmax.xlane.f32.xlu1 %v3458_v36 }
 0x724   :  { %6277 = vpow2.f32 %v2751_v37 }
 0x725   :  { %v2290_v61 = vpop.f32.mrf.mxu1 }
 0x726   :  { %5787 = vmatmul.msk.f32.gmra.mxu3 %vm706_vm13, %v2290_v61 }
 0x727   :  { %v3419_v18 = vpop.f32.mrf.mxu2 }
 0x728   :  { %v8561_v16 = vadd.f32 %v3419_v18, %v7765_v3 }
 0x72a   :  { %v3461_v52 = vsel %vm1176_vm9, %v8561_v16, -inf  ;;  %v8578_v35 = vpop.eup %6277 }
 0x72b   :  { %3462 = vmax.xlane.f32.xlu1 %v3461_v52  ;;  %v2780_v55 = vsel %vm1176_vm9, %v8578_v35, 0.0  ;;  %v2755_v52 = vmul.f32 1.442695, %v2738_v20 }
 0x72d   :  { %v2293_v27 = vpop.f32.mrf.mxu1 }
 0x72e   :  { %5788 = vmatmul.msk.f32.gmra.mxu3 %vm706_vm13, %v2293_v27 }
 0x72f   :  { %v3422_v21 = vpop.f32.mrf.mxu2 }
 0x730   :  { %v8571_v63 = vadd.f32 %v3422_v21, %v7781_v50 }
 0x732   :  { %v3464_v3 = vsel %vm1176_vm9, %v8571_v63, -inf }
 0x733   :  { %3465 = vmax.xlane.f32.xlu1 %v3464_v3 }
 0x734   :  { %2778 = vadd.xlane.f32.xlu2 %v2777_v0 }
 0x735   :  { %v2296_v58 = vpop.f32.mrf.mxu1 }
 0x736   :  { %v1957_v32 = vpop.xlane.xlu2 %1956  ;;  %5789 = vmatmul.msk.f32.gmra.mxu3 %vm706_vm13, %v2296_v58 }
 0x737   :  { %6279 = vrcp.f32 %v1957_v32  ;;  %v3425_v17 = vpop.f32.mrf.mxu2  ;;  %v2128_v61 = vand.u32 2147483648, %v1957_v32  ;;  %v2126_v12 = vand.u32 2147483647, %v1957_v32  ;;  %vm2122_vm2 = vweird.f32 %v1957_v32 }
 0x738   :  { %v8581_v50 = vadd.f32 %v3425_v17, %v7795_v24 }
 0x739   :  { %v2129_v21 = vor.u32 1.1754944e-38, %v2128_v61  ;;  %vm2127_vm6 = vcmp.eq.f32.partialorder %v2126_v12, 8.507059e+37 }
 0x73a   :  { %v3467_v41 = vsel %vm1176_vm9, %v8581_v50, -inf }
 0x73b   :  { %3468 = vmax.xlane.f32.xlu1 %v3467_v41 }
 0x73c   :  { %2781 = vadd.xlane.f32.xlu2 %v2780_v55 }
 0x73d   :  { %v6280_v8 = vpop.eup %6279 }
 0x73e   :  { %v2118_v31 = vmul.f32 %v6280_v8, %v1957_v32  ;;  %v1960_v62 = vpop.xlane.xlu2 %1959  ;;  %vm2123_vm1 = vweird.f32 %v6280_v8 }
 0x73f   :  { %6281 = vrcp.f32 %v1960_v62  ;;  %v3428_v22 = vpop.f32.mrf.mxu2  ;;  %vm2124_vm5 = vmor %vm2122_vm2, %vm2123_vm1  ;;  %v2143_v32 = vand.u32 2147483648, %v1960_v62  ;;  %vm2137_vm11 = vweird.f32 %v1960_v62 }
 0x740   :  { %v2119_v36 = vsub.f32 1.0, %v2118_v31  ;;  %v8590_v24 = vadd.f32 %v3428_v22, %v7869_v9 }
 0x742   :  { %v2120_v25 = vmul.f32 %v6280_v8, %v2119_v36  ;;  %v3470_v18 = vsel %vm1176_vm9, %v8590_v24, -inf  ;;  %v2144_v36 = vor.u32 1.1754944e-38, %v2143_v32 }
 0x743   :  { %3471 = vmax.xlane.f32.xlu1 %v3470_v18 }
 0x744   :  { %v2121_v27 = vadd.f32 %v6280_v8, %v2120_v25 }
 0x745   :  { %v6282_v37 = vpop.eup %6281 }
 0x746   :  { %v2133_v3 = vmul.f32 %v6282_v37, %v1960_v62  ;;  %v1963_v54 = vpop.xlane.xlu2 %1962  ;;  %v2125_v14 = vsel %vm2124_vm5, %v6280_v8, %v2121_v27  ;;  %vm2138_vm10 = vweird.f32 %v6282_v37  ;;  %v2141_v8 = vand.u32 2147483647, %v1960_v62 }
 0x747   :  { %6283 = vrcp.f32 %v1963_v54  ;;  %v3431_v9 = vpop.f32.mrf.mxu2  ;;  %v2130_v0 = vsel %vm2127_vm6, %v2129_v21, %v2125_v14  ;;  %vm2139_vm14 = vmor %vm2137_vm11, %vm2138_vm10  ;;  %vm2152_vm0 = vweird.f32 %v1963_v54 }
 0x748   :  { %6285 = vpow2.f32 %v2755_v52  ;;  %v2134_v58 = vsub.f32 1.0, %v2133_v3  ;;  %v8595_v17 = vadd.f32 %v3431_v9, %v7887_v38  ;;  %v2131_v41 = vmul.f32 %v8460_v2, %v2130_v0  ;;  %v8603_v52 = vpop.xlane.xlu0 %2715 }
 0x749   :  { %vm2142_vm15 = vcmp.eq.f32.partialorder %v2141_v8, 8.507059e+37  ;;  %v2158_v3 = vand.u32 2147483648, %v1963_v54  ;;  %v2156_v0 = vand.u32 2147483647, %v1963_v54 }
 0x74a   :  { %v2135_v55 = vmul.f32 %v6282_v37, %v2134_v58  ;;  %5779 = vmatmul.msk.f32.gmra.mxu1 %vm1176_vm9, %v2131_v41  ;;  %v3473_v31 = vsel %vm1176_vm9, %v8595_v17, -inf }
 0x74b   :  { %3474 = vmax.xlane.f32.xlu2 %v3473_v31  ;;  %v2159_v41 = vor.u32 1.1754944e-38, %v2158_v3  ;;  %vm2157_vm2 = vcmp.eq.f32.partialorder %v2156_v0, 8.507059e+37 }
 0x74c   :  { %v2136_v22 = vadd.f32 %v6282_v37, %v2135_v55 }
 0x74d   :  { %v6284_v20 = vpop.eup %6283 }
 0x74e   :  { %v8601_v61 = vpop.eup %6285  ;;  %v2148_v38 = vmul.f32 %v6284_v20, %v1963_v54  ;;  %v1966_v25 = vpop.xlane.xlu2 %1965  ;;  %v2140_v2 = vsel %vm2139_vm14, %v6282_v37, %v2136_v22  ;;  %vm2153_vm12 = vweird.f32 %v6284_v20 }
 0x74f   :  { %6287 = vrcp.f32 %v1966_v25  ;;  %v3434_v18 = vpop.f32.mrf.mxu2  ;;  %v2145_v12 = vsel %vm2142_vm15, %v2144_v36, %v2140_v2  ;;  %v2786_v14 = vsel %vm1176_vm9, %v8601_v61, 0.0  ;;  %vm2154_vm1 = vmor %vm2152_vm0, %vm2153_vm12  ;;  %v2173_v54 = vand.u32 2147483648, %v1966_v25 }
 0x750   :  { %v2149_v27 = vsub.f32 1.0, %v2148_v38  ;;  %v8606_v21 = vadd.f32 %v3434_v18, %v7813_v13  ;;  %v2146_v62 = vmul.f32 %v8472_v15, %v2145_v12  ;;  %v8614_v36 = vpop.permute.xlu0 %6129  ;;  %v2171_v3 = vand.u32 2147483647, %v1966_v25 }
 0x751   :  { %vm2167_vm6 = vweird.f32 %v1966_v25 }
 0x752   :  { %v2150_v9 = vmul.f32 %v6284_v20, %v2149_v27  ;;  %5780 = vmatmul.msk.f32.gmra.mxu1 %vm1176_vm9, %v2146_v62  ;;  %v3476_v37 = vsel %vm1176_vm9, %v8606_v21, -inf  ;;  %v6125_v27 = vpop.permute.xlu1 %6124  ;;  %vm2172_vm11 = vcmp.eq.f32.partialorder %v2171_v3, 8.507059e+37 }
 0x753   :  { %2787 = vadd.xlane.f32.xlu2 %v2786_v14  ;;  %3477 = vmax.xlane.f32.xlu1 %v3476_v37 }
 0x754   :  { %v2151_v58 = vadd.f32 %v6284_v20, %v2150_v9 }
 0x755   :  { %v6288_v13 = vpop.eup %6287 }
 0x756   :  { %v2163_v15 = vmul.f32 %v6288_v13, %v1966_v25  ;;  %v6105_v32 = vpop.permute.xlu2 %6104  ;;  %v2155_v55 = vsel %vm2154_vm1, %v6284_v20, %v2151_v58  ;;  %vm2168_vm5 = vweird.f32 %v6288_v13 }
 0x757   :  { %v6106_v31 = vunpack.i.l.bf16 %v6105_v32  ;;  %v3437_v8 = vpop.f32.mrf.mxu2  ;;  %v2160_v22 = vsel %vm2157_vm2, %v2159_v41, %v2155_v55  ;;  %v6107_v12 = vunpack.i.h.bf16 %v6105_v32  ;;  %vm2169_vm10 = vmor %vm2167_vm6, %vm2168_vm5 }
 0x758   :  { %v2164_v38 = vsub.f32 1.0, %v2163_v15  ;;  %v8617_v2 = vadd.f32 %v3437_v8, %v7881_v51  ;;  %v2161_v18 = vmul.f32 %v8482_v10, %v2160_v22  ;;  %v2174_v51 = vor.u32 1.1754944e-38, %v2173_v54  ;;  %v8624_v15 = vpop.xlane.xlu0 %2718 }
 0x759   :  { %3119 = vmatpush.msrb.mxu1 %v6106_v31  ;;  %v6126_v8 = vunpack.i.l.bf16 %v6125_v27  ;;  %v6127_v22 = vunpack.i.h.bf16 %v6125_v27  ;;  %v6132_v27 = vunpack.i.h.bf16 %v8614_v36 }
 0x75a   :  { %v2165_v62 = vmul.f32 %v6288_v13, %v2164_v38  ;;  %5781 = vmatmul.msk.f32.gmra.mxu1 %vm1176_vm9, %v2161_v18  ;;  %v3479_v20 = vsel %vm1176_vm9, %v8617_v2, -inf }
 0x75b   :  { %3480 = vmax.xlane.f32.xlu2 %v3479_v20  ;;  %3120 = vmatpush.msrb.mxu1 %v6107_v12  ;;  %v6131_v20 = vunpack.i.l.bf16 %v8614_v36 }
 0x75c   :  { %v2166_v14 = vadd.f32 %v6288_v13, %v2165_v62  ;;  %v2299_v9 = vpop.f32.mrf.mxu1 }
 0x75d   :  { %5790 = vmatmul.msk.f32.gmra.mxu3 %vm706_vm13, %v2299_v9 }
 0x75e   :  { %v6115_v10 = vpop.permute.xlu2 %6114  ;;  %v2170_v37 = vsel %vm2169_vm10, %v6288_v13, %v2166_v14  ;;  %v6135_v13 = vpop.permute.xlu1 %6134 }
 0x75f   :  { %v6116_v0 = vunpack.i.l.bf16 %v6115_v10  ;;  %v3440_v58 = vpop.f32.mrf.mxu2  ;;  %v2175_v41 = vsel %vm2172_vm11, %v2174_v51, %v2170_v37  ;;  %v6117_v25 = vunpack.i.h.bf16 %v6115_v10  ;;  %v6136_v18 = vunpack.i.l.bf16 %v6135_v13 }
 0x760   :  { %v8627_v32 = vadd.f32 %v3440_v58, %v7824_v46  ;;  %v2176_v55 = vmul.f32 %v8492_v60, %v2175_v41  ;;  %v6145_v60 = vpop.permute.xlu0 %6144  ;;  %v6137_v12 = vunpack.i.h.bf16 %v6135_v13 }
 0x761   :  { %3121 = vmatpush.msrb.mxu1 %v6116_v0  ;;  %v6146_v3 = vunpack.i.l.bf16 %v6145_v60  ;;  %v6147_v14 = vunpack.i.h.bf16 %v6145_v60 }
 0x762   :  { %5782 = vmatmul.msk.f32.gmra.mxu1 %vm1176_vm9, %v2176_v55  ;;  %v3482_v31 = vsel %vm1176_vm9, %v8627_v32, -inf }
 0x763   :  { %3483 = vmax.xlane.f32.xlu2 %v3482_v31  ;;  %3122 = vmatpush.msrb.mxu1 %v6117_v25 }
 0x764   :  { %v2302_v38 = vpop.f32.mrf.mxu1 }
 0x765   :  { %3123 = vmatpush.msrb.mxu1 %v6126_v8  ;;  %5791 = vmatmul.msk.f32.gmra.mxu3 %vm706_vm13, %v2302_v38 }
 0x766   :  { %v6120_v46 = vpop.permute.xlu2 %6119  ;;  %v6150_v10 = vpop.permute.xlu1 %6149 }
 0x767   :  { %v6121_v54 = vunpack.i.l.bf16 %v6120_v46  ;;  %3124 = vmatpush.msrb.mxu1 %v6127_v22  ;;  %v6122_v62 = vunpack.i.h.bf16 %v6120_v46  ;;  %v6151_v0 = vunpack.i.l.bf16 %v6150_v10  ;;  %v6152_v58 = vunpack.i.h.bf16 %v6150_v10 }
 0x769   :  { %3125 = vmatpush.msrb.mxu1 %v6136_v18  ;;  %3882 = vmatpush.msra.mxu0 %v6121_v54 }
 0x76b   :  { %3126 = vmatpush.msrb.mxu1 %v6137_v12  ;;  %3883 = vmatpush.msra.mxu0 %v6122_v62  ;;  %v2681_v12 = vpop.f32.mrf.mxu0 }
 0x76c   :  { %6154 = vrot.lane.b32.xlu1 %v10101_v29, %s10026_s29  ;;  %v3443_v29 = vpop.f32.mrf.mxu2  ;;  %v8653_v62 = vadd.f32 %v2681_v12, %v10105_v48 }
 0x76d   :  { %3127 = vmatpush.msrb.mxu1 %v6146_v3  ;;  %3884 = vmatpush.msra.mxu0 %v6131_v20 }
 0x76e   :  { %v6140_v51 = vpop.permute.xlu2 %6139  ;;  %v8639_v36 = vpop.xlane.xlu1 %2784 }
 0x76f   :  { %v6141_v9 = vunpack.i.l.bf16 %v6140_v51  ;;  %3128 = vmatpush.msrb.mxu1 %v6147_v14  ;;  %3885 = vmatpush.msra.mxu0 %v6132_v27  ;;  %v6142_v37 = vunpack.i.h.bf16 %v6140_v51  ;;  %v2723_v14 = vsel %vm1176_vm9, %v8653_v62, -inf  ;;  %vm2854_vm11 = vweird.f32 %v8639_v36 }
 0x771   :  { %3886 = vmatpush.msra.mxu0 %v6141_v9  ;;  %v8664_v9 = vadd.f32 %v3443_v29, %v7898_v39 }
 0x773   :  { %3887 = vmatpush.msra.mxu0 %v6142_v37  ;;  %v2684_v29 = vpop.f32.mrf.mxu0 }
 0x774   :  { %v2305_v41 = vpop.f32.mrf.mxu1  ;;  %v3446_v55 = vpop.f32.mrf.mxu2 }
 0x775   :  { %3888 = vmatpush.msra.mxu0 %v6151_v0  ;;  %5792 = vmatmul.msk.f32.gmra.mxu3 %vm706_vm13, %v2305_v41  ;;  %v8642_v25 = vadd.f32 %v3446_v55, %v10105_v48  ;;  %v10118_v41 = vld [vmem:[#allocation26_spill] sm:$0xff] }
 0x776   :  { %v2740_v55 = vsub.f32 %v10118_v41, %v8443_v47 }
 0x777   :  { %3889 = vmatpush.msra.mxu0 %v6152_v58  ;;  %v3488_v31 = vsel %vm1176_vm9, %v8642_v25, -inf }
 0x796   :  { %3489 = vmax.xlane.f32.xlu1 %v3488_v31  ;;  %v3460_v8 = vpop.xlane.xlu1 %3459 }
 0x797   :  { %v3500_v13 = vsub.f32 %v8553_v28, %v3460_v8 }
 0x799   :  { %v3514_v22 = vmul.f32 1.442695, %v3500_v13  ;;  %v3485_v13 = vsel %vm1176_vm9, %v8664_v9, -inf }
 0x79b   :  { %6289 = vpow2.f32 %v3514_v22  ;;  %v3449_v22 = vpop.f32.mrf.mxu2 }
 0x79e   :  { %v3463_v38 = vpop.xlane.xlu1 %3462 }
 0x79f   :  { %v3501_v46 = vsub.f32 %v8561_v16, %v3463_v38 }
 0x7a1   :  { %v8648_v18 = vpop.eup %6289  ;;  %v3516_v54 = vmul.f32 1.442695, %v3501_v46 }
 0x7a2   :  { %v3542_v60 = vsel %vm1176_vm9, %v8648_v18, 0.0 }
 0x7a3   :  { %6291 = vpow2.f32 %v3516_v54  ;;  %3543 = vadd.xlane.f32.xlu0 %v3542_v60  ;;  %v2759_v60 = vmul.f32 1.442695, %v2740_v55 }
 0x7a6   :  { %v3466_v20 = vpop.xlane.xlu1 %3465 }
 0x7a7   :  { %v3502_v28 = vsub.f32 %v8571_v63, %v3466_v20  ;;  %v2779_v3 = vpop.xlane.xlu2 %2778  ;;  %v10119_v20 = vld [vmem:[#allocation42_spill] sm:$0xff] }
 0x7a8   :  { %6293 = vrcp.f32 %v2779_v3  ;;  %v2830_v8 = vand.u32 2147483648, %v2779_v3  ;;  %v2828_v46 = vand.u32 2147483647, %v2779_v3  ;;  %vm2824_vm15 = vweird.f32 %v2779_v3 }
 0x7a9   :  { %v8656_v27 = vpop.eup %6291  ;;  %v3518_v16 = vmul.f32 1.442695, %v3502_v28  ;;  %6295 = vrcp.f32 %v8639_v36  ;;  %v8679_v28 = vadd.f32 %v2684_v29, %v10119_v20 }
 0x7aa   :  { %v3545_v51 = vsel %vm1176_vm9, %v8656_v27, 0.0  ;;  %vm2829_vm0 = vcmp.eq.f32.partialorder %v2828_v46, 8.507059e+37 }
 0x7ab   :  { %6297 = vpow2.f32 %v3518_v16  ;;  %2724 = vmax.xlane.f32.xlu0 %v2723_v14  ;;  %3546 = vadd.xlane.f32.xlu2 %v3545_v51  ;;  %v8682_v16 = vadd.f32 %v3449_v22, %v10119_v20  ;;  %v2831_v14 = vor.u32 1.1754944e-38, %v2830_v8  ;;  %v2726_v22 = vsel %vm1176_vm9, %v8679_v28, -inf }
 0x7ae   :  { %v6294_v48 = vpop.eup %6293  ;;  %v3469_v10 = vpop.xlane.xlu1 %3468 }
 0x7af   :  { %v2820_v63 = vmul.f32 %v6294_v48, %v2779_v3  ;;  %v2782_v37 = vpop.xlane.xlu2 %2781  ;;  %v8666_v0 = vpop.eup %6295  ;;  %vm2825_vm14 = vweird.f32 %v6294_v48  ;;  %v3503_v55 = vsub.f32 %v8581_v50, %v3469_v10 }
 0x7b0   :  { %6299 = vrcp.f32 %v2782_v37  ;;  %v2850_v54 = vmul.f32 %v8666_v0, %v8639_v36  ;;  %vm2826_vm12 = vmor %vm2824_vm15, %vm2825_vm14  ;;  %v2843_v46 = vand.u32 2147483647, %v2782_v37  ;;  %vm2839_vm2 = vweird.f32 %v2782_v37 }
 0x7b1   :  { %v8668_v58 = vpop.eup %6297  ;;  %v2821_v31 = vsub.f32 1.0, %v2820_v63  ;;  %6301 = vpow2.f32 %v2759_v60  ;;  %vm2855_vm10 = vweird.f32 %v8666_v0 }
 0x7b2   :  { %v3548_v39 = vsel %vm1176_vm9, %v8668_v58, 0.0  ;;  %vm2844_vm6 = vcmp.eq.f32.partialorder %v2843_v46, 8.507059e+37  ;;  %vm8708_vm14 = vmor %vm2854_vm11, %vm2855_vm10 }
 0x7b3   :  { %v2822_v38 = vmul.f32 %v6294_v48, %v2821_v31  ;;  %3486 = vmax.xlane.f32.xlu0 %v3485_v13  ;;  %3549 = vadd.xlane.f32.xlu1 %v3548_v39  ;;  %v2851_v31 = vsub.f32 1.0, %v2850_v54 }
 0x7b5   :  { %v2823_v47 = vadd.f32 %v6294_v48, %v2822_v38  ;;  %v2845_v38 = vand.u32 2147483648, %v2782_v37 }
 0x7b6   :  { %v6300_v12 = vpop.eup %6299  ;;  %v3472_v41 = vpop.xlane.xlu1 %3471 }
 0x7b7   :  { %v2827_v51 = vsel %vm2826_vm12, %v6294_v48, %v2823_v47  ;;  %v2835_v63 = vmul.f32 %v6300_v12, %v2782_v37  ;;  %v3504_v39 = vsub.f32 %v8590_v24, %v3472_v41  ;;  %v3491_v48 = vsel %vm1176_vm9, %v8682_v16, -inf  ;;  %v8693_v60 = vpop.eup %6301 }
 0x7b8   :  { %v2832_v13 = vsel %vm2829_vm0, %v2831_v14, %v2827_v51  ;;  %vm2840_vm1 = vweird.f32 %v6300_v12  ;;  %v2852_v24 = vmul.f32 %v8666_v0, %v2851_v31  ;;  %v2846_v10 = vor.u32 1.1754944e-38, %v2845_v38  ;;  %v10122_v38 = vld [vmem:[#allocation27_spill] sm:$0xff] }
 0x7b9   :  { %v2833_v3 = vmul.f32 %v8568_v4, %v2832_v13  ;;  %v2836_v29 = vsub.f32 1.0, %v2835_v63  ;;  %v3522_v45 = vmul.f32 1.442695, %v3504_v39  ;;  %v3520_v4 = vmul.f32 1.442695, %v3503_v55  ;;  %vm2841_vm5 = vmor %vm2839_vm2, %vm2840_vm1 }
 0x7ba   :  { %v2742_v14 = vsub.f32 %v8365_v59, %v8603_v52  ;;  %v2853_v51 = vadd.f32 %v8666_v0, %v2852_v24  ;;  %v2860_v63 = vand.u32 2147483648, %v8639_v36  ;;  %v2792_v59 = vsel %vm1176_vm9, %v8693_v60, 0.0 }
 0x7bb   :  { %v2837_v8 = vmul.f32 %v6300_v12, %v2836_v29  ;;  %2727 = vmax.xlane.f32.xlu0 %v2726_v22  ;;  %3492 = vmax.xlane.f32.xlu1 %v3491_v48  ;;  %6303 = vpow2.f32 %v3522_v45  ;;  %v2741_v22 = vsub.f32 %v10122_v38, %v8511_v1  ;;  %v2687_v48 = vpop.f32.mrf.mxu0 }
 0x7bc   :  { %5839 = vmatmul.msk.f32.vlgmr.msrb.gmra.mxu1 %vm1176_vm9, %v2833_v3  ;;  %6305 = vpow2.f32 %v3520_v4  ;;  %v2861_v13 = vor.u32 1.1754944e-38, %v2860_v63 }
 0x7bd   :  { %v2838_v50 = vadd.f32 %v6300_v12, %v2837_v8 }
 0x7be   :  { %v3475_v54 = vpop.xlane.xlu2 %3474 }
 0x7bf   :  { %v3505_v47 = vsub.f32 %v8595_v17, %v3475_v54  ;;  %v2842_v20 = vsel %vm2841_vm5, %v6300_v12, %v2838_v50  ;;  %v2858_v17 = vand.u32 2147483647, %v8639_v36  ;;  %v2857_v36 = vsel %vm8708_vm14, %v8666_v0, %v2853_v51  ;;  %v10123_v50 = vld [vmem:[#allocation43_spill] sm:$0xff] }
 0x7c0   :  { %v2847_v45 = vsel %vm2844_vm6, %v2846_v10, %v2842_v20  ;;  %v2763_v12 = vmul.f32 1.442695, %v2742_v14  ;;  %v2743_v0 = vsub.f32 %v8447_v49, %v8624_v15  ;;  %v8736_v1 = vadd.f32 %v2687_v48, %v10123_v50  ;;  %v10124_v48 = vld [vmem:[#allocation25_spill] sm:$0xff] }
 0x7c1   :  { %v3524_v37 = vmul.f32 1.442695, %v3505_v47  ;;  %v2848_v41 = vmul.f32 %v8578_v35, %v2847_v45  ;;  %v8702_v31 = vpop.eup %6303  ;;  %vm2859_vm15 = vcmp.eq.f32.partialorder %v2858_v17, 8.507059e+37  ;;  %v2761_v10 = vmul.f32 1.442695, %v2741_v22 }
 0x7c2   :  { %v3554_v35 = vsel %vm1176_vm9, %v8702_v31, 0.0  ;;  %v8720_v3 = vpop.eup %6305  ;;  %v2862_v29 = vsel %vm2859_vm15, %v2861_v13, %v2857_v36  ;;  %v2765_v54 = vmul.f32 1.442695, %v2743_v0  ;;  %v2729_v51 = vsel %vm1176_vm9, %v8736_v1, -inf }
 0x7c3   :  { %6307 = vpow2.f32 %v3524_v37  ;;  %2793 = vadd.xlane.f32.xlu0 %v2792_v59  ;;  %6159 = vrot.lane.b32.xlu2 %v10102_v57, %s10026_s29  ;;  %v3551_v8 = vsel %vm1176_vm9, %v8720_v3, 0.0  ;;  %v2863_v24 = vmul.f32 %v8458_v19, %v2862_v29  ;;  %v2739_v0 = vsub.f32 %v10124_v48, %v8432_v11 }
 0x7c4   :  { %3555 = vadd.xlane.f32.xlu1 %v3554_v35  ;;  %5840 = vmatmul.msk.f32.gmra.mxu1 %vm1176_vm9, %v2848_v41 }
 0x7c6   :  { %v2788_v39 = vpop.xlane.xlu2 %2787  ;;  %v3478_v59 = vpop.xlane.xlu1 %3477 }
 0x7c7   :  { %6309 = vrcp.f32 %v2788_v39  ;;  %v2308_v55 = vpop.f32.mrf.mxu1  ;;  %v2875_v19 = vand.u32 2147483648, %v2788_v39  ;;  %v2873_v63 = vand.u32 2147483647, %v2788_v39  ;;  %vm2869_vm0 = vweird.f32 %v2788_v39 }
 0x7c8   :  { %5793 = vmatmul.msk.f32.gmra.mxu3 %vm706_vm13, %v2308_v55  ;;  %6311 = vpow2.f32 %v2763_v12 }
 0x7c9   :  { %v8723_v57 = vpop.eup %6307  ;;  %6313 = vpow2.f32 %v2761_v10  ;;  %v2876_v17 = vor.u32 1.1754944e-38, %v2875_v19  ;;  %vm2874_vm2 = vcmp.eq.f32.partialorder %v2873_v63, 8.507059e+37 }
 0x7ca   :  { %v3557_v46 = vsel %vm1176_vm9, %v8723_v57, 0.0  ;;  %6315 = vpow2.f32 %v2765_v54 }
 0x7cb   :  { %3552 = vadd.xlane.f32.xlu0 %v3551_v8 }
 0x7cc   :  { %3558 = vadd.xlane.f32.xlu1 %v3557_v46  ;;  %5841 = vmatmul.msk.f32.gmra.mxu1 %vm1176_vm9, %v2863_v24  ;;  %v2757_v46 = vmul.f32 1.442695, %v2739_v0  ;;  %v2722_v24 = vpop.xlane.xlu0 %2721  ;;  %v849_v0 = vld [vmem:[%s9967_s11 + $0x10] sm:$0xff] }
 0x7cd   :  { %v6310_v4 = vpop.eup %6309  ;;  %3229 = vmatpush.msra.mxu3 %v849_v0 }
 0x7ce   :  { %v2865_v47 = vmul.f32 %v6310_v4, %v2788_v39  ;;  %v8738_v49 = vpop.xlane.xlu2 %3480  ;;  %v8740_v15 = vpop.eup %6311  ;;  %vm2870_vm12 = vweird.f32 %v6310_v4 }
 0x7cf   :  { %v2311_v20 = vpop.f32.mrf.mxu1  ;;  %v2798_v37 = vsel %vm1176_vm9, %v8740_v15, 0.0  ;;  %vm2871_vm1 = vmor %vm2869_vm0, %vm2870_vm12  ;;  %v8747_v36 = vpop.eup %6313 }
 0x7d0   :  { %v2866_v14 = vsub.f32 1.0, %v2865_v47  ;;  %5794 = vmatmul.msk.f32.gmra.mxu3 %vm706_vm13, %v2311_v20  ;;  %v8750_v29 = vpop.eup %6315  ;;  %v3452_v39 = vpop.f32.mrf.mxu2  ;;  %v2795_v8 = vsel %vm1176_vm9, %v8747_v36, 0.0  ;;  %v2744_v47 = vsub.f32 %v8522_v34, %v2722_v24  ;;  %v3506_v34 = vsub.f32 %v8606_v21, %v3478_v59 }
 0x7d2   :  { %v2867_v45 = vmul.f32 %v6310_v4, %v2866_v14 }
 0x7d3   :  { %2730 = vmax.xlane.f32.xlu0 %v2729_v51  ;;  %v2767_v51 = vmul.f32 1.442695, %v2744_v47 }
 0x7d4   :  { %v2868_v41 = vadd.f32 %v6310_v4, %v2867_v45  ;;  %2799 = vadd.xlane.f32.xlu1 %v2798_v37  ;;  %v10125_v45 = vld [vmem:[#allocation44_spill] sm:$0xff] }
 0x7d6   :  { %v3484_v52 = vpop.xlane.xlu2 %3483  ;;  %v2872_v35 = vsel %vm2871_vm1, %v6310_v4, %v2868_v41 }
 0x7d7   :  { %v3508_v12 = vsub.f32 %v8627_v32, %v3484_v52  ;;  %v2314_v13 = vpop.f32.mrf.mxu1  ;;  %v2877_v55 = vsel %vm2874_vm2, %v2876_v17, %v2872_v35  ;;  %v2801_v32 = vsel %vm1176_vm9, %v8750_v29, 0.0  ;;  %v2690_v52 = vpop.f32.mrf.mxu0  ;;  %v3526_v35 = vmul.f32 1.442695, %v3506_v34 }
 0x7d8   :  { %5795 = vmatmul.msk.f32.gmra.mxu3 %vm706_vm13, %v2314_v13  ;;  %v2878_v38 = vmul.f32 %v8601_v61, %v2877_v55  ;;  %v8762_v61 = vadd.f32 %v3452_v39, %v10123_v50  ;;  %v3455_v50 = vpop.f32.mrf.mxu2  ;;  %v8785_v13 = vadd.f32 %v2690_v52, %v10125_v45  ;;  %v3507_v55 = vsub.f32 %v8617_v2, %v8738_v49 }
 0x7d9   :  { %v3530_v22 = vmul.f32 1.442695, %v3508_v12  ;;  %v8773_v63 = vadd.f32 %v3455_v50, %v10125_v45 }
 0x7da   :  { %5842 = vmatmul.msk.f32.gmra.mxu1 %vm1176_vm9, %v2878_v38  ;;  %v3494_v14 = vsel %vm1176_vm9, %v8762_v61, -inf  ;;  %v2732_v59 = vsel %vm1176_vm9, %v8785_v13, -inf  ;;  %v3528_v38 = vmul.f32 1.442695, %v3507_v55 }
 0x7db   :  { %6317 = vpow2.f32 %v3530_v22  ;;  %2796 = vadd.xlane.f32.xlu0 %v2795_v8  ;;  %v3497_v41 = vsel %vm1176_vm9, %v8773_v63, -inf }
 0x7dc   :  { %2802 = vadd.xlane.f32.xlu1 %v2801_v32  ;;  %6319 = vpow2.f32 %v2757_v46 }
 0x7dd   :  { %6321 = vpow2.f32 %v2767_v51 }
 0x7de   :  { %v6155_v4 = vpop.permute.xlu1 %6154  ;;  %6323 = vpow2.f32 %v3526_v35 }
 0x7df   :  { %v6156_v10 = vunpack.i.l.bf16 %v6155_v4  ;;  %v2317_v54 = vpop.f32.mrf.mxu1  ;;  %v6157_v20 = vunpack.i.h.bf16 %v6155_v4  ;;  %6325 = vpow2.f32 %v3528_v38 }
 0x7e0   :  { %5796 = vmatmul.msk.f32.gmra.mxu3 %vm706_vm13, %v2317_v54 }
 0x7e1   :  { %v8765_v11 = vpop.eup %6317  ;;  %3890 = vmatpush.msra.mxu0 %v6156_v10 }
 0x7e2   :  { %v3566_v19 = vsel %vm1176_vm9, %v8765_v11, 0.0  ;;  %v8775_v37 = vpop.eup %6319 }
 0x7e3   :  { %3495 = vmax.xlane.f32.xlu0 %v3494_v14  ;;  %3891 = vmatpush.msra.mxu0 %v6157_v20  ;;  %v2789_v17 = vsel %vm1176_vm9, %v8775_v37, 0.0  ;;  %v8782_v12 = vpop.eup %6321 }
 0x7e4   :  { %3567 = vadd.xlane.f32.xlu1 %v3566_v19  ;;  %v2804_v21 = vsel %vm1176_vm9, %v8782_v12, 0.0  ;;  %v8793_v39 = vpop.eup %6323 }
 0x7e5   :  { %v3560_v22 = vsel %vm1176_vm9, %v8793_v39, 0.0  ;;  %v8797_v48 = vpop.eup %6325 }
 0x7e6   :  { %v3563_v2 = vsel %vm1176_vm9, %v8797_v48, 0.0 }
 0x7eb   :  { %3498 = vmax.xlane.f32.xlu0 %v3497_v41 }
 0x7ec   :  { %2790 = vadd.xlane.f32.xlu2 %v2789_v17 }
 0x7f3   :  { %2805 = vadd.xlane.f32.xlu0 %v2804_v21 }
 0x7f4   :  { %2733 = vmax.xlane.f32.xlu2 %v2732_v59 }
 0x7fc   :  { %3561 = vadd.xlane.f32.xlu2 %v3560_v22 }
 0x804   :  { %3564 = vadd.xlane.f32.xlu2 %v3563_v2 }
 0x809   :  { %v3490_v8 = vpop.xlane.xlu1 %3489 }
 0x80a   :  { %v3510_v10 = vsub.f32 %v8642_v25, %v3490_v8 }
 0x80c   :  { %v3534_v51 = vmul.f32 1.442695, %v3510_v10 }
 0x816   :  { %v3544_v49 = vpop.xlane.xlu0 %3543 }
 0x817   :  { %6327 = vrcp.f32 %v3544_v49  ;;  %v3595_v20 = vand.u32 2147483648, %v3544_v49  ;;  %v3593_v50 = vand.u32 2147483647, %v3544_v49  ;;  %vm3589_vm6 = vweird.f32 %v3544_v49 }
 0x819   :  { %v3596_v41 = vor.u32 1.1754944e-38, %v3595_v20  ;;  %vm3594_vm11 = vcmp.eq.f32.partialorder %v3593_v50, 8.507059e+37 }
 0x81d   :  { %v6328_v32 = vpop.eup %6327 }
 0x81e   :  { %v3585_v46 = vmul.f32 %v6328_v32, %v3544_v49  ;;  %v2725_v24 = vpop.xlane.xlu0 %2724  ;;  %v3547_v4 = vpop.xlane.xlu2 %3546  ;;  %vm3590_vm5 = vweird.f32 %v6328_v32 }
 0x81f   :  { %v2745_v54 = vsub.f32 %v8653_v62, %v2725_v24  ;;  %6329 = vrcp.f32 %v3547_v4  ;;  %vm3591_vm10 = vmor %vm3589_vm6, %vm3590_vm5  ;;  %v3608_v2 = vand.u32 2147483647, %v3547_v4  ;;  %v3610_v49 = vand.u32 2147483648, %v3547_v4 }
 0x820   :  { %v3586_v47 = vsub.f32 1.0, %v3585_v46  ;;  %vm3604_vm15 = vweird.f32 %v3547_v4 }
 0x821   :  { %v2769_v14 = vmul.f32 1.442695, %v2745_v54  ;;  %v3611_v54 = vor.u32 1.1754944e-38, %v3610_v49  ;;  %vm3609_vm0 = vcmp.eq.f32.partialorder %v3608_v2, 8.507059e+37 }
 0x822   :  { %v3587_v19 = vmul.f32 %v6328_v32, %v3586_v47 }
 0x823   :  { %6331 = vpow2.f32 %v2769_v14 }
 0x824   :  { %v3588_v45 = vadd.f32 %v6328_v32, %v3587_v19  ;;  %6333 = vpow2.f32 %v3534_v51 }
 0x825   :  { %v6330_v34 = vpop.eup %6329 }
 0x826   :  { %v3592_v17 = vsel %vm3591_vm10, %v6328_v32, %v3588_v45  ;;  %v3600_v52 = vmul.f32 %v6330_v34, %v3547_v4  ;;  %v3487_v25 = vpop.xlane.xlu0 %3486  ;;  %v6160_v35 = vpop.permute.xlu2 %6159  ;;  %vm3605_vm14 = vweird.f32 %v6330_v34 }
 0x827   :  { %v3597_v62 = vsel %vm3594_vm11, %v3596_v41, %v3592_v17  ;;  %v3509_v55 = vsub.f32 %v8664_v9, %v3487_v25  ;;  %v6161_v21 = vunpack.i.l.bf16 %v6160_v35  ;;  %v3550_v59 = vpop.xlane.xlu1 %3549  ;;  %v6162_v8 = vunpack.i.h.bf16 %v6160_v35  ;;  %vm3606_vm12 = vmor %vm3604_vm15, %vm3605_vm14 }
 0x828   :  { %v3601_v38 = vsub.f32 1.0, %v3600_v52  ;;  %6335 = vrcp.f32 %v3550_v59  ;;  %v3598_v32 = vmul.f32 %v8648_v18, %v3597_v62  ;;  %vm3619_vm2 = vweird.f32 %v3550_v59 }
 0x829   :  { %v8807_v22 = vpop.eup %6331  ;;  %v3532_v0 = vmul.f32 1.442695, %v3509_v55  ;;  %3892 = vmatpush.msra.mxu0 %v6161_v21  ;;  %v3623_v55 = vand.u32 2147483647, %v3550_v59 }
 0x82a   :  { %v3602_v46 = vmul.f32 %v6330_v34, %v3601_v38  ;;  %v2807_v24 = vsel %vm1176_vm9, %v8807_v22, 0.0  ;;  %v8813_v10 = vpop.eup %6333 }
 0x82b   :  { %6337 = vpow2.f32 %v3532_v0  ;;  %2808 = vadd.xlane.f32.xlu2 %v2807_v24  ;;  %3893 = vmatpush.msra.mxu0 %v6162_v8  ;;  %v3572_v25 = vsel %vm1176_vm9, %v8813_v10, 0.0  ;;  %vm3624_vm6 = vcmp.eq.f32.partialorder %v3623_v55, 8.507059e+37 }
 0x82c   :  { %v3603_v9 = vadd.f32 %v6330_v34, %v3602_v46  ;;  %5895 = vmatmul.msk.f32.vlgmr.msra.gmra.mxu0 %vm1176_vm9, %v3598_v32 }
 0x82e   :  { %v6336_v47 = vpop.eup %6335  ;;  %v2728_v20 = vpop.xlane.xlu0 %2727  ;;  %v3607_v18 = vsel %vm3606_vm12, %v6330_v34, %v3603_v9 }
 0x82f   :  { %v3615_v14 = vmul.f32 %v6336_v47, %v3550_v59  ;;  %v2746_v19 = vsub.f32 %v8679_v28, %v2728_v20  ;;  %v3493_v50 = vpop.xlane.xlu1 %3492  ;;  %v3612_v51 = vsel %vm3609_vm0, %v3611_v54, %v3607_v18  ;;  %v3625_v28 = vand.u32 2147483648, %v3550_v59 }
 0x830   :  { %v3511_v4 = vsub.f32 %v8682_v16, %v3493_v50  ;;  %v3613_v35 = vmul.f32 %v8656_v27, %v3612_v51  ;;  %vm3620_vm1 = vweird.f32 %v6336_v47 }
 0x831   :  { %v8816_v45 = vpop.eup %6337  ;;  %v3616_v41 = vsub.f32 1.0, %v3615_v14  ;;  %v2771_v17 = vmul.f32 1.442695, %v2746_v19  ;;  %vm3621_vm5 = vmor %vm3619_vm2, %vm3620_vm1  ;;  %v3626_v2 = vor.u32 1.1754944e-38, %v3625_v28 }
 0x832   :  { %v3569_v52 = vsel %vm1176_vm9, %v8816_v45, 0.0  ;;  %v3536_v21 = vmul.f32 1.442695, %v3511_v4 }
 0x833   :  { %v3617_v34 = vmul.f32 %v6336_v47, %v3616_v41  ;;  %6339 = vpow2.f32 %v2771_v17  ;;  %3570 = vadd.xlane.f32.xlu0 %v3569_v52  ;;  %3573 = vadd.xlane.f32.xlu2 %v3572_v25 }
 0x834   :  { %5896 = vmatmul.msk.f32.gmra.mxu0 %vm1176_vm9, %v3613_v35  ;;  %6341 = vpow2.f32 %v3536_v21 }
 0x835   :  { %v3618_v62 = vadd.f32 %v6336_v47, %v3617_v34 }
 0x836   :  { %v8825_v16 = vpop.xlane.xlu0 %2793 }
 0x837   :  { %v8827_v38 = vpop.xlane.xlu1 %3555  ;;  %v3622_v0 = vsel %vm3621_vm5, %v6336_v47, %v3618_v62 }
 0x838   :  { %v3627_v32 = vsel %vm3624_vm6, %v3626_v2, %v3622_v0  ;;  %6343 = vrcp.f32 %v8827_v38  ;;  %vm3649_vm0 = vweird.f32 %v8827_v38 }
 0x839   :  { %v8829_v49 = vpop.eup %6339  ;;  %v3130_v27 = vpop.f32.mrf.mxu1  ;;  %v3628_v59 = vmul.f32 %v8668_v58, %v3627_v32  ;;  %v3655_v32 = vand.u32 2147483648, %v8827_v38 }
 0x83a   :  { %5853 = vmatmul.msk.f32.vlgmr.msra.gmra.mxu3 %vm706_vm13, %v3130_v27  ;;  %v2810_v8 = vsel %vm1176_vm9, %v8829_v49, 0.0  ;;  %v8837_v24 = vpop.eup %6341 }
 0x83b   :  { %2811 = vadd.xlane.f32.xlu1 %v2810_v8  ;;  %v3575_v20 = vsel %vm1176_vm9, %v8837_v24, 0.0 }
 0x83c   :  { %5897 = vmatmul.msk.f32.gmra.mxu0 %vm1176_vm9, %v3628_v59 }
 0x83e   :  { %v3553_v46 = vpop.xlane.xlu0 %3552  ;;  %v6344_v54 = vpop.eup %6343 }
 0x83f   :  { %6345 = vrcp.f32 %v3553_v46  ;;  %v8839_v9 = vpop.xlane.xlu1 %3558  ;;  %v3645_v58 = vmul.f32 %v6344_v54, %v8827_v38  ;;  %vm3634_vm11 = vweird.f32 %v3553_v46  ;;  %v3640_v35 = vand.u32 2147483648, %v3553_v46 }
 0x840   :  { %6347 = vrcp.f32 %v8839_v9  ;;  %v3638_v62 = vand.u32 2147483647, %v3553_v46  ;;  %vm3650_vm15 = vweird.f32 %v6344_v54  ;;  %vm3664_vm6 = vweird.f32 %v8839_v9 }
 0x841   :  { %v3133_v47 = vpop.f32.mrf.mxu1  ;;  %v3646_v51 = vsub.f32 1.0, %v3645_v58  ;;  %v3641_v2 = vor.u32 1.1754944e-38, %v3640_v35  ;;  %vm3651_vm1 = vmor %vm3649_vm0, %vm3650_vm15 }
 0x842   :  { %5854 = vmatmul.msk.f32.gmra.mxu3 %vm706_vm13, %v3133_v47  ;;  %vm3639_vm12 = vcmp.eq.f32.partialorder %v3638_v62, 8.507059e+37 }
 0x843   :  { %3576 = vadd.xlane.f32.xlu1 %v3575_v20  ;;  %v3647_v34 = vmul.f32 %v6344_v54, %v3646_v51 }
 0x845   :  { %v6346_v18 = vpop.eup %6345  ;;  %v3648_v27 = vadd.f32 %v6344_v54, %v3647_v34 }
 0x846   :  { %v3630_v14 = vmul.f32 %v6346_v18, %v3553_v46  ;;  %v2731_v19 = vpop.xlane.xlu0 %2730  ;;  %v6348_v17 = vpop.eup %6347  ;;  %vm3635_vm10 = vweird.f32 %v6346_v18  ;;  %v3653_v46 = vand.u32 2147483647, %v8827_v38 }
 0x847   :  { %v2747_v50 = vsub.f32 %v8736_v1, %v2731_v19  ;;  %v3660_v55 = vmul.f32 %v6348_v17, %v8839_v9  ;;  %vm3636_vm14 = vmor %vm3634_vm11, %vm3635_vm10  ;;  %vm3665_vm5 = vweird.f32 %v6348_v17 }
 0x848   :  { %v3631_v41 = vsub.f32 1.0, %v3630_v14  ;;  %v3656_v14 = vor.u32 1.1754944e-38, %v3655_v32  ;;  %vm3654_vm2 = vcmp.eq.f32.partialorder %v3653_v46, 8.507059e+37  ;;  %vm3666_vm10 = vmor %vm3664_vm6, %vm3665_vm5 }
 0x849   :  { %v2773_v4 = vmul.f32 1.442695, %v2747_v50  ;;  %v3136_v52 = vpop.f32.mrf.mxu1  ;;  %v3661_v0 = vsub.f32 1.0, %v3660_v55 }
 0x84a   :  { %v3632_v25 = vmul.f32 %v6346_v18, %v3631_v41  ;;  %5855 = vmatmul.msk.f32.gmra.mxu3 %vm706_vm13, %v3136_v52  ;;  %v8866_v52 = vpop.xlane.xlu1 %2799 }
 0x84b   :  { %6349 = vpow2.f32 %v2773_v4  ;;  %v3662_v58 = vmul.f32 %v6348_v17, %v3661_v0 }
 0x84c   :  { %v3633_v28 = vadd.f32 %v6346_v18, %v3632_v25  ;;  %6351 = vrcp.f32 %v8825_v16 }
 0x84d   :  { %v3663_v4 = vadd.f32 %v6348_v17, %v3662_v58 }
 0x84e   :  { %v8849_v21 = vpop.xlane.xlu0 %2796  ;;  %v3637_v1 = vsel %vm3636_vm14, %v6346_v18, %v3633_v28  ;;  %v3652_v18 = vsel %vm3651_vm1, %v6344_v54, %v3648_v27  ;;  %v3668_v54 = vand.u32 2147483647, %v8839_v9 }
 0x84f   :  { %v3642_v59 = vsel %vm3639_vm12, %v3641_v2, %v3637_v1  ;;  %v3657_v41 = vsel %vm3654_vm2, %v3656_v14, %v3652_v18  ;;  %vm2899_vm2 = vweird.f32 %v8825_v16 }
 0x850   :  { %v3643_v47 = vmul.f32 %v8720_v3, %v3642_v59  ;;  %v3670_v3 = vand.u32 2147483648, %v8839_v9  ;;  %v3658_v25 = vmul.f32 %v8702_v31, %v3657_v41  ;;  %vm3669_vm11 = vcmp.eq.f32.partialorder %v3668_v54, 8.507059e+37 }
 0x851   :  { %v8851_v8 = vpop.eup %6349 }
 0x852   :  { %v2813_v20 = vsel %vm1176_vm9, %v8851_v8, 0.0  ;;  %5898 = vmatmul.msk.f32.gmra.mxu0 %vm1176_vm9, %v3643_v47  ;;  %v3671_v35 = vor.u32 1.1754944e-38, %v3670_v3  ;;  %v8871_v1 = vpop.eup %6351 }
 0x853   :  { %2814 = vadd.xlane.f32.xlu0 %v2813_v20  ;;  %v2895_v27 = vmul.f32 %v8871_v1, %v8825_v16  ;;  %vm2900_vm0 = vweird.f32 %v8871_v1 }
 0x854   :  { %vm8907_vm5 = vmor %vm2899_vm2, %vm2900_vm0 }
 0x855   :  { %v2896_v59 = vsub.f32 1.0, %v2895_v27 }
 0x856   :  { %v3496_v19 = vpop.xlane.xlu0 %3495 }
 0x857   :  { %v3512_v50 = vsub.f32 %v8762_v61, %v3496_v19  ;;  %v3139_v51 = vpop.f32.mrf.mxu1  ;;  %v3667_v61 = vsel %vm3666_vm10, %v6348_v17, %v3663_v4 }
 0x858   :  { %5856 = vmatmul.msk.f32.gmra.mxu3 %vm706_vm13, %v3139_v51  ;;  %v3672_v55 = vsel %vm3669_vm11, %v3671_v35, %v3667_v61  ;;  %vm2914_vm11 = vweird.f32 %v8849_v21 }
 0x859   :  { %v3538_v38 = vmul.f32 1.442695, %v3512_v50  ;;  %v3673_v2 = vmul.f32 %v8723_v57, %v3672_v55  ;;  %v2897_v50 = vmul.f32 %v8871_v1, %v2896_v59 }
 0x85a   :  { %5899 = vmatmul.msk.f32.gmra.mxu0 %vm1176_vm9, %v3658_v25 }
 0x85b   :  { %6353 = vpow2.f32 %v3538_v38  ;;  %v2898_v25 = vadd.f32 %v8871_v1, %v2897_v50 }
 0x85d   :  { %v2902_v59 = vsel %vm8907_vm5, %v8871_v1, %v2898_v25  ;;  %v2920_v1 = vand.u32 2147483648, %v8849_v21 }
 0x85e   :  { %v3499_v34 = vpop.xlane.xlu0 %3498 }
 0x85f   :  { %v3513_v28 = vsub.f32 %v8773_v63, %v3499_v34  ;;  %v2791_v62 = vpop.xlane.xlu2 %2790  ;;  %v8881_v63 = vpop.xlane.xlu1 %2802 }
 0x860   :  { %6355 = vrcp.f32 %v2791_v62  ;;  %v2890_v41 = vand.u32 2147483648, %v2791_v62  ;;  %v2888_v4 = vand.u32 2147483647, %v2791_v62  ;;  %vm2884_vm15 = vweird.f32 %v2791_v62 }
 0x861   :  { %v8873_v9 = vpop.eup %6353  ;;  %6357 = vrcp.f32 %v8849_v21  ;;  %v3540_v31 = vmul.f32 1.442695, %v3513_v28  ;;  %v2905_v28 = vand.u32 2147483648, %v8825_v16 }
 0x862   :  { %v3578_v17 = vsel %vm1176_vm9, %v8873_v9, 0.0  ;;  %5900 = vmatmul.msk.f32.gmra.mxu0 %vm1176_vm9, %v3673_v2  ;;  %v2891_v61 = vor.u32 1.1754944e-38, %v2890_v41  ;;  %vm2889_vm1 = vcmp.eq.f32.partialorder %v2888_v4, 8.507059e+37  ;;  %v2918_v4 = vand.u32 2147483647, %v8849_v21 }
 0x863   :  { %6359 = vpow2.f32 %v3540_v31  ;;  %3579 = vadd.xlane.f32.xlu0 %v3578_v17  ;;  %v2921_v2 = vor.u32 1.1754944e-38, %v2920_v1  ;;  %v2933_v1 = vand.u32 2147483647, %v8866_v52 }
 0x864   :  { %6361 = vrcp.f32 %v8866_v52 }
 0x866   :  { %v6356_v0 = vpop.eup %6355  ;;  %v8930_v50 = vpop.xlane.xlu0 %2805 }
 0x867   :  { %v8884_v32 = vpop.eup %6357  ;;  %v2880_v46 = vmul.f32 %v6356_v0, %v2791_v62  ;;  %v2734_v47 = vpop.xlane.xlu2 %2733  ;;  %vm2885_vm14 = vweird.f32 %v6356_v0  ;;  %v2903_v62 = vand.u32 2147483647, %v8825_v16 }
 0x868   :  { %v2748_v57 = vsub.f32 %v8785_v13, %v2734_v47  ;;  %v2910_v18 = vmul.f32 %v8884_v32, %v8849_v21  ;;  %v8895_v38 = vpop.xlane.xlu1 %3567  ;;  %vm2886_vm12 = vmor %vm2884_vm15, %vm2885_vm14  ;;  %vm2915_vm10 = vweird.f32 %v8884_v32 }
 0x869   :  { %v8887_v20 = vpop.eup %6359  ;;  %v2881_v58 = vsub.f32 1.0, %v2880_v46  ;;  %v2906_v46 = vor.u32 1.1754944e-38, %v2905_v28  ;;  %vm2904_vm6 = vcmp.eq.f32.partialorder %v2903_v62, 8.507059e+37  ;;  %vm8935_vm14 = vmor %vm2914_vm11, %vm2915_vm10 }
 0x86a   :  { %v2775_v14 = vmul.f32 1.442695, %v2748_v57  ;;  %v3581_v19 = vsel %vm1176_vm9, %v8887_v20, 0.0  ;;  %v2911_v3 = vsub.f32 1.0, %v2910_v18  ;;  %v8897_v54 = vpop.eup %6361 }
 0x86b   :  { %v2882_v51 = vmul.f32 %v6356_v0, %v2881_v58  ;;  %3582 = vadd.xlane.f32.xlu1 %v3581_v19  ;;  %v2925_v17 = vmul.f32 %v8897_v54, %v8866_v52 }
 0x86c   :  { %6363 = vpow2.f32 %v2775_v14  ;;  %v2912_v27 = vmul.f32 %v8884_v32, %v2911_v3 }
 0x86d   :  { %v2883_v13 = vadd.f32 %v6356_v0, %v2882_v51  ;;  %v2926_v57 = vsub.f32 1.0, %v2925_v17 }
 0x86e   :  { %v2913_v58 = vadd.f32 %v8884_v32, %v2912_v27 }
 0x86f   :  { %v3562_v35 = vpop.xlane.xlu2 %3561  ;;  %v2887_v34 = vsel %vm2886_vm12, %v6356_v0, %v2883_v13  ;;  %v2927_v25 = vmul.f32 %v8897_v54, %v2926_v57  ;;  %vm2919_vm12 = vcmp.eq.f32.partialorder %v2918_v4, 8.507059e+37  ;;  %v2935_v57 = vand.u32 2147483648, %v8866_v52 }
 0x870   :  { %6365 = vrcp.f32 %v3562_v35  ;;  %v2892_v55 = vsel %vm2889_vm1, %v2891_v61, %v2887_v34  ;;  %v3685_v34 = vand.u32 2147483648, %v3562_v35  ;;  %v2917_v28 = vsel %vm8935_vm14, %v8884_v32, %v2913_v58 }
 0x871   :  { %6367 = vrcp.f32 %v8895_v38  ;;  %v2893_v0 = vmul.f32 %v8775_v37, %v2892_v55  ;;  %v2907_v37 = vsel %vm2904_vm6, %v2906_v46, %v2902_v59  ;;  %v3683_v55 = vand.u32 2147483647, %v3562_v35 }
 0x872   :  { %v8905_v31 = vpop.eup %6363  ;;  %6369 = vrcp.f32 %v8881_v63  ;;  %v2908_v3 = vmul.f32 %v8693_v60, %v2907_v37  ;;  %vm3679_vm0 = vweird.f32 %v3562_v35  ;;  %v2928_v27 = vadd.f32 %v8897_v54, %v2927_v25 }
 0x873   :  { %v2816_v16 = vsel %vm1176_vm9, %v8905_v31, 0.0  ;;  %5843 = vmatmul.msk.f32.gmra.mxu1 %vm1176_vm9, %v2893_v0  ;;  %vm2930_vm1 = vweird.f32 %v8897_v54  ;;  %v3686_v32 = vor.u32 1.1754944e-38, %v3685_v34  ;;  %v2922_v0 = vsel %vm2919_vm12, %v2921_v2, %v2917_v28 }
 0x874   :  { %2817 = vadd.xlane.f32.xlu2 %v2816_v16  ;;  %vm3684_vm5 = vcmp.eq.f32.partialorder %v3683_v55, 8.507059e+37  ;;  %vm2929_vm6 = vweird.f32 %v8866_v52  ;;  %v2936_v52 = vor.u32 1.1754944e-38, %v2935_v57  ;;  %vm2934_vm14 = vcmp.eq.f32.partialorder %v2933_v1, 8.507059e+37 }
 0x875   :  { %vm8958_vm10 = vmor %vm2929_vm6, %vm2930_vm1  ;;  %vm2944_vm6 = vweird.f32 %v8881_v63  ;;  %v2963_v1 = vand.u32 2147483647, %v8930_v50 }
 0x876   :  { %v6366_v47 = vpop.eup %6365 }
 0x877   :  { %v8924_v18 = vpop.eup %6367  ;;  %v3675_v14 = vmul.f32 %v6366_v47, %v3562_v35  ;;  %v8926_v19 = vpop.xlane.xlu2 %3564  ;;  %vm3680_vm15 = vweird.f32 %v6366_v47 }
 0x878   :  { %6371 = vrcp.f32 %v8926_v19  ;;  %v8933_v51 = vpop.eup %6369  ;;  %v3705_v61 = vmul.f32 %v8924_v18, %v8895_v38  ;;  %vm3681_vm2 = vmor %vm3679_vm0, %vm3680_vm15  ;;  %v3698_v34 = vand.u32 2147483647, %v8926_v19  ;;  %vm3694_vm15 = vweird.f32 %v8926_v19 }
 0x879   :  { %v3676_v13 = vsub.f32 1.0, %v3675_v14  ;;  %6373 = vrcp.f32 %v8930_v50  ;;  %v2940_v21 = vmul.f32 %v8933_v51, %v8881_v63  ;;  %vm2945_vm12 = vweird.f32 %v8933_v51 }
 0x87a   :  { %v3706_v16 = vsub.f32 1.0, %v3705_v61  ;;  %vm3710_vm1 = vweird.f32 %v8924_v18  ;;  %v2965_v14 = vand.u32 2147483648, %v8930_v50 }
 0x87b   :  { %v3677_v62 = vmul.f32 %v6366_v47, %v3676_v13  ;;  %5844 = vmatmul.msk.f32.gmra.mxu1 %vm1176_vm9, %v2908_v3  ;;  %v2941_v58 = vsub.f32 1.0, %v2940_v21  ;;  %v3700_v13 = vand.u32 2147483648, %v8926_v19  ;;  %v2932_v3 = vsel %vm8958_vm10, %v8897_v54, %v2928_v27 }
 0x87c   :  { %v3707_v25 = vmul.f32 %v8924_v18, %v3706_v16 }
 0x87d   :  { %v3678_v60 = vadd.f32 %v6366_v47, %v3677_v62  ;;  %v2942_v28 = vmul.f32 %v8933_v51, %v2941_v58  ;;  %v3701_v54 = vor.u32 1.1754944e-38, %v3700_v13  ;;  %v2937_v62 = vsel %vm2934_vm14, %v2936_v52, %v2932_v3 }
 0x87e   :  { %v6372_v17 = vpop.eup %6371  ;;  %v3708_v55 = vadd.f32 %v8924_v18, %v3707_v25 }
 0x87f   :  { %v3690_v59 = vmul.f32 %v6372_v17, %v8926_v19  ;;  %v3682_v46 = vsel %vm3681_vm2, %v6366_v47, %v3678_v60  ;;  %v8956_v35 = vpop.eup %6373  ;;  %v2923_v47 = vmul.f32 %v8747_v36, %v2922_v0  ;;  %vm3695_vm11 = vweird.f32 %v6372_v17 }
 0x880   :  { %v3687_v37 = vsel %vm3684_vm5, %v3686_v32, %v3682_v46  ;;  %vm3696_vm0 = vmor %vm3694_vm15, %vm3695_vm11  ;;  %vm3699_vm2 = vcmp.eq.f32.partialorder %v3698_v34, 8.507059e+37  ;;  %v2943_v21 = vadd.f32 %v8933_v51, %v2942_v28  ;;  %v3715_v60 = vand.u32 2147483648, %v8895_v38 }
 0x881   :  { %v3691_v41 = vsub.f32 1.0, %v3690_v59  ;;  %v3688_v4 = vmul.f32 %v8793_v39, %v3687_v37  ;;  %v2955_v39 = vmul.f32 %v8956_v35, %v8930_v50  ;;  %v2950_v0 = vand.u32 2147483648, %v8881_v63  ;;  %vm2946_vm11 = vmor %vm2944_vm6, %vm2945_vm12 }
 0x882   :  { %vm3709_vm5 = vweird.f32 %v8895_v38  ;;  %v3713_v19 = vand.u32 2147483647, %v8895_v38  ;;  %v2948_v59 = vand.u32 2147483647, %v8881_v63  ;;  %v3716_v57 = vor.u32 1.1754944e-38, %v3715_v60 }
 0x883   :  { %v3692_v61 = vmul.f32 %v6372_v17, %v3691_v41  ;;  %5901 = vmatmul.msk.f32.gmra.mxu0 %vm1176_vm9, %v3688_v4  ;;  %5845 = vmatmul.msk.f32.gmra.mxu1 %vm1176_vm9, %v2923_v47  ;;  %v2956_v27 = vsub.f32 1.0, %v2955_v39  ;;  %vm3711_vm10 = vmor %vm3709_vm5, %vm3710_vm1  ;;  %v2951_v38 = vor.u32 1.1754944e-38, %v2950_v0  ;;  %vm2960_vm12 = vweird.f32 %v8956_v35 }
 0x884   :  { %v3712_v46 = vsel %vm3711_vm10, %v8924_v18, %v3708_v55  ;;  %vm3714_vm14 = vcmp.eq.f32.partialorder %v3713_v19, 8.507059e+37  ;;  %vm2949_vm15 = vcmp.eq.f32.partialorder %v2948_v59, 8.507059e+37  ;;  %v2966_v4 = vor.u32 1.1754944e-38, %v2965_v14 }
 0x885   :  { %v3693_v36 = vadd.f32 %v6372_v17, %v3692_v61  ;;  %v2957_v58 = vmul.f32 %v8956_v35, %v2956_v27  ;;  %v3717_v63 = vsel %vm3714_vm14, %v3716_v57, %v3712_v46 }
 0x886   :  { %v3718_v18 = vmul.f32 %v8765_v11, %v3717_v63 }
 0x887   :  { %v3697_v2 = vsel %vm3696_vm0, %v6372_v17, %v3693_v36  ;;  %v2938_v17 = vmul.f32 %v8740_v15, %v2937_v62  ;;  %v2958_v15 = vadd.f32 %v8956_v35, %v2957_v58  ;;  %vm2959_vm0 = vweird.f32 %v8930_v50 }
 0x888   :  { %v3702_v32 = vsel %vm3699_vm2, %v3701_v54, %v3697_v2  ;;  %vm2961_vm1 = vmor %vm2959_vm0, %vm2960_vm12  ;;  %vm2964_vm2 = vcmp.eq.f32.partialorder %v2963_v1, 8.507059e+37 }
 0x889   :  { %v3703_v16 = vmul.f32 %v8797_v48, %v3702_v32  ;;  %v2947_v48 = vsel %vm2946_vm11, %v8933_v51, %v2943_v21  ;;  %v2962_v51 = vsel %vm2961_vm1, %v8956_v35, %v2958_v15 }
 0x88a   :  { %v2952_v37 = vsel %vm2949_vm15, %v2951_v38, %v2947_v48  ;;  %v2967_v13 = vsel %vm2964_vm2, %v2966_v4, %v2962_v51 }
 0x88b   :  { %5902 = vmatmul.msk.f32.gmra.mxu0 %vm1176_vm9, %v3703_v16  ;;  %5846 = vmatmul.msk.f32.gmra.mxu1 %vm1176_vm9, %v2938_v17  ;;  %v2953_v41 = vmul.f32 %v8750_v29, %v2952_v37  ;;  %v2968_v47 = vmul.f32 %v8782_v12, %v2967_v13 }
 0x893   :  { %5903 = vmatmul.msk.f32.gmra.mxu0 %vm1176_vm9, %v3718_v18  ;;  %5847 = vmatmul.msk.f32.gmra.mxu1 %vm1176_vm9, %v2953_v41 }
 0x89b   :  { %5848 = vmatmul.msk.f32.gmra.mxu1 %vm1176_vm9, %v2968_v47 }
 0x89e   :  { %v2809_v11 = vpop.xlane.xlu2 %2808 }
 0x89f   :  { %6375 = vrcp.f32 %v2809_v11  ;;  %v2980_v52 = vand.u32 2147483648, %v2809_v11  ;;  %v2978_v35 = vand.u32 2147483647, %v2809_v11  ;;  %vm2974_vm6 = vweird.f32 %v2809_v11 }
 0x8a1   :  { %v2981_v36 = vor.u32 1.1754944e-38, %v2980_v52  ;;  %vm2979_vm11 = vcmp.eq.f32.partialorder %v2978_v35, 8.507059e+37 }
 0x8a5   :  { %v6376_v3 = vpop.eup %6375 }
 0x8a6   :  { %v2970_v50 = vmul.f32 %v6376_v3, %v2809_v11  ;;  %v3571_v25 = vpop.xlane.xlu0 %3570  ;;  %v3574_v29 = vpop.xlane.xlu2 %3573  ;;  %vm2975_vm5 = vweird.f32 %v6376_v3 }
 0x8a7   :  { %6377 = vrcp.f32 %v3571_v25  ;;  %vm2976_vm10 = vmor %vm2974_vm6, %vm2975_vm5  ;;  %v3730_v19 = vand.u32 2147483648, %v3571_v25  ;;  %v3728_v16 = vand.u32 2147483647, %v3571_v25  ;;  %vm3724_vm15 = vweird.f32 %v3571_v25 }
 0x8a8   :  { %v2971_v61 = vsub.f32 1.0, %v2970_v50  ;;  %6379 = vrcp.f32 %v3574_v29  ;;  %vm3739_vm2 = vweird.f32 %v3574_v29  ;;  %v3743_v14 = vand.u32 2147483647, %v3574_v29 }
 0x8a9   :  { %v3731_v57 = vor.u32 1.1754944e-38, %v3730_v19  ;;  %vm3729_vm0 = vcmp.eq.f32.partialorder %v3728_v16, 8.507059e+37 }
 0x8aa   :  { %v2972_v34 = vmul.f32 %v6376_v3, %v2971_v61 }
 0x8ac   :  { %v2973_v28 = vadd.f32 %v6376_v3, %v2972_v34 }
 0x8ad   :  { %v6378_v39 = vpop.eup %6377 }
 0x8ae   :  { %v6380_v12 = vpop.eup %6379  ;;  %v3720_v54 = vmul.f32 %v6378_v39, %v3571_v25  ;;  %v2812_v62 = vpop.xlane.xlu1 %2811  ;;  %v2977_v55 = vsel %vm2976_vm10, %v6376_v3, %v2973_v28  ;;  %vm3725_vm14 = vweird.f32 %v6378_v39 }
 0x8af   :  { %v3735_v2 = vmul.f32 %v6380_v12, %v3574_v29  ;;  %6381 = vrcp.f32 %v2812_v62  ;;  %v2982_v60 = vsel %vm2979_vm11, %v2981_v36, %v2977_v55  ;;  %vm3726_vm12 = vmor %vm3724_vm15, %vm3725_vm14  ;;  %vm3740_vm1 = vweird.f32 %v6380_v12 }
 0x8b0   :  { %v3721_v21 = vsub.f32 1.0, %v3720_v54  ;;  %v2983_v32 = vmul.f32 %v8807_v22, %v2982_v60  ;;  %v3745_v22 = vand.u32 2147483648, %v3574_v29  ;;  %v2995_v18 = vand.u32 2147483648, %v2812_v62  ;;  %vm9011_vm5 = vmor %vm3739_vm2, %vm3740_vm1 }
 0x8b1   :  { %v3736_v27 = vsub.f32 1.0, %v3735_v2  ;;  %v2993_v4 = vand.u32 2147483647, %v2812_v62  ;;  %vm2989_vm10 = vweird.f32 %v2812_v62  ;;  %vm3744_vm11 = vcmp.eq.f32.partialorder %v3743_v14, 8.507059e+37 }
 0x8b2   :  { %v3722_v0 = vmul.f32 %v6378_v39, %v3721_v21  ;;  %5849 = vmatmul.msk.f32.gmra.mxu1 %vm1176_vm9, %v2983_v32  ;;  %v3746_v47 = vor.u32 1.1754944e-38, %v3745_v22  ;;  %v2996_v50 = vor.u32 1.1754944e-38, %v2995_v18 }
 0x8b3   :  { %v3737_v59 = vmul.f32 %v6380_v12, %v3736_v27  ;;  %vm2994_vm15 = vcmp.eq.f32.partialorder %v2993_v4, 8.507059e+37 }
 0x8b4   :  { %v3723_v17 = vadd.f32 %v6378_v39, %v3722_v0 }
 0x8b5   :  { %v6382_v46 = vpop.eup %6381  ;;  %v3738_v63 = vadd.f32 %v6380_v12, %v3737_v59 }
 0x8b6   :  { %v2985_v58 = vmul.f32 %v6382_v46, %v2812_v62  ;;  %v3577_v48 = vpop.xlane.xlu1 %3576  ;;  %v3727_v38 = vsel %vm3726_vm12, %v6378_v39, %v3723_v17  ;;  %vm2990_vm6 = vweird.f32 %v6382_v46 }
 0x8b7   :  { %6383 = vrcp.f32 %v3577_v48  ;;  %v3732_v15 = vsel %vm3729_vm0, %v3731_v57, %v3727_v38  ;;  %v3742_v13 = vsel %vm9011_vm5, %v6380_v12, %v3738_v63  ;;  %vm2991_vm14 = vmor %vm2989_vm10, %vm2990_vm6  ;;  %v3760_v39 = vand.u32 2147483648, %v3577_v48 }
 0x8b8   :  { %v2986_v37 = vsub.f32 1.0, %v2985_v58  ;;  %v3733_v1 = vmul.f32 %v8816_v45, %v3732_v15  ;;  %v3747_v29 = vsel %vm3744_vm11, %v3746_v47, %v3742_v13  ;;  %v3758_v12 = vand.u32 2147483647, %v3577_v48  ;;  %v850_v15 = vld [vmem:[%s9967_s11 + $0x18] sm:$0xff] }
 0x8b9   :  { %v3748_v35 = vmul.f32 %v8813_v10, %v3747_v29  ;;  %vm3754_vm0 = vweird.f32 %v3577_v48  ;;  %v3761_v54 = vor.u32 1.1754944e-38, %v3760_v39  ;;  %3994 = vmatpush.msra.mxu1 %v850_v15 }
 0x8ba   :  { %v2987_v51 = vmul.f32 %v6382_v46, %v2986_v37  ;;  %5904 = vmatmul.msk.f32.gmra.mxu0 %vm1176_vm9, %v3733_v1  ;;  %vm3759_vm2 = vcmp.eq.f32.partialorder %v3758_v12, 8.507059e+37  ;;  %v3895_v12 = vpop.f32.mrf.mxu0 }
 0x8bc   :  { %v2988_v11 = vadd.f32 %v6382_v46, %v2987_v51 }
 0x8bd   :  { %v6384_v3 = vpop.eup %6383 }
 0x8be   :  { %v3750_v45 = vmul.f32 %v6384_v3, %v3577_v48  ;;  %v2992_v25 = vsel %vm2991_vm14, %v6382_v46, %v2988_v11  ;;  %vm3755_vm12 = vweird.f32 %v6384_v3 }
 0x8bf   :  { %v2997_v61 = vsel %vm2994_vm15, %v2996_v50, %v2992_v25  ;;  %vm3756_vm1 = vmor %vm3754_vm0, %vm3755_vm12 }
 0x8c0   :  { %v3751_v34 = vsub.f32 1.0, %v3750_v45  ;;  %v2998_v52 = vmul.f32 %v8829_v49, %v2997_v61  ;;  %v9031_v45 = vpop.f32.mrf.mxu3 }
 0x8c2   :  { %v3752_v28 = vmul.f32 %v6384_v3, %v3751_v34  ;;  %5850 = vmatmul.msk.f32.gmra.mxu1 %vm1176_vm9, %v2998_v52  ;;  %5905 = vmatmul.msk.f32.gmra.mxu0 %vm1176_vm9, %v3748_v35 }
 0x8c4   :  { %v3753_v36 = vadd.f32 %v6384_v3, %v3752_v28 }
 0x8c6   :  { %v2815_v62 = vpop.xlane.xlu0 %2814  ;;  %v3757_v55 = vsel %vm3756_vm1, %v6384_v3, %v3753_v36 }
 0x8c7   :  { %6385 = vrcp.f32 %v2815_v62  ;;  %v3762_v2 = vsel %vm3759_vm2, %v3761_v54, %v3757_v55  ;;  %v3010_v32 = vand.u32 2147483648, %v2815_v62  ;;  %v3008_v0 = vand.u32 2147483647, %v2815_v62 }
 0x8c8   :  { %v3763_v49 = vmul.f32 %v8837_v24, %v3762_v2  ;;  %vm3004_vm6 = vweird.f32 %v2815_v62  ;;  %v9036_v2 = vpop.f32.mrf.mxu3 }
 0x8c9   :  { %v3011_v16 = vor.u32 1.1754944e-38, %v3010_v32  ;;  %vm3009_vm11 = vcmp.eq.f32.partialorder %v3008_v0, 8.507059e+37 }
 0x8ca   :  { %5906 = vmatmul.msk.f32.gmra.mxu0 %vm1176_vm9, %v3763_v49 }
 0x8cd   :  { %v6386_v10 = vpop.eup %6385 }
 0x8ce   :  { %v3000_v21 = vmul.f32 %v6386_v10, %v2815_v62  ;;  %vm3005_vm5 = vweird.f32 %v6386_v10 }
 0x8cf   :  { %vm3006_vm10 = vmor %vm3004_vm6, %vm3005_vm5 }
 0x8d0   :  { %v3001_v60 = vsub.f32 1.0, %v3000_v21  ;;  %v9041_v32 = vpop.f32.mrf.mxu3 }
 0x8d2   :  { %v3002_v27 = vmul.f32 %v6386_v10, %v3001_v60 }
 0x8d4   :  { %v3003_v19 = vadd.f32 %v6386_v10, %v3002_v27  ;;  %v3898_v27 = vpop.f32.mrf.mxu0 }
 0x8d6   :  { %v3580_v59 = vpop.xlane.xlu0 %3579  ;;  %v3007_v17 = vsel %vm3006_vm10, %v6386_v10, %v3003_v19 }
 0x8d7   :  { %6387 = vrcp.f32 %v3580_v59  ;;  %v3012_v46 = vsel %vm3009_vm11, %v3011_v16, %v3007_v17  ;;  %v3775_v63 = vand.u32 2147483648, %v3580_v59  ;;  %v3773_v37 = vand.u32 2147483647, %v3580_v59 }
 0x8d8   :  { %v3013_v24 = vmul.f32 %v8851_v8, %v3012_v46  ;;  %vm3769_vm15 = vweird.f32 %v3580_v59 }
 0x8d9   :  { %v3776_v8 = vor.u32 1.1754944e-38, %v3775_v63  ;;  %vm3774_vm0 = vcmp.eq.f32.partialorder %v3773_v37, 8.507059e+37 }
 0x8da   :  { %5851 = vmatmul.msk.f32.gmra.mxu1 %vm1176_vm9, %v3013_v24 }
 0x8dc   :  { %v3901_v19 = vpop.f32.mrf.mxu0 }
 0x8dd   :  { %v6388_v57 = vpop.eup %6387 }
 0x8de   :  { %v3765_v58 = vmul.f32 %v6388_v57, %v3580_v59  ;;  %v3583_v48 = vpop.xlane.xlu1 %3582  ;;  %vm3770_vm14 = vweird.f32 %v6388_v57  ;;  %v9045_v59 = vpop.f32.mrf.mxu3 }
 0x8df   :  { %6389 = vrcp.f32 %v3583_v48  ;;  %vm3771_vm12 = vmor %vm3769_vm15, %vm3770_vm14  ;;  %v3790_v47 = vand.u32 2147483648, %v3583_v48  ;;  %v3788_v50 = vand.u32 2147483647, %v3583_v48  ;;  %vm3784_vm2 = vweird.f32 %v3583_v48 }
 0x8e0   :  { %v3766_v38 = vsub.f32 1.0, %v3765_v58 }
 0x8e1   :  { %v3791_v29 = vor.u32 1.1754944e-38, %v3790_v47  ;;  %vm3789_vm6 = vcmp.eq.f32.partialorder %v3788_v50, 8.507059e+37 }
 0x8e2   :  { %v3767_v22 = vmul.f32 %v6388_v57, %v3766_v38 }
 0x8e4   :  { %v3768_v14 = vadd.f32 %v6388_v57, %v3767_v22 }
 0x8e5   :  { %v6390_v18 = vpop.eup %6389 }
 0x8e6   :  { %v3780_v1 = vmul.f32 %v6390_v18, %v3583_v48  ;;  %v3772_v41 = vsel %vm3771_vm12, %v6388_v57, %v3768_v14  ;;  %vm3785_vm1 = vweird.f32 %v6390_v18  ;;  %v9049_v46 = vpop.f32.mrf.mxu3 }
 0x8e7   :  { %v2818_v51 = vpop.xlane.xlu2 %2817  ;;  %v3777_v4 = vsel %vm3774_vm0, %v3776_v8, %v3772_v41  ;;  %vm3786_vm5 = vmor %vm3784_vm2, %vm3785_vm1 }
 0x8e8   :  { %v3781_v13 = vsub.f32 1.0, %v3780_v1  ;;  %6391 = vrcp.f32 %v2818_v51  ;;  %v3778_v11 = vmul.f32 %v8873_v9, %v3777_v4  ;;  %v3025_v36 = vand.u32 2147483648, %v2818_v51 }
 0x8e9   :  { %v3023_v62 = vand.u32 2147483647, %v2818_v51  ;;  %vm3019_vm11 = vweird.f32 %v2818_v51 }
 0x8ea   :  { %v3782_v3 = vmul.f32 %v6390_v18, %v3781_v13  ;;  %5907 = vmatmul.msk.f32.gmra.mxu0 %vm1176_vm9, %v3778_v11  ;;  %v3026_v49 = vor.u32 1.1754944e-38, %v3025_v36 }
 0x8eb   :  { %vm3024_vm15 = vcmp.eq.f32.partialorder %v3023_v62, 8.507059e+37 }
 0x8ec   :  { %v3783_v25 = vadd.f32 %v6390_v18, %v3782_v3 }
 0x8ee   :  { %v6392_v61 = vpop.eup %6391  ;;  %v3787_v34 = vsel %vm3786_vm5, %v6390_v18, %v3783_v25  ;;  %v9055_v58 = vpop.f32.mrf.mxu3 }
 0x8ef   :  { %v3015_v52 = vmul.f32 %v6392_v61, %v2818_v51  ;;  %v3792_v35 = vsel %vm3789_vm6, %v3791_v29, %v3787_v34  ;;  %vm3020_vm10 = vweird.f32 %v6392_v61 }
 0x8f0   :  { %v3793_v28 = vmul.f32 %v8887_v20, %v3792_v35  ;;  %v3142_v9 = vpop.f32.mrf.mxu1  ;;  %vm3021_vm14 = vmor %vm3019_vm11, %vm3020_vm10 }
 0x8f1   :  { %v3016_v39 = vsub.f32 1.0, %v3015_v52  ;;  %5857 = vmatmul.msk.f32.gmra.mxu3 %vm706_vm13, %v3142_v9 }
 0x8f2   :  { %5908 = vmatmul.msk.f32.gmra.mxu0 %vm1176_vm9, %v3793_v28 }
 0x8f3   :  { %v3017_v54 = vmul.f32 %v6392_v61, %v3016_v39 }
 0x8f5   :  { %v3018_v55 = vadd.f32 %v6392_v61, %v3017_v54 }
 0x8f6   :  { %v9058_v38 = vpop.f32.mrf.mxu3 }
 0x8f7   :  { %v3022_v10 = vsel %vm3021_vm14, %v6392_v61, %v3018_v55 }
 0x8f8   :  { %v3027_v20 = vsel %vm3024_vm15, %v3026_v49, %v3022_v10  ;;  %v3145_v21 = vpop.f32.mrf.mxu1 }
 0x8f9   :  { %v3028_v60 = vmul.f32 %v8905_v31, %v3027_v20  ;;  %5858 = vmatmul.msk.f32.gmra.mxu3 %vm706_vm13, %v3145_v21  ;;  %v3904_v31 = vpop.f32.mrf.mxu0 }
 0x8fb   :  { %5852 = vmatmul.msk.f32.gmra.mxu1 %vm1176_vm9, %v3028_v60 }
 0x8fe   :  { %v2400_v22 = vpop.f32.mrf.mxu3 }
 0x8ff   :  { %v2502_v60 = vadd.f32 %v8507_v40, %v2400_v22 }
 0x900   :  { %v3148_v0 = vpop.f32.mrf.mxu1 }
 0x901   :  { %5859 = vmatmul.msk.f32.gmra.mxu3 %vm706_vm13, %v3148_v0  ;;  %v3907_v24 = vpop.f32.mrf.mxu0 }
 0x903   :  { %5909 = vmatmul.msk.f32.vlgmr.msra.gmra.mxu1 %vm706_vm13, %v3895_v12 }
 0x906   :  { %v9063_v14 = vpop.f32.mrf.mxu3 }
 0x908   :  { %v3151_v16 = vpop.f32.mrf.mxu1 }
 0x909   :  { %5860 = vmatmul.msk.f32.gmra.mxu3 %vm706_vm13, %v3151_v16  ;;  %v3910_v48 = vpop.f32.mrf.mxu0 }
 0x90b   :  { %5910 = vmatmul.msk.f32.gmra.mxu1 %vm706_vm13, %v3898_v27 }
 0x90e   :  { %v2406_v1 = vpop.f32.mrf.mxu3 }
 0x910   :  { %v3154_v17 = vpop.f32.mrf.mxu1 }
 0x911   :  { %5861 = vmatmul.msk.f32.gmra.mxu3 %vm706_vm13, %v3154_v17  ;;  %v3913_v63 = vpop.f32.mrf.mxu0 }
 0x913   :  { %5911 = vmatmul.msk.f32.gmra.mxu1 %vm706_vm13, %v3901_v19 }
 0x916   :  { %v2409_v51 = vpop.f32.mrf.mxu3 }
 0x918   :  { %v3157_v57 = vpop.f32.mrf.mxu1 }
 0x919   :  { %5862 = vmatmul.msk.f32.gmra.mxu3 %vm706_vm13, %v3157_v57  ;;  %v3916_v15 = vpop.f32.mrf.mxu0 }
 0x91b   :  { %5912 = vmatmul.msk.f32.gmra.mxu1 %vm706_vm13, %v3904_v31 }
 0x91e   :  { %v2412_v13 = vpop.f32.mrf.mxu3 }
 0x921   :  { %v3919_v18 = vpop.f32.mrf.mxu0 }
 0x923   :  { %5913 = vmatmul.msk.f32.gmra.mxu1 %vm706_vm13, %v3907_v24  ;;  %v2508_v24 = vadd.f32 %v8524_v43, %v2406_v1 }
 0x926   :  { %v9072_v3 = vpop.f32.mrf.mxu3 }
 0x92b   :  { %5914 = vmatmul.msk.f32.gmra.mxu1 %vm706_vm13, %v3910_v48 }
 0x92e   :  { %v9074_v50 = vpop.f32.mrf.mxu3 }
 0x92f   :  { %v3160_v37 = vpop.f32.mrf.mxu1 }
 0x930   :  { %5863 = vmatmul.msk.f32.gmra.mxu3 %vm706_vm13, %v3160_v37 }
 0x933   :  { %5915 = vmatmul.msk.f32.gmra.mxu1 %vm706_vm13, %v3913_v63  ;;  %v9106_v63 = vld [vmem:[%s9965_s14] sm:$0xff] }
 0x934   :  { %v9109_v37 = vperm.slane %v9106_v63, 3 }
 0x936   :  { %v9077_v29 = vpop.f32.mrf.mxu3 }
 0x937   :  { %v3922_v41 = vpop.f32.mrf.mxu0 }
 0x93b   :  { %5916 = vmatmul.msk.f32.gmra.mxu1 %vm706_vm13, %v3916_v15 }
 0x93e   :  { %v9080_v34 = vpop.f32.mrf.mxu3 }
 0x93f   :  { %v3163_v8 = vpop.f32.mrf.mxu1  ;;  %v3925_v4 = vpop.f32.mrf.mxu0 }
 0x940   :  { %5864 = vmatmul.msk.f32.gmra.mxu3 %vm706_vm13, %v3163_v8  ;;  %v10134_v8 = vld [vmem:[#allocation14_spill] sm:$0xff] }
 0x943   :  { %5917 = vmatmul.msk.f32.gmra.mxu1 %vm706_vm13, %v3919_v18  ;;  %v2511_v18 = vadd.f32 %v8534_v53, %v2409_v51  ;;  %v2505_v53 = vadd.f32 %v8515_v7, %v9063_v14 }
 0x946   :  { %v9085_v28 = vpop.f32.mrf.mxu3 }
 0x947   :  { %v3928_v11 = vpop.f32.mrf.mxu0 }
 0x94b   :  { %5918 = vmatmul.msk.f32.gmra.mxu1 %vm706_vm13, %v3922_v41 }
 0x94e   :  { %v9089_v9 = vpop.f32.mrf.mxu3 }
 0x953   :  { %5919 = vmatmul.msk.f32.gmra.mxu1 %vm706_vm13, %v3925_v4 }
 0x957   :  { %v3166_v47 = vpop.f32.mrf.mxu1 }
 0x958   :  { %5865 = vmatmul.msk.f32.gmra.mxu3 %vm706_vm13, %v3166_v47 }
 0x95b   :  { %5920 = vmatmul.msk.f32.gmra.mxu1 %vm706_vm13, %v3928_v11 }
 0x967   :  { %v3931_v25 = vpop.f32.mrf.mxu0 }
 0x968   :  { %5921 = vmatmul.msk.f32.gmra.mxu1 %vm706_vm13, %v3931_v25 }
 0x96f   :  { %v3934_v61 = vpop.f32.mrf.mxu0 }
 0x970   :  { %5922 = vmatmul.msk.f32.gmra.mxu1 %vm706_vm13, %v3934_v61  ;;  %v2514_v61 = vadd.f32 %v8541_v5, %v2412_v13  ;;  %v2496_v5 = vadd.f32 %v8490_v23, %v9055_v58  ;;  %v2487_v23 = vadd.f32 %v8452_v6, %v9041_v32  ;;  %v10139_v6 = vld [vmem:[#allocation10_spill] sm:$0xff] }
 0x974   :  { %v9093_v36 = vpop.f32.mrf.mxu3 }
 0x978   :  { %v3169_v52 = vpop.f32.mrf.mxu1 }
 0x979   :  { %5866 = vmatmul.msk.f32.gmra.mxu3 %vm706_vm13, %v3169_v52  ;;  %v10135_v52 = vld [vmem:[#allocation15_spill] sm:$0xff] }
 0x97c   :  { %v3246_v62 = vpop.f32.mrf.mxu3 }
 0x97d   :  { %v3278_v14 = vadd.f32 %v3246_v62, %v2496_v5 }
 0x980   :  { %v9083_v35 = vpop.f32.mrf.mxu1 }
 0x984   :  { %v3249_v49 = vpop.f32.mrf.mxu3 }
 0x988   :  { %v9087_v39 = vpop.f32.mrf.mxu1 }
 0x98c   :  { %v3252_v20 = vpop.f32.mrf.mxu3 }
 0x98d   :  { %v3280_v27 = vadd.f32 %v3252_v20, %v2502_v60 }
 0x990   :  { %v9091_v12 = vpop.f32.mrf.mxu1 }
 0x994   :  { %v3255_v16 = vpop.f32.mrf.mxu3 }
 0x998   :  { %v9095_v54 = vpop.f32.mrf.mxu1 }
 0x99c   :  { %v3258_v17 = vpop.f32.mrf.mxu3 }
 0x99d   :  { %v3282_v57 = vadd.f32 %v3258_v17, %v2508_v24 }
 0x9a0   :  { %v9097_v55 = vpop.f32.mrf.mxu1 }
 0x9a8   :  { %v4011_v10 = vpop.f32.mrf.mxu1 }
 0x9b0   :  { %v4014_v21 = vpop.f32.mrf.mxu1 }
 0x9b3   :  { %v3261_v15 = vpop.f32.mrf.mxu3 }
 0x9b4   :  { %v3283_v43 = vadd.f32 %v3261_v15, %v2511_v18  ;;  %v10137_v15 = vld [vmem:[#allocation13_spill] sm:$0xff] }
 0x9b8   :  { %v4017_v0 = vpop.f32.mrf.mxu1 }
 0x9b9   :  { %v9100_v19 = vadd.f32 %v4017_v0, %v3280_v27  ;;  %v3281_v0 = vadd.f32 %v3255_v16, %v2505_v53  ;;  %v2517_v16 = vadd.f32 %v8546_v42, %v9072_v3  ;;  %v3275_v42 = vadd.f32 %v9085_v28, %v2487_v23  ;;  %v10140_v53 = vld [vmem:[#allocation11_spill] sm:$0xff] }
 0x9c0   :  { %v4020_v31 = vpop.f32.mrf.mxu1 }
 0x9c1   :  { %v4046_v24 = vadd.f32 %v4020_v31, %v3281_v0  ;;  %v4043_v31 = vadd.f32 %v4011_v10, %v3278_v14 }
 0x9c3   :  { %v3264_v25 = vpop.f32.mrf.mxu3  ;;  %v4061_v13 = vadd.f32 %v9109_v37, %v4046_v24  ;;  %v10142_v24 = vld [vmem:[#allocation8_spill] sm:$0xff] }
 0x9c4   :  { %v3284_v51 = vadd.f32 %v3264_v25, %v2514_v61 }
 0x9c5   :  { %v9139_v18 = vadd.f32 %v4061_v13, %v10137_v15 }
 0x9c8   :  { %v4023_v48 = vpop.f32.mrf.mxu1 }
 0x9c9   :  { %v4047_v40 = vadd.f32 %v4023_v48, %v3282_v57  ;;  %v10136_v48 = vld [vmem:[#allocation16_spill] sm:$0xff] }
 0x9cb   :  { %v4062_v22 = vadd.f32 %v9109_v37, %v4047_v40 }
 0x9cd   :  { %v9114_v41 = vadd.f32 %v4062_v22, %v10134_v8  ;;  %v2499_v8 = vadd.f32 %v8498_v44, %v9058_v38  ;;  %v4040_v44 = vadd.f32 %v9091_v12, %v3275_v42  ;;  %v10138_v38 = vld [vmem:[#allocation17_spill] sm:$0xff] }
 0x9ce   :  { %v10147_v42 = vld [vmem:[#allocation9_spill] sm:$0xff] }
 0x9cf   :  { %v4108_v1 = vsel %vm89_vm7, %v9114_v41, 0.0 }
 0x9d0   :  { %v4026_v4 = vpop.f32.mrf.mxu1  ;;  %4109 = vadd.xlane.f32.xlu0 %v4108_v1  ;;  %v3279_v1 = vadd.f32 %v3249_v49, %v2499_v8  ;;  %v2490_v49 = vadd.f32 %v8470_v56, %v9045_v59  ;;  %v10141_v56 = vld [vmem:[#allocation7_spill] sm:$0xff] }
 0x9d1   :  { %v4048_v47 = vadd.f32 %v4026_v4, %v3283_v43  ;;  %v4058_v4 = vadd.f32 %v9109_v37, %v4043_v31 }
 0x9d2   :  { %v4044_v3 = vadd.f32 %v4014_v21, %v3279_v1  ;;  %v3276_v28 = vadd.f32 %v9089_v9, %v2490_v49  ;;  %v4055_v21 = vadd.f32 %v9109_v37, %v4040_v44 }
 0x9d3   :  { %v4063_v11 = vadd.f32 %v9109_v37, %v4048_v47  ;;  %v4105_v47 = vsel %vm89_vm7, %v9139_v18, 0.0  ;;  %v9155_v32 = vadd.f32 %v4058_v4, %v10139_v6 }
 0x9d4   :  { %v4059_v25 = vadd.f32 %v9109_v37, %v4044_v3  ;;  %v9171_v59 = vadd.f32 %v4055_v21, %v10141_v56 }
 0x9d5   :  { %v9121_v20 = vadd.f32 %v4063_v11, %v10135_v52  ;;  %v4096_v12 = vsel %vm89_vm7, %v9155_v32, 0.0  ;;  %v4041_v52 = vadd.f32 %v9095_v54, %v3276_v28 }
 0x9d6   :  { %v4087_v54 = vsel %vm89_vm7, %v9171_v59, 0.0 }
 0x9d7   :  { %v4111_v60 = vsel %vm89_vm7, %v9121_v20, 0.0 }
 0x9d8   :  { %v4029_v27 = vpop.f32.mrf.mxu1  ;;  %4112 = vadd.xlane.f32.xlu2 %v4111_v60  ;;  %v2481_v60 = vadd.f32 %v8427_v30, %v9031_v45  ;;  %v2520_v30 = vadd.f32 %v8549_v33, %v9074_v50  ;;  %v2493_v33 = vadd.f32 %v8480_v26, %v9049_v46  ;;  %v4060_v50 = vadd.f32 %v9109_v37, %v9100_v19  ;;  %v10146_v26 = vld [vmem:[#allocation28_spill] sm:$0xff] }
 0x9d9   :  { %v4049_v17 = vadd.f32 %v4029_v27, %v3284_v51  ;;  %v9168_v51 = vadd.f32 %v4059_v25, %v10140_v53  ;;  %v4056_v27 = vadd.f32 %v9109_v37, %v4041_v52  ;;  %v2484_v46 = vadd.f32 %v10146_v26, %v9036_v2  ;;  %v10148_v2 = vld [vmem:[#allocation6_spill] sm:$0xff] }
 0x9da   :  { %v3273_v0 = vadd.f32 %v9077_v29, %v2481_v60 }
 0x9db   :  { %v4064_v57 = vadd.f32 %v9109_v37, %v4049_v17  ;;  %v3267_v22 = vpop.f32.mrf.mxu3  ;;  %v4099_v9 = vsel %vm89_vm7, %v9168_v51, 0.0 }
 0x9dc   :  { %v3285_v43 = vadd.f32 %v3267_v22, %v2517_v16  ;;  %v4038_v17 = vadd.f32 %v9083_v35, %v3273_v0  ;;  %v10143_v22 = vld [vmem:[#allocation5_spill] sm:$0xff]  ;;  %v10144_v16 = vld [vmem:[#allocation18_spill] sm:$0xff] }
 0x9dd   :  { %v9129_v40 = vadd.f32 %v4064_v57, %v10136_v48  ;;  %v9183_v57 = vadd.f32 %v4056_v27, %v10142_v24 }
 0x9de   :  { %v4053_v48 = vadd.f32 %v9109_v37, %v4038_v17 }
 0x9df   :  { %v4114_v7 = vsel %vm89_vm7, %v9129_v40, 0.0  ;;  %v4090_v13 = vsel %vm89_vm7, %v9183_v57, 0.0 }
 0x9e0   :  { %4115 = vadd.xlane.f32.xlu1 %v4114_v7  ;;  %v9192_v35 = vadd.f32 %v4053_v48, %v10143_v22 }
 0x9e2   :  { %v4081_v15 = vsel %vm89_vm7, %v9192_v35, 0.0 }
 0x9e5   :  { %v4032_v58 = vpop.f32.mrf.mxu1 }
 0x9e6   :  { %v4050_v62 = vadd.f32 %v4032_v58, %v3285_v43  ;;  %v3277_v43 = vadd.f32 %v9093_v36, %v2493_v33  ;;  %v10145_v58 = vld [vmem:[#allocation12_spill] sm:$0xff] }
 0x9e7   :  { %v9208_v1 = vadd.f32 %v4060_v50, %v10145_v58 }
 0x9e8   :  { %4106 = vadd.xlane.f32.xlu1 %v4105_v47  ;;  %v4065_v10 = vadd.f32 %v9109_v37, %v4050_v62  ;;  %v4042_v23 = vadd.f32 %v9097_v55, %v3277_v43  ;;  %v3274_v62 = vadd.f32 %v9080_v34, %v2484_v46 }
 0x9e9   :  { %v4102_v4 = vsel %vm89_vm7, %v9208_v1, 0.0 }
 0x9ea   :  { %v9152_v11 = vadd.f32 %v4065_v10, %v10138_v38  ;;  %v4057_v19 = vadd.f32 %v9109_v37, %v4042_v23  ;;  %v4039_v47 = vadd.f32 %v9087_v39, %v3274_v62  ;;  %v6491_v38 = vmov 32.0  }
 0x9eb   :  { %6393 = vrcp.f32 %v6491_v38 }
 0x9ec   :  { %v4117_v61 = vsel %vm89_vm7, %v9152_v11, 0.0  ;;  %v9218_v36 = vadd.f32 %v4057_v19, %v10147_v42  ;;  %v4054_v55 = vadd.f32 %v9109_v37, %v4039_v47 }
 0x9ed   :  { %4118 = vadd.xlane.f32.xlu0 %v4117_v61  ;;  %v4035_v29 = vpop.f32.mrf.mxu1 }
 0x9ee   :  { %v4093_v3 = vsel %vm89_vm7, %v9218_v36, 0.0  ;;  %v9224_v10 = vadd.f32 %v4054_v55, %v10148_v2 }
 0x9f0   :  { %4097 = vadd.xlane.f32.xlu1 %v4096_v12  ;;  %v4084_v44 = vsel %vm89_vm7, %v9224_v10, 0.0 }
 0x9f1   :  { %v6394_v34 = vpop.eup %6393 }
 0x9f2   :  { %v4124_v39 = vmul.f32 32.0, %v6394_v34  ;;  %vm4128_vm12 = vweird.f32 %v6394_v34 }
 0x9f4   :  { %v4125_v6 = vsub.f32 1.0, %v4124_v39 }
 0x9f5   :  { %4100 = vadd.xlane.f32.xlu0 %v4099_v9 }
 0x9f6   :  { %v4126_v49 = vmul.f32 %v6394_v34, %v4125_v6 }
 0x9f8   :  { %4088 = vadd.xlane.f32.xlu1 %v4087_v54  ;;  %v4127_v25 = vadd.f32 %v6394_v34, %v4126_v49 }
 0x9fc   :  { %v3270_v45 = vpop.f32.mrf.mxu3 }
 0x9fd   :  { %v3286_v5 = vadd.f32 %v3270_v45, %v2520_v30  ;;  %4091 = vadd.xlane.f32.xlu0 %v4090_v13 }
 0x9ff   :  { %v4051_v7 = vadd.f32 %v4035_v29, %v3286_v5 }
 0xa01   :  { %v4066_v14 = vadd.f32 %v9109_v37, %v4051_v7  ;;  %v9228_v37 = vsel %vm4128_vm12, %v6394_v34, %v4127_v25 }
 0xa03   :  { %v9195_v31 = vadd.f32 %v4066_v14, %v10144_v16 }
 0xa05   :  { %v4120_v8 = vsel %vm89_vm7, %v9195_v31, 0.0  ;;  %4082 = vadd.xlane.f32.xlu0 %v4081_v15 }
 0xa06   :  { %4121 = vadd.xlane.f32.xlu2 %v4120_v8 }
 0xa0e   :  { %4103 = vadd.xlane.f32.xlu2 %v4102_v4 }
 0xa16   :  { %4094 = vadd.xlane.f32.xlu2 %v4093_v3 }
 0xa1e   :  { %4085 = vadd.xlane.f32.xlu2 %v4084_v44  ;;  %v6492_v44 = vmov 5  }
 0xa1f   :  { %6163 = vset.pattern.permute.xlu0 %v6492_v44 }
 0xa43   :  { %v4110_v61 = vpop.xlane.xlu0 %4109 }
 0xa44   :  { %v4139_v28 = vmul.f32 %v9228_v37, %v4110_v61 }
 0xa46   :  { %v9232_v21 = vsub.f32 %v9114_v41, %v4139_v28 }
 0xa48   :  { %v4167_v12 = vmul.f32 %v9232_v21, %v9232_v21 }
 0xa4a   :  { %v4199_v52 = vsel %vm89_vm7, %v4167_v12, 0.0 }
 0xa4b   :  { %v4113_v53 = vpop.xlane.xlu2 %4112  ;;  %4200 = vadd.xlane.f32.xlu2 %v4199_v52 }
 0xa4c   :  { %v4140_v56 = vmul.f32 %v9228_v37, %v4113_v53 }
 0xa4e   :  { %v9239_v60 = vsub.f32 %v9121_v20, %v4140_v56 }
 0xa50   :  { %v4168_v27 = vmul.f32 %v9239_v60, %v9239_v60 }
 0xa52   :  { %v4202_v9 = vsel %vm89_vm7, %v4168_v27, 0.0 }
 0xa53   :  { %v4116_v0 = vpop.xlane.xlu1 %4115  ;;  %4203 = vadd.xlane.f32.xlu1 %v4202_v9 }
 0xa54   :  { %v4141_v17 = vmul.f32 %v9228_v37, %v4116_v0 }
 0xa56   :  { %v9252_v45 = vsub.f32 %v9129_v40, %v4141_v17 }
 0xa58   :  { %v4169_v14 = vmul.f32 %v9252_v45, %v9252_v45 }
 0xa5b   :  { %v4107_v41 = vpop.xlane.xlu1 %4106 }
 0xa5c   :  { %v4138_v54 = vmul.f32 %v9228_v37, %v4107_v41 }
 0xa5e   :  { %v9247_v24 = vsub.f32 %v9139_v18, %v4138_v54 }
 0xa60   :  { %v4166_v30 = vmul.f32 %v9247_v24, %v9247_v24  ;;  %v4119_v20 = vpop.xlane.xlu0 %4118 }
 0xa61   :  { %v4142_v48 = vmul.f32 %v9228_v37, %v4119_v20 }
 0xa62   :  { %v4196_v5 = vsel %vm89_vm7, %v4166_v30, 0.0 }
 0xa63   :  { %v4098_v13 = vpop.xlane.xlu1 %4097  ;;  %4197 = vadd.xlane.f32.xlu0 %v4196_v5  ;;  %v9257_v29 = vsub.f32 %v9152_v11, %v4142_v48  ;;  %v4205_v11 = vsel %vm89_vm7, %v4169_v14, 0.0 }
 0xa64   :  { %v4135_v7 = vmul.f32 %v9228_v37, %v4098_v13 }
 0xa65   :  { %v4170_v18 = vmul.f32 %v9257_v29, %v9257_v29 }
 0xa66   :  { %v9266_v16 = vsub.f32 %v9155_v32, %v4135_v7 }
 0xa67   :  { %v4208_v40 = vsel %vm89_vm7, %v4170_v18, 0.0 }
 0xa68   :  { %v4101_v22 = vpop.xlane.xlu0 %4100  ;;  %4209 = vadd.xlane.f32.xlu2 %v4208_v40  ;;  %v4163_v23 = vmul.f32 %v9266_v16, %v9266_v16 }
 0xa69   :  { %v4136_v33 = vmul.f32 %v9228_v37, %v4101_v22 }
 0xa6b   :  { %v4089_v50 = vpop.xlane.xlu1 %4088  ;;  %4206 = vadd.xlane.f32.xlu0 %v4205_v11  ;;  %v9271_v15 = vsub.f32 %v9168_v51, %v4136_v33  ;;  %v4187_v51 = vsel %vm89_vm7, %v4163_v23, 0.0 }
 0xa6c   :  { %v4132_v8 = vmul.f32 %v9228_v37, %v4089_v50 }
 0xa6d   :  { %v4164_v43 = vmul.f32 %v9271_v15, %v9271_v15 }
 0xa6e   :  { %v9280_v26 = vsub.f32 %v9171_v59, %v4132_v8 }
 0xa6f   :  { %v4190_v32 = vsel %vm89_vm7, %v4164_v43, 0.0 }
 0xa70   :  { %v4092_v58 = vpop.xlane.xlu0 %4091  ;;  %4191 = vadd.xlane.f32.xlu2 %v4190_v32  ;;  %v4160_v62 = vmul.f32 %v9280_v26, %v9280_v26 }
 0xa71   :  { %v4133_v46 = vmul.f32 %v9228_v37, %v4092_v58 }
 0xa72   :  { %v4178_v2 = vsel %vm89_vm7, %v4160_v62, 0.0 }
 0xa73   :  { %4188 = vadd.xlane.f32.xlu0 %v4187_v51  ;;  %v9285_v19 = vsub.f32 %v9183_v57, %v4133_v46 }
 0xa75   :  { %v4161_v4 = vmul.f32 %v9285_v19, %v9285_v19 }
 0xa77   :  { %v4181_v47 = vsel %vm89_vm7, %v4161_v4, 0.0 }
 0xa78   :  { %4182 = vadd.xlane.f32.xlu2 %v4181_v47  ;;  %v4083_v42 = vpop.xlane.xlu0 %4082 }
 0xa79   :  { %v4122_v59 = vpop.xlane.xlu2 %4121  ;;  %v4130_v55 = vmul.f32 %v9228_v37, %v4083_v42 }
 0xa7a   :  { %v4143_v3 = vmul.f32 %v9228_v37, %v4122_v59 }
 0xa7b   :  { %4179 = vadd.xlane.f32.xlu0 %v4178_v2  ;;  %v9296_v57 = vsub.f32 %v9192_v35, %v4130_v55 }
 0xa7c   :  { %v9299_v38 = vsub.f32 %v9195_v31, %v4143_v3 }
 0xa7d   :  { %v4158_v34 = vmul.f32 %v9296_v57, %v9296_v57 }
 0xa7e   :  { %v4171_v39 = vmul.f32 %v9299_v38, %v9299_v38 }
 0xa7f   :  { %v4172_v6 = vsel %vm89_vm7, %v4158_v34, 0.0 }
 0xa80   :  { %v4211_v49 = vsel %vm89_vm7, %v4171_v39, 0.0  ;;  %4173 = vadd.xlane.f32.xlu2 %v4172_v6 }
 0xa81   :  { %v4104_v25 = vpop.xlane.xlu2 %4103  ;;  %4212 = vadd.xlane.f32.xlu1 %v4211_v49 }
 0xa82   :  { %v4137_v61 = vmul.f32 %v9228_v37, %v4104_v25 }
 0xa84   :  { %v9309_v35 = vsub.f32 %v9208_v1, %v4137_v61  ;;  %v9323_v1 = vld [vmem:[%s9963_s0] sm:$0xff] }
 0xa86   :  { %v4165_v31 = vmul.f32 %v9309_v35, %v9309_v35 }
 0xa88   :  { %v4193_v28 = vsel %vm89_vm7, %v4165_v31, 0.0 }
 0xa89   :  { %v4095_v12 = vpop.xlane.xlu2 %4094  ;;  %4194 = vadd.xlane.f32.xlu1 %v4193_v28 }
 0xa8a   :  { %v4134_v52 = vmul.f32 %v9228_v37, %v4095_v12 }
 0xa8c   :  { %v9316_v53 = vsub.f32 %v9218_v36, %v4134_v52 }
 0xa8e   :  { %v4162_v56 = vmul.f32 %v9316_v53, %v9316_v53 }
 0xa8f   :  { %837 = vperm.xlu0 %6163, %v9323_v1  }
 0xa90   :  { %v4184_v27 = vsel %vm89_vm7, %v4162_v56, 0.0 }
 0xa91   :  { %4185 = vadd.xlane.f32.xlu1 %v4184_v27  ;;  %v4086_v9 = vpop.xlane.xlu2 %4085 }
 0xa92   :  { %v4131_v0 = vmul.f32 %v9228_v37, %v4086_v9 }
 0xa94   :  { %v9329_v41 = vsub.f32 %v9224_v10, %v4131_v0 }
 0xa96   :  { %v4159_v36 = vmul.f32 %v9329_v41, %v9329_v41 }
 0xa98   :  { %v4175_v54 = vsel %vm89_vm7, %v4159_v36, 0.0 }
 0xa99   :  { %4176 = vadd.xlane.f32.xlu1 %v4175_v54 }
 0xabe   :  { %v4201_v17 = vpop.xlane.xlu2 %4200 }
 0xabf   :  { %v4223_v5 = vmul.f32 %v4201_v17, %v9228_v37 }
 0xac1   :  { %v9338_v18 = vadd.f32 1e-05, %v4223_v5 }
 0xac3   :  { %vm4338_vm5 = vweird.f32 %v9338_v18 }
 0xac6   :  { %v4204_v20 = vpop.xlane.xlu1 %4203 }
 0xac7   :  { %v4224_v48 = vmul.f32 %v4204_v20, %v9228_v37 }
 0xac9   :  { %v9336_v7 = vadd.f32 1e-05, %v4224_v48 }
 0xacb   :  { %6395 = vrsqrt.f32 %v9336_v7  ;;  %vm4348_vm2 = vweird.f32 %v9336_v7 }
 0xacc   :  { %6397 = vrsqrt.f32 %v9338_v18 }
 0xad1   :  { %v9349_v8 = vpop.eup %6395 }
 0xad2   :  { %v9353_v23 = vpop.eup %6397  ;;  %v4343_v58 = vmul.f32 %v9349_v8, %v9336_v7  ;;  %vm4349_vm0 = vweird.f32 %v9349_v8 }
 0xad3   :  { %v4333_v46 = vmul.f32 %v9353_v23, %v9338_v18  ;;  %vm4339_vm1 = vweird.f32 %v9353_v23  ;;  %vm9410_vm6 = vmor %vm4348_vm2, %vm4349_vm0 }
 0xad4   :  { %v4344_v47 = vmul.f32 %v9349_v8, %v4343_v58  ;;  %vm9415_vm10 = vmor %vm4338_vm5, %vm4339_vm1 }
 0xad5   :  { %v4334_v42 = vmul.f32 %v9353_v23, %v4333_v46 }
 0xad6   :  { %v4198_v30 = vpop.xlane.xlu0 %4197  ;;  %v4345_v34 = vmul.f32 0.5, %v4344_v47 }
 0xad7   :  { %v4222_v40 = vmul.f32 %v4198_v30, %v9228_v37  ;;  %v4335_v6 = vmul.f32 0.5, %v4334_v42 }
 0xad8   :  { %v4346_v27 = vsub.f32 1.5, %v4345_v34  ;;  %v9432_v34 = vperm.slane %v9106_v63, 6 }
 0xad9   :  { %v9347_v50 = vadd.f32 1e-05, %v4222_v40  ;;  %v4336_v0 = vsub.f32 1.5, %v4335_v6 }
 0xada   :  { %v4347_v5 = vmul.f32 %v9349_v8, %v4346_v27 }
 0xadb   :  { %v4210_v13 = vpop.xlane.xlu2 %4209  ;;  %vm4328_vm14 = vweird.f32 %v9347_v50 }
 0xadc   :  { %v4226_v14 = vmul.f32 %v4210_v13, %v9228_v37  ;;  %v4351_v7 = vsel %vm9410_vm6, %v9349_v8, %v4347_v5 }
 0xade   :  { %v4207_v10 = vpop.xlane.xlu0 %4206  ;;  %v9345_v11 = vadd.f32 1e-05, %v4226_v14  ;;  %v4337_v14 = vmul.f32 %v9353_v23, %v4336_v0 }
 0xadf   :  { %v4225_v22 = vmul.f32 %v4207_v10, %v9228_v37 }
 0xae0   :  { %6399 = vrsqrt.f32 %v9345_v11  ;;  %vm4368_vm12 = vweird.f32 %v9345_v11 }
 0xae1   :  { %v9351_v43 = vadd.f32 1e-05, %v4225_v22  ;;  %6401 = vrsqrt.f32 %v9347_v50 }
 0xae3   :  { %v4192_v33 = vpop.xlane.xlu2 %4191  ;;  %6403 = vrsqrt.f32 %v9351_v43  ;;  %vm4358_vm5 = vweird.f32 %v9351_v43 }
 0xae4   :  { %v4220_v51 = vmul.f32 %v4192_v33, %v9228_v37 }
 0xae6   :  { %v4189_v32 = vpop.xlane.xlu0 %4188  ;;  %v9363_v62 = vpop.eup %6399  ;;  %v9374_v44 = vadd.f32 1e-05, %v4220_v51 }
 0xae7   :  { %v4219_v59 = vmul.f32 %v4189_v32, %v9228_v37  ;;  %v9368_v55 = vpop.eup %6401  ;;  %v4363_v2 = vmul.f32 %v9363_v62, %v9345_v11  ;;  %vm4369_vm11 = vweird.f32 %v9363_v62 }
 0xae8   :  { %v4323_v49 = vmul.f32 %v9368_v55, %v9347_v50  ;;  %6405 = vrsqrt.f32 %v9374_v44  ;;  %vm4329_vm15 = vweird.f32 %v9368_v55  ;;  %vm9457_vm0 = vmor %vm4368_vm12, %vm4369_vm11 }
 0xae9   :  { %v9370_v3 = vpop.eup %6403  ;;  %v9378_v25 = vadd.f32 1e-05, %v4219_v59  ;;  %v4364_v52 = vmul.f32 %v9363_v62, %v4363_v2  ;;  %v4341_v59 = vsel %vm9415_vm10, %v9353_v23, %v4337_v14  ;;  %vm9475_vm2 = vmor %vm4328_vm14, %vm4329_vm15  ;;  %vm4308_vm14 = vweird.f32 %v9374_v44 }
 0xaea   :  { %v4353_v31 = vmul.f32 %v9370_v3, %v9351_v43  ;;  %v4324_v36 = vmul.f32 %v9368_v55, %v4323_v49  ;;  %v9438_v49 = vperm.slane %v9106_v63, 7  ;;  %vm4359_vm1 = vweird.f32 %v9370_v3 }
 0xaeb   :  { %v4183_v4 = vpop.xlane.xlu2 %4182  ;;  %6407 = vrsqrt.f32 %v9378_v25  ;;  %v4365_v20 = vmul.f32 0.5, %v4364_v52  ;;  %v9450_v52 = vmul.f32 %v4341_v59, %v9232_v21  ;;  %vm9487_vm6 = vmor %vm4358_vm5, %vm4359_vm1 }
 0xaec   :  { %v4217_v28 = vmul.f32 %v4183_v4, %v9228_v37  ;;  %v4354_v17 = vmul.f32 %v9370_v3, %v4353_v31  ;;  %v4325_v40 = vmul.f32 0.5, %v4324_v36  ;;  %v4392_v31 = vmul.f32 %v4351_v7, %v9239_v60 }
 0xaed   :  { %v4366_v51 = vsub.f32 1.5, %v4365_v20 }
 0xaee   :  { %v4180_v39 = vpop.xlane.xlu0 %4179  ;;  %v9392_v30 = vadd.f32 1e-05, %v4217_v28  ;;  %v9400_v10 = vpop.eup %6405  ;;  %v4355_v33 = vmul.f32 0.5, %v4354_v17  ;;  %v4326_v2 = vsub.f32 1.5, %v4325_v40 }
 0xaef   :  { %v4216_v56 = vmul.f32 %v4180_v39, %v9228_v37  ;;  %v4303_v47 = vmul.f32 %v9400_v10, %v9374_v44  ;;  %vm4309_vm12 = vweird.f32 %v9400_v10 }
 0xaf0   :  { %v4356_v6 = vsub.f32 1.5, %v4355_v33  ;;  %v4327_v27 = vmul.f32 %v9368_v55, %v4326_v2 }
 0xaf1   :  { %v9394_v48 = vadd.f32 1e-05, %v4216_v56  ;;  %v9407_v58 = vpop.eup %6407 }
 0xaf2   :  { %v4293_v8 = vmul.f32 %v9407_v58, %v9378_v25 }
 0xaf3   :  { %v4174_v54 = vpop.xlane.xlu2 %4173 }
 0xaf4   :  { %v4213_v61 = vpop.xlane.xlu1 %4212  ;;  %v4214_v13 = vmul.f32 %v4174_v54, %v9228_v37  ;;  %v4357_v54 = vmul.f32 %v9370_v3, %v4356_v6  ;;  %v4294_v21 = vmul.f32 %v9407_v58, %v4293_v8 }
 0xaf5   :  { %v4227_v12 = vmul.f32 %v4213_v61, %v9228_v37  ;;  %v4367_v61 = vmul.f32 %v9363_v62, %v4366_v51 }
 0xaf6   :  { %v9424_v42 = vadd.f32 1e-05, %v4214_v13  ;;  %v4407_v13 = vmul.f32 %v9432_v34, %v4392_v31  ;;  %v4361_v4 = vsel %vm9487_vm6, %v9370_v3, %v4357_v54  ;;  %v4295_v7 = vmul.f32 0.5, %v4294_v21  ;;  %vm9542_vm6 = vmor %vm4308_vm14, %vm4309_vm12 }
 0xaf7   :  { %v9387_v9 = vadd.f32 1e-05, %v4227_v12  ;;  %v4304_v12 = vmul.f32 %v9400_v10, %v4303_v47  ;;  %v4371_v20 = vsel %vm9457_vm0, %v9363_v62, %v4367_v61  ;;  %vm4278_vm12 = vweird.f32 %v9392_v30 }
 0xaf9   :  { %6409 = vrsqrt.f32 %v9387_v9  ;;  %vm4378_vm11 = vweird.f32 %v9387_v9 }
 0xafa   :  { %6411 = vrsqrt.f32 %v9392_v30 }
 0xafb   :  { %6413 = vrsqrt.f32 %v9394_v48 }
 0xafc   :  { %v4195_v22 = vpop.xlane.xlu1 %4194 }
 0xafd   :  { %v4221_v32 = vmul.f32 %v4195_v22, %v9228_v37  ;;  %v4305_v22 = vmul.f32 0.5, %v4304_v12 }
 0xaff   :  { %v9426_v18 = vadd.f32 1e-05, %v4221_v32  ;;  %v6410_v39 = vpop.eup %6409  ;;  %v4331_v32 = vsel %vm9475_vm2, %v9368_v55, %v4327_v27  ;;  %v4394_v55 = vmul.f32 %v4371_v20, %v9257_v29  ;;  %v4306_v6 = vsub.f32 1.5, %v4305_v22 }
 0xb00   :  { %v4373_v23 = vmul.f32 %v6410_v39, %v9387_v9  ;;  %v9444_v28 = vpop.eup %6411  ;;  %vm4379_vm10 = vweird.f32 %v6410_v39  ;;  %v4390_v3 = vmul.f32 %v4331_v32, %v9247_v24  ;;  %vm4299_vm2 = vweird.f32 %v9407_v58 }
 0xb01   :  { %6415 = vrsqrt.f32 %v9426_v18  ;;  %v9452_v56 = vpop.eup %6413  ;;  %v4273_v11 = vmul.f32 %v9444_v28, %v9392_v30  ;;  %vm4380_vm15 = vmor %vm4378_vm11, %vm4379_vm10  ;;  %v4409_v27 = vmul.f32 %v9432_v34, %v4394_v55  ;;  %v4307_v21 = vmul.f32 %v9400_v10, %v4306_v6 }
 0xb02   :  { %6417 = vrsqrt.f32 %v9424_v42  ;;  %v4374_v60 = vmul.f32 %v6410_v39, %v4373_v23  ;;  %v4263_v62 = vmul.f32 %v9452_v56, %v9394_v48  ;;  %vm4318_vm1 = vweird.f32 %v9426_v18 }
 0xb03   :  { %v4274_v47 = vmul.f32 %v9444_v28, %v4273_v11  ;;  %v4406_v55 = vmul.f32 %v9432_v34, %v9450_v52  ;;  %vm4298_vm10 = vweird.f32 %v9378_v25  ;;  %vm4279_vm14 = vweird.f32 %v9444_v28 }
 0xb04   :  { %v4186_v0 = vpop.xlane.xlu1 %4185  ;;  %v4375_v5 = vmul.f32 0.5, %v4374_v60  ;;  %v4264_v8 = vmul.f32 %v9452_v56, %v4263_v62  ;;  %v4393_v60 = vmul.f32 %v4361_v4, %v9252_v45  ;;  %v4424_v4 = vadd.f32 %v9438_v49, %v4409_v27  ;;  %vm9556_vm11 = vmor %vm4298_vm10, %vm4299_vm2 }
 0xb05   :  { %v4218_v17 = vmul.f32 %v4186_v0, %v9228_v37  ;;  %v4296_v0 = vsub.f32 1.5, %v4295_v7  ;;  %v4275_v36 = vmul.f32 0.5, %v4274_v47  ;;  %v4422_v7 = vadd.f32 %v9438_v49, %v4407_v13 }
 0xb06   :  { %v4376_v50 = vsub.f32 1.5, %v4375_v5  ;;  %v4408_v22 = vmul.f32 %v9432_v34, %v4393_v60  ;;  %v4405_v52 = vmul.f32 %v9432_v34, %v4390_v3 }
 0xb07   :  { %v9471_v14 = vpop.eup %6415  ;;  %v9482_v33 = vadd.f32 1e-05, %v4218_v17  ;;  %v4297_v62 = vmul.f32 %v9407_v58, %v4296_v0  ;;  %v4276_v32 = vsub.f32 1.5, %v4275_v36 }
 0xb08   :  { %v4313_v51 = vmul.f32 %v9471_v14, %v9426_v18  ;;  %v9493_v43 = vpop.eup %6417  ;;  %v4377_v59 = vmul.f32 %v6410_v39, %v4376_v50  ;;  %vm4319_vm0 = vweird.f32 %v9471_v14  ;;  %v4423_v13 = vadd.f32 %v9438_v49, %v4408_v22 }
 0xb09   :  { %6419 = vrsqrt.f32 %v9482_v33  ;;  %v4243_v29 = vmul.f32 %v9493_v43, %v9424_v42  ;;  %vm9526_vm5 = vmor %vm4318_vm1, %vm4319_vm0  ;;  %v4301_v25 = vsel %vm9556_vm11, %v9407_v58, %v4297_v62  ;;  %vm4269_vm0 = vweird.f32 %v9452_v56 }
 0xb0a   :  { %v4314_v2 = vmul.f32 %v9471_v14, %v4313_v51  ;;  %v4381_v61 = vsel %vm4380_vm15, %v6410_v39, %v4377_v59  ;;  %v4265_v39 = vmul.f32 0.5, %v4264_v8  ;;  %vm9575_vm1 = vmor %vm4278_vm12, %vm4279_vm14  ;;  %vm4288_vm2 = vweird.f32 %v9482_v33  ;;  %v4479_v59 = vld [vmem:[%s9969_s13 + $0x8] sm:$0xff] }
 0xb0b   :  { %v4395_v9 = vmul.f32 %v4381_v61, %v9299_v38  ;;  %v4244_v20 = vmul.f32 %v9493_v43, %v4243_v29  ;;  %v4420_v60 = vadd.f32 %v9438_v49, %v4405_v52  ;;  %vm4249_vm11 = vweird.f32 %v9493_v43 }
 0xb0c   :  { %v4315_v23 = vmul.f32 0.5, %v4314_v2  ;;  %v4177_v31 = vpop.xlane.xlu1 %4176  ;;  %v4266_v51 = vsub.f32 1.5, %v4265_v39  ;;  %vm4248_vm14 = vweird.f32 %v9424_v42  ;;  %v4453_v52 = vperm.slane %v9106_v63, 4 }
 0xb0d   :  { %v4215_v12 = vmul.f32 %v4177_v31, %v9228_v37  ;;  %v4410_v38 = vmul.f32 %v9432_v34, %v4395_v9  ;;  %v4245_v44 = vmul.f32 0.5, %v4244_v20  ;;  %vm9608_vm12 = vmor %vm4248_vm14, %vm4249_vm11 }
 0xb0e   :  { %v4316_v54 = vsub.f32 1.5, %v4315_v23  ;;  %v4267_v29 = vmul.f32 %v9452_v56, %v4266_v51  ;;  %v4421_v23 = vadd.f32 %v9438_v49, %v4406_v55  ;;  %v10171_v51 = vld [vmem:[#allocation4_spill] sm:$0xff]  ;;  %v4451_v55 = vld [vmem:[%s9968_s12 + $0x10] sm:$0xff] }
 0xb0f   :  { %v9514_v24 = vpop.eup %6419  ;;  %v9517_v17 = vadd.f32 1e-05, %v4215_v12  ;;  %v4425_v40 = vadd.f32 %v9438_v49, %v4410_v38  ;;  %v4246_v58 = vsub.f32 1.5, %v4245_v44 }
 0xb10   :  { %v4317_v11 = vmul.f32 %v9471_v14, %v4316_v54  ;;  %v4283_v45 = vmul.f32 %v9514_v24, %v9482_v33  ;;  %vm4289_vm15 = vweird.f32 %v9514_v24 }
 0xb11   :  { %6421 = vrsqrt.f32 %v9517_v17  ;;  %4431 = vmatpush.msrb.mxu3 %v4425_v40 }
 0xb12   :  { %v4321_v18 = vsel %vm9526_vm5, %v9471_v14, %v4317_v11  ;;  %v4284_v46 = vmul.f32 %v9514_v24, %v4283_v45  ;;  %v4311_v14 = vsel %vm9542_vm6, %v9400_v10, %v4307_v21  ;;  %v4277_v10 = vmul.f32 %v9444_v28, %v4276_v32  ;;  %vm4290_vm5 = vmor %vm4288_vm2, %vm4289_vm15  ;;  %v838_v32 = vpop.permute.xlu0 %837 }
 0xb13   :  { %4432 = vmatpush.msrb.mxu3 %v4424_v4  ;;  %v4389_v2 = vmul.f32 %v4321_v18, %v9309_v35  ;;  %v4388_v3 = vmul.f32 %v4311_v14, %v9271_v15  ;;  %v4387_v15 = vmul.f32 %v4301_v25, %v9266_v16  ;;  %vm4268_vm6 = vweird.f32 %v9394_v48  ;;  %v4481_v14 = vld [vmem:[%s9969_s13 + $0x18] sm:$0xff] }
 0xb14   :  { %v4285_v47 = vmul.f32 0.5, %v4284_v46  ;;  %v4281_v9 = vsel %vm9575_vm1, %v9444_v28, %v4277_v10  ;;  %vm9592_vm10 = vmor %vm4268_vm6, %vm4269_vm0  ;;  %v4247_v28 = vmul.f32 %v9493_v43, %v4246_v58  ;;  %vm4258_vm0 = vweird.f32 %v9517_v17 }
 0xb15   :  { %4433 = vmatpush.msrb.mxu3 %v4423_v13  ;;  %v4404_v31 = vmul.f32 %v9432_v34, %v4389_v2  ;;  %v4403_v16 = vmul.f32 %v9432_v34, %v4388_v3  ;;  %v4271_v48 = vsel %vm9592_vm10, %v9452_v56, %v4267_v29  ;;  %v4385_v21 = vmul.f32 %v4281_v9, %v9285_v19  ;;  %v4478_v13 = vld [vmem:[%s9969_s13] sm:$0xff] }
 0xb16   :  { %v4286_v6 = vsub.f32 1.5, %v4285_v47  ;;  %v4384_v20 = vmul.f32 %v4271_v48, %v9280_v26  ;;  %v4251_v11 = vsel %vm9608_vm12, %v9493_v43, %v4247_v28  ;;  %vm839_vm2 = vcmp.eq.s32.totalorder %v10171_v51, %v838_v32  ;;  %v4480_v47 = vld [vmem:[%s9969_s13 + $0x10] sm:$0xff] }
 0xb17   :  { %v6422_v8 = vpop.eup %6421  ;;  %4434 = vmatpush.msrb.mxu3 %v4422_v7  ;;  %v4419_v54 = vadd.f32 %v9438_v49, %v4404_v31  ;;  %v4418_v56 = vadd.f32 %v9438_v49, %v4403_v16  ;;  %v4400_v45 = vmul.f32 %v9432_v34, %v4385_v21  ;;  %v4382_v62 = vmul.f32 %v4251_v11, %v9296_v57  ;;  %v4452_v7 = vld [vmem:[%s9968_s12 + $0x18] sm:$0xff] }
 0xb18   :  { %v4287_v61 = vmul.f32 %v9514_v24, %v4286_v6  ;;  %v4253_v30 = vmul.f32 %v6422_v8, %v9517_v17  ;;  %vm4259_vm15 = vweird.f32 %v6422_v8  ;;  %v4399_v22 = vmul.f32 %v9432_v34, %v4384_v20 }
 0xb19   :  { %4435 = vmatpush.msrb.mxu3 %v4421_v23  ;;  %vm4260_vm1 = vmor %vm4258_vm0, %vm4259_vm15  ;;  %v4415_v43 = vadd.f32 %v9438_v49, %v4400_v45  ;;  %v4397_v50 = vmul.f32 %v9432_v34, %v4382_v62  ;;  %v4482_v6 = vperm.slane %v9106_v63, 5  ;;  %v6473_v45 = vld [vmem:[%s9963_s0 + $0x8] sm:$0xff]  ;;  %vm4616_vm12 = vcmask 15360  }
 0xb1a   :  { %v4291_v12 = vsel %vm4290_vm5, %v9514_v24, %v4287_v61  ;;  %v4254_v27 = vmul.f32 %v6422_v8, %v4253_v30  ;;  %v4402_v24 = vmul.f32 %v9432_v34, %v4387_v15  ;;  %v4414_v18 = vadd.f32 %v9438_v49, %v4399_v22 }
 0xb1b   :  { %v4386_v0 = vmul.f32 %v4291_v12, %v9316_v53  ;;  %4436 = vmatpush.msrb.mxu3 %v4420_v60  ;;  %v4412_v57 = vadd.f32 %v9438_v49, %v4397_v50 }
 0xb1c   :  { %v4255_v36 = vmul.f32 0.5, %v4254_v27  ;;  %v4417_v42 = vadd.f32 %v9438_v49, %v4402_v24 }
 0xb1d   :  { %4437 = vmatpush.msrb.mxu3 %v4419_v54  ;;  %v4401_v38 = vmul.f32 %v9432_v34, %v4386_v0  ;;  %v842_v0 = vld [vmem:[%s9965_s14 + $0x8] sm:$0xf] }
 0xb1e   :  { %v4256_v39 = vsub.f32 1.5, %v4255_v36  ;;  %v4529_v28 = vperm.slane %v842_v0, 0  ;;  %v4531_v24 = vperm.slane %v842_v0, 1 }
 0xb1f   :  { %4438 = vmatpush.msrb.mxu3 %v4418_v56  ;;  %v4416_v40 = vadd.f32 %v9438_v49, %v4401_v38  ;;  %v6493_v56 = vmov 3  }
 0xb20   :  { %v4257_v19 = vmul.f32 %v6422_v8, %v4256_v39  ;;  %6164 = vset.pattern.permute.xlu1 %v6493_v56  ;;  %6165 = vset.pattern.permute.xlu2 %v6493_v56 }
 0xb21   :  { %4439 = vmatpush.msrb.mxu3 %v4417_v42 }
 0xb22   :  { %v4261_v5 = vsel %vm4260_vm1, %v6422_v8, %v4257_v19 }
 0xb23   :  { %v4383_v26 = vmul.f32 %v4261_v5, %v9329_v41  ;;  %4440 = vmatpush.msrb.mxu3 %v4416_v40  ;;  %v10172_v41 = vmov 0.0   ;;  %v6494_v5 = vmov 4   ;;  %v4563_v40 = vld [vmem:[#allocation3 + $0x8] sm:$0x1] }
 0xb24   :  { %v840_v4 = vsel %vm839_vm2, 1.0, %v10172_v41  ;;  %6166 = vset.pattern.permute.xlu0 %v6494_v5  ;;  %vm4754_vm2 = vcmask 74752  }
 0xb25   :  { %v4398_v17 = vmul.f32 %v9432_v34, %v4383_v26  ;;  %4441 = vmatpush.msrb.mxu3 %v4415_v43  ;;  %v4450_v34 = vld [vmem:[%s9968_s12 + $0x8] sm:$0xff]  ;;  %4610 = vperm.xlu0 %6166, %v6473_v45  }
 0xb27   :  { %v4413_v46 = vadd.f32 %v9438_v49, %v4398_v17  ;;  %4442 = vmatpush.msrb.mxu3 %v4414_v18  ;;  %v4449_v49 = vld [vmem:[%s9968_s12] sm:$0xff] }
 0xb29   :  { %4443 = vmatpush.msrb.mxu3 %v4413_v46 }
 0xb2b   :  { %4444 = vmatpush.msrb.mxu3 %v4412_v57 }
 0xb2c   :  { %5923 = vmatmul.msk.f32.vlgmr.msrb.gmra.mxu3 %vm1176_vm9, %v840_v4  ;;  %v4555_v4 = vperm.slane %v842_v0, 2 }
 0xb2d   :  { %4469 = vmatpush.msra.mxu3 %v4452_v7 }
 0xb2f   :  { %4470 = vmatpush.msra.mxu3 %v4451_v55 }
 0xb31   :  { %4471 = vmatpush.msra.mxu3 %v4450_v34 }
 0xb33   :  { %4472 = vmatpush.msra.mxu3 %v4449_v49 }
 0xb35   :  { %4498 = vmatpush.msrb.mxu3 %v4481_v14 }
 0xb37   :  { %4499 = vmatpush.msrb.mxu3 %v4480_v47 }
 0xb39   :  { %4500 = vmatpush.msrb.mxu3 %v4479_v59 }
 0xb3b   :  { %4501 = vmatpush.msrb.mxu3 %v4478_v13 }
 0xb97   :  { %v4611_v13 = vpop.permute.xlu0 %4610 }
 0xb98   :  { %vm4613_vm0 = vcmp.eq.s32.totalorder %v10171_v51, %v4611_v13 }
 0xbaf   :  { %v4446_v44 = vpop.f32.mrf.mxu3 }
 0xbb0   :  { %5924 = vmatmul.msk.f32.vlgmr.msra.gmra.mxu3 %vm89_vm7, %v4446_v44 }
 0xbb1   :  { %5926 = vmatpush.msk.msra.mxu3 %vm124_vm3, %v4563_v40 }
 0xc33   :  { %v4474_v2 = vpop.f32.mrf.mxu3 }
 0xc34   :  { %v4475_v25 = vadd.f32 %v4474_v2, %v4453_v52  ;;  %v4615_v2 = vsel %vm4613_vm0, 1.0, %v10172_v41 }
 0xc36   :  { %v4477_v10 = vmax.f32 %v4475_v25, 0.0 }
 0xc38   :  { %5925 = vmatmul.msk.f32.vlgmr.msrb.gmra.mxu3 %vm89_vm7, %v4477_v10  ;;  %v4660_v10 = vld [vmem:[%s9970_s15 + $0x18] sm:$0xff] }
 0xcbb   :  { %v4503_v8 = vpop.f32.mrf.mxu3 }
 0xcbc   :  { %v4504_v29 = vadd.f32 %v4503_v8, %v4482_v6  ;;  %v4659_v6 = vld [vmem:[%s9970_s15 + $0x10] sm:$0xff]  ;;  %v4658_v8 = vld [vmem:[%s9970_s15 + $0x8] sm:$0xff] }
 0xcbe   :  { %v4506_v3 = vadd.f32 %v4504_v29, %v4446_v44  ;;  %v4657_v29 = vld [vmem:[%s9970_s15] sm:$0xff] }
 0xcc0   :  { %v4507_v35 = vsel %vm89_vm7, %v4506_v3, 0.0 }
 0xcc1   :  { %4508 = vadd.xlane.f32.xlu1 %v4507_v35 }
 0xd34   :  { %v4509_v58 = vpop.xlane.xlu1 %4508 }
 0xd35   :  { %v4510_v61 = vmul.f32 %v4509_v58, %v9228_v37 }
 0xd37   :  { %v4511_v30 = vsub.f32 %v4506_v3, %v4510_v61  ;;  %v9709_v3 = vld [vmem:[%s9971_s19] sm:$0xff] }
 0xd38   :  { %v4697_v35 = vperm.slane %v9709_v3, 1 }
 0xd39   :  { %v4512_v23 = vmul.f32 %v4511_v30, %v4511_v30 }
 0xd3b   :  { %v4513_v31 = vsel %vm89_vm7, %v4512_v23, 0.0 }
 0xd3c   :  { %4514 = vadd.xlane.f32.xlu2 %v4513_v31 }
 0xdaf   :  { %v4515_v15 = vpop.xlane.xlu2 %4514 }
 0xdb0   :  { %v4516_v9 = vmul.f32 %v4515_v15, %v9228_v37 }
 0xdb2   :  { %v4517_v12 = vadd.f32 1e-05, %v4516_v9 }
 0xdb4   :  { %6423 = vrsqrt.f32 %v4517_v12  ;;  %vm4524_vm5 = vweird.f32 %v4517_v12 }
 0xdba   :  { %v6424_v63 = vpop.eup %6423 }
 0xdbb   :  { %v4519_v27 = vmul.f32 %v6424_v63, %v4517_v12  ;;  %vm4525_vm9 = vweird.f32 %v6424_v63  ;;  %v4704_v12 = vperm.slane %v9709_v3, 2 }
 0xdbc   :  { %vm4526_vm6 = vmor %vm4524_vm5, %vm4525_vm9  ;;  %vm4813_vm9 = vcmask 1041408  }
 0xdbd   :  { %v4520_v33 = vmul.f32 %v6424_v63, %v4519_v27 }
 0xdbf   :  { %v4521_v60 = vmul.f32 0.5, %v4520_v33 }
 0xdc1   :  { %v4522_v16 = vsub.f32 1.5, %v4521_v60  ;;  %v4694_v60 = vperm.slane %v9709_v3, 0 }
 0xdc3   :  { %v4523_v48 = vmul.f32 %v6424_v63, %v4522_v16 }
 0xdc5   :  { %v4527_v36 = vsel %vm4526_vm6, %v6424_v63, %v4523_v48 }
 0xdc6   :  { %v4528_v54 = vmul.f32 %v4527_v36, %v4511_v30 }
 0xdc8   :  { %v4530_v21 = vmul.f32 %v4529_v28, %v4528_v54 }
 0xdca   :  { %v4532_v39 = vadd.f32 %v4531_v24, %v4530_v21 }
 0xdcc   :  { %v4533_v53 = vsel %vm89_vm7, %v4532_v39, 0.0 }
 0xdcd   :  { %4534 = vadd.xlane.f32.xlu1 %v4533_v53 }
 0xde6   :  { %4565 = vperm.xlu1 %6164, %v9323_v1  }
 0xdee   :  { %6167 = vset.pattern.permute.xlu1 %v6494_v5 }
 0xdef   :  { %4607 = vperm.xlu1 %6167, %v9323_v1   ;;  %v4557_v1 = vperm.slane %v842_v0, 3 }
 0xe40   :  { %v4535_v38 = vpop.xlane.xlu1 %4534 }
 0xe41   :  { %v4536_v20 = vmul.f32 %v4535_v38, %v9228_v37 }
 0xe43   :  { %v4537_v11 = vsub.f32 %v4532_v39, %v4536_v20 }
 0xe45   :  { %v4538_v19 = vmul.f32 %v4537_v11, %v4537_v11 }
 0xe47   :  { %v4539_v42 = vsel %vm89_vm7, %v4538_v19, 0.0 }
 0xe48   :  { %4540 = vadd.xlane.f32.xlu2 %v4539_v42 }
 0xe58   :  { %v4566_v49 = vpop.permute.xlu1 %4565 }
 0xe59   :  { %vm4570_vm3 = vcmp.eq.s32.totalorder %v10171_v51, %v4566_v49 }
 0xe5a   :  { %v4572_v14 = vsel %vm4570_vm3, 1.0, %v10172_v41 }
 0xe60   :  { %4568 = vperm.xlu2 %6165, %v6473_v45  }
 0xe61   :  { %v4608_v52 = vpop.permute.xlu1 %4607 }
 0xe62   :  { %vm4612_vm1 = vcmp.eq.s32.totalorder %v10171_v51, %v4608_v52 }
 0xe63   :  { %v4614_v25 = vsel %vm4612_vm1, 1.0, %v10172_v41 }
 0xe68   :  { %4699 = vrot.lane.b32.xlu2 %v4697_v35, %s6478_s6 }
 0xebb   :  { %v4541_v22 = vpop.xlane.xlu2 %4540 }
 0xebc   :  { %v4542_v26 = vmul.f32 %v4541_v22, %v9228_v37 }
 0xebe   :  { %v4543_v62 = vadd.f32 1e-05, %v4542_v26 }
 0xec0   :  { %6425 = vrsqrt.f32 %v4543_v62  ;;  %vm4550_vm11 = vweird.f32 %v4543_v62 }
 0xec3   :  { %v4569_v47 = vpop.permute.xlu2 %4568 }
 0xec4   :  { %vm4571_vm15 = vcmp.eq.s32.totalorder %v10171_v51, %v4569_v47 }
 0xec5   :  { %v4573_v59 = vsel %vm4571_vm15, 1.0, %v10172_v41 }
 0xec6   :  { %v6426_v43 = vpop.eup %6425 }
 0xec7   :  { %v4545_v17 = vmul.f32 %v6426_v43, %v4543_v62  ;;  %vm4551_vm10 = vweird.f32 %v6426_v43 }
 0xec8   :  { %vm4552_vm14 = vmor %vm4550_vm11, %vm4551_vm10 }
 0xec9   :  { %v4546_v32 = vmul.f32 %v6426_v43, %v4545_v17 }
 0xecb   :  { %v4547_v18 = vmul.f32 0.5, %v4546_v32  ;;  %v4700_v31 = vpop.permute.xlu2 %4699 }
 0xecd   :  { %v4548_v46 = vsub.f32 1.5, %v4547_v18 }
 0xecf   :  { %v4549_v50 = vmul.f32 %v6426_v43, %v4548_v46 }
 0xed1   :  { %v4553_v57 = vsel %vm4552_vm14, %v6426_v43, %v4549_v50 }
 0xed2   :  { %v4554_v7 = vmul.f32 %v4553_v57, %v4537_v11 }
 0xed4   :  { %v4556_v55 = vmul.f32 %v4555_v4, %v4554_v7 }
 0xed6   :  { %v4558_v34 = vadd.f32 %v4557_v1, %v4556_v55 }
 0xed8   :  { %4559 = vst.msk [vmem:[#allocation3] sm:$0xff] %vm89_vm7, %v4558_v34  ;;  %v4661_v34 = vld [vmem:[%s9972_s16] sm:$0xff] }
 0xedf   :  { %v4562_v44 = vld [vmem:[#allocation3] sm:$0xff] }
 0xee0   :  { %4598 = vmatpush.msra.mxu3 %v4562_v44 }
 0xee1   :  { %5927 = vmatmul.msk.f32.vlgmr.msra.gmra.mxu3 %vm111_vm4, %v4572_v14 }
 0xee2   :  { %5929 = vmatpush.xpose.msk.msrb.mxu3 %vm4616_vm12, %v4615_v2 }
 0xee6   :  { %5930 = vmatpush.xpose.msk.msrb.mxu3 %vm4616_vm12, %v4614_v25 }
 0xee9   :  { %5928 = vmatmul.msk.f32.gmra.mxu3 %vm111_vm4, %v4573_v59  ;;  %vm4750_vm4 = vcmask 80896  }
 0xeea   :  { %4683 = vmatpush.msra.mxu3 %v4660_v10 }
 0xeec   :  { %4684 = vmatpush.msra.mxu3 %v4659_v6 }
 0xeee   :  { %4685 = vmatpush.msra.mxu3 %v4658_v8 }
 0xef0   :  { %4686 = vmatpush.msra.mxu3 %v4657_v29 }
 0xef1   :  { %5931 = vmatmul.msk.f32.vlgmr.msrb.gmra.mxu3 %vm4616_vm12, %v4614_v25 }
 0xef9   :  { %5932 = vmatmul.msk.f32.gmra.mxu3 %vm4616_vm12, %v4615_v2 }
 0xf64   :  { %v9713_v58 = vpop.f32.mrf.mxu3 }
 0xf65   :  { %5935 = vmatmul.msk.f32.vlgmr.msra.gmra.mxu3 %vm89_vm7, %v9713_v58 }
 0xf6c   :  { %v9717_v61 = vpop.f32.mrf.mxu3 }
 0xf6d   :  { %5936 = vmatmul.msk.f32.gmra.mxu3 %vm89_vm7, %v9717_v61 }
 0xf74   :  { %v4640_v30 = vpop.f32.mrf.mxu3 }
 0xf75   :  { %v5933_v28 = vadd.f32 -1.0, %v4640_v30 }
 0xf77   :  { %v9730_v36 = vmul.f32 1e+30, %v5933_v28 }
 0xf7c   :  { %v4643_v23 = vpop.f32.mrf.mxu3 }
 0xf7d   :  { %v5934_v21 = vadd.f32 -1.0, %v4643_v23 }
 0xf7f   :  { %v9734_v53 = vmul.f32 1e+30, %v5934_v21 }
 0xfe8   :  { %v4688_v15 = vpop.f32.mrf.mxu3 }
 0xfe9   :  { %v4702_v9 = vadd.f32 %v4700_v31, %v4688_v15  ;;  %v4695_v0 = vadd.f32 %v4694_v60, %v4688_v15 }
 0xfeb   :  { %4713 = vrot.lane.b32.xlu2 %v4702_v9, %s6482_s30 }
 0xff0   :  { %v4691_v63 = vpop.f32.mrf.mxu3 }
 0xff1   :  { %v4703_v27 = vadd.f32 %v4700_v31, %v4691_v63  ;;  %v4696_v48 = vadd.f32 %v4694_v60, %v4691_v63 }
 0xff3   :  { %4706 = vrot.lane.b32.xlu2 %v4704_v12, %s6480_s10  ;;  %4715 = vrot.lane.b32.xlu1 %v4703_v27, %s6482_s30 }
0x1045   :  { %v4714_v16 = vpop.permute.xlu2 %4713 }
0x104d   :  { %v4707_v11 = vpop.permute.xlu2 %4706 }
0x104e   :  { %v9738_v19 = vadd.f32 %v4707_v11, %v4691_v63  ;;  %v9750_v46 = vadd.f32 %v4707_v11, %v4688_v15 }
0x1065   :  { %v4716_v33 = vpop.permute.xlu1 %4715 }
0x1066   :  { %5937 = vmatpush.xpose.msk.msra.mxu2 %vm706_vm13, %v4716_v33 }
0x106a   :  { %5938 = vmatpush.xpose.msk.msra.mxu2 %vm706_vm13, %v4714_v16 }
0x106d   :  { %5939 = vmatmul.msk.f32.vlgmr.msra.gmra.mxu2 %vm706_vm13, %v4695_v0 }
0x1075   :  { %5940 = vmatmul.msk.f32.gmra.mxu2 %vm706_vm13, %v4696_v48 }
0x10f0   :  { %v4744_v54 = vpop.f32.mrf.mxu2 }
0x10f1   :  { %v4745_v24 = vadd.f32 %v4744_v54, %v9730_v36 }
0x10f3   :  { %v4751_v39 = vsel %vm4750_vm4, %v4745_v24, -inf }
0x10f4   :  { %4752 = vmax.xlane.f32.xlu0 %v4751_v39 }
0x10f8   :  { %v4747_v56 = vpop.f32.mrf.mxu2 }
0x10f9   :  { %v4748_v38 = vadd.f32 %v4747_v56, %v9734_v53 }
0x10fb   :  { %v4755_v20 = vsel %vm4754_vm2, %v4748_v38, -inf }
0x10fc   :  { %4756 = vmax.xlane.f32.xlu1 %v4755_v20 }
0x1115   :  { %4804 = vrot.lane.b32.xlu1 %v9738_v19, %s6480_s10 }
0x111d   :  { %4843 = vrot.lane.b32.xlu1 %v4702_v9, %s6481_s25 }
0x1125   :  { %5180 = vrot.lane.b32.xlu1 %v4703_v27, %s6484_s9 }
0x112d   :  { %5174 = vrot.lane.b32.xlu1 %v4695_v0, %s6487_s3 }
0x1135   :  { %5176 = vrot.lane.b32.xlu1 %v4696_v48, %s6487_s3 }
0x1167   :  { %v4753_v42 = vpop.xlane.xlu0 %4752 }
0x1168   :  { %v4758_v45 = vsub.f32 %v4745_v24, %v4753_v42 }
0x116a   :  { %v4760_v5 = vmul.f32 1.442695, %v4758_v45 }
0x116c   :  { %6427 = vpow2.f32 %v4760_v5 }
0x116f   :  { %v4757_v40 = vpop.xlane.xlu1 %4756 }
0x1170   :  { %v4759_v22 = vsub.f32 %v4748_v38, %v4757_v40 }
0x1172   :  { %v6428_v26 = vpop.eup %6427  ;;  %v4762_v62 = vmul.f32 1.442695, %v4759_v22 }
0x1173   :  { %v4764_v43 = vsel %vm4750_vm4, %v6428_v26, 0.0 }
0x1174   :  { %6429 = vpow2.f32 %v4762_v62  ;;  %4765 = vadd.xlane.f32.xlu2 %v4764_v43 }
0x117a   :  { %v6430_v17 = vpop.eup %6429 }
0x117b   :  { %v4767_v32 = vsel %vm4754_vm2, %v6430_v17, 0.0 }
0x117c   :  { %4768 = vadd.xlane.f32.xlu0 %v4767_v32 }
0x1187   :  { %v4805_v18 = vpop.permute.xlu1 %4804 }
0x1188   :  { %5941 = vmatpush.msk.msrb.mxu0 %vm4813_vm9, %v4805_v18 }
0x118c   :  { %4845 = vrot.lane.b32.xlu2 %v4703_v27, %s6481_s25  ;;  %s10174_s25 = smov 40  }
0x118f   :  { %v4844_v49 = vpop.permute.xlu1 %4843 }
0x1190   :  { %4802 = vrot.lane.b32.xlu0 %v9750_v46, %s6480_s10  ;;  %s10173_s10 = smov 48  }
0x1194   :  { %4841 = vrot.lane.b32.xlu2 %v4696_v48, %s6483_s2 }
0x1197   :  { %v5181_v60 = vpop.permute.xlu1 %5180 }
0x1198   :  { %4839 = vrot.lane.b32.xlu0 %v4695_v0, %s6483_s2 }
0x119c   :  { %5178 = vrot.lane.b32.xlu2 %v4702_v9, %s6484_s9 }
0x119f   :  { %v5175_v56 = vpop.permute.xlu1 %5174 }
0x11a0   :  { %5026 = vrot.lane.b32.xlu0 %v4703_v27, %s6485_s24 }
0x11a4   :  { %5020 = vrot.lane.b32.xlu2 %v4695_v0, %s6486_s7 }
0x11a7   :  { %v5177_v45 = vpop.permute.xlu1 %5176 }
0x11a8   :  { %5024 = vrot.lane.b32.xlu0 %v4702_v9, %s6485_s24 }
0x11b0   :  { %5022 = vrot.lane.b32.xlu0 %v4696_v48, %s6486_s7 }
0x11e7   :  { %v4766_v50 = vpop.xlane.xlu2 %4765 }
0x11e8   :  { %6431 = vrcp.f32 %v4766_v50  ;;  %v4781_v13 = vand.u32 2147483648, %v4766_v50  ;;  %vm4775_vm6 = vweird.f32 %v4766_v50  ;;  %v4779_v2 = vand.u32 2147483647, %v4766_v50 }
0x11ea   :  { %v4782_v6 = vor.u32 1.1754944e-38, %v4781_v13  ;;  %vm4780_vm11 = vcmp.eq.f32.partialorder %v4779_v2, 8.507059e+37 }
0x11ee   :  { %v6432_v4 = vpop.eup %6431 }
0x11ef   :  { %v4771_v57 = vmul.f32 %v6432_v4, %v4766_v50  ;;  %v4846_v1 = vpop.permute.xlu2 %4845  ;;  %v4769_v7 = vpop.xlane.xlu0 %4768  ;;  %vm4776_vm5 = vweird.f32 %v6432_v4 }
0x11f0   :  { %6433 = vrcp.f32 %v4769_v7  ;;  %5944 = vmatpush.xpose.msk.msrb.mxu3 %vm706_vm13, %v4846_v1  ;;  %vm4777_vm10 = vmor %vm4775_vm6, %vm4776_vm5  ;;  %v4796_v35 = vand.u32 2147483648, %v4769_v7  ;;  %vm4790_vm3 = vweird.f32 %v4769_v7  ;;  %v4794_v23 = vand.u32 2147483647, %v4769_v7 }
0x11f1   :  { %v4772_v55 = vsub.f32 1.0, %v4771_v57 }
0x11f2   :  { %v4797_v9 = vor.u32 1.1754944e-38, %v4796_v35  ;;  %vm4795_vm12 = vcmp.eq.f32.partialorder %v4794_v23, 8.507059e+37 }
0x11f3   :  { %v4773_v14 = vmul.f32 %v6432_v4, %v4772_v55 }
0x11f4   :  { %5945 = vmatpush.xpose.msk.msrb.mxu3 %vm706_vm13, %v4844_v49 }
0x11f5   :  { %v4774_v59 = vadd.f32 %v6432_v4, %v4773_v14 }
0x11f6   :  { %v6434_v44 = vpop.eup %6433 }
0x11f7   :  { %v4786_v47 = vmul.f32 %v6434_v44, %v4769_v7  ;;  %v4778_v25 = vsel %vm4777_vm10, %v6432_v4, %v4774_v59  ;;  %vm4791_vm14 = vweird.f32 %v6434_v44  ;;  %v4842_v12 = vpop.permute.xlu2 %4841 }
0x11f8   :  { %5012 = vmatpush.msra.mxu3 %v4661_v34  ;;  %v4783_v8 = vsel %vm4780_vm11, %v4782_v6, %v4778_v25  ;;  %vm4792_vm15 = vmor %vm4790_vm3, %vm4791_vm14 }
0x11f9   :  { %v4787_v52 = vsub.f32 1.0, %v4786_v47  ;;  %v4784_v30 = vmul.f32 %v6428_v26, %v4783_v8 }
0x11fb   :  { %v4788_v10 = vmul.f32 %v6434_v44, %v4787_v52 }
0x11fd   :  { %v4789_v29 = vadd.f32 %v6434_v44, %v4788_v10 }
0x11ff   :  { %v4793_v15 = vsel %vm4792_vm15, %v6434_v44, %v4789_v29  ;;  %v5179_v16 = vpop.permute.xlu2 %5178 }
0x1200   :  { %v4798_v63 = vsel %vm4795_vm12, %v4797_v9, %v4793_v15 }
0x1201   :  { %v4799_v33 = vmul.f32 %v6430_v17, %v4798_v63 }
0x1202   :  { %v4803_v31 = vpop.permute.xlu0 %4802 }
0x1203   :  { %4831 = vmatpush.msrb.mxu0 %v4803_v31 }
0x1204   :  { %5942 = vmatmul.msk.f32.vlgmr.msrb.gmra.mxu0 %vm4750_vm4, %v4784_v30 }
0x1207   :  { %v5021_v28 = vpop.permute.xlu2 %5020 }
0x120a   :  { %v4840_v27 = vpop.permute.xlu0 %4839 }
0x120b   :  { %5946 = vmatmul.msk.f32.vlgmr.msrb.gmra.mxu3 %vm706_vm13, %v4840_v27 }
0x120c   :  { %5964 = vmatpush.xpose.msk.msrb.mxu3 %vm706_vm13, %v5181_v60  ;;  %5943 = vmatmul.msk.f32.gmra.mxu0 %vm4750_vm4, %v4799_v33 }
0x1210   :  { %5965 = vmatpush.xpose.msk.msrb.mxu3 %vm706_vm13, %v5179_v16 }
0x1212   :  { %v5027_v0 = vpop.permute.xlu0 %5026 }
0x1213   :  { %5947 = vmatmul.msk.f32.gmra.mxu3 %vm706_vm13, %v4842_v12  ;;  %5955 = vmatpush.xpose.msk.msrb.mxu1 %vm706_vm13, %v5027_v0 }
0x121a   :  { %v5025_v48 = vpop.permute.xlu0 %5024 }
0x121b   :  { %5956 = vmatpush.xpose.msk.msrb.mxu1 %vm706_vm13, %v5025_v48 }
0x121e   :  { %5957 = vmatmul.msk.f32.vlgmr.msrb.gmra.mxu1 %vm706_vm13, %v5021_v28 }
0x1222   :  { %v5023_v54 = vpop.permute.xlu0 %5022 }
0x1226   :  { %5958 = vmatmul.msk.f32.gmra.mxu1 %vm706_vm13, %v5023_v54 }
0x1281   :  { %v4833_v24 = vpop.f32.mrf.mxu0 }
0x1282   :  { %5953 = vmatmul.msk.f32.vlgmr.msra.gmra.mxu3 %vm706_vm13, %v4833_v24 }
0x1289   :  { %v4836_v21 = vpop.f32.mrf.mxu0 }
0x128a   :  { %5954 = vmatmul.msk.f32.gmra.mxu3 %vm706_vm13, %v4836_v21 }
0x128e   :  { %v4872_v39 = vpop.f32.mrf.mxu3 }
0x128f   :  { %v4873_v38 = vadd.f32 %v4872_v39, %v9730_v36 }
0x1291   :  { %v4878_v20 = vsel %vm4750_vm4, %v4873_v38, -inf }
0x1292   :  { %4879 = vmax.xlane.f32.xlu2 %v4878_v20  ;;  %5966 = vmatmul.msk.f32.vlgmr.msrb.gmra.mxu3 %vm706_vm13, %v5175_v56 }
0x1296   :  { %v4875_v11 = vpop.f32.mrf.mxu3 }
0x1297   :  { %v4876_v42 = vadd.f32 %v4875_v11, %v9734_v53 }
0x1299   :  { %v4881_v5 = vsel %vm4754_vm2, %v4876_v42, -inf }
0x129a   :  { %4882 = vmax.xlane.f32.xlu1 %v4881_v5  ;;  %5967 = vmatmul.msk.f32.gmra.mxu3 %vm706_vm13, %v5177_v45 }
0x129b   :  { %v5053_v40 = vpop.f32.mrf.mxu1 }
0x129c   :  { %v5054_v22 = vadd.f32 %v5053_v40, %v9730_v36 }
0x129e   :  { %v5059_v26 = vsel %vm4750_vm4, %v5054_v22, -inf }
0x129f   :  { %5060 = vmax.xlane.f32.xlu0 %v5059_v26 }
0x12a3   :  { %v5056_v62 = vpop.f32.mrf.mxu1 }
0x12a4   :  { %v5057_v43 = vadd.f32 %v5056_v62, %v9734_v53 }
0x12a6   :  { %v5062_v17 = vsel %vm4754_vm2, %v5057_v43, -inf }
0x12a7   :  { %5063 = vmax.xlane.f32.xlu1 %v5062_v17 }
0x1305   :  { %v9788_v32 = vpop.f32.mrf.mxu3  ;;  %v4880_v18 = vpop.xlane.xlu2 %4879 }
0x1306   :  { %v4884_v1 = vsub.f32 %v4873_v38, %v4880_v18 }
0x1308   :  { %v4886_v55 = vmul.f32 1.442695, %v4884_v1 }
0x130d   :  { %v9790_v50 = vpop.f32.mrf.mxu3  ;;  %v4883_v4 = vpop.xlane.xlu1 %4882 }
0x130e   :  { %v4885_v57 = vsub.f32 %v4876_v42, %v4883_v4 }
0x1310   :  { %v4888_v7 = vmul.f32 1.442695, %v4885_v57 }
0x1312   :  { %6435 = vpow2.f32 %v4888_v7  ;;  %v5061_v34 = vpop.xlane.xlu0 %5060 }
0x1313   :  { %v5065_v14 = vsub.f32 %v5054_v22, %v5061_v34  ;;  %6437 = vpow2.f32 %v4886_v55 }
0x1315   :  { %v5207_v49 = vpop.f32.mrf.mxu3  ;;  %v5067_v52 = vmul.f32 1.442695, %v5065_v14 }
0x1316   :  { %v5208_v44 = vadd.f32 %v5207_v49, %v9730_v36 }
0x1317   :  { %6439 = vpow2.f32 %v5067_v52 }
0x1318   :  { %v9793_v47 = vpop.eup %6435  ;;  %v5213_v59 = vsel %vm4750_vm4, %v5208_v44, -inf }
0x1319   :  { %5214 = vmax.xlane.f32.xlu2 %v5213_v59  ;;  %v4893_v13 = vsel %vm4754_vm2, %v9793_v47, 0.0  ;;  %v9798_v10 = vpop.eup %6437 }
0x131a   :  { %4894 = vadd.xlane.f32.xlu1 %v4893_v13  ;;  %v5064_v2 = vpop.xlane.xlu1 %5063  ;;  %v4890_v29 = vsel %vm4750_vm4, %v9798_v10, 0.0 }
0x131b   :  { %v5066_v25 = vsub.f32 %v5057_v43, %v5064_v2 }
0x131d   :  { %v5069_v6 = vmul.f32 1.442695, %v5066_v25  ;;  %v5210_v8 = vpop.f32.mrf.mxu3  ;;  %v9804_v30 = vpop.eup %6439 }
0x131e   :  { %v5211_v36 = vadd.f32 %v5210_v8, %v9734_v53  ;;  %v5071_v15 = vsel %vm4750_vm4, %v9804_v30, 0.0 }
0x131f   :  { %6441 = vpow2.f32 %v5069_v6 }
0x1320   :  { %v5216_v35 = vsel %vm4754_vm2, %v5211_v36, -inf }
0x1321   :  { %4891 = vadd.xlane.f32.xlu2 %v4890_v29  ;;  %5217 = vmax.xlane.f32.xlu0 %v5216_v35 }
0x1325   :  { %v9806_v23 = vpop.eup %6441 }
0x1326   :  { %v5074_v31 = vsel %vm4754_vm2, %v9806_v23, 0.0 }
0x1327   :  { %5075 = vadd.xlane.f32.xlu1 %v5074_v31 }
0x1329   :  { %5072 = vadd.xlane.f32.xlu0 %v5071_v15 }
0x1339   :  { %4928 = vrot.lane.b32.xlu2 %v9738_v19, %s6488_s8 }
0x133d   :  { %4926 = vrot.lane.b32.xlu0 %v9750_v46, %s6488_s8 }
0x1341   :  { %5107 = vrot.lane.b32.xlu2 %v9750_v46, %s10173_s10 }
0x1345   :  { %5109 = vrot.lane.b32.xlu0 %v9738_v19, %s10173_s10 }
0x134d   :  { %5261 = vrot.lane.b32.xlu0 %v9750_v46, %s10174_s25 }
0x138c   :  { %v5215_v53 = vpop.xlane.xlu2 %5214 }
0x138d   :  { %v5219_v9 = vsub.f32 %v5208_v44, %v5215_v53  ;;  %v4895_v33 = vpop.xlane.xlu1 %4894 }
0x138e   :  { %v4922_v55 = vand.u32 2147483648, %v4895_v33  ;;  %v4920_v34 = vand.u32 2147483647, %v4895_v33 }
0x138f   :  { %v5221_v12 = vmul.f32 1.442695, %v5219_v9 }
0x1390   :  { %v4923_v52 = vor.u32 1.1754944e-38, %v4922_v55  ;;  %vm4921_vm14 = vcmp.eq.f32.partialorder %v4920_v34, 8.507059e+37 }
0x1391   :  { %6443 = vpow2.f32 %v5221_v12 }
0x1394   :  { %v4892_v63 = vpop.xlane.xlu2 %4891  ;;  %v5218_v27 = vpop.xlane.xlu0 %5217 }
0x1395   :  { %6445 = vrcp.f32 %v4892_v63  ;;  %v5220_v60 = vsub.f32 %v5211_v36, %v5218_v27  ;;  %v4907_v22 = vand.u32 2147483648, %v4892_v63  ;;  %vm4901_vm1 = vweird.f32 %v4892_v63 }
0x1396   :  { %6447 = vrcp.f32 %v4895_v33  ;;  %v4905_v26 = vand.u32 2147483647, %v4892_v63 }
0x1397   :  { %v9822_v16 = vpop.eup %6443  ;;  %v5223_v0 = vmul.f32 1.442695, %v5220_v60  ;;  %v4908_v18 = vor.u32 1.1754944e-38, %v4907_v22 }
0x1398   :  { %v5225_v48 = vsel %vm4750_vm4, %v9822_v16, 0.0  ;;  %vm4906_vm6 = vcmp.eq.f32.partialorder %v4905_v26, 8.507059e+37 }
0x1399   :  { %5226 = vadd.xlane.f32.xlu1 %v5225_v48  ;;  %6449 = vpow2.f32 %v5223_v0 }
0x139a   :  { %v5076_v5 = vpop.xlane.xlu1 %5075 }
0x139b   :  { %v6446_v28 = vpop.eup %6445 }
0x139c   :  { %v4897_v46 = vmul.f32 %v6446_v28, %v4892_v63  ;;  %v4929_v54 = vpop.permute.xlu2 %4928  ;;  %v5073_v24 = vpop.xlane.xlu0 %5072  ;;  %vm4902_vm0 = vweird.f32 %v6446_v28  ;;  %v5103_v63 = vand.u32 2147483648, %v5076_v5 }
0x139d   :  { %5948 = vmatpush.msk.msrb.mxu2 %vm4813_vm9, %v4929_v54  ;;  %v6448_v21 = vpop.eup %6447  ;;  %6451 = vrcp.f32 %v5073_v24  ;;  %vm4903_vm5 = vmor %vm4901_vm1, %vm4902_vm0  ;;  %v5088_v8 = vand.u32 2147483648, %v5073_v24  ;;  %vm5082_vm15 = vweird.f32 %v5073_v24  ;;  %v5086_v36 = vand.u32 2147483647, %v5073_v24 }
0x139e   :  { %v4898_v39 = vsub.f32 1.0, %v4897_v46  ;;  %v4912_v38 = vmul.f32 %v6448_v21, %v4895_v33  ;;  %6453 = vrcp.f32 %v5076_v5  ;;  %vm4917_vm10 = vweird.f32 %v6448_v21 }
0x139f   :  { %v9827_v56 = vpop.eup %6449  ;;  %v5089_v53 = vor.u32 1.1754944e-38, %v5088_v8  ;;  %vm5087_vm0 = vcmp.eq.f32.partialorder %v5086_v36, 8.507059e+37  ;;  %v5104_v60 = vor.u32 1.1754944e-38, %v5103_v63  ;;  %v5328_v36 = vperm.slane %v9709_v3, 3 }
0x13a0   :  { %v4899_v20 = vmul.f32 %v6446_v28, %v4898_v39  ;;  %v5228_v11 = vsel %vm4754_vm2, %v9827_v56, 0.0  ;;  %v4913_v42 = vsub.f32 1.0, %v4912_v38  ;;  %vm4916_vm2 = vweird.f32 %v4895_v33 }
0x13a1   :  { %5229 = vadd.xlane.f32.xlu1 %v5228_v11  ;;  %vm4918_vm11 = vmor %vm4916_vm2, %vm4917_vm10 }
0x13a2   :  { %v4900_v45 = vadd.f32 %v6446_v28, %v4899_v20  ;;  %v4914_v62 = vmul.f32 %v6448_v21, %v4913_v42 }
0x13a3   :  { %v6452_v40 = vpop.eup %6451 }
0x13a4   :  { %v4904_v43 = vsel %vm4903_vm5, %v6446_v28, %v4900_v45  ;;  %v5078_v17 = vmul.f32 %v6452_v40, %v5073_v24  ;;  %v4915_v57 = vadd.f32 %v6448_v21, %v4914_v62  ;;  %v6454_v7 = vpop.eup %6453  ;;  %vm5083_vm3 = vweird.f32 %v6452_v40  ;;  %v5108_v15 = vpop.permute.xlu2 %5107  ;;  %v4662_v28 = vld [vmem:[%s9972_s16 + $0x8] sm:$0xff] }
0x13a5   :  { %v4909_v4 = vsel %vm4906_vm6, %v4908_v18, %v4904_v43  ;;  %v5093_v44 = vmul.f32 %v6454_v7, %v5076_v5  ;;  %vm5084_vm12 = vmor %vm5082_vm15, %vm5083_vm3  ;;  %vm5098_vm1 = vweird.f32 %v6454_v7  ;;  %vm5097_vm5 = vweird.f32 %v5076_v5  ;;  %4983 = vmatpush.msra.mxu0 %v4662_v28 }
0x13a6   :  { %v5079_v1 = vsub.f32 1.0, %v5078_v17  ;;  %v4910_v49 = vmul.f32 %v9798_v10, %v4909_v4  ;;  %v4919_v13 = vsel %vm4918_vm11, %v6448_v21, %v4915_v57  ;;  %vm5099_vm6 = vmor %vm5097_vm5, %vm5098_vm1 }
0x13a7   :  { %v4924_v2 = vsel %vm4921_vm14, %v4923_v52, %v4919_v13  ;;  %v5094_v25 = vsub.f32 1.0, %v5093_v44 }
0x13a8   :  { %v5080_v59 = vmul.f32 %v6452_v40, %v5079_v1  ;;  %v4925_v10 = vmul.f32 %v9793_v47, %v4924_v2  ;;  %v5101_v47 = vand.u32 2147483647, %v5076_v5 }
0x13a9   :  { %v5095_v35 = vmul.f32 %v6454_v7, %v5094_v25 }
0x13aa   :  { %v5081_v6 = vadd.f32 %v6452_v40, %v5080_v59  ;;  %vm5102_vm10 = vcmp.eq.f32.partialorder %v5101_v47, 8.507059e+37  ;;  %v4664_v59 = vld [vmem:[%s9972_s16 + $0x18] sm:$0xff] }
0x13ab   :  { %v5096_v12 = vadd.f32 %v6454_v7, %v5095_v35 }
0x13ac   :  { %v5085_v31 = vsel %vm5084_vm12, %v6452_v40, %v5081_v6 }
0x13ad   :  { %v5090_v9 = vsel %vm5087_vm0, %v5089_v53, %v5085_v31  ;;  %v5100_v33 = vsel %vm5099_vm6, %v6454_v7, %v5096_v12 }
0x13ae   :  { %v5091_v27 = vmul.f32 %v9804_v30, %v5090_v9  ;;  %v5105_v0 = vsel %vm5102_vm10, %v5104_v60, %v5100_v33  ;;  %v6495_v60 = vmov 6  }
0x13af   :  { %v4927_v14 = vpop.permute.xlu0 %4926  ;;  %v5106_v48 = vmul.f32 %v9806_v23, %v5105_v0  ;;  %v4663_v23 = vld [vmem:[%s9972_s16 + $0x10] sm:$0xff]  ;;  %6168 = vset.pattern.permute.xlu0 %v6495_v60 }
0x13b0   :  { %4954 = vmatpush.msrb.mxu2 %v4927_v14  ;;  %5164 = vmatpush.msrb.mxu0 %v4663_v23 }
0x13b1   :  { %5949 = vmatmul.msk.f32.vlgmr.msrb.gmra.mxu2 %vm4750_vm4, %v4910_v49 }
0x13b7   :  { %v5110_v29 = vpop.permute.xlu0 %5109 }
0x13b8   :  { %5959 = vmatpush.msk.msra.mxu2 %vm4813_vm9, %v5110_v29 }
0x13b9   :  { %5950 = vmatmul.msk.f32.gmra.mxu2 %vm4750_vm4, %v4925_v10 }
0x13ba   :  { %5135 = vmatpush.msra.mxu2 %v5108_v15  ;;  %5263 = vrot.lane.b32.xlu1 %v9738_v19, %s10174_s25 }
0x13bc   :  { %5318 = vmatpush.msrb.mxu2 %v4664_v59 }
0x13bf   :  { %v5262_v18 = vpop.permute.xlu0 %5261 }
0x13c1   :  { %5960 = vmatmul.msk.f32.vlgmr.msra.gmra.mxu2 %vm4750_vm4, %v5091_v27 }
0x13c9   :  { %5961 = vmatmul.msk.f32.gmra.mxu2 %vm4750_vm4, %v5106_v48 }
0x140c   :  { %v5227_v19 = vpop.xlane.xlu1 %5226 }
0x140d   :  { %6455 = vrcp.f32 %v5227_v19  ;;  %v5242_v42 = vand.u32 2147483648, %v5227_v19  ;;  %vm5236_vm11 = vweird.f32 %v5227_v19  ;;  %v5240_v45 = vand.u32 2147483647, %v5227_v19 }
0x140f   :  { %v5243_v22 = vor.u32 1.1754944e-38, %v5242_v42  ;;  %vm5241_vm3 = vcmp.eq.f32.partialorder %v5240_v45, 8.507059e+37  ;;  %v5410_v45 = vld [vmem:[%s9973_s17 + $0x8] sm:$0xff] }
0x1413   :  { %v6456_v30 = vpop.eup %6455 }
0x1414   :  { %v5230_v46 = vpop.xlane.xlu1 %5229  ;;  %v5232_v54 = vmul.f32 %v6456_v30, %v5227_v19  ;;  %vm5237_vm2 = vweird.f32 %v6456_v30 }
0x1415   :  { %6457 = vrcp.f32 %v5230_v46  ;;  %vm5238_vm14 = vmor %vm5236_vm11, %vm5237_vm2  ;;  %v5257_v17 = vand.u32 2147483648, %v5230_v46  ;;  %vm5251_vm12 = vweird.f32 %v5230_v46  ;;  %v5255_v57 = vand.u32 2147483647, %v5230_v46 }
0x1416   :  { %v5233_v24 = vsub.f32 1.0, %v5232_v54 }
0x1417   :  { %v5258_v7 = vor.u32 1.1754944e-38, %v5257_v17  ;;  %vm5256_vm1 = vcmp.eq.f32.partialorder %v5255_v57, 8.507059e+37 }
0x1418   :  { %v5234_v39 = vmul.f32 %v6456_v30, %v5233_v24 }
0x141a   :  { %v5235_v20 = vadd.f32 %v6456_v30, %v5234_v39 }
0x141b   :  { %v6458_v21 = vpop.eup %6457 }
0x141c   :  { %v5247_v38 = vmul.f32 %v6458_v21, %v5230_v46  ;;  %v5239_v5 = vsel %vm5238_vm14, %v6456_v30, %v5235_v20  ;;  %vm5252_vm15 = vweird.f32 %v6458_v21  ;;  %v5412_v20 = vld [vmem:[%s9973_s17 + $0x18] sm:$0xff] }
0x141d   :  { %v5244_v26 = vsel %vm5241_vm3, %v5243_v22, %v5239_v5  ;;  %vm5253_vm0 = vmor %vm5251_vm12, %vm5252_vm15  ;;  %5429 = vmatpush.msra.mxu3 %v5412_v20 }
0x141e   :  { %v5248_v11 = vsub.f32 1.0, %v5247_v38  ;;  %v5245_v4 = vmul.f32 %v9822_v16, %v5244_v26 }
0x1420   :  { %v5249_v40 = vmul.f32 %v6458_v21, %v5248_v11  ;;  %v5411_v11 = vld [vmem:[%s9973_s17 + $0x10] sm:$0xff] }
0x1421   :  { %5430 = vmatpush.msra.mxu3 %v5411_v11 }
0x1422   :  { %v5250_v62 = vadd.f32 %v6458_v21, %v5249_v40 }
0x1423   :  { %5431 = vmatpush.msra.mxu3 %v5410_v45 }
0x1424   :  { %v5254_v1 = vsel %vm5253_vm0, %v6458_v21, %v5250_v62 }
0x1425   :  { %v5259_v34 = vsel %vm5256_vm1, %v5258_v7, %v5254_v1 }
0x1426   :  { %v5260_v49 = vmul.f32 %v9827_v56, %v5259_v34 }
0x142c   :  { %v5264_v43 = vpop.permute.xlu1 %5263 }
0x142d   :  { %5968 = vmatpush.msk.msra.mxu1 %vm4813_vm9, %v5264_v43 }
0x142f   :  { %5289 = vmatpush.msra.mxu1 %v5262_v18 }
0x1430   :  { %5969 = vmatmul.msk.f32.vlgmr.msra.gmra.mxu1 %vm4750_vm4, %v5245_v4 }
0x1434   :  { %v4956_v55 = vpop.f32.mrf.mxu2 }
0x1435   :  { %5951 = vmatmul.msk.f32.vlgmr.msra.gmra.mxu0 %vm706_vm13, %v4956_v55 }
0x1438   :  { %5970 = vmatmul.msk.f32.gmra.mxu1 %vm4750_vm4, %v5260_v49  ;;  %v5377_v49 = vperm.slane %v9709_v3, 6 }
0x143c   :  { %v4959_v14 = vpop.f32.mrf.mxu2 }
0x143d   :  { %5952 = vmatmul.msk.f32.gmra.mxu0 %vm706_vm13, %v4959_v14 }
0x1444   :  { %v5137_v16 = vpop.f32.mrf.mxu2 }
0x1445   :  { %5962 = vmatmul.msk.f32.vlgmr.msrb.gmra.mxu0 %vm706_vm13, %v5137_v16 }
0x144c   :  { %v5140_v44 = vpop.f32.mrf.mxu2 }
0x144d   :  { %5963 = vmatmul.msk.f32.gmra.mxu0 %vm706_vm13, %v5140_v44 }
0x14ad   :  { %v5291_v13 = vpop.f32.mrf.mxu1 }
0x14ae   :  { %5971 = vmatmul.msk.f32.vlgmr.msrb.gmra.mxu2 %vm706_vm13, %v5291_v13 }
0x14b2   :  { %v4985_v52 = vpop.f32.mrf.mxu0 }
0x14b3   :  { %v5015_v6 = vadd.f32 %v9788_v32, %v4985_v52 }
0x14b5   :  { %v5294_v56 = vpop.f32.mrf.mxu1 }
0x14b6   :  { %5972 = vmatmul.msk.f32.gmra.mxu2 %vm706_vm13, %v5294_v56  ;;  %v5380_v56 = vperm.slane %v9709_v3, 7 }
0x14ba   :  { %v4988_v2 = vpop.f32.mrf.mxu0 }
0x14bb   :  { %v5018_v15 = vadd.f32 %v9790_v50, %v4988_v2  ;;  %v6474_v50 = vld [vmem:[%s9963_s0] sm:$0xff] }
0x14c2   :  { %v5166_v25 = vpop.f32.mrf.mxu0 }
0x14c3   :  { %v5172_v8 = vadd.f32 %v5166_v25, %v5015_v6 }
0x14ca   :  { %v5169_v31 = vpop.f32.mrf.mxu0 }
0x14cb   :  { %v5173_v9 = vadd.f32 %v5169_v31, %v5018_v15 }
0x1531   :  { %v5320_v29 = vpop.f32.mrf.mxu2 }
0x1532   :  { %v5326_v10 = vadd.f32 %v5320_v29, %v5172_v8  ;;  %v5409_v8 = vld [vmem:[%s9973_s17] sm:$0xff]  ;;  %v5439_v29 = vld [vmem:[%s9974_s18 + $0x8] sm:$0xff] }
0x1533   :  { %5432 = vmatpush.msra.mxu3 %v5409_v8  ;;  %v5549_v8 = vld [vmem:[%s9976_s21] sm:$0xff] }
0x1534   :  { %v5329_v35 = vadd.f32 %v5328_v36, %v5326_v10  ;;  %v5438_v10 = vld [vmem:[%s9974_s18] sm:$0xff] }
0x1536   :  { %v5331_v53 = vadd.f32 %v5329_v35, %v9713_v58  ;;  %v5413_v35 = vperm.slane %v9709_v3, 4 }
0x1538   :  { %v5333_v12 = vsel %vm89_vm7, %v5331_v53, 0.0 }
0x1539   :  { %5334 = vadd.xlane.f32.xlu0 %v5333_v12  ;;  %v5323_v63 = vpop.f32.mrf.mxu2 }
0x153a   :  { %v5327_v47 = vadd.f32 %v5323_v63, %v5173_v9  ;;  %v5442_v9 = vperm.slane %v9709_v3, 5 }
0x153c   :  { %v5330_v27 = vadd.f32 %v5328_v36, %v5327_v47  ;;  %v5441_v36 = vld [vmem:[%s9974_s18 + $0x18] sm:$0xff] }
0x153e   :  { %v5332_v32 = vadd.f32 %v5330_v27, %v9717_v61 }
0x1540   :  { %v5336_v33 = vsel %vm284_vm8, %v5332_v32, 0.0 }
0x1541   :  { %5337 = vadd.xlane.f32.xlu2 %v5336_v33 }
0x154d   :  { %4651 = vperm.xlu0 %6168, %v6474_v50  }
0x15ac   :  { %v5335_v58 = vpop.xlane.xlu0 %5334 }
0x15ad   :  { %v5339_v0 = vmul.f32 %v5335_v58, %v9228_v37 }
0x15af   :  { %v5341_v48 = vsub.f32 %v5331_v53, %v5339_v0 }
0x15b1   :  { %v5343_v19 = vmul.f32 %v5341_v48, %v5341_v48 }
0x15b3   :  { %v5345_v28 = vsel %vm89_vm7, %v5343_v19, 0.0 }
0x15b4   :  { %5346 = vadd.xlane.f32.xlu2 %v5345_v28  ;;  %v5338_v46 = vpop.xlane.xlu2 %5337 }
0x15b5   :  { %v5340_v61 = vmul.f32 %v5338_v46, %v9228_v37 }
0x15b7   :  { %v5342_v30 = vsub.f32 %v5332_v32, %v5340_v61 }
0x15b9   :  { %v5344_v54 = vmul.f32 %v5342_v30, %v5342_v30 }
0x15bb   :  { %v5348_v24 = vsel %vm284_vm8, %v5344_v54, 0.0  ;;  %v4656_v54 = vld [vmem:[%s9971_s19 + $0x8] sm:$0xf] }
0x15bc   :  { %5349 = vadd.xlane.f32.xlu1 %v5348_v24 }
0x15bf   :  { %v4652_v59 = vpop.permute.xlu0 %4651 }
0x15c0   :  { %vm4653_vm14 = vcmp.eq.s32.totalorder %v10171_v51, %v4652_v59  ;;  %v5515_v59 = vperm.slane %v4656_v54, 2 }
0x15c1   :  { %v4654_v25 = vsel %vm4653_vm14, 1.0, %v10172_v41  ;;  %v5440_v41 = vld [vmem:[%s9974_s18 + $0x10] sm:$0xff] }
0x1627   :  { %v5347_v21 = vpop.xlane.xlu2 %5346 }
0x1628   :  { %v5351_v39 = vmul.f32 %v5347_v21, %v9228_v37  ;;  %v5489_v21 = vperm.slane %v4656_v54, 0 }
0x162a   :  { %v5353_v38 = vadd.f32 1e-05, %v5351_v39 }
0x162c   :  { %6459 = vrsqrt.f32 %v5353_v38  ;;  %vm5361_vm5 = vweird.f32 %v5353_v38 }
0x162f   :  { %v5350_v23 = vpop.xlane.xlu1 %5349 }
0x1630   :  { %v5352_v42 = vmul.f32 %v5350_v23, %v9228_v37  ;;  %v5491_v23 = vperm.slane %v4656_v54, 1 }
0x1632   :  { %v6460_v5 = vpop.eup %6459  ;;  %v5354_v40 = vadd.f32 1e-05, %v5352_v42 }
0x1633   :  { %v5356_v22 = vmul.f32 %v6460_v5, %v5353_v38  ;;  %vm5362_vm13 = vweird.f32 %v6460_v5 }
0x1634   :  { %6461 = vrsqrt.f32 %v5354_v40  ;;  %vm5363_vm6 = vmor %vm5361_vm5, %vm5362_vm13  ;;  %vm5371_vm2 = vweird.f32 %v5354_v40 }
0x1635   :  { %v5357_v26 = vmul.f32 %v6460_v5, %v5356_v22 }
0x1637   :  { %v5358_v62 = vmul.f32 0.5, %v5357_v26 }
0x1639   :  { %v5359_v43 = vsub.f32 1.5, %v5358_v62  ;;  %v5523_v62 = vld [vmem:[%s9975_s20 + $0x18] sm:$0xff] }
0x163a   :  { %v6462_v17 = vpop.eup %6461  ;;  %5540 = vmatpush.msrb.mxu1 %v5523_v62 }
0x163b   :  { %v5366_v18 = vmul.f32 %v6462_v17, %v5354_v40  ;;  %v5360_v4 = vmul.f32 %v6460_v5, %v5359_v43  ;;  %vm5372_vm10 = vweird.f32 %v6462_v17  ;;  %v5522_v43 = vld [vmem:[%s9975_s20 + $0x10] sm:$0xff] }
0x163c   :  { %vm5373_vm11 = vmor %vm5371_vm2, %vm5372_vm10  ;;  %5541 = vmatpush.msrb.mxu1 %v5522_v43 }
0x163d   :  { %v5367_v57 = vmul.f32 %v6462_v17, %v5366_v18  ;;  %v5364_v7 = vsel %vm5363_vm6, %v6460_v5, %v5360_v4  ;;  %v5520_v18 = vld [vmem:[%s9975_s20] sm:$0xff]  ;;  %v5552_v4 = vld [vmem:[%s9976_s21 + $0x18] sm:$0xff] }
0x163e   :  { %v5375_v14 = vmul.f32 %v5364_v7, %v5341_v48  ;;  %5569 = vmatpush.msrb.mxu3 %v5552_v4 }
0x163f   :  { %v5368_v1 = vmul.f32 0.5, %v5367_v57 }
0x1640   :  { %v5378_v52 = vmul.f32 %v5377_v49, %v5375_v14 }
0x1641   :  { %v5369_v55 = vsub.f32 1.5, %v5368_v1 }
0x1642   :  { %v5381_v6 = vadd.f32 %v5380_v56, %v5378_v52 }
0x1643   :  { %v5370_v34 = vmul.f32 %v6462_v17, %v5369_v55 }
0x1645   :  { %v5374_v16 = vsel %vm5373_vm11, %v6462_v17, %v5370_v34  ;;  %v5521_v17 = vld [vmem:[%s9975_s20 + $0x8] sm:$0xff] }
0x1646   :  { %v5376_v44 = vmul.f32 %v5374_v16, %v5342_v30  ;;  %5542 = vmatpush.msrb.mxu1 %v5521_v17 }
0x1648   :  { %v5379_v13 = vmul.f32 %v5377_v49, %v5376_v44  ;;  %5543 = vmatpush.msrb.mxu1 %v5520_v18 }
0x164a   :  { %v5382_v2 = vadd.f32 %v5380_v56, %v5379_v13  ;;  %v5517_v56 = vperm.slane %v4656_v54, 3 }
0x164c   :  { %5973 = vmatpush.msk.msra.mxu0 %vm4813_vm9, %v5382_v2 }
0x164e   :  { %5404 = vmatpush.msra.mxu0 %v5381_v6  ;;  %v5550_v6 = vld [vmem:[%s9976_s21 + $0x8] sm:$0xff] }
0x164f   :  { %5974 = vmatmul.msk.f32.vlgmr.msra.gmra.mxu0 %vm4750_vm4, %v4654_v25 }
0x1650   :  { %5458 = vmatpush.msrb.mxu0 %v5441_v36  ;;  %v5519_v36 = vld [vmem:[%s9977_s22] sm:$0x3] }
0x1652   :  { %5459 = vmatpush.msrb.mxu0 %v5440_v41 }
0x1654   :  { %5460 = vmatpush.msrb.mxu0 %v5439_v29 }
0x1656   :  { %5461 = vmatpush.msrb.mxu0 %v5438_v10 }
0x16cc   :  { %v5406_v51 = vpop.f32.mrf.mxu0 }
0x16cd   :  { %5975 = vmatmul.msk.f32.vlgmr.msra.gmra.mxu3 %vm89_vm7, %v5406_v51 }
0x1750   :  { %v5434_v31 = vpop.f32.mrf.mxu3 }
0x1751   :  { %v5435_v15 = vadd.f32 %v5434_v31, %v5413_v35  ;;  %v5553_v35 = vperm.slane %v5519_v36, 1 }
0x1753   :  { %v5437_v53 = vmax.f32 %v5435_v15, 0.0 }
0x1755   :  { %5976 = vmatmul.msk.f32.vlgmr.msrb.gmra.mxu0 %vm89_vm7, %v5437_v53 }
0x17d2   :  { %v5463_v12 = vpop.f32.mrf.mxu0 }
0x17d3   :  { %v5464_v63 = vadd.f32 %v5463_v12, %v5442_v9 }
0x17d5   :  { %v5466_v47 = vadd.f32 %v5464_v63, %v5406_v51  ;;  %v5524_v51 = vperm.slane %v5519_v36, 0 }
0x17d7   :  { %v5467_v27 = vsel %vm284_vm8, %v5466_v47, 0.0 }
0x17d8   :  { %5468 = vadd.xlane.f32.xlu2 %v5467_v27 }
0x184b   :  { %v5469_v32 = vpop.xlane.xlu2 %5468 }
0x184c   :  { %v5470_v33 = vmul.f32 %v5469_v32, %v9228_v37 }
0x184e   :  { %v5471_v60 = vsub.f32 %v5466_v47, %v5470_v33 }
0x1850   :  { %v5472_v50 = vmul.f32 %v5471_v60, %v5471_v60 }
0x1852   :  { %v5473_v58 = vsel %vm284_vm8, %v5472_v50, 0.0 }
0x1853   :  { %5474 = vadd.xlane.f32.xlu2 %v5473_v58 }
0x18c6   :  { %v5475_v0 = vpop.xlane.xlu2 %5474 }
0x18c7   :  { %v5476_v48 = vmul.f32 %v5475_v0, %v9228_v37 }
0x18c9   :  { %v5477_v19 = vadd.f32 1e-05, %v5476_v48 }
0x18cb   :  { %6463 = vrsqrt.f32 %v5477_v19  ;;  %vm5484_vm9 = vweird.f32 %v5477_v19 }
0x18d1   :  { %v6464_v3 = vpop.eup %6463 }
0x18d2   :  { %v5479_v28 = vmul.f32 %v6464_v3, %v5477_v19  ;;  %vm5485_vm4 = vweird.f32 %v6464_v3 }
0x18d3   :  { %vm5486_vm3 = vmor %vm5484_vm9, %vm5485_vm4 }
0x18d4   :  { %v5480_v46 = vmul.f32 %v6464_v3, %v5479_v28 }
0x18d6   :  { %v5481_v61 = vmul.f32 0.5, %v5480_v46 }
0x18d8   :  { %v5482_v30 = vsub.f32 1.5, %v5481_v61 }
0x18da   :  { %v5483_v24 = vmul.f32 %v6464_v3, %v5482_v30 }
0x18dc   :  { %v5487_v39 = vsel %vm5486_vm3, %v6464_v3, %v5483_v24 }
0x18dd   :  { %v5488_v38 = vmul.f32 %v5487_v39, %v5471_v60 }
0x18df   :  { %v5490_v20 = vmul.f32 %v5489_v21, %v5488_v38 }
0x18e1   :  { %v5492_v11 = vadd.f32 %v5491_v23, %v5490_v20 }
0x18e3   :  { %v5493_v42 = vsel %vm284_vm8, %v5492_v11, 0.0 }
0x18e4   :  { %5494 = vadd.xlane.f32.xlu1 %v5493_v42 }
0x1957   :  { %v5495_v45 = vpop.xlane.xlu1 %5494 }
0x1958   :  { %v5496_v5 = vmul.f32 %v5495_v45, %v9228_v37 }
0x195a   :  { %v5497_v40 = vsub.f32 %v5492_v11, %v5496_v5 }
0x195c   :  { %v5498_v22 = vmul.f32 %v5497_v40, %v5497_v40 }
0x195e   :  { %v5499_v26 = vsel %vm284_vm8, %v5498_v22, 0.0 }
0x195f   :  { %5500 = vadd.xlane.f32.xlu2 %v5499_v26 }
0x19d2   :  { %v5501_v57 = vpop.xlane.xlu2 %5500 }
0x19d3   :  { %v5502_v1 = vmul.f32 %v5501_v57, %v9228_v37  ;;  %v5551_v37 = vld [vmem:[%s9976_s21 + $0x10] sm:$0xff] }
0x19d4   :  { %5570 = vmatpush.msrb.mxu3 %v5551_v37 }
0x19d5   :  { %v5503_v7 = vadd.f32 1e-05, %v5502_v1 }
0x19d6   :  { %5571 = vmatpush.msrb.mxu3 %v5550_v6 }
0x19d7   :  { %6465 = vrsqrt.f32 %v5503_v7  ;;  %vm5510_vm15 = vweird.f32 %v5503_v7 }
0x19d8   :  { %5572 = vmatpush.msrb.mxu3 %v5549_v8 }
0x19dd   :  { %v6466_v55 = vpop.eup %6465 }
0x19de   :  { %v5505_v34 = vmul.f32 %v6466_v55, %v5503_v7  ;;  %vm5511_vm8 = vweird.f32 %v6466_v55 }
0x19df   :  { %vm5512_vm12 = vmor %vm5510_vm15, %vm5511_vm8 }
0x19e0   :  { %v5506_v49 = vmul.f32 %v6466_v55, %v5505_v34 }
0x19e2   :  { %v5507_v14 = vmul.f32 0.5, %v5506_v49 }
0x19e4   :  { %v5508_v16 = vsub.f32 1.5, %v5507_v14 }
0x19e6   :  { %v5509_v44 = vmul.f32 %v6466_v55, %v5508_v16 }
0x19e8   :  { %v5513_v13 = vsel %vm5512_vm12, %v6466_v55, %v5509_v44 }
0x19e9   :  { %v5514_v52 = vmul.f32 %v5513_v13, %v5497_v40 }
0x19eb   :  { %v5516_v2 = vmul.f32 %v5515_v59, %v5514_v52 }
0x19ed   :  { %v5518_v25 = vadd.f32 %v5517_v56, %v5516_v2 }
0x19ef   :  { %5977 = vmatmul.msk.f32.vlgmr.msrb.gmra.mxu1 %vm89_vm7, %v5518_v25 }
0x1a6c   :  { %v5545_v41 = vpop.f32.mrf.mxu1 }
0x1a6d   :  { %v5546_v29 = vadd.f32 %v5545_v41, %v5524_v51 }
0x1a6f   :  { %v5548_v10 = vmax.f32 %v5546_v29, 0.0 }
0x1a71   :  { %5978 = vmatmul.msk.f32.vlgmr.msrb.gmra.mxu3 %vm89_vm7, %v5548_v10  ;;  %vm5596_vm7 = vcmask 1024  }
0x1af4   :  { %v5574_v31 = vpop.f32.mrf.mxu3 }
0x1af5   :  { %v5575_v15 = vadd.f32 %v5574_v31, %v5553_v35 }
0x1af7   :  { %v5979_v53 = vmul.f32 -1.442695, %v5575_v15 }
0x1af9   :  { %6467 = vpow2.f32 %v5979_v53 }
0x1aff   :  { %v6468_v9 = vpop.eup %6467 }
0x1b00   :  { %v5580_v12 = vadd.f32 1.0, %v6468_v9 }
0x1b02   :  { %6469 = vrcp.f32 %v5580_v12  ;;  %v5592_v32 = vand.u32 2147483648, %v5580_v12  ;;  %v5590_v60 = vand.u32 2147483647, %v5580_v12  ;;  %vm5586_vm1 = vweird.f32 %v5580_v12 }
0x1b04   :  { %v5593_v58 = vor.u32 1.1754944e-38, %v5592_v32  ;;  %vm5591_vm5 = vcmp.eq.f32.partialorder %v5590_v60, 8.507059e+37 }
0x1b08   :  { %v6470_v63 = vpop.eup %6469 }
0x1b09   :  { %v5582_v47 = vmul.f32 %v6470_v63, %v5580_v12  ;;  %vm5587_vm0 = vweird.f32 %v6470_v63 }
0x1b0a   :  { %vm5588_vm13 = vmor %vm5586_vm1, %vm5587_vm0 }
0x1b0b   :  { %v5583_v27 = vsub.f32 1.0, %v5582_v47 }
0x1b0d   :  { %v5584_v33 = vmul.f32 %v6470_v63, %v5583_v27 }
0x1b0f   :  { %v5585_v50 = vadd.f32 %v6470_v63, %v5584_v33 }
0x1b11   :  { %v5589_v0 = vsel %vm5588_vm13, %v6470_v63, %v5585_v50 }
0x1b12   :  { %v5594_v48 = vsel %vm5591_vm5, %v5593_v58, %v5589_v0 }
0x1b13   :  { %5597 = vst.msk [vmem:[%s9978_s23] sm:$0x3] %vm5596_vm7, %v5594_v48 }

</bundles_post_ra>
